<compile_context>
chip_gen: v7x
topology: tpu7x:2x2x1
jax: 0.10.0
libtpu: 0.0.40
codegen_flags: <defaults>
</compile_context>

<pallas_src>
import functools
import numpy as np
import jax
import jax.numpy as jnp
from jax.experimental import pallas as pl
from jax.experimental.pallas import tpu as pltpu


def _round_up(x, m):
    return ((x + m - 1) // m) * m


# ---------------------------------------------------------------------------
# PiGANMappingNetwork: z -> (gamma | beta).  Tiny (B x 32) MLP: plain XLA ops so
# it fuses with the FiLM folding below (no extra kernel launch / VMEM staging).
# ---------------------------------------------------------------------------
def mapping_forward(z2, mp):
    hp = 'highest'
    h = jnp.dot(z2, mp['w_in_t'], precision=hp) + mp['b_in']
    h = jnp.where(h > 0, h, 0.2 * h)                       # LeakyReLU(0.2)
    for l in range(mp['wh_t'].shape[0]):
        h = jnp.dot(h, mp['wh_t'][l], precision=hp) + mp['bh'][l]
        h = jnp.where(h > 0, h, 0.2 * h)
    return jnp.dot(h, mp['w_out_t'], precision=hp) + mp['b_out']


# ---------------------------------------------------------------------------
# Fused INR network: all FiLM-SIREN layers + final linear in one kernel.
# Feature-major: activations are (H, tm) with points on the 128-lane axis.
# FiLM scale is pre-folded into the (per-batch) weight rows; FiLM bias into cb.
# ---------------------------------------------------------------------------
def pigan_inr_kernel(x_ref, cb_ref, wf_ref, wh_ref, wl_ref, bl_ref, o_ref,
                     *, n_hidden, in_features):
    x = x_ref[0]                       # (C, tm)   coordinates, points on lanes
    wf = wf_ref[0]                     # (H, C)    FiLM scale already in rows

    # --- first FiLM layer: C is tiny, so VPU broadcast MADs instead of a K=C dot
    y = wf[:, 0:1] * x[0:1, :]
    for c in range(1, in_features):
        y = y + wf[:, c:c + 1] * x[c:c + 1, :]
    h = jnp.sin(y + cb_ref[0, 0])                       # (H,tm) + (H,1)
    # switch_layer multiply is folded into wh[0]'s columns by the wrapper.

    # --- hidden FiLM layers: (H,H) @ (H,tm) on the MXU, one column add + sin
    for l in range(n_hidden):
        y = jnp.dot(wh_ref[0, l], h, preferred_element_type=jnp.float32)
        h = jnp.sin(y + cb_ref[0, l + 1])

    # --- last layer: plain linear (omega_0 = 1, no FiLM, no activation)
    o = jnp.dot(wl_ref[...], h, preferred_element_type=jnp.float32) + bl_ref[...]
    o_ref[0] = o.astype(o_ref.dtype)


def pigan_prog_forward(coords, z, params, *, tm=2048, feature_major_output=False):
    """coords: (B, N, in_features), z: (B, 1, z_size) -> (B, N, out_features).

    If feature_major_output=True, returns (B, out_features, N) and skips the
    wrapper transpose (avoids one HBM round trip for consumers that accept it).
    """
    B, N, C = coords.shape
    wf, bf = params['wf'], params['bf']
    wh, bh = params['wh'], params['bh']
    wl, bl = params['wl'], params['bl']
    H = wf.shape[0]
    OUT = wl.shape[0]
    Lh = wh.shape[0]
    assert Lh >= 1, "fused kernel expects at least one hidden INR layer"

    # ---- mapping network -> gamma, beta (per batch, broadcast over points) ----
    gb = mapping_forward(z.reshape(B, -1), params['mapping'])
    Hm = gb.shape[-1] // 2
    assert Hm >= H, (
        f"mapping hidden width ({Hm}) must be >= num_hidden_INR ({H}) for the "
        "gamma/beta slicing to be valid")
    gamma = gb[:, :Hm][:, :H]                 # torch: gamma[:, :, :out_features]
    beta = gb[:, Hm:][:, :H]

    # ---- FULL FiLM fold per (layer, batch): param-sized, trace-time ----
    # arg_l = (gamma+omega_l) * (W_l h + b_l) + beta
    #       = ((gamma+omega_l) (.) rows(W_l)) h  +  ((gamma+omega_l)*b_l + beta)
    mult_first = gamma + params['om_first'][None, :]            # (B, H)
    mult_hidden = gamma + params['hidden_omega']                # (B, H)
    lf = 1 + Lh

    # switch_layer scales the first layer's OUTPUT features -> fold into the
    # COLUMNS of its consumer weight (hidden layer 0).
    wh_sw = wh.at[0].set(wh[0] * params['switch_layer'][None, :])

    wf_b = mult_first[:, :, None] * wf[None, :, :]              # (B, H, C)
    wh_b = mult_hidden[:, None, :, None] * wh_sw[None, :, :, :]  # (B, Lh, H, H)

    cb_first = mult_first * bf[None, :] + beta                  # (B, H)
    cb_hidden = (mult_hidden[:, None, :] * bh[None, :, :]
                 + beta[:, None, :])                            # (B, Lh, H)
    cb = jnp.concatenate([cb_first[:, None, :], cb_hidden],
                         axis=1).reshape(B, lf, H, 1)

    # pad the (tiny) last-layer rows to a sublane multiple for aligned MXU/stores
    OUT_pad = _round_up(OUT, 8)
    wl_p = jnp.pad(wl, ((0, OUT_pad - OUT), (0, 0)))
    bl_p = jnp.pad(bl, ((0, OUT_pad - OUT),)).reshape(OUT_pad, 1)

    # ---- feature-major coordinates, N zero-padded so the point axis tiles by tm
    tm = max(128, (min(tm, _round_up(N, 128)) // 128) * 128)    # multiple of 128
    n_pad = _round_up(N, tm)
    # v7x has 2 TensorCores sharded over "parallel" axes: make sure the grid has
    # at least 2 programs so one core doesn't idle on small single-batch calls.
    while B * (n_pad // tm) < 2 and tm > 128:
        tm = max(128, (tm // 2) // 128 * 128)
        n_pad = _round_up(N, tm)

    x_t = jnp.swapaxes(coords, 1, 2)                      # (B, C, N)
    x_t = jnp.pad(x_t, ((0, 0), (0, 0), (0, n_pad - N)))  # (B, C, n_pad)
    # NOTE: padded points still produce nonzero activations (sin of the folded
    # bias); only the sliced [:N] region of the kernel output is valid.

    out_t = pl.pallas_call(
        functools.partial(pigan_inr_kernel, n_hidden=Lh, in_features=C),
        out_shape=jax.ShapeDtypeStruct((B, OUT_pad, n_pad), jnp.float32),
        grid_spec=pltpu.PrefetchScalarGridSpec(
            num_scalar_prefetch=0,
            grid=(B, n_pad // tm),
            in_specs=[
                pl.BlockSpec((1, C, tm), lambda b, i: (b, 0, i)),         # coords
                pl.BlockSpec((1, lf, H, 1), lambda b, i: (b, 0, 0, 0)),   # folded bias
                pl.BlockSpec((1, H, C), lambda b, i: (b, 0, 0)),          # W first (scaled)
                pl.BlockSpec((1, Lh, H, H), lambda b, i: (b, 0, 0, 0)),   # W hidden (scaled)
                pl.BlockSpec((OUT_pad, H), lambda b, i: (0, 0)),          # W last
                pl.BlockSpec((OUT_pad, 1), lambda b, i: (0, 0)),          # b last
            ],
            out_specs=pl.BlockSpec((1, OUT_pad, tm), lambda b, i: (b, 0, i)),
        ),
        compiler_params=pltpu.CompilerParams(
            dimension_semantics=("parallel", "parallel")),
    )(x_t, cb, wf_b, wh_b, wl_p, bl_p)

    out_t = out_t[:, :OUT, :N]                             # (B, OUT, N)
    if feature_major_output:
        return out_t
    # Point-major to match the PyTorch module; the kernel keeps the lane-dense
    # feature-major store and the transpose is left to XLA / the consumer.
    return jnp.swapaxes(out_t, 1, 2)                       # (B, N, OUT)


# ---------------------------------------------------------------------------
# Deterministic parameter init matching piGAN_prog.__init__ distributions.
# Mapping weights stored transposed (in,out) for the row-major mapping MLP;
# INR weights stored in torch (out,in) layout for the feature-major INR kernel.
# ---------------------------------------------------------------------------
def init_pigan_prog_params(key, *, in_features=2, out_features=3,
                           num_mapping_layers=3, num_INR_layers=4,
                           num_hidden_mapping=32, num_hidden_INR=32,
                           z_size=16, first_omega_0=30.0, hidden_omega_0=30.0):
    H, Hm, C = num_hidden_INR, num_hidden_mapping, in_features
    assert Hm >= H, "gamma/beta are sliced to num_hidden_INR features"
    k = key

    # --- PiGANMappingNetwork: kaiming_normal(fan_in, leaky_relu a=0.2) weights
    gain = float(np.sqrt(2.0 / (1.0 + 0.2 ** 2)))

    def kaiming(rng, shape):                   # shape = (out, in)
        return (gain / np.sqrt(shape[1])) * jax.random.normal(rng, shape, jnp.float32)

    def linear_bias(rng, fan_in, n):           # default nn.Linear bias init
        bb = float(1.0 / np.sqrt(fan_in))
        return jax.random.uniform(rng, (1, n), jnp.float32, -bb, bb)

    k, kw, kb = jax.random.split(k, 3)
    w_in_t = kaiming(kw, (Hm, z_size)).T                       # (Z, Hm)
    b_in = linear_bias(kb, z_size, Hm)
    wh_t, bh_m = [], []
    for _ in range(num_mapping_layers - 1):
        k, kw, kb = jax.random.split(k, 3)
        wh_t.append(kaiming(kw, (Hm, Hm)).T)
        bh_m.append(linear_bias(kb, Hm, Hm))
    k, kw, kb = jax.random.split(k, 3)
    w_out_t = (0.25 * kaiming(kw, (2 * Hm, Hm))).T             # (Hm, 2Hm), *0.25
    b_out = linear_bias(kb, Hm, 2 * Hm)
    mapping = dict(w_in_t=w_in_t, b_in=b_in, wh_t=jnp.stack(wh_t),
                   bh=jnp.stack(bh_m), w_out_t=w_out_t, b_out=b_out)

    # --- INR layer 0: siren_first weights, polar bias, omega_uniform (sorted)
    k, kw, kb, ko = jax.random.split(k, 4)
    wf = jax.random.uniform(kw, (H, C), jnp.float32, -1.0 / C, 1.0 / C)
    bf = jax.random.uniform(kb, (H,), jnp.float32, 0.0, 2.0 * np.pi)
    om_first = jnp.sort(jax.random.uniform(ko, (H,), jnp.float32)
                        * first_omega_0 / C)

    # --- hidden INR layers: siren weights, polar bias, constant hidden_omega_0
    bound = float(np.sqrt(6.0 / H) / hidden_omega_0)
    whs, bhs = [], []
    for _ in range(num_INR_layers - 1):
        k, kw, kb = jax.random.split(k, 3)
        whs.append(jax.random.uniform(kw, (H, H), jnp.float32, -bound, bound))
        bhs.append(jax.random.uniform(kb, (H,), jnp.float32, 0.0, 2.0 * np.pi))

    # --- last INR layer: siren_omega(30) weights, default nn.Linear bias, omega=1
    k, kw, kb = jax.random.split(k, 3)
    bound_l = float(np.sqrt(6.0 / H) / 30.0)
    wl = jax.random.uniform(kw, (out_features, H), jnp.float32, -bound_l, bound_l)
    bb = float(1.0 / np.sqrt(H))
    bl = jax.random.uniform(kb, (out_features,), jnp.float32, -bb, bb)

    # switch_layer is a progressive-training parameter (zeros at __init__, ramped
    # toward 1 by step()); use a nontrivial ramp so the full forward path
    # (including the coordinate branch) is exercised.
    switch_layer = jnp.linspace(0.0, 1.0, H, dtype=jnp.float32)

    return dict(mapping=mapping, wf=wf, bf=bf, om_first=om_first,
                wh=jnp.stack(whs), bh=jnp.stack(bhs), wl=wl, bl=bl,
                hidden_omega=jnp.float32(hidden_omega_0),
                switch_layer=switch_layer)


# ---------------------------------------------------------------------------
# Pure-JAX reference mirroring piGAN_prog.forward (for correctness checking).
# ---------------------------------------------------------------------------
def pigan_prog_ref(coords, z, params):
    mp = params['mapping']
    B, N, C = coords.shape
    H = params['wf'].shape[0]
    hp = 'highest'

    h = z.reshape(B, -1)
    h = jnp.dot(h, mp['w_in_t'], precision=hp) + mp['b_in']
    h = jnp.where(h > 0, h, 0.2 * h)
    for l in range(mp['wh_t'].shape[0]):
        h = jnp.dot(h, mp['wh_t'][l], precision=hp) + mp['bh'][l]
        h = jnp.where(h > 0, h, 0.2 * h)
    gb = jnp.dot(h, mp['w_out_t'], precision=hp) + mp['b_out']
    Hm = gb.shape[-1] // 2
    gamma = gb[:, :Hm][:, :H][:, None, :]       # (B, 1, H)
    beta = gb[:, Hm:][:, :H][:, None, :]

    y = jnp.einsum('bnc,hc->bnh', coords, params['wf'], precision=hp) + params['bf']
    y = (gamma + params['om_first']) * y + beta
    h = jnp.sin(y) * params['switch_layer']
    for l in range(params['wh'].shape[0]):
        y = jnp.einsum('bnh,oh->bno', h, params['wh'][l], precision=hp) + params['bh'][l]
        y = (gamma + params['hidden_omega']) * y + beta
        h = jnp.sin(y)
    return jnp.einsum('bnh,oh->bno', h, params['wl'], precision=hp) + params['bl']


if __name__ == "__main__":
    key = jax.random.PRNGKey(0)
    kp, kx, kz = jax.random.split(key, 3)

    in_features, out_features = 2, 3
    z_size = 16
    B, N = 2, 300                      # N not a multiple of the tile -> ragged path

    params = init_pigan_prog_params(
        kp, in_features=in_features, out_features=out_features,
        num_mapping_layers=3, num_INR_layers=4,
        num_hidden_mapping=32, num_hidden_INR=32,
        z_size=z_size, first_omega_0=30.0, hidden_omega_0=30.0)

    coords = jax.random.uniform(kx, (B, N, in_features), jnp.float32, -1.0, 1.0)
    z = jax.random.normal(kz, (B, 1, z_size), jnp.float32)

    fwd = jax.jit(pigan_prog_forward)
    out = jax.block_until_ready(fwd(coords, z, params))

    ref = pigan_prog_ref(coords, z, params)
    assert out.shape == (B, N, out_features)
    np.testing.assert_allclose(np.asarray(out), np.asarray(ref),
                               rtol=5e-5, atol=5e-5)

    print("KERNEL_OK")
</pallas_src>

<mosaic_0001>
module attributes {stable_mosaic.version = 11 : i64} {
  func.func @pigan_inr_kernel(%arg0: i32, %arg1: i32, %arg2: memref<1x2x384xf32, #tpu.memory_space<vmem>>, %arg3: memref<1x4x32x1xf32, #tpu.memory_space<vmem>>, %arg4: memref<1x32x2xf32, #tpu.memory_space<vmem>>, %arg5: memref<1x3x32x32xf32, #tpu.memory_space<vmem>>, %arg6: memref<8x32xf32, #tpu.memory_space<vmem>>, %arg7: memref<8x1xf32, #tpu.memory_space<vmem>>, %arg8: memref<1x8x384xf32, #tpu.memory_space<vmem>>) attributes {dimension_semantics = [#tpu.dimension_semantics<parallel>, #tpu.dimension_semantics<parallel>], iteration_bounds = array<i64: 2, 1>, scalar_prefetch = 0 : i64, scratch_operands = 0 : i64, tpu.core_type = #tpu.core_type<tc>, window_params = [{transform_indices = @transform_0, window_bounds = array<i64: 1, 2, 384>}, {transform_indices = @transform_1, window_bounds = array<i64: 1, 4, 32, 1>}, {transform_indices = @transform_2, window_bounds = array<i64: 1, 32, 2>}, {transform_indices = @transform_3, window_bounds = array<i64: 1, 3, 32, 32>}, {pipeline_mode = #tpu.pipeline_mode<synchronous>, transform_indices = @transform_4, window_bounds = array<i64: 8, 32>}, {pipeline_mode = #tpu.pipeline_mode<synchronous>, transform_indices = @transform_5, window_bounds = array<i64: 8, 1>}, {transform_indices = @transform_6, window_bounds = array<i64: 1, 8, 384>}]} {
    %c0 = arith.constant 0 : index
    %c0_0 = arith.constant 0 : index
    %c0_1 = arith.constant 0 : index
    %0 = vector.load %arg2[%c0, %c0_0, %c0_1] : memref<1x2x384xf32, #tpu.memory_space<vmem>>, vector<1x2x384xf32>
    %1 = vector.shape_cast %0 : vector<1x2x384xf32> to vector<2x384xf32>
    %c0_2 = arith.constant 0 : index
    %c0_3 = arith.constant 0 : index
    %c0_4 = arith.constant 0 : index
    %2 = vector.load %arg4[%c0_2, %c0_3, %c0_4] : memref<1x32x2xf32, #tpu.memory_space<vmem>>, vector<1x32x2xf32>
    %3 = vector.shape_cast %2 : vector<1x32x2xf32> to vector<32x2xf32>
    %4 = vector.extract_strided_slice %3 {offsets = [0, 0], sizes = [32, 1], strides = [1, 1]} : vector<32x2xf32> to vector<32x1xf32>
    %5 = vector.extract_strided_slice %1 {offsets = [0, 0], sizes = [1, 384], strides = [1, 1]} : vector<2x384xf32> to vector<1x384xf32>
    %6 = vector.broadcast %4 : vector<32x1xf32> to vector<32x384xf32>
    %7 = vector.broadcast %5 : vector<1x384xf32> to vector<32x384xf32>
    %8 = arith.mulf %6, %7 : vector<32x384xf32>
    %9 = vector.extract_strided_slice %3 {offsets = [0, 1], sizes = [32, 1], strides = [1, 1]} : vector<32x2xf32> to vector<32x1xf32>
    %10 = vector.extract_strided_slice %1 {offsets = [1, 0], sizes = [1, 384], strides = [1, 1]} : vector<2x384xf32> to vector<1x384xf32>
    %11 = vector.broadcast %9 : vector<32x1xf32> to vector<32x384xf32>
    %12 = vector.broadcast %10 : vector<1x384xf32> to vector<32x384xf32>
    %13 = arith.mulf %11, %12 : vector<32x384xf32>
    %14 = arith.addf %8, %13 : vector<32x384xf32>
    %c0_5 = arith.constant 0 : index
    %c0_6 = arith.constant 0 : index
    %c0_7 = arith.constant 0 : index
    %c0_8 = arith.constant 0 : index
    %15 = vector.load %arg3[%c0_5, %c0_6, %c0_7, %c0_8] : memref<1x4x32x1xf32, #tpu.memory_space<vmem>>, vector<1x1x32x1xf32>
    %16 = vector.shape_cast %15 : vector<1x1x32x1xf32> to vector<32x1xf32>
    %17 = vector.broadcast %16 : vector<32x1xf32> to vector<32x384xf32>
    %18 = arith.addf %14, %17 : vector<32x384xf32>
    %19 = math.sin %18 : vector<32x384xf32>
    %c0_9 = arith.constant 0 : index
    %c0_10 = arith.constant 0 : index
    %c0_11 = arith.constant 0 : index
    %c0_12 = arith.constant 0 : index
    %20 = vector.load %arg5[%c0_9, %c0_10, %c0_11, %c0_12] : memref<1x3x32x32xf32, #tpu.memory_space<vmem>>, vector<1x1x32x32xf32>
    %21 = vector.shape_cast %20 : vector<1x1x32x32xf32> to vector<32x32xf32>
    %cst = arith.constant dense<0.000000e+00> : vector<32x384xf32>
    %22 = tpu.matmul %21, %19, %cst {dimension_numbers = #tpu.dot_dimension_numbers<[1], [0], [0], [1], [0, 0, 1, 1], [], []>} : vector<32x32xf32>, vector<32x384xf32>, vector<32x384xf32> -> vector<32x384xf32>
    %c0_13 = arith.constant 0 : index
    %c1 = arith.constant 1 : index
    %c0_14 = arith.constant 0 : index
    %c0_15 = arith.constant 0 : index
    %23 = vector.load %arg3[%c0_13, %c1, %c0_14, %c0_15] : memref<1x4x32x1xf32, #tpu.memory_space<vmem>>, vector<1x1x32x1xf32>
    %24 = vector.shape_cast %23 : vector<1x1x32x1xf32> to vector<32x1xf32>
    %25 = vector.broadcast %24 : vector<32x1xf32> to vector<32x384xf32>
    %26 = arith.addf %22, %25 : vector<32x384xf32>
    %27 = math.sin %26 : vector<32x384xf32>
    %c0_16 = arith.constant 0 : index
    %c1_17 = arith.constant 1 : index
    %c0_18 = arith.constant 0 : index
    %c0_19 = arith.constant 0 : index
    %28 = vector.load %arg5[%c0_16, %c1_17, %c0_18, %c0_19] : memref<1x3x32x32xf32, #tpu.memory_space<vmem>>, vector<1x1x32x32xf32>
    %29 = vector.shape_cast %28 : vector<1x1x32x32xf32> to vector<32x32xf32>
    %cst_20 = arith.constant dense<0.000000e+00> : vector<32x384xf32>
    %30 = tpu.matmul %29, %27, %cst_20 {dimension_numbers = #tpu.dot_dimension_numbers<[1], [0], [0], [1], [0, 0, 1, 1], [], []>} : vector<32x32xf32>, vector<32x384xf32>, vector<32x384xf32> -> vector<32x384xf32>
    %c0_21 = arith.constant 0 : index
    %c2 = arith.constant 2 : index
    %c0_22 = arith.constant 0 : index
    %c0_23 = arith.constant 0 : index
    %31 = vector.load %arg3[%c0_21, %c2, %c0_22, %c0_23] : memref<1x4x32x1xf32, #tpu.memory_space<vmem>>, vector<1x1x32x1xf32>
    %32 = vector.shape_cast %31 : vector<1x1x32x1xf32> to vector<32x1xf32>
    %33 = vector.broadcast %32 : vector<32x1xf32> to vector<32x384xf32>
    %34 = arith.addf %30, %33 : vector<32x384xf32>
    %35 = math.sin %34 : vector<32x384xf32>
    %c0_24 = arith.constant 0 : index
    %c2_25 = arith.constant 2 : index
    %c0_26 = arith.constant 0 : index
    %c0_27 = arith.constant 0 : index
    %36 = vector.load %arg5[%c0_24, %c2_25, %c0_26, %c0_27] : memref<1x3x32x32xf32, #tpu.memory_space<vmem>>, vector<1x1x32x32xf32>
    %37 = vector.shape_cast %36 : vector<1x1x32x32xf32> to vector<32x32xf32>
    %cst_28 = arith.constant dense<0.000000e+00> : vector<32x384xf32>
    %38 = tpu.matmul %37, %35, %cst_28 {dimension_numbers = #tpu.dot_dimension_numbers<[1], [0], [0], [1], [0, 0, 1, 1], [], []>} : vector<32x32xf32>, vector<32x384xf32>, vector<32x384xf32> -> vector<32x384xf32>
    %c0_29 = arith.constant 0 : index
    %c3 = arith.constant 3 : index
    %c0_30 = arith.constant 0 : index
    %c0_31 = arith.constant 0 : index
    %39 = vector.load %arg3[%c0_29, %c3, %c0_30, %c0_31] : memref<1x4x32x1xf32, #tpu.memory_space<vmem>>, vector<1x1x32x1xf32>
    %40 = vector.shape_cast %39 : vector<1x1x32x1xf32> to vector<32x1xf32>
    %41 = vector.broadcast %40 : vector<32x1xf32> to vector<32x384xf32>
    %42 = arith.addf %38, %41 : vector<32x384xf32>
    %43 = math.sin %42 : vector<32x384xf32>
    %c0_32 = arith.constant 0 : index
    %c0_33 = arith.constant 0 : index
    %44 = vector.load %arg6[%c0_32, %c0_33] : memref<8x32xf32, #tpu.memory_space<vmem>>, vector<8x32xf32>
    %cst_34 = arith.constant dense<0.000000e+00> : vector<8x384xf32>
    %45 = tpu.matmul %44, %43, %cst_34 {dimension_numbers = #tpu.dot_dimension_numbers<[1], [0], [0], [1], [0, 0, 1, 1], [], []>} : vector<8x32xf32>, vector<32x384xf32>, vector<8x384xf32> -> vector<8x384xf32>
    %c0_35 = arith.constant 0 : index
    %c0_36 = arith.constant 0 : index
    %46 = vector.load %arg7[%c0_35, %c0_36] : memref<8x1xf32, #tpu.memory_space<vmem>>, vector<8x1xf32>
    %47 = vector.broadcast %46 : vector<8x1xf32> to vector<8x384xf32>
    %48 = arith.addf %45, %47 : vector<8x384xf32>
    %c0_37 = arith.constant 0 : index
    %c0_38 = arith.constant 0 : index
    %c0_39 = arith.constant 0 : index
    %49 = vector.load %arg8[%c0_37, %c0_38, %c0_39] : memref<1x8x384xf32, #tpu.memory_space<vmem>>, vector<1x8x384xf32>
    %50 = vector.shape_cast %49 : vector<1x8x384xf32> to vector<8x384xf32>
    %51 = vector.shape_cast %48 : vector<8x384xf32> to vector<1x8x384xf32>
    tpu.vector_store %arg8[%c0_37, %c0_38, %c0_39], %51 {strides = array<i32>} : memref<1x8x384xf32, #tpu.memory_space<vmem>>, vector<1x8x384xf32>,
    return
  }
  func.func @transform_0(%arg0: i32, %arg1: i32) -> (i32, i32, i32) {
    %c0_i32 = arith.constant 0 : i32
    %c0_i32_0 = arith.constant 0 : i32
    return %arg0, %c0_i32, %arg1 : i32, i32, i32
  }
  func.func @transform_1(%arg0: i32, %arg1: i32) -> (i32, i32, i32, i32) {
    %c0_i32 = arith.constant 0 : i32
    %c0_i32_0 = arith.constant 0 : i32
    %c0_i32_1 = arith.constant 0 : i32
    %c0_i32_2 = arith.constant 0 : i32
    return %arg0, %c0_i32, %c0_i32_0, %c0_i32_1 : i32, i32, i32, i32
  }
  func.func @transform_2(%arg0: i32, %arg1: i32) -> (i32, i32, i32) {
    %c0_i32 = arith.constant 0 : i32
    %c0_i32_0 = arith.constant 0 : i32
    %c0_i32_1 = arith.constant 0 : i32
    return %arg0, %c0_i32, %c0_i32_0 : i32, i32, i32
  }
  func.func @transform_3(%arg0: i32, %arg1: i32) -> (i32, i32, i32, i32) {
    %c0_i32 = arith.constant 0 : i32
    %c0_i32_0 = arith.constant 0 : i32
    %c0_i32_1 = arith.constant 0 : i32
    %c0_i32_2 = arith.constant 0 : i32
    return %arg0, %c0_i32, %c0_i32_0, %c0_i32_1 : i32, i32, i32, i32
  }
  func.func @transform_4(%arg0: i32, %arg1: i32) -> (i32, i32) {
    %c0_i32 = arith.constant 0 : i32
    %c0_i32_0 = arith.constant 0 : i32
    %c0_i32_1 = arith.constant 0 : i32
    return %c0_i32, %c0_i32_0 : i32, i32
  }
  func.func @transform_5(%arg0: i32, %arg1: i32) -> (i32, i32) {
    %c0_i32 = arith.constant 0 : i32
    %c0_i32_0 = arith.constant 0 : i32
    %c0_i32_1 = arith.constant 0 : i32
    return %c0_i32, %c0_i32_0 : i32, i32
  }
  func.func @transform_6(%arg0: i32, %arg1: i32) -> (i32, i32, i32) {
    %c0_i32 = arith.constant 0 : i32
    %c0_i32_0 = arith.constant 0 : i32
    return %arg0, %c0_i32, %arg1 : i32, i32, i32
  }
}

</mosaic_0001>

<bundles_post_ra>
// kernel: pigan_prog_forward.1
= control target key start
LH: loop header
LB: loop body
LE: loop exit
PB: predicated region body
PF: predicated region fallthrough
CT: control target
= control target key end

     0   :  { %s7334_s21 = smov 0   ;;  %s7336_s22 = smov 0   ;;  %s12170_s0 = inlined_call_operand.vmem [shape: f32[2,2,384], index: 0, kind: input, shape index: {}]   ;;  %s12171_s1 = inlined_call_operand.vmem [shape: f32[2,4,32,1], index: 1, kind: input, shape index: {}]   ;;  %s12172_s2 = inlined_call_operand.vmem [shape: f32[2,32,2], index: 2, kind: input, shape index: {}]   ;;  %s12173_s3 = inlined_call_operand.vmem [shape: f32[2,3,32,32], index: 3, kind: input, shape index: {}]   ;;  %s12174_s4 = inlined_call_operand.vmem [shape: f32[8,32], index: 4, kind: input, shape index: {}]   ;;  %s12175_s5 = inlined_call_operand.vmem [shape: f32[8,1], index: 5, kind: input, shape index: {}]   ;;  %s12176_s6 = inlined_call_operand.vmem [shape: f32[2,8,384], index: 6, kind: output, shape index: {}]  }
   0x1   :  { %s7338_s23 = smov 0  }
   0x2 LB: > { %s28_s24 = sadd.s32 1, %s7282_s22  ;;  %p6440_p0 = scmp.ge.s32.totalorder %s7286_s23, 1  ;;  %s7286_s23 = sphi %s7338_s23, %s16_s23   ;;  %s7282_s22 = sphi %s7336_s22, %s12700_s22   ;;  %s7278_s21 = sphi %s7334_s21, %s12699_s21  }
   0x3   : > { %p30_p1 = scmp.ge.s32.totalorder %s28_s24, 2  ;;  %p263_p2 = scmp.lt.s32.totalorder %s7286_s23, 3 }
   0x5   : > { %s12702_s24 = smov (%p30_p1, %s28_s24), 0  ;;  %p264_p3 = pnand %p6440_p0, %p263_p2 }
   0x7   : > { %267 = sbr.rel (%p264_p3) target bundleno = 2216 (0x8a8), region = 44 }
   0xe   : > { %p317_p4 = scmp.lt.s32.totalorder %s7278_s21, 1  ;;  %v7288_v0 = vmov 1   ;;  %v377_v1 = vlaneseq  ;;  %v7289_v8 = vmov 0   ;;  %v6160_v29 = vld [vmem:[%s12175_s5] sm:$0xff] }
   0xf   : > { %7066 = vset.pattern.permute.xlu0 %v7288_v0  ;;  %7064 = vset.pattern.permute.xlu1 %v7288_v0 }
  0x10   : > { %s12704_s21 = smov (!%p317_p4, %s7278_s21), 1  ;;  %v7358_v2 = vshrl.u32 %v377_v1, 7 }
  0x11   : > { %s6689_s25 = sshll.u32 %s12704_s21, 5  ;;  %s6834_s29 = smul.u32 6, %s12704_s21 }
  0x12   : > { %s335_s28 = scalar_lea.vmem %s12172_s2, %s6689_s25  ;;  %v7362_v6 = vsub.s32 1, %v7358_v2  ;;  %v7368_v7 = vsub.s32 0, %v7358_v2  ;;  %s6688_s9 = sshll.u32 %s12704_s21, 7  ;;  %v438_v32 = vsub.s32 3, %v7358_v2  ;;  %v383_v39 = vsub.s32 2, %v7358_v2 }
  0x13   : > { %v354_v3 = vld [vmem:[%s335_s28 + $0x10] sm:$0xff]  ;;  %v352_v4 = vld [vmem:[%s335_s28] sm:$0xff]  ;;  %v353_v5 = vld [vmem:[%s335_s28 + $0x8] sm:$0xff]  ;;  %s324_s8 = scalar_lea.vmem %s12170_s0, %s6834_s29  ;;  %s7386_s12 = scalar_lea.vmem %s12171_s1, %s6688_s9  ;;  %v442_v41 = vsub.s32 5, %v7358_v2  ;;  %v387_v43 = vsub.s32 4, %v7358_v2 }
  0x14   : > { %425 = vperm.xlu0 %7066, %v354_v3   ;;  %417 = vperm.xlu1 %7064, %v352_v4   ;;  %v7370_v9 = vld [vmem:[%s324_s8] sm:$0x3f]  ;;  %v355_v10 = vld [vmem:[%s335_s28 + $0x18] sm:$0xff]  ;;  %v484_v15 = vld [vmem:[%s7386_s12 + $0x8] sm:$0xff]  ;;  %s6835_s15 = smul.u32 96, %s12704_s21 }
  0x15   : > { %v435_v11 = vrot.slane %v7370_v9, %v7362_v6  ;;  %v380_v12 = vrot.slane %v7370_v9, %v7368_v7  ;;  %v483_v16 = vld [vmem:[%s7386_s12] sm:$0xff]  ;;  %v485_v18 = vld [vmem:[%s7386_s12 + $0x10] sm:$0xff]  ;;  %v486_v20 = vld [vmem:[%s7386_s12 + $0x18] sm:$0xff]  ;;  %v439_v33 = vrot.slane %v7370_v9, %v438_v32  ;;  %v384_v46 = vrot.slane %v7370_v9, %v383_v39  ;;  %s6836_s25 = smul.u32 24, %s12704_s21 }
  0x16   : > { %v6496_v17 = vld [vmem:[%s7386_s12 + $0x20] sm:$0xff]  ;;  %v6498_v19 = vld [vmem:[%s7386_s12 + $0x30] sm:$0xff]  ;;  %v6497_v22 = vld [vmem:[%s7386_s12 + $0x28] sm:$0xff]  ;;  %v443_v48 = vrot.slane %v7370_v9, %v442_v41  ;;  %v388_v49 = vrot.slane %v7370_v9, %v387_v43  ;;  %s8740_s18 = scalar_lea.vmem %s12173_s3, %s6835_s15 }
  0x17   : > { %v7378_v13 = vrot.slane %v435_v11, %v7362_v6  ;;  %v7381_v14 = vrot.slane %v380_v12, %v7368_v7  ;;  %v6560_v21 = vld [vmem:[%s7386_s12 + $0x40] sm:$0xff]  ;;  %v6562_v23 = vld [vmem:[%s7386_s12 + $0x50] sm:$0xff]  ;;  %v6499_v24 = vld [vmem:[%s7386_s12 + $0x38] sm:$0xff]  ;;  %v454_v35 = vrot.slane %v439_v33, %v7362_v6  ;;  %v399_v51 = vrot.slane %v384_v46, %v7368_v7  ;;  %s349_s28 = scalar_lea.vmem %s12176_s6, %s6836_s25 }
  0x18   : > { %7067 = vset.pattern.permute.xlu0 %v7289_v8  ;;  %421 = vperm.xlu1 %7064, %v353_v5   ;;  %v6624_v25 = vld [vmem:[%s7386_s12 + $0x60] sm:$0xff]  ;;  %v6561_v26 = vld [vmem:[%s7386_s12 + $0x48] sm:$0xff]  ;;  %v6626_v27 = vld [vmem:[%s7386_s12 + $0x70] sm:$0xff]  ;;  %v458_v56 = vrot.slane %v443_v48, %v7362_v6  ;;  %v403_v58 = vrot.slane %v388_v49, %v7368_v7 }
  0x19   : > { %358 = vperm.xlu0 %7067, %v352_v4   ;;  %v6563_v28 = vld [vmem:[%s7386_s12 + $0x58] sm:$0xff]  ;;  %v6625_v30 = vld [vmem:[%s7386_s12 + $0x68] sm:$0xff] }
  0x1a   : > { %v6627_v31 = vld [vmem:[%s7386_s12 + $0x78] sm:$0xff] }
  0x1c   : > { %7065 = vset.pattern.permute.xlu1 %v7289_v8 }
  0x1d   : > { %363 = vperm.xlu0 %7067, %v353_v5   ;;  %373 = vperm.xlu1 %7065, %v355_v10  }
  0x21   : > { %368 = vperm.xlu0 %7067, %v354_v3   ;;  %7068 = vset.pattern.permute.xlu1 %v7288_v0 }
  0x22   : > { %429 = vperm.xlu1 %7068, %v355_v10  }
  0x25   : > { %494 = vperm.xlu0 %7067, %v484_v15  }
  0x26   : > { %7069 = vset.pattern.permute.xlu1 %v7289_v8 }
  0x27   : > { %489 = vperm.xlu1 %7069, %v483_v16  }
  0x29   : > { %1778 = vperm.xlu0 %7067, %v6496_v17  }
  0x2b   : > { %499 = vperm.xlu1 %7069, %v485_v18  }
  0x2d   : > { %1788 = vperm.xlu0 %7067, %v6498_v19  }
  0x2f   : > { %504 = vperm.xlu1 %7069, %v486_v20  }
  0x31   : > { %3243 = vperm.xlu0 %7067, %v6560_v21  }
  0x33   : > { %1783 = vperm.xlu1 %7069, %v6497_v22  }
  0x35   : > { %3253 = vperm.xlu0 %7067, %v6562_v23  }
  0x37   : > { %1793 = vperm.xlu1 %7069, %v6499_v24  }
  0x39   : > { %4707 = vperm.xlu0 %7067, %v6624_v25  }
  0x3b   : > { %3248 = vperm.xlu1 %7069, %v6561_v26  }
  0x3d   : > { %4717 = vperm.xlu0 %7067, %v6626_v27  }
  0x3f   : > { %3258 = vperm.xlu1 %7069, %v6563_v28  }
  0x41   : > { %6163 = vperm.xlu0 %7067, %v6160_v29  }
  0x43   : > { %4712 = vperm.xlu1 %7069, %v6625_v30  }
  0x47   : > { %4722 = vperm.xlu1 %7069, %v6627_v31  }
  0x93   : > { %v418_v34 = vpop.permute.xlu1 %417  ;;  %v426_v36 = vpop.permute.xlu0 %425 }
  0x94   : > { %v459_v37 = vmul.f32 %v7378_v13, %v418_v34  ;;  %v465_v38 = vmul.f32 %v7378_v13, %v426_v36  ;;  %v466_v40 = vmul.f32 %v454_v35, %v426_v36  ;;  %v467_v60 = vmul.f32 %v458_v56, %v426_v36 }
  0x95   : > { %v460_v27 = vmul.f32 %v454_v35, %v418_v34  ;;  %v461_v32 = vmul.f32 %v458_v56, %v418_v34 }
  0x97   : > { %v422_v42 = vpop.permute.xlu1 %421 }
  0x98   : > { %v462_v44 = vmul.f32 %v7378_v13, %v422_v42  ;;  %v359_v45 = vpop.permute.xlu0 %358  ;;  %v463_v9 = vmul.f32 %v454_v35, %v422_v42  ;;  %v464_v18 = vmul.f32 %v458_v56, %v422_v42 }
  0x99   : > { %v404_v47 = vmul.f32 %v7381_v14, %v359_v45  ;;  %v405_v24 = vmul.f32 %v399_v51, %v359_v45  ;;  %v406_v28 = vmul.f32 %v403_v58, %v359_v45 }
  0x9b   : > { %v471_v50 = vadd.f32 %v459_v37, %v404_v47  ;;  %v472_v31 = vadd.f32 %v460_v27, %v405_v24 }
  0x9c   : > { %v364_v52 = vpop.permute.xlu0 %363  ;;  %v374_v53 = vpop.permute.xlu1 %373 }
  0x9d   : > { %v407_v54 = vmul.f32 %v7381_v14, %v364_v52  ;;  %v413_v55 = vmul.f32 %v7381_v14, %v374_v53  ;;  %v414_v57 = vmul.f32 %v399_v51, %v374_v53  ;;  %v408_v62 = vmul.f32 %v399_v51, %v364_v52 }
  0x9e   : > { %v415_v3 = vmul.f32 %v403_v58, %v374_v53  ;;  %v409_v12 = vmul.f32 %v403_v58, %v364_v52 }
  0x9f   : > { %v474_v59 = vadd.f32 %v462_v44, %v407_v54  ;;  %v475_v19 = vadd.f32 %v463_v9, %v408_v62 }
  0xa0   : > { %v369_v61 = vpop.permute.xlu0 %368  ;;  %v476_v21 = vadd.f32 %v464_v18, %v409_v12 }
  0xa1   : > { %v410_v63 = vmul.f32 %v7381_v14, %v369_v61  ;;  %v411_v0 = vmul.f32 %v399_v51, %v369_v61  ;;  %v412_v1 = vmul.f32 %v403_v58, %v369_v61  ;;  %v430_v2 = vpop.permute.xlu1 %429 }
  0xa2   : > { %v468_v4 = vmul.f32 %v7378_v13, %v430_v2  ;;  %v469_v5 = vmul.f32 %v454_v35, %v430_v2  ;;  %v470_v8 = vmul.f32 %v458_v56, %v430_v2 }
  0xa3   : > { %v477_v10 = vadd.f32 %v465_v38, %v410_v63  ;;  %v478_v6 = vadd.f32 %v466_v40, %v411_v0  ;;  %v479_v11 = vadd.f32 %v467_v60, %v412_v1  ;;  %v473_v38 = vadd.f32 %v461_v32, %v406_v28 }
  0xa4   : > { %v495_v7 = vpop.permute.xlu0 %494  ;;  %v7427_v15 = vadd.f32 %v468_v4, %v413_v55  ;;  %v7429_v16 = vadd.f32 %v469_v5, %v414_v57  ;;  %v7431_v17 = vadd.f32 %v470_v8, %v415_v3 }
  0xa5   : > { %v7433_v14 = vadd.f32 %v495_v7, %v474_v59  ;;  %v7437_v22 = vadd.f32 %v495_v7, %v475_v19  ;;  %v7439_v23 = vadd.f32 %v495_v7, %v476_v21 }
  0xa6   : > { %v490_v20 = vpop.permute.xlu1 %489 }
  0xa7   : > { %12345 = vst [vmem:[#allocation2_spill] sm:$0xff] %v7433_v14  ;;  %v7435_v13 = vadd.f32 %v490_v20, %v471_v50  ;;  %12347 = vst [vmem:[#allocation4_spill] sm:$0xff] %v7439_v23  ;;  %v834_v25 = vand.u32 2139095040, %v7433_v14  ;;  %v938_v26 = vand.u32 2139095040, %v7437_v22  ;;  %v1042_v29 = vand.u32 2139095040, %v7439_v23 }
  0xa8   : > { %v7444_v36 = vadd.f32 %v490_v20, %v472_v31  ;;  %v7446_v41 = vadd.f32 %v490_v20, %v473_v38  ;;  %v12189_v31 = vmov 920167782  }
  0xa9   : > { %12346 = vst [vmem:[#allocation3_spill] sm:$0xff] %v7435_v13  ;;  %v835_v30 = vshrl.u32 %v834_v25, 23  ;;  %v939_v33 = vshrl.u32 %v938_v26, 23  ;;  %v1043_v37 = vshrl.u32 %v1042_v29, 23  ;;  %v522_v43 = vand.u32 2139095040, %v7435_v13 }
  0xaa   : > { %12348 = vst [vmem:[#allocation5_spill] sm:$0xff] %v7446_v41  ;;  %v500_v42 = vpop.permute.xlu1 %499  ;;  %v626_v35 = vand.u32 2139095040, %v7444_v36  ;;  %v730_v34 = vand.u32 2139095040, %v7446_v41  ;;  %v12191_v29 = vmov 2102212464  }
  0xab   : > { %v6460_v39 = vadd.s32 4294967169, %v835_v30  ;;  %v6464_v40 = vadd.s32 4294967169, %v939_v33  ;;  %v6468_v44 = vadd.s32 4294967169, %v1043_v37  ;;  %v7450_v46 = vadd.f32 %v500_v42, %v477_v10 }
  0xac   : > { %v523_v48 = vshrl.u32 %v522_v43, 23  ;;  %v627_v49 = vshrl.u32 %v626_v35, 23  ;;  %v731_v52 = vshrl.u32 %v730_v34, 23  ;;  %v7454_v53 = vadd.f32 %v500_v42, %v478_v6 }
  0xad   : > { %v841_v45 = vadd.s32 1, %v6460_v39  ;;  %12349 = vst [vmem:[#allocation6_spill] sm:$0xff] %v7450_v46  ;;  %v945_v47 = vadd.s32 1, %v6464_v40  ;;  %v1049_v50 = vadd.s32 1, %v6468_v44  ;;  %v12177_v51 = vand.u32 2147483647, %v7450_v46 }
  0xae   : > { %12350 = vst [vmem:[#allocation7_spill] sm:$0xff] %v7454_v53  ;;  %v1146_v54 = vand.u32 2139095040, %v7450_v46  ;;  %v6448_v55 = vadd.s32 4294967169, %v523_v48  ;;  %v6452_v56 = vadd.s32 4294967169, %v627_v49  ;;  %v7457_v60 = vadd.f32 %v500_v42, %v479_v11 }
  0xaf   : > { %vm842_vm0 = vcmp.gt.s32.totalorder %v841_v45, 0  ;;  %vm946_vm1 = vcmp.gt.s32.totalorder %v945_v47, 0  ;;  %vm1050_vm2 = vcmp.gt.s32.totalorder %v1049_v50, 0  ;;  %v1150_v61 = vand.u32 8388607, %v12177_v51 }
  0xb0   : > { %v843_v57 = vsel %vm842_vm0, %v841_v45, 0  ;;  %v1147_v58 = vshrl.u32 %v1146_v54, 23  ;;  %v947_v59 = vsel %vm946_vm1, %v945_v47, 0  ;;  %12351 = vst [vmem:[#allocation8_spill] sm:$0xff] %v7457_v60  ;;  %v7462_v63 = vadd.s32 4294967169, %v731_v52 }
  0xb1   : > { %v12179_v1 = vand.u32 2147483647, %v7454_v53  ;;  %v1250_v2 = vand.u32 2139095040, %v7454_v53  ;;  %v7466_v3 = vand.u32 31, %v843_v57  ;;  %v1051_v4 = vsel %vm1050_vm2, %v1049_v50, 0 }
  0xb2   : > { %v6472_v0 = vadd.s32 4294967169, %v1147_v58  ;;  %v7468_v5 = vadd.s32 1, %v6448_v55  ;;  %v7470_v8 = vadd.s32 1, %v6452_v56  ;;  %v7472_v9 = vshrl.u32 %v843_v57, 5 }
  0xb3   : > { %12352 = vst [vmem:[#allocation9_spill] sm:$0xff] %v7466_v3  ;;  %v7474_v10 = vshrl.u32 %v947_v59, 5  ;;  %v1251_v11 = vshrl.u32 %v1250_v2, 23  ;;  %v1151_v12 = vor.u32 8388608, %v1150_v61  ;;  %v7478_v7 = vand.u32 8388607, %v12179_v1 }
  0xb4   : > { %12353 = vst [vmem:[#allocation10_spill] sm:$0xff] %v7472_v9  ;;  %v1153_v6 = vadd.s32 1, %v6472_v0  ;;  %v12178_v18 = vand.u32 2147483647, %v7457_v60  ;;  %v1354_v19 = vand.u32 2139095040, %v7457_v60  ;;  %v7482_v20 = vand.u32 31, %v947_v59 }
  0xb5   : > { %12354 = vst [vmem:[#allocation11_spill] sm:$0xff] %v7474_v10  ;;  %v7484_v21 = vshrl.u32 %v1051_v4, 5  ;;  %v6476_v24 = vadd.s32 4294967169, %v1251_v11  ;;  %v7487_v25 = vsub.s32 32, %v7466_v3  ;;  %v7489_v26 = vand.u32 31, %v1051_v4 }
  0xb6   : > { %vm1154_vm3 = vcmp.gt.s32.totalorder %v1153_v6, 0  ;;  %v1355_v28 = vshrl.u32 %v1354_v19, 23  ;;  %v7493_v30 = vshll.u32 %v12191_v29, %v7466_v3  ;;  %v7497_v32 = vshll.u32 %v12189_v31, %v7466_v3 }
  0xb7   : > { %12355 = vst [vmem:[#allocation12_spill] sm:$0xff] %v7484_v21  ;;  %12356 = vst [vmem:[#allocation13_spill] sm:$0xff] %v7487_v25  ;;  %v1155_v27 = vsel %vm1154_vm3, %v1153_v6, 0  ;;  %v7499_v38 = vshll.u32 %v1151_v12, 8  ;;  %v1255_v39 = vor.u32 8388608, %v7478_v7  ;;  %v1257_v40 = vadd.s32 1, %v6476_v24 }
  0xb8   : > { %12357 = vst [vmem:[#allocation14_spill] sm:$0xff] %v7489_v26  ;;  %v1156_v33 = vshrl.u32 %v1155_v27, 5  ;;  %v1157_v37 = vand.u32 31, %v1155_v27  ;;  %v7504_v42 = vand.u32 8388607, %v12178_v18  ;;  %v6480_v34 = vadd.s32 4294967169, %v1355_v28 }
  0xb9   : > { %v12184_v35 = vmov 683565275   ;;  %v12182_v45 = vmov 2475754826   ;;  %v12180_v48 = vmov 2131351028   ;;  %v858_v18 = vshrl.u32 %v12189_v31, %v7487_v25 }
  0xba   : > { %v1158_v43 = vsub.s32 32, %v1157_v37  ;;  %v1160_v44 = vshll.u32 %v12184_v35, %v1157_v37  ;;  %v1163_v47 = vshll.u32 %v12182_v45, %v1157_v37  ;;  %v1166_v49 = vshll.u32 %v12180_v48, %v1157_v37 }
  0xbb   : > { %v1169_v50 = vshll.u32 %v12191_v29, %v1157_v37  ;;  %v1172_v52 = vshll.u32 %v12189_v31, %v1157_v37  ;;  %vm1175_vm4 = vcmp.lt.s32.totalorder %v1156_v33, 1  ;;  %vm1176_vm5 = vcmp.lt.s32.totalorder %v1156_v33, 2 }
  0xbc   : > { %v1161_v54 = vshrl.u32 %v12182_v45, %v1158_v43  ;;  %v1164_v55 = vshrl.u32 %v12180_v48, %v1158_v43  ;;  %v1167_v56 = vshrl.u32 %v12191_v29, %v1158_v43  ;;  %v1159_v57 = vshrl.u32 %v12184_v35, %v1158_v43 }
  0xbd   : > { %v1170_v58 = vshrl.u32 %v12189_v31, %v1158_v43  ;;  %v12186_v59 = vmov 1326507024   ;;  %vm1177_vm6 = vcmp.lt.s32.totalorder %v1156_v33, 3  ;;  %vm1258_vm7 = vcmp.gt.s32.totalorder %v1257_v40, 0 }
  0xbe   : > { %v1173_v61 = vshrl.u32 %v12186_v59, %v1158_v43  ;;  %v1162_v0 = vor.u32 %v1161_v54, %v1160_v44  ;;  %v1165_v2 = vor.u32 %v1164_v55, %v1163_v47  ;;  %v1168_v4 = vor.u32 %v1167_v56, %v1166_v49 }
  0xbf   : > { %v1171_v6 = vor.u32 %v1170_v58, %v1169_v50  ;;  %vm1178_vm8 = vcmp.lt.s32.totalorder %v1156_v33, 4  ;;  %v1259_v12 = vsel %vm1258_vm7, %v1257_v40, 0  ;;  %v7526_v54 = vshll.u32 %v1255_v39, 8 }
  0xc0   : > { %v1174_v11 = vor.u32 %v1173_v61, %v1172_v52  ;;  %v1179_v7 = vsel %vm1175_vm4, %v1159_v57, %v1162_v0  ;;  %v1180_v19 = vsel %vm1178_vm8, %v1168_v4, 2102212464  ;;  %v1183_v24 = vsel %vm1175_vm4, %v1162_v0, %v1165_v2 }
  0xc1   : > { %v1187_v27 = vsel %vm1175_vm4, %v1165_v2, %v1168_v4  ;;  %v1181_v28 = vsel %vm1177_vm6, %v1165_v2, %v1180_v19  ;;  %v1184_v37 = vsel %vm1178_vm8, %v1171_v6, 920167782  ;;  %v1260_v51 = vshrl.u32 %v1259_v12, 5 }
  0xc2   : > { %v1188_v43 = vsel %vm1178_vm8, %v1174_v11, 1326507024  ;;  %v1182_v44 = vsel %vm1176_vm5, %v1179_v7, %v1181_v28  ;;  %v1185_v47 = vsel %vm1177_vm6, %v1168_v4, %v1184_v37  ;;  %v1261_v50 = vand.u32 31, %v1259_v12 }
  0xc3   : > { %v1189_v49 = vsel %vm1177_vm6, %v1171_v6, %v1188_v43  ;;  %v1186_v40 = vsel %vm1176_vm5, %v1183_v24, %v1185_v47  ;;  %v1361_v55 = vadd.s32 1, %v6480_v34  ;;  %v1198_v0 = vmul.u32 %v7499_v38, %v1182_v44 }
  0xc4   : > { %v1190_v52 = vsel %vm1176_vm5, %v1187_v27, %v1189_v49  ;;  %v7533_v58 = vmul.u32.u64.low %v7499_v38, %v1186_v40  ;;  %v7534_v61 = vmul.u32.u64.high %v7499_v38, %v1186_v40, %v7533_v58  ;;  %v1262_v2 = vsub.s32 32, %v1261_v50 }
  0xc5   : > { %v7529_v56 = vmul.u32.u64.low %v7499_v38, %v1190_v52  ;;  %v7530_v57 = vmul.u32.u64.high %v7499_v38, %v1190_v52, %v7529_v56  ;;  %v1264_v4 = vshll.u32 %v12184_v35, %v1261_v50  ;;  %vm1279_vm9 = vcmp.lt.s32.totalorder %v1260_v51, 1 }
  0xc6   : > { %v1267_v33 = vshll.u32 %v12182_v45, %v1261_v50  ;;  %v1270_v39 = vshll.u32 %v12180_v48, %v1261_v50  ;;  %v1273_v34 = vshll.u32 %v12191_v29, %v1261_v50  ;;  %v1276_v6 = vshll.u32 %v12189_v31, %v1261_v50 }
  0xc7   : > { %v1265_v11 = vshrl.u32 %v12182_v45, %v1262_v2  ;;  %v1268_v12 = vshrl.u32 %v12180_v48, %v1262_v2  ;;  %v1271_v7 = vshrl.u32 %v12191_v29, %v1262_v2  ;;  %vm1281_vm10 = vcmp.lt.s32.totalorder %v1260_v51, 3 }
  0xc8   : > { %vm1200_vm11 = vc.u32 %v7530_v57, %v7533_v58  ;;  %v1201_v38 = vadd.s32 1, %v7534_v61  ;;  %v1263_v19 = vshrl.u32 %v12184_v35, %v1262_v2  ;;  %v1274_v24 = vshrl.u32 %v12189_v31, %v1262_v2 }
  0xc9   : > { %v1266_v27 = vor.u32 %v1265_v11, %v1264_v4  ;;  %v1269_v28 = vor.u32 %v1268_v12, %v1267_v33  ;;  %v1272_v37 = vor.u32 %v1271_v7, %v1270_v39  ;;  %v1277_v43 = vshrl.u32 %v12186_v59, %v1262_v2 }
  0xca   : > { %v1202_v44 = vsel %vm1200_vm11, %v1201_v38, %v7534_v61  ;;  %v1275_v47 = vor.u32 %v1274_v24, %v1273_v34  ;;  %vm1282_vm12 = vcmp.lt.s32.totalorder %v1260_v51, 4  ;;  %vm1362_vm13 = vcmp.gt.s32.totalorder %v1361_v55, 0 }
  0xcb   : > { %v1203_v49 = vadd.s32 %v1202_v44, %v1198_v0  ;;  %v1278_v50 = vor.u32 %v1277_v43, %v1276_v6  ;;  %v1283_v40 = vsel %vm1279_vm9, %v1263_v19, %v1266_v27  ;;  %v1284_v52 = vsel %vm1282_vm12, %v1272_v37, 2102212464 }
  0xcc   : > { %vm530_vm14 = vcmp.gt.s32.totalorder %v7468_v5, 0  ;;  %v1285_v56 = vsel %vm1281_vm10, %v1269_v28, %v1284_v52  ;;  %v1287_v4 = vsel %vm1279_vm9, %v1266_v27, %v1269_v28  ;;  %v1288_v33 = vsel %vm1282_vm12, %v1275_v47, 920167782 }
  0xcd   : > { %v1291_v39 = vsel %vm1279_vm9, %v1269_v28, %v1272_v37  ;;  %v1204_v2 = vadd.s32 536870912, %v1203_v49  ;;  %vm1280_vm15 = vcmp.lt.s32.totalorder %v1260_v51, 2  ;;  %v1289_v61 = vsel %vm1281_vm10, %v1272_v37, %v1288_v33 }
  0xce   : > { %v1292_v34 = vsel %vm1282_vm12, %v1278_v50, 1326507024  ;;  %v1286_v11 = vsel %vm1280_vm15, %v1283_v40, %v1285_v56  ;;  %v1290_v0 = vsel %vm1280_vm15, %v1287_v4, %v1289_v61  ;;  %v1363_v12 = vsel %vm1362_vm13, %v1361_v55, 0 }
  0xcf   : > { %v1293_v6 = vsel %vm1281_vm10, %v1275_v47, %v1292_v34  ;;  %v7561_v7 = vshrl.u32 %v1204_v2, 30  ;;  %v7564_v19 = vmul.u32.u64.low %v7526_v54, %v1290_v0  ;;  %v7565_v24 = vmul.u32.u64.high %v7526_v54, %v1290_v0, %v7564_v19 }
  0xd0   : > { %v1294_v38 = vsel %vm1280_vm15, %v1291_v39, %v1293_v6  ;;  %v7569_v27 = vsub.s32 32, %v7482_v20  ;;  %v1365_v43 = vand.u32 31, %v1363_v12  ;;  %v7576_v51 = vsub.s32 32, %v7489_v26 }
  0xd1   : > { %12358 = vst [vmem:[#allocation15_spill] sm:$0xff] %v7561_v7  ;;  %v7572_v28 = vmul.u32.u64.low %v7526_v54, %v1294_v38  ;;  %v7573_v37 = vmul.u32.u64.high %v7526_v54, %v1294_v38, %v7572_v28  ;;  %v7580_v55 = vshll.u32 %v12191_v29, %v7489_v26  ;;  %v7584_v44 = vshll.u32 %v12189_v31, %v7489_v26 }
  0xd2   : > { %12359 = vst [vmem:[#allocation16_spill] sm:$0xff] %v7576_v51  ;;  %v1206_v47 = vshll.u32 %v7561_v7, 30  ;;  %v1302_v50 = vmul.u32 %v7526_v54, %v1286_v11  ;;  %v1359_v40 = vor.u32 8388608, %v7504_v42  ;;  %v7589_v52 = vshrl.u32 %v1363_v12, 5  ;;  %v7605_v12 = vpop.permute.xlu1 %504 }
  0xd3   : > { %v1366_v56 = vsub.s32 32, %v1365_v43  ;;  %v1305_v4 = vadd.s32 1, %v7565_v24  ;;  %v1368_v33 = vshll.u32 %v12184_v35, %v1365_v43  ;;  %v1371_v39 = vshll.u32 %v12182_v45, %v1365_v43 }
  0xd4   : > { %v1374_v2 = vshll.u32 %v12180_v48, %v1365_v43  ;;  %v7595_v61 = vsub.s32 %v1203_v49, %v1206_v47  ;;  %vm1304_vm0 = vc.u32 %v7573_v37, %v7564_v19  ;;  %v1377_v42 = vshll.u32 %v12191_v29, %v1365_v43 }
  0xd5   : > { %v1369_v54 = vshrl.u32 %v12182_v45, %v1366_v56  ;;  %v1306_v34 = vsel %vm1304_vm0, %v1305_v4, %v7565_v24  ;;  %v1372_v11 = vshrl.u32 %v12180_v48, %v1366_v56  ;;  %v1375_v0 = vshrl.u32 %v12191_v29, %v1366_v56 }
  0xd6   : > { %v1380_v6 = vshll.u32 %v12189_v31, %v1365_v43  ;;  %v1307_v38 = vadd.s32 %v1306_v34, %v1302_v50  ;;  %v1378_v28 = vshrl.u32 %v12189_v31, %v1366_v56  ;;  %v1381_v47 = vshrl.u32 %v12186_v59, %v1366_v56 }
  0xd7   : > { %v1370_v49 = vor.u32 %v1369_v54, %v1368_v33  ;;  %v531_v24 = vsel %vm530_vm14, %v7468_v5, 0  ;;  %vm634_vm1 = vcmp.gt.s32.totalorder %v7470_v8, 0  ;;  %v1373_v4 = vor.u32 %v1372_v11, %v1371_v39 }
  0xd8   : > { %v1376_v1 = vor.u32 %v1375_v0, %v1374_v2  ;;  %v1308_v43 = vadd.s32 536870912, %v1307_v38  ;;  %v1379_v62 = vor.u32 %v1378_v28, %v1377_v42  ;;  %v1382_v48 = vor.u32 %v1381_v47, %v1380_v6 }
  0xd9   : > { %v7617_v50 = vadd.f32 %v7605_v12, %v7427_v15  ;;  %v1209_v33 = vsub.s32 0, %v7595_v61  ;;  %vm1383_vm2 = vcmp.lt.s32.totalorder %v7589_v52, 1  ;;  %vm1386_vm3 = vcmp.lt.s32.totalorder %v7589_v52, 4 }
  0xda   : > { %v1399_v54 = vshll.u32 %v1359_v40, 8  ;;  %v7622_v34 = vshrl.u32 %v1308_v43, 30  ;;  %vm1385_vm4 = vcmp.lt.s32.totalorder %v7589_v52, 3  ;;  %v1391_v5 = vsel %vm1383_vm2, %v1370_v49, %v1373_v4 }
  0xdb   : > { %12360 = vst [vmem:[#allocation17_spill] sm:$0xff] %v7617_v50  ;;  %v1392_v39 = vsel %vm1386_vm3, %v1379_v62, 920167782  ;;  %vm1384_vm5 = vcmp.lt.s32.totalorder %v7589_v52, 2  ;;  %v1388_v2 = vsel %vm1386_vm3, %v1376_v1, 2102212464  ;;  %v1395_v42 = vsel %vm1383_vm2, %v1373_v4, %v1376_v1 }
  0xdc   : > { %12361 = vst [vmem:[#allocation18_spill] sm:$0xff] %v7622_v34  ;;  %v1393_v15 = vsel %vm1385_vm4, %v1376_v1, %v1392_v39  ;;  %v1310_v11 = vshll.u32 %v7622_v34, 30  ;;  %v1367_v40 = vshrl.u32 %v12184_v35, %v1366_v56  ;;  %v1396_v6 = vsel %vm1386_vm3, %v1382_v48, 1326507024 }
  0xdd   : > { %v1394_v0 = vsel %vm1384_vm5, %v1391_v5, %v1393_v15  ;;  %vm866_vm6 = vcmp.lt.s32.totalorder %v7472_v9, 4  ;;  %v6473_v28 = vmin.u32 %v1209_v33, %v7595_v61  ;;  %v1397_v47 = vsel %vm1385_vm4, %v1379_v62, %v1396_v6 }
  0xde   : > { %v7640_v43 = vmul.u32.u64.low %v1399_v54, %v1394_v0  ;;  %v7641_v39 = vmul.u32.u64.high %v1399_v54, %v1394_v0, %v7640_v43  ;;  %v861_v1 = vshrl.u32 %v12186_v59, %v7487_v25  ;;  %v1387_v56 = vsel %vm1383_vm2, %v1367_v40, %v1370_v49 }
  0xdf   : > { %v1389_v48 = vsel %vm1385_vm4, %v1373_v4, %v1388_v2  ;;  %v1398_v5 = vsel %vm1384_vm5, %v1395_v42, %v1397_v47  ;;  %v1066_v33 = vshrl.u32 %v12189_v31, %v7576_v51  ;;  %v7654_v62 = vand.u32 31, %v531_v24 }
  0xe0   : > { %v737_v15 = vadd.s32 1, %v7462_v63  ;;  %v1458_v0 = vand.u32 2139095040, %v7617_v50  ;;  %v1069_v6 = vshrl.u32 %v12186_v59, %v7576_v51  ;;  %vm1074_vm7 = vcmp.lt.s32.totalorder %v7484_v21, 4 }
  0xe1   : > { %12362 = vst [vmem:[#allocation19_spill] sm:$0xff] %v7654_v62  ;;  %v7661_v49 = vsub.s32 %v1307_v38, %v1310_v11  ;;  %v7663_v4 = vmul.u32.u64.low %v1399_v54, %v1398_v5  ;;  %v7664_v2 = vmul.u32.u64.high %v1399_v54, %v1398_v5, %v7663_v4  ;;  %v1211_v42 = vclz %v6473_v28 }
  0xe2   : > { %v1390_v40 = vsel %vm1384_vm5, %v1387_v56, %v1389_v48  ;;  %v1409_v47 = vadd.s32 1, %v7641_v39  ;;  %v1459_v45 = vshrl.u32 %v1458_v0, 23  ;;  %v7670_v63 = vor.u32 %v858_v18, %v7493_v30 }
  0xe3   : > { %v862_v35 = vor.u32 %v861_v1, %v7497_v32  ;;  %v7673_v59 = vshrl.u32 %v531_v24, 5  ;;  %v635_v38 = vsel %vm634_vm1, %v7470_v8, 0  ;;  %v7679_v11 = vsub.s32 32, %v7654_v62 }
  0xe4   : > { %12363 = vst [vmem:[#allocation20_spill] sm:$0xff] %v7670_v63  ;;  %vm738_vm8 = vcmp.gt.s32.totalorder %v737_v15, 0  ;;  %v7683_v52 = vadd.f32 %v7605_v12, %v7429_v16  ;;  %v6484_v28 = vadd.s32 4294967169, %v1459_v45  ;;  %v1313_v18 = vsub.s32 0, %v7661_v49 }
  0xe5   : > { %12364 = vst [vmem:[#allocation21_spill] sm:$0xff] %v7673_v59  ;;  %12365 = vst [vmem:[#allocation22_spill] sm:$0xff] %v7679_v11  ;;  %v1406_v30 = vmul.u32 %v1399_v54, %v1390_v40  ;;  %vm1408_vm9 = vc.u32 %v7664_v2, %v7640_v43  ;;  %v12188_v32 = vand.u32 2147483647, %v7617_v50  ;;  %v7690_v24 = vor.u32 %v1066_v33, %v7580_v55 }
  0xe6   : > { %12366 = vst [vmem:[#allocation23_spill] sm:$0xff] %v7683_v52  ;;  %v6474_v8 = vadd.s32 4294967294, %v1211_v42  ;;  %v1410_v1 = vsel %vm1408_vm9, %v1409_v47, %v7641_v39  ;;  %v1465_v56 = vadd.s32 1, %v6484_v28  ;;  %v7696_v16 = vsel %vm866_vm6, %v7670_v63, 920167782 }
  0xe7   : > { %12367 = vst [vmem:[#allocation24_spill] sm:$0xff] %v7690_v24  ;;  %12368 = vst [vmem:[#allocation25_spill] sm:$0xff] %v7696_v16  ;;  %v1070_v45 = vor.u32 %v1069_v6, %v7584_v44  ;;  %v545_v54 = vshll.u32 %v12191_v29, %v7654_v62  ;;  %v1411_v48 = vadd.s32 %v1410_v1, %v1406_v30  ;;  %v7703_v5 = vsel %vm866_vm6, %v862_v35, 1326507024 }
  0xe8   : > { %12369 = vst [vmem:[#allocation26_spill] sm:$0xff] %v7703_v5  ;;  %v546_v55 = vshrl.u32 %v12189_v31, %v7679_v11  ;;  %v739_v39 = vsel %vm738_vm8, %v737_v15, 0  ;;  %vm1466_vm10 = vcmp.gt.s32.totalorder %v1465_v56, 0  ;;  %v6477_v33 = vmin.u32 %v1313_v18, %v7661_v49 }
  0xe9   : > { %v1462_v0 = vand.u32 8388607, %v12188_v32  ;;  %v1467_v44 = vsel %vm1466_vm10, %v1465_v56, 0  ;;  %v1562_v6 = vand.u32 2139095040, %v7683_v52  ;;  %v7715_v4 = vsel %vm1074_vm7, %v7690_v24, 920167782 }
  0xea   : > { %12370 = vst [vmem:[#allocation27_spill] sm:$0xff] %v7715_v4  ;;  %v7719_v35 = vshll.u32 %v12189_v31, %v7654_v62  ;;  %vm6475_vm11 = vcmp.lt.s32.totalorder %v6474_v8, 0  ;;  %v1469_v15 = vand.u32 31, %v1467_v44  ;;  %v7723_v42 = vsel %vm1074_vm7, %v1070_v45, 1326507024 }
  0xeb   : > { %12371 = vst [vmem:[#allocation28_spill] sm:$0xff] %v7723_v42  ;;  %v12372_v40 = vmov 1326507024   ;;  %v7729_v28 = vshrl.u32 %v635_v38, 5  ;;  %v1412_v18 = vadd.s32 536870912, %v1411_v48  ;;  %v7731_v30 = vor.u32 %v546_v55, %v545_v54 }
  0xec   : > { %v7727_v47 = vshrl.u32 %v12372_v40, %v7679_v11  ;;  %v7733_v1 = vand.u32 31, %v635_v38  ;;  %v7735_v56 = vand.u32 31, %v739_v39  ;;  %v1470_v32 = vsub.s32 32, %v1469_v15 }
  0xed   : > { %12373 = vst [vmem:[#allocation29_spill] sm:$0xff] %v7731_v30  ;;  %v7737_v31 = vsel %vm6475_vm11, 0, %v6474_v8  ;;  %v1315_v29 = vclz %v6477_v33  ;;  %v1463_v7 = vor.u32 8388608, %v1462_v0  ;;  %v1563_v45 = vshrl.u32 %v1562_v6, 23 }
  0xee   : > { %v12374_v34 = vmov 683565275   ;;  %v12375_v60 = vmov 2475754826   ;;  %v12376_v5 = vmov 2131351028  }
  0xef   : > { %v1472_v50 = vshll.u32 %v12374_v34, %v1469_v15  ;;  %v1473_v53 = vshrl.u32 %v12375_v60, %v1470_v32  ;;  %v1475_v63 = vshll.u32 %v12375_v60, %v1469_v15  ;;  %v1476_v16 = vshrl.u32 %v12376_v5, %v1470_v32 }
  0xf0   : > { %v7743_v54 = vshrl.u32 %v1412_v18, 30  ;;  %v1468_v38 = vshrl.u32 %v1467_v44, 5  ;;  %v1478_v55 = vshll.u32 %v12376_v5, %v1469_v15  ;;  %v12378_v9 = vmov 2102212464  }
  0xf1   : > { %v1479_v3 = vshrl.u32 %v12378_v9, %v1470_v32  ;;  %v1474_v8 = vor.u32 %v1473_v53, %v1472_v50  ;;  %v1477_v25 = vor.u32 %v1476_v16, %v1475_v63  ;;  %v1481_v33 = vshll.u32 %v12378_v9, %v1469_v15 }
  0xf2   : > { %12377 = vst [vmem:[#allocation30_spill] sm:$0xff] %v7743_v54  ;;  %v12379_v0 = vmov 920167782   ;;  %v7751_v62 = vshrl.u32 %v739_v39, 5  ;;  %v7754_v11 = vsub.s32 32, %v7735_v56  ;;  %v1215_v44 = vsub.s32 32, %v7737_v31 }
  0xf3   : > { %v1482_v6 = vshrl.u32 %v12379_v0, %v1470_v32  ;;  %v1480_v18 = vor.u32 %v1479_v3, %v1478_v55  ;;  %v1484_v4 = vshll.u32 %v12379_v0, %v1469_v15  ;;  %v1485_v53 = vshrl.u32 %v12372_v40, %v1470_v32 }
  0xf4   : > { %v6478_v50 = vadd.s32 4294967294, %v1315_v29  ;;  %v1414_v63 = vshll.u32 %v7743_v54, 30  ;;  %vm1487_vm12 = vcmp.lt.s32.totalorder %v1468_v38, 1  ;;  %v1503_v16 = vshll.u32 %v1463_v7, 8 }
  0xf5   : > { %v1483_v13 = vor.u32 %v1482_v6, %v1481_v33  ;;  %v1486_v24 = vor.u32 %v1485_v53, %v1484_v4  ;;  %vm1490_vm13 = vcmp.lt.s32.totalorder %v1468_v38, 4  ;;  %v1495_v39 = vsel %vm1487_vm12, %v1474_v8, %v1477_v25 }
  0xf6   : > { %v6488_v14 = vadd.s32 4294967169, %v1563_v45  ;;  %v1471_v42 = vshrl.u32 %v12374_v34, %v1470_v32  ;;  %vm1489_vm14 = vcmp.lt.s32.totalorder %v1468_v38, 3  ;;  %v1492_v3 = vsel %vm1490_vm13, %v1480_v18, 2102212464 }
  0xf7   : > { %v1496_v55 = vsel %vm1490_vm13, %v1483_v13, 920167782  ;;  %vm1488_vm15 = vcmp.lt.s32.totalorder %v1468_v38, 2  ;;  %v1499_v15 = vsel %vm1487_vm12, %v1477_v25, %v1480_v18  ;;  %v1500_v6 = vsel %vm1490_vm13, %v1486_v24, 1326507024 }
  0xf8   : > { %v1497_v33 = vsel %vm1489_vm14, %v1480_v18, %v1496_v55  ;;  %v1219_v29 = vsub.s32 4294967266, %v7737_v31  ;;  %v7764_v54 = vsub.s32 %v1411_v48, %v1414_v63  ;;  %v1491_v7 = vsel %vm1487_vm12, %v1471_v42, %v1474_v8 }
  0xf9   : > { %v1498_v4 = vsel %vm1488_vm15, %v1495_v39, %v1497_v33  ;;  %v1493_v53 = vsel %vm1489_vm14, %v1477_v25, %v1492_v3  ;;  %v1501_v45 = vsel %vm1489_vm14, %v1483_v13, %v1500_v6  ;;  %v1199_v55 = vadd.s32 %v7533_v58, %v7530_v57 }
  0xfa   : > { %v7768_v21 = vmul.u32.u64.low %v1503_v16, %v1498_v4  ;;  %v7769_v32 = vmul.u32.u64.high %v1503_v16, %v1498_v4, %v7768_v21  ;;  %vm6479_vm0 = vcmp.lt.s32.totalorder %v6478_v50, 0  ;;  %v1502_v24 = vsel %vm1488_vm15, %v1499_v15, %v1501_v45 }
  0xfb   : > { %v12223_v18 = vand.u32 2147483647, %v7683_v52  ;;  %v7778_v48 = vshll.u32 %v12378_v9, %v7735_v56  ;;  %v7780_v42 = vmul.u32.u64.low %v1503_v16, %v1502_v24  ;;  %v7781_v8 = vmul.u32.u64.high %v1503_v16, %v1502_v24, %v7780_v42 }
  0xfc   : > { %v1569_v13 = vadd.s32 1, %v6488_v14  ;;  %v7785_v25 = vshrl.u32 %v12379_v0, %v7754_v11  ;;  %v1217_v63 = vshrl.u32 %v1199_v55, %v1215_v44  ;;  %v7787_v39 = vadd.s32 127, %v1219_v29 }
  0xfd   : > { %v1494_v57 = vsel %vm1488_vm15, %v1491_v7, %v1493_v53  ;;  %v7790_v58 = vsel %vm6479_vm0, 0, %v6478_v50  ;;  %v1417_v3 = vsub.s32 0, %v7764_v54  ;;  %v1513_v33 = vadd.s32 1, %v7769_v32 }
  0xfe   : > { %vm1570_vm1 = vcmp.gt.s32.totalorder %v1569_v13, 0  ;;  %v1216_v15 = vshll.u32 %v7595_v61, %v7737_v31  ;;  %v7798_v14 = vadd.f32 %v7605_v12, %v7431_v17  ;;  %v1566_v44 = vand.u32 8388607, %v12223_v18 }
  0xff   : > { %v1571_v6 = vsel %vm1570_vm1, %v1569_v13, 0  ;;  %v1303_v38 = vadd.s32 %v7564_v19, %v7573_v37  ;;  %v1510_v50 = vmul.u32 %v1503_v16, %v1494_v57  ;;  %vm1512_vm2 = vc.u32 %v7781_v8, %v7768_v21 }
 0x100   : > { %12380 = vst [vmem:[#allocation31_spill] sm:$0xff] %v7798_v14  ;;  %v1573_v29 = vand.u32 31, %v1571_v6  ;;  %v7806_v7 = vor.u32 %v1217_v63, %v1216_v15  ;;  %v1221_v31 = vshll.u32 %v7787_v39, 23  ;;  %v1319_v61 = vsub.s32 32, %v7790_v58 }
 0x101   : > { %v1514_v17 = vsel %vm1512_vm2, %v1513_v33, %v7769_v32  ;;  %v1323_v12 = vsub.s32 4294967266, %v7790_v58  ;;  %v6481_v4 = vmin.u32 %v1417_v3, %v7764_v54  ;;  %v1567_v19 = vor.u32 8388608, %v1566_v44 }
 0x102   : > { %v1515_v53 = vadd.s32 %v1514_v17, %v1510_v50  ;;  %v1574_v45 = vsub.s32 32, %v1573_v29  ;;  %v1572_v37 = vshrl.u32 %v1571_v6, 5  ;;  %v1576_v16 = vshll.u32 %v12374_v34, %v1573_v29 }
 0x103   : > { %v1666_v55 = vand.u32 2139095040, %v7798_v14  ;;  %v1579_v13 = vshll.u32 %v12375_v60, %v1573_v29  ;;  %v1582_v32 = vshll.u32 %v12376_v5, %v1573_v29  ;;  %v1585_v57 = vshll.u32 %v12378_v9, %v1573_v29 }
 0x104   : > { %v1516_v24 = vadd.s32 536870912, %v1515_v53  ;;  %v1577_v42 = vshrl.u32 %v12375_v60, %v1574_v45  ;;  %v1580_v63 = vshrl.u32 %v12376_v5, %v1574_v45  ;;  %v1583_v39 = vshrl.u32 %v12378_v9, %v1574_v45 }
 0x105   : > { %v1586_v3 = vshrl.u32 %v12379_v0, %v1574_v45  ;;  %v1588_v44 = vshll.u32 %v12379_v0, %v1573_v29  ;;  %v1589_v6 = vshrl.u32 %v12372_v40, %v1574_v45  ;;  %v1324_v50 = vadd.s32 127, %v1323_v12 }
 0x106   : > { %v1578_v33 = vor.u32 %v1577_v42, %v1576_v16  ;;  %v1581_v15 = vor.u32 %v1580_v63, %v1579_v13  ;;  %v7824_v17 = vshrl.u32 %v1516_v24, 30  ;;  %v1584_v18 = vor.u32 %v1583_v39, %v1582_v32 }
 0x107   : > { %v1587_v52 = vor.u32 %v1586_v3, %v1585_v57  ;;  %v1419_v26 = vclz %v6481_v4  ;;  %v1590_v51 = vor.u32 %v1589_v6, %v1588_v44  ;;  %vm1591_vm3 = vcmp.lt.s32.totalorder %v1572_v37, 1 }
 0x108   : > { %12381 = vst [vmem:[#allocation32_spill] sm:$0xff] %v7824_v17  ;;  %v1607_v23 = vshll.u32 %v1567_v19, 8  ;;  %v1575_v41 = vshrl.u32 %v12374_v34, %v1574_v45  ;;  %vm1594_vm4 = vcmp.lt.s32.totalorder %v1572_v37, 4  ;;  %v1599_v10 = vsel %vm1591_vm3, %v1578_v33, %v1581_v15 }
 0x109   : > { %v1667_v46 = vshrl.u32 %v1666_v55, 23  ;;  %vm1593_vm5 = vcmp.lt.s32.totalorder %v1572_v37, 3  ;;  %v1596_v16 = vsel %vm1594_vm4, %v1584_v18, 2102212464  ;;  %v1600_v42 = vsel %vm1594_vm4, %v1587_v52, 920167782 }
 0x10a   : > { %v1603_v29 = vsel %vm1591_vm3, %v1581_v15, %v1584_v18  ;;  %v1518_v13 = vshll.u32 %v7824_v17, 30  ;;  %vm1592_vm8 = vcmp.lt.s32.totalorder %v1572_v37, 2  ;;  %v1601_v12 = vsel %vm1593_vm5, %v1584_v18, %v1600_v42 }
 0x10b   : > { %v1604_v24 = vsel %vm1594_vm4, %v1590_v51, 1326507024  ;;  %vm554_vm9 = vcmp.lt.s32.totalorder %v7673_v59, 4  ;;  %v1595_v4 = vsel %vm1591_vm3, %v1575_v41, %v1578_v33  ;;  %v1597_v63 = vsel %vm1593_vm5, %v1581_v15, %v1596_v16 }
 0x10c   : > { %v1602_v19 = vsel %vm1592_vm8, %v1599_v10, %v1601_v12  ;;  %v1605_v32 = vsel %vm1593_vm5, %v1587_v52, %v1604_v24  ;;  %v1222_v45 = vor.u32 4788187, %v1221_v31  ;;  %v7837_v3 = vshll.u32 %v12379_v0, %v7735_v56 }
 0x10d   : > { %v1606_v39 = vsel %vm1592_vm8, %v1603_v29, %v1605_v32  ;;  %v7831_v55 = vmul.u32.u64.low %v1607_v23, %v1602_v19  ;;  %v7832_v57 = vmul.u32.u64.high %v1607_v23, %v1602_v19, %v7831_v55  ;;  %v6492_v44 = vadd.s32 4294967169, %v1667_v46 }
 0x10e   : > { %v7839_v18 = vmul.u32.u64.low %v1607_v23, %v1606_v39  ;;  %v7840_v51 = vmul.u32.u64.high %v1607_v23, %v1606_v39, %v7839_v18  ;;  %v7844_v41 = vshrl.u32 %v12372_v40, %v7754_v11  ;;  %v1321_v10 = vshrl.u32 %v1303_v38, %v1319_v61 }
 0x10f   : > { %v1325_v52 = vshll.u32 %v1324_v50, 23  ;;  %v1598_v31 = vsel %vm1592_vm8, %v1595_v4, %v1597_v63  ;;  %v7849_v33 = vor.u32 %v7785_v25, %v7778_v48  ;;  %v6482_v15 = vadd.s32 4294967294, %v1419_v26 }
 0x110   : > { %v7851_v6 = vsub.s32 %v1515_v53, %v1518_v13  ;;  %v1673_v16 = vadd.s32 1, %v6492_v44  ;;  %v1223_v42 = vand.u32 2147483647, %v1222_v45  ;;  %v1225_v29 = vcvt.s32.f32 %v7806_v7 }
 0x111   : > { %v1320_v46 = vshll.u32 %v7661_v49, %v7790_v58  ;;  %v1617_v12 = vadd.s32 1, %v7832_v57  ;;  %v1614_v38 = vmul.u32 %v1607_v23, %v1598_v31  ;;  %vm1616_vm10 = vc.u32 %v7840_v51, %v7831_v55 }
 0x112   : > { %v12237_v61 = vand.u32 2147483647, %v7798_v14  ;;  %vm1674_vm11 = vcmp.gt.s32.totalorder %v1673_v16, 0  ;;  %v7862_v26 = vor.u32 4788187, %v1325_v52  ;;  %vm6483_vm12 = vcmp.lt.s32.totalorder %v6482_v15, 0 }
 0x113   : > { %v7860_v48 = vor.u32 %v1321_v10, %v1320_v46  ;;  %v1618_v25 = vsel %vm1616_vm10, %v1617_v12, %v7832_v57  ;;  %v1675_v53 = vsel %vm1674_vm11, %v1673_v16, 0  ;;  %v1521_v7 = vsub.s32 0, %v7851_v6 }
 0x114   : > { %v7866_v49 = vadd.s32 %v1618_v25, %v1614_v38  ;;  %v1677_v58 = vand.u32 31, %v1675_v53  ;;  %v7871_v23 = vsel %vm554_vm9, %v7731_v30, 920167782  ;;  %v12383_v37 = vor.u32 %v7727_v47, %v7719_v35 }
 0x115   : > { %12382 = vst [vmem:[#allocation33_spill] sm:$0xff] %v7871_v23  ;;  %v7881_v13 = vsub.s32 32, %v7733_v1  ;;  %vm762_vm13 = vcmp.lt.s32.totalorder %v7751_v62, 4  ;;  %v7891_v63 = vmul.f32 %v1225_v29, %v1223_v42  ;;  %v1407_v35 = vadd.s32 %v7640_v43, %v7664_v2 }
 0x116   : > { %v7878_v50 = vsel %vm554_vm9, %v12383_v37, 1326507024  ;;  %v7889_v4 = vsel %vm762_vm13, %v7849_v33, 920167782  ;;  %v7897_v32 = vsel %vm6483_vm12, 0, %v6482_v15  ;;  %v1678_v45 = vsub.s32 32, %v1677_v58 }
 0x117   : > { %12384 = vst [vmem:[#allocation34_spill] sm:$0xff] %v7878_v50  ;;  %v6485_v39 = vmin.u32 %v1521_v7, %v7851_v6  ;;  %v1620_v57 = vadd.s32 536870912, %v7866_v49  ;;  %v1670_v18 = vand.u32 8388607, %v12237_v61  ;;  %v1680_v44 = vshll.u32 %v12374_v34, %v1677_v58 }
 0x118   : > { %v1681_v10 = vshrl.u32 %v12375_v60, %v1678_v45  ;;  %v1683_v43 = vshll.u32 %v12375_v60, %v1677_v58  ;;  %v1684_v2 = vshrl.u32 %v12376_v5, %v1678_v45  ;;  %v1687_v52 = vshrl.u32 %v12378_v9, %v1678_v45 }
 0x119   : > { %v7908_v31 = vshrl.u32 %v1675_v53, 5  ;;  %v1686_v15 = vshll.u32 %v12376_v5, %v1677_v58  ;;  %v1689_v16 = vshll.u32 %v12378_v9, %v1677_v58  ;;  %v1690_v42 = vshrl.u32 %v12379_v0, %v1678_v45 }
 0x11a   : > { %v1423_v29 = vsub.s32 32, %v7897_v32  ;;  %v1427_v46 = vsub.s32 4294967266, %v7897_v32  ;;  %v1682_v12 = vor.u32 %v1681_v10, %v1680_v44  ;;  %v1685_v38 = vor.u32 %v1684_v2, %v1683_v43 }
 0x11b   : > { %v1671_v25 = vor.u32 8388608, %v1670_v18  ;;  %v1688_v7 = vor.u32 %v1687_v52, %v1686_v15  ;;  %v1691_v37 = vor.u32 %v1690_v42, %v1689_v16  ;;  %v12385_v61 = vand.u32 2147483647, %v7444_v36 }
 0x11c   : > { %v7919_v53 = vshrl.u32 %v1620_v57, 30  ;;  %v1692_v19 = vshll.u32 %v12379_v0, %v1677_v58  ;;  %v1693_v47 = vshrl.u32 %v12372_v40, %v1678_v45  ;;  %v640_v17 = vshll.u32 %v12374_v34, %v7733_v1 }
 0x11d   : > { %v7917_v24 = vand.u32 8388607, %v12385_v61  ;;  %v1523_v14 = vclz %v6485_v39  ;;  %vm1695_vm14 = vcmp.lt.s32.totalorder %v7908_v31, 1  ;;  %vm1698_vm15 = vcmp.lt.s32.totalorder %v7908_v31, 4 }
 0x11e   : > { %12386 = vst [vmem:[#allocation35_spill] sm:$0xff] %v7919_v53  ;;  %v641_v18 = vshrl.u32 %v12375_v60, %v7881_v13  ;;  %v1694_v44 = vor.u32 %v1693_v47, %v1692_v19  ;;  %vm1697_vm0 = vcmp.lt.s32.totalorder %v7908_v31, 3  ;;  %v1703_v61 = vsel %vm1695_vm14, %v1682_v12, %v1685_v38 }
 0x11f   : > { %v1704_v58 = vsel %vm1698_vm15, %v1691_v37, 920167782  ;;  %vm1696_vm1 = vcmp.lt.s32.totalorder %v7908_v31, 2  ;;  %v7937_v57 = vshll.u32 %v1671_v25, 8  ;;  %v643_v10 = vshll.u32 %v12375_v60, %v7733_v1 }
 0x120   : > { %v1705_v39 = vsel %vm1697_vm0, %v1688_v7, %v1704_v58  ;;  %v1622_v47 = vshll.u32 %v7919_v53, 30  ;;  %v1707_v43 = vsel %vm1695_vm14, %v1685_v38, %v1688_v7  ;;  %v1708_v2 = vsel %vm1698_vm15, %v1694_v44, 1326507024 }
 0x121   : > { %v1706_v19 = vsel %vm1696_vm1, %v1703_v61, %v1705_v39  ;;  %v6486_v52 = vadd.s32 4294967294, %v1523_v14  ;;  %v1709_v15 = vsel %vm1697_vm0, %v1691_v37, %v1708_v2  ;;  %v644_v16 = vshrl.u32 %v12376_v5, %v7881_v13 }
 0x122   : > { %v646_v42 = vshll.u32 %v12376_v5, %v7733_v1  ;;  %v1710_v25 = vsel %vm1696_vm1, %v1707_v43, %v1709_v15  ;;  %v7957_v61 = vmul.u32.u64.low %v7937_v57, %v1706_v19  ;;  %v7958_v58 = vmul.u32.u64.high %v7937_v57, %v1706_v19, %v7957_v61 }
 0x123   : > { %v647_v14 = vshrl.u32 %v12378_v9, %v7881_v13  ;;  %v1700_v37 = vsel %vm1698_vm15, %v1688_v7, 2102212464  ;;  %v7966_v44 = vmul.u32.u64.low %v7937_v57, %v1710_v25  ;;  %v7967_v39 = vmul.u32.u64.high %v7937_v57, %v1710_v25, %v7966_v44 }
 0x124   : > { %v649_v2 = vshll.u32 %v12378_v9, %v7733_v1  ;;  %v7972_v43 = vsub.s32 %v7866_v49, %v1622_v47  ;;  %v1679_v19 = vshrl.u32 %v12374_v34, %v1678_v45  ;;  %v650_v15 = vshrl.u32 %v12379_v0, %v7881_v13 }
 0x125   : > { %v653_v53 = vshrl.u32 %v12372_v40, %v7881_v13  ;;  %v1425_v23 = vshrl.u32 %v1407_v35, %v1423_v29  ;;  %v642_v7 = vor.u32 %v641_v18, %v640_v17  ;;  %v645_v30 = vor.u32 %v644_v16, %v643_v10 }
 0x126   : > { %v652_v25 = vshll.u32 %v12379_v0, %v7733_v1  ;;  %v1699_v44 = vsel %vm1695_vm14, %v1679_v19, %v1682_v12  ;;  %v1701_v49 = vsel %vm1697_vm0, %v1685_v38, %v1700_v37  ;;  %v648_v47 = vor.u32 %v647_v14, %v646_v42 }
 0x127   : > { %v651_v45 = vor.u32 %v650_v15, %v649_v2  ;;  %v7985_v50 = vadd.s32 127, %v1427_v46  ;;  %v631_v59 = vor.u32 8388608, %v7917_v24  ;;  %v639_v35 = vshrl.u32 %v12374_v34, %v7881_v13 }
 0x128   : > { %v654_v17 = vor.u32 %v653_v53, %v652_v25  ;;  %vm6487_vm2 = vcmp.lt.s32.totalorder %v6486_v52, 0  ;;  %v1625_v29 = vsub.s32 0, %v7972_v43  ;;  %v1721_v1 = vadd.s32 1, %v7958_v58 }
 0x129   : > { %vm655_vm3 = vcmp.lt.s32.totalorder %v7729_v28, 1  ;;  %v1702_v12 = vsel %vm1696_vm1, %v1699_v44, %v1701_v49  ;;  %vm1720_vm4 = vc.u32 %v7967_v39, %v7957_v61  ;;  %vm658_vm5 = vcmp.lt.s32.totalorder %v7729_v28, 4 }
 0x12a   : > { %v663_v24 = vsel %vm655_vm3, %v642_v7, %v645_v30  ;;  %vm657_vm8 = vcmp.lt.s32.totalorder %v7729_v28, 3  ;;  %v660_v13 = vsel %vm658_vm5, %v648_v47, 2102212464  ;;  %v664_v46 = vsel %vm658_vm5, %v651_v45, 920167782 }
 0x12b   : > { %v667_v38 = vsel %vm655_vm3, %v645_v30, %v648_v47  ;;  %v8003_v53 = vsel %vm6487_vm2, 0, %v6486_v52  ;;  %vm656_vm10 = vcmp.lt.s32.totalorder %v7729_v28, 2  ;;  %v665_v31 = vsel %vm657_vm8, %v648_v47, %v664_v46 }
 0x12c   : > { %v668_v18 = vsel %vm658_vm5, %v654_v17, 1326507024  ;;  %v1722_v10 = vsel %vm1720_vm4, %v1721_v1, %v7958_v58  ;;  %v666_v16 = vsel %vm656_vm10, %v663_v24, %v665_v31  ;;  %v671_v14 = vshll.u32 %v631_v59, 8 }
 0x12d   : > { %v669_v42 = vsel %vm657_vm8, %v651_v45, %v668_v18  ;;  %v1718_v37 = vmul.u32 %v7937_v57, %v1702_v12  ;;  %v659_v2 = vsel %vm655_vm3, %v639_v35, %v642_v7  ;;  %v661_v19 = vsel %vm657_vm8, %v645_v30, %v660_v13 }
 0x12e   : > { %v670_v52 = vsel %vm656_vm10, %v667_v38, %v669_v42  ;;  %v1531_v15 = vsub.s32 4294967266, %v8003_v53  ;;  %v6489_v25 = vmin.u32 %v1625_v29, %v7972_v43  ;;  %v1424_v49 = vshll.u32 %v7764_v54, %v7897_v32 }
 0x12f   : > { %v8016_v44 = vmul.u32.u64.low %v671_v14, %v670_v52  ;;  %v8017_v58 = vmul.u32.u64.high %v671_v14, %v670_v52, %v8016_v44  ;;  %v8021_v59 = vadd.s32 %v1722_v10, %v1718_v37  ;;  %v1227_v30 = vxor.u32 2147483648, %v7891_v63 }
 0x130   : > { %v8023_v57 = vmul.u32.u64.low %v671_v14, %v666_v16  ;;  %v8024_v47 = vmul.u32.u64.high %v671_v14, %v666_v16, %v8023_v57  ;;  %v12387_v7 = vand.u32 2147483647, %v7862_v26  ;;  %v12388_v45 = vcvt.s32.f32 %v7860_v48 }
 0x131   : > { %v662_v17 = vsel %vm656_vm10, %v659_v2, %v661_v19  ;;  %v935_v29 = vand.u32 2147483647, %v7437_v22  ;;  %v8037_v54 = vor.u32 %v1425_v23, %v1424_v49  ;;  %v1429_v32 = vshll.u32 %v7985_v50, 23 }
 0x132   : > { %v8032_v35 = vmul.f32 %v12388_v45, %v12387_v7  ;;  %v1511_v1 = vadd.s32 %v7768_v21, %v7781_v8  ;;  %v1527_v12 = vsub.s32 32, %v8003_v53  ;;  %v1532_v24 = vadd.s32 127, %v1531_v15  ;;  %v12389_v45 = vld [vmem:[#allocation6_spill] sm:$0xff] }
 0x133   : > { %v1627_v26 = vclz %v6489_v25  ;;  %vm680_vm11 = vc.u32 %v8017_v58, %v8023_v57  ;;  %v953_v28 = vshrl.u32 %v12375_v60, %v7569_v27  ;;  %v1724_v48 = vadd.s32 536870912, %v8021_v59 }
 0x134   : > { %v678_v13 = vmul.u32 %v671_v14, %v662_v17  ;;  %v681_v23 = vadd.s32 1, %v8024_v47  ;;  %v952_v50 = vshll.u32 %v12374_v34, %v7482_v20  ;;  %v942_v21 = vand.u32 8388607, %v935_v29 }
 0x135   : > { %v955_v8 = vshll.u32 %v12375_v60, %v7482_v20  ;;  %v956_v46 = vshrl.u32 %v12376_v5, %v7569_v27  ;;  %v959_v38 = vshrl.u32 %v12378_v9, %v7569_v27  ;;  %v958_v18 = vshll.u32 %v12376_v5, %v7482_v20 }
 0x136   : > { %v682_v31 = vsel %vm680_vm11, %v681_v23, %v8024_v47  ;;  %v961_v10 = vshll.u32 %v12378_v9, %v7482_v20  ;;  %v962_v16 = vshrl.u32 %v12379_v0, %v7569_v27  ;;  %v6490_v42 = vadd.s32 4294967294, %v1627_v26 }
 0x137   : > { %v683_v14 = vadd.s32 %v682_v31, %v678_v13  ;;  %v954_v37 = vor.u32 %v953_v28, %v952_v50  ;;  %v957_v2 = vor.u32 %v956_v46, %v955_v8  ;;  %v960_v19 = vor.u32 %v959_v38, %v958_v18  ;;  %v12390_v13 = vld [vmem:[#allocation11_spill] sm:$0xff] }
 0x138   : > { %v963_v52 = vor.u32 %v962_v16, %v961_v10  ;;  %v964_v15 = vshll.u32 %v12379_v0, %v7482_v20  ;;  %v965_v25 = vshrl.u32 %v12372_v40, %v7569_v27  ;;  %v1430_v44 = vor.u32 4788187, %v1429_v32 }
 0x139   : > { %v1529_v49 = vshrl.u32 %v1511_v1, %v1527_v12  ;;  %v8070_v47 = vshrl.u32 %v1724_v48, 30  ;;  %v684_v7 = vadd.s32 536870912, %v683_v14  ;;  %vm1145_vm12 = vcmp.lt.s32.totalorder %v12389_v45, 0 }
 0x13a   : > { %v943_v17 = vor.u32 8388608, %v942_v21  ;;  %v966_v26 = vor.u32 %v965_v25, %v964_v15  ;;  %vm967_vm14 = vcmp.lt.s32.totalorder %v12390_v13, 1  ;;  %vm970_vm15 = vcmp.lt.s32.totalorder %v12390_v13, 4 }
 0x13b   : > { %v8075_v28 = vshrl.u32 %v684_v7, 30  ;;  %vm969_vm0 = vcmp.lt.s32.totalorder %v12390_v13, 3  ;;  %v975_v20 = vsel %vm967_vm14, %v954_v37, %v957_v2  ;;  %v976_v32 = vsel %vm970_vm15, %v963_v52, 920167782 }
 0x13c   : > { %v1533_v1 = vshll.u32 %v1532_v24, 23  ;;  %vm6491_vm1 = vcmp.lt.s32.totalorder %v6490_v42, 0  ;;  %v977_v12 = vsel %vm969_vm0, %v960_v19, %v976_v32  ;;  %v980_v48 = vsel %vm970_vm15, %v966_v26, 1326507024 }
 0x13d   : > { %v1726_v23 = vshll.u32 %v8070_v47, 30  ;;  %v686_v50 = vshll.u32 %v8075_v28, 30  ;;  %vm968_vm2 = vcmp.lt.s32.totalorder %v12390_v13, 2  ;;  %v979_v21 = vsel %vm967_vm14, %v957_v2, %v960_v19 }
 0x13e   : > { %v972_v8 = vsel %vm970_vm15, %v960_v19, 2102212464  ;;  %v978_v46 = vsel %vm968_vm2, %v975_v20, %v977_v12  ;;  %v981_v24 = vsel %vm969_vm0, %v963_v52, %v980_v48  ;;  %v983_v38 = vshll.u32 %v943_v17, 8 }
 0x13f   : > { %v1431_v31 = vand.u32 2147483647, %v1430_v44  ;;  %v1528_v18 = vshll.u32 %v7851_v6, %v8003_v53  ;;  %v8093_v10 = vsub.s32 %v683_v14, %v686_v50  ;;  %v951_v16 = vshrl.u32 %v12374_v34, %v7569_v27  ;;  %v12392_v50 = vld [vmem:[#allocation5_spill] sm:$0xff] }
 0x140   : > { %v8097_v15 = vsel %vm6491_vm1, 0, %v6490_v42  ;;  %v982_v19 = vsel %vm968_vm2, %v979_v21, %v981_v24  ;;  %v8101_v25 = vmul.u32.u64.low %v983_v38, %v978_v46  ;;  %v8102_v7 = vmul.u32.u64.high %v983_v38, %v978_v46, %v8101_v25 }
 0x141   : > { %v8106_v52 = vsub.s32 %v8021_v59, %v1726_v23  ;;  %v689_v44 = vsub.s32 0, %v8093_v10  ;;  %v971_v6 = vsel %vm967_vm14, %v951_v16, %v954_v37  ;;  %v973_v27 = vsel %vm969_vm0, %v957_v2, %v972_v8 }
 0x142   : > { %v8113_v53 = vor.u32 %v1529_v49, %v1528_v18  ;;  %v8115_v42 = vor.u32 4788187, %v1533_v1  ;;  %v8117_v14 = vmul.u32.u64.low %v983_v38, %v982_v19  ;;  %v8118_v17 = vmul.u32.u64.high %v983_v38, %v982_v19, %v8117_v14 }
 0x143   : > { %v12391_v26 = vor.u32 %v7844_v41, %v7837_v3  ;;  %v8132_v37 = vsel %vm1145_vm12, %v1227_v30, %v7891_v63  ;;  %v1433_v2 = vcvt.s32.f32 %v8037_v54  ;;  %v6453_v49 = vmin.u32 %v689_v44, %v8093_v10 }
 0x144   : > { %v1631_v20 = vsub.s32 32, %v8097_v15  ;;  %v1635_v32 = vsub.s32 4294967266, %v8097_v15  ;;  %v974_v3 = vsel %vm968_vm2, %v971_v6, %v973_v27  ;;  %v993_v41 = vadd.s32 1, %v8102_v7 }
 0x145   : > { %v8125_v59 = vsel %vm762_vm13, %v12391_v26, 1326507024  ;;  %v1331_v1 = vxor.u32 2147483648, %v8032_v35  ;;  %v8142_v12 = vmul.f32 %v1433_v2, %v1431_v31  ;;  %v1729_v63 = vsub.s32 0, %v8106_v52 }
 0x146   : > { %v691_v30 = vclz %v6453_v49  ;;  %v1535_v54 = vand.u32 2147483647, %v8115_v42  ;;  %v1537_v48 = vcvt.s32.f32 %v8113_v53  ;;  %v1615_v23 = vadd.s32 %v7831_v55, %v7840_v51 }
 0x147   : > { %v727_v21 = vand.u32 2147483647, %v12392_v50  ;;  %v1632_v13 = vshll.u32 %v7972_v43, %v8097_v15  ;;  %v990_v46 = vmul.u32 %v983_v38, %v974_v3  ;;  %vm992_vm3 = vc.u32 %v8118_v17, %v8101_v25 }
 0x148   : > { %v6454_v8 = vadd.s32 4294967294, %v691_v30  ;;  %v8154_v24 = vshrl.u32 %v1615_v23, %v1631_v20  ;;  %v8156_v31 = vadd.s32 127, %v1635_v32  ;;  %v994_v18 = vsel %vm992_vm3, %v993_v41, %v8102_v7 }
 0x149   : > { %v745_v16 = vshrl.u32 %v12375_v60, %v7754_v11  ;;  %v6493_v55 = vmin.u32 %v1729_v63, %v8106_v52  ;;  %v995_v51 = vadd.s32 %v994_v18, %v990_v46  ;;  %v744_v19 = vshll.u32 %v12374_v34, %v7735_v56 }
 0x14a   : > { %vm6455_vm4 = vcmp.lt.s32.totalorder %v6454_v8, 0  ;;  %v734_v44 = vand.u32 8388607, %v727_v21  ;;  %v747_v6 = vshll.u32 %v12375_v60, %v7735_v56  ;;  %v748_v7 = vshrl.u32 %v12376_v5, %v7754_v11 }
 0x14b   : > { %v694_v38 = vsel %vm6455_vm4, 0, %v6454_v8  ;;  %vm625_vm5 = vcmp.lt.s32.totalorder %v7444_v36, 0  ;;  %v679_v27 = vadd.s32 %v8023_v57, %v8017_v58  ;;  %v746_v2 = vor.u32 %v745_v16, %v744_v19 }
 0x14c   : > { %v695_v14 = vsub.s32 32, %v694_v38  ;;  %v699_v26 = vsub.s32 4294967266, %v694_v38  ;;  %v996_v49 = vadd.s32 536870912, %v995_v51  ;;  %v749_v20 = vor.u32 %v748_v7, %v747_v6 }
 0x14d   : > { %v750_v32 = vshll.u32 %v12376_v5, %v7735_v56  ;;  %v751_v3 = vshrl.u32 %v12378_v9, %v7754_v11  ;;  %v1731_v41 = vclz %v6493_v55  ;;  %v696_v63 = vshll.u32 %v8093_v10, %v694_v38 }
 0x14e   : > { %v697_v30 = vshrl.u32 %v679_v27, %v695_v14  ;;  %v700_v23 = vadd.s32 127, %v699_v26  ;;  %v1637_v8 = vshll.u32 %v8156_v31, 23  ;;  %v12393_v58 = vand.u32 2147483647, %v7444_v36 }
 0x14f   : > { %v8185_v46 = vshrl.u32 %v996_v49, 30  ;;  %v735_v18 = vor.u32 8388608, %v734_v44  ;;  %v752_v56 = vor.u32 %v751_v3, %v750_v32  ;;  %vm759_vm10 = vcmp.lt.s32.totalorder %v7751_v62, 1 }
 0x150   : > { %vm8181_vm8 = vcmp.le.f32.partialorder %v12393_v58, 0.7853982  ;;  %v698_v16 = vor.u32 %v697_v30, %v696_v63  ;;  %v701_v19 = vshll.u32 %v700_v23, 23  ;;  %vm761_vm11 = vcmp.lt.s32.totalorder %v7751_v62, 3 }
 0x151   : > { %v709_v10 = vsub.s32 4, %v8075_v28  ;;  %v998_v31 = vshll.u32 %v8185_v46, 30  ;;  %v767_v55 = vsel %vm759_vm10, %v746_v2, %v749_v20  ;;  %v769_v38 = vsel %vm761_vm11, %v752_v56, %v7889_v4 }
 0x152   : > { %v6494_v6 = vadd.s32 4294967294, %v1731_v41  ;;  %v702_v44 = vor.u32 4788187, %v701_v19  ;;  %v743_v7 = vshrl.u32 %v12374_v34, %v7754_v11  ;;  %vm760_vm14 = vcmp.lt.s32.totalorder %v7751_v62, 2 }
 0x153   : > { %v705_v27 = vcvt.s32.f32 %v698_v16  ;;  %v8199_v14 = vsub.s32 %v995_v51, %v998_v31  ;;  %v764_v26 = vsel %vm762_vm13, %v752_v56, 2102212464  ;;  %v771_v49 = vsel %vm759_vm10, %v749_v20, %v752_v56 }
 0x154   : > { %v703_v32 = vand.u32 2147483647, %v702_v44  ;;  %v770_v4 = vsel %vm760_vm14, %v767_v55, %v769_v38  ;;  %v773_v11 = vsel %vm761_vm11, %v7849_v33, %v8125_v59  ;;  %v775_v3 = vshll.u32 %v735_v18, 8  ;;  %v12396_v38 = vld [vmem:[#allocation4_spill] sm:$0xff] }
 0x155   : > { %v710_v51 = vsel %vm625_vm5, %v709_v10, %v8075_v28  ;;  %v1001_v41 = vsub.s32 0, %v8199_v14  ;;  %v763_v63 = vsel %vm759_vm10, %v743_v7, %v746_v2  ;;  %v774_v30 = vsel %vm760_vm14, %v771_v49, %v773_v11  ;;  %v12398_v49 = vld [vmem:[#allocation14_spill] sm:$0xff] }
 0x156   : > { %v706_v23 = vmul.f32 %v705_v27, %v703_v32  ;;  %v765_v58 = vsel %vm761_vm11, %v749_v20, %v764_v26  ;;  %v8221_v56 = vmul.u32.u64.low %v775_v3, %v774_v30  ;;  %v8222_v16 = vmul.u32.u64.high %v775_v3, %v774_v30, %v8221_v56 }
 0x157   : > { %vm6495_vm13 = vcmp.lt.s32.totalorder %v6494_v6, 0  ;;  %v6465_v33 = vmin.u32 %v1001_v41, %v8199_v14  ;;  %v8225_v59 = vmul.u32.u64.low %v775_v3, %v770_v4  ;;  %v8226_v28 = vmul.u32.u64.high %v775_v3, %v770_v4, %v8225_v59 }
 0x158   : > { %v1435_v18 = vxor.u32 2147483648, %v8142_v12  ;;  %v8234_v2 = vmul.f32 %v1537_v48, %v1535_v54  ;;  %v707_v19 = vxor.u32 2147483648, %v706_v23  ;;  %v712_v20 = vsel %vm8181_vm8, 0, %v710_v51 }
 0x159   : > { %v8242_v10 = vor.u32 %v8154_v24, %v1632_v13  ;;  %v1003_v31 = vclz %v6465_v33  ;;  %v766_v55 = vsel %vm760_vm14, %v763_v63, %v765_v58  ;;  %v1039_v42 = vand.u32 2147483647, %v12396_v38 }
 0x15a   : > { %v8247_v44 = vor.u32 4788187, %v1637_v8  ;;  %v8249_v53 = vsel %vm6495_vm13, 0, %v6494_v6  ;;  %v708_v54 = vsel %vm625_vm5, %v707_v19, %v706_v23  ;;  %vm784_vm15 = vc.u32 %v8222_v16, %v8225_v59  ;;  %v12397_v8 = vld [vmem:[#allocation16_spill] sm:$0xff] }
 0x15b   : > { %v711_v43 = vsel %vm8181_vm8, %v7444_v36, %v708_v54  ;;  %v716_v15 = vadd.s32 3, %v712_v20  ;;  %v6466_v48 = vadd.s32 4294967294, %v1003_v31  ;;  %v785_v62 = vadd.s32 1, %v8226_v28 }
 0x15c   : > { %7070 = vcosq.f32 %v711_v43  ;;  %vm937_vm0 = vcmp.lt.s32.totalorder %v7437_v22, 0  ;;  %v991_v13 = vadd.s32 %v8101_v25, %v8118_v17  ;;  %v782_v24 = vmul.u32 %v775_v3, %v766_v55 }
 0x15d   : > { %v1057_v6 = vshrl.u32 %v12375_v60, %v12397_v8  ;;  %7072 = vsinq.f32 %v711_v43  ;;  %vm6467_vm1 = vcmp.lt.s32.totalorder %v6466_v48, 0  ;;  %v786_v7 = vsel %vm784_vm15, %v785_v62, %v8226_v28 }
 0x15e   : > { %v1046_v57 = vand.u32 8388607, %v1039_v42  ;;  %v1006_v27 = vsel %vm6467_vm1, 0, %v6466_v48  ;;  %v787_v26 = vadd.s32 %v786_v7, %v782_v24  ;;  %v1056_v32 = vshll.u32 %v12374_v34, %v12398_v49  ;;  %v12401_v48 = vld [vmem:[#allocation12_spill] sm:$0xff] }
 0x15f   : > { %v1060_v4 = vshrl.u32 %v12376_v5, %v12397_v8  ;;  %v1007_v25 = vsub.s32 32, %v1006_v27  ;;  %v1011_v17 = vsub.s32 4294967266, %v1006_v27  ;;  %v1021_v11 = vsub.s32 4, %v8185_v46 }
 0x160   : > { %v1059_v3 = vshll.u32 %v12375_v60, %v12398_v49  ;;  %v788_v51 = vadd.s32 536870912, %v787_v26  ;;  %v1058_v41 = vor.u32 %v1057_v6, %v1056_v32  ;;  %v1062_v63 = vshll.u32 %v12376_v5, %v12398_v49 }
 0x161   : > { %v1063_v30 = vshrl.u32 %v12378_v9, %v12397_v8  ;;  %v1008_v23 = vshll.u32 %v8199_v14, %v1006_v27  ;;  %v1009_v58 = vshrl.u32 %v991_v13, %v1007_v25  ;;  %v1012_v56 = vadd.s32 127, %v1011_v17  ;;  %v12402_v13 = vld [vmem:[#allocation28_spill] sm:$0xff]  ;;  %v12404_v27 = vld [vmem:[#allocation27_spill] sm:$0xff] }
 0x162   : > { %v1061_v33 = vor.u32 %v1060_v4, %v1059_v3  ;;  %vm8281_vm2 = vcmp.le.f32.partialorder %v935_v29, 0.7853982  ;;  %v8285_v19 = vshrl.u32 %v788_v51, 30  ;;  %v1047_v20 = vor.u32 8388608, %v1046_v57  ;;  %v12403_v29 = vld [vmem:[#allocation24_spill] sm:$0xff] }
 0x163   : > { %v1064_v31 = vor.u32 %v1063_v30, %v1062_v63  ;;  %v1739_v55 = vsub.s32 4294967266, %v8249_v53  ;;  %v1010_v54 = vor.u32 %v1009_v58, %v1008_v23  ;;  %v1013_v43 = vshll.u32 %v1012_v56, 23 }
 0x164   : > { %vm1073_vm3 = vcmp.lt.s32.totalorder %v12401_v48, 3  ;;  %v717_v14 = vand.u32 3, %v716_v15  ;;  %v790_v62 = vshll.u32 %v8285_v19, 30  ;;  %vm1071_vm4 = vcmp.lt.s32.totalorder %v12401_v48, 1 }
 0x165   : > { %v1085_v24 = vsel %vm1073_vm3, %v12403_v29, %v12402_v13  ;;  %v1014_v6 = vor.u32 4788187, %v1013_v43  ;;  %v1022_v7 = vsel %vm937_vm0, %v1021_v11, %v8185_v46  ;;  %v1079_v57 = vsel %vm1071_vm4, %v1058_v41, %v1061_v33 }
 0x166   : > { %v1081_v15 = vsel %vm1073_vm3, %v1064_v31, %v12404_v27  ;;  %v7071_v49 = vpop.eup %7070  ;;  %v8303_v32 = vsub.s32 %v787_v26, %v790_v62  ;;  %vm1072_vm5 = vcmp.lt.s32.totalorder %v12401_v48, 2  ;;  %v1083_v4 = vsel %vm1071_vm4, %v1061_v33, %v1064_v31 }
 0x167   : > { %v1087_v25 = vshll.u32 %v1047_v20, 8  ;;  %v7073_v17 = vpop.eup %7072  ;;  %v1015_v3 = vand.u32 2147483647, %v1014_v6  ;;  %v1017_v51 = vcvt.s32.f32 %v1010_v54  ;;  %v1076_v46 = vsel %vm1074_vm7, %v1064_v31, 2102212464 }
 0x168   : > { %v1086_v11 = vsel %vm1072_vm5, %v1083_v4, %v1085_v24  ;;  %v1024_v63 = vsel %vm8281_vm2, 0, %v1022_v7  ;;  %v793_v26 = vsub.s32 0, %v8303_v32  ;;  %v1055_v30 = vshrl.u32 %v12374_v34, %v12397_v8 }
 0x169   : > { %v1082_v23 = vsel %vm1072_vm5, %v1079_v57, %v1081_v15  ;;  %v723_v58 = vxor.u32 2147483648, %v7071_v49  ;;  %v1018_v56 = vmul.f32 %v1017_v51, %v1015_v3  ;;  %v720_v31 = vxor.u32 2147483648, %v7073_v17 }
 0x16a   : > { %v8319_v20 = vmul.u32.u64.low %v1087_v25, %v1086_v11  ;;  %v8320_v54 = vmul.u32.u64.high %v1087_v25, %v1086_v11, %v8319_v20  ;;  %v6457_v43 = vmin.u32 %v793_v26, %v8303_v32  ;;  %v1075_v62 = vsel %vm1071_vm4, %v1055_v30, %v1058_v41 }
 0x16b   : > { %v1077_v13 = vsel %vm1073_vm3, %v1061_v33, %v1076_v46  ;;  %v1019_v29 = vxor.u32 2147483648, %v1018_v56  ;;  %v1028_v24 = vadd.s32 3, %v1024_v63  ;;  %v1639_v7 = vand.u32 2147483647, %v8247_v44  ;;  %v12405_v63 = vld [vmem:[#allocation3_spill] sm:$0xff] }
 0x16c   : > { %v8327_v8 = vmul.u32.u64.low %v1087_v25, %v1082_v23  ;;  %v8328_v6 = vmul.u32.u64.high %v1087_v25, %v1082_v23, %v8327_v8  ;;  %v8332_v57 = vadd.s32 127, %v1739_v55  ;;  %vm722_vm7 = vcmp.eq.s32.totalorder %v717_v14, 2 }
 0x16d   : > { %v795_v27 = vclz %v6457_v43  ;;  %vm719_vm8 = vcmp.eq.s32.totalorder %v717_v14, 0  ;;  %v724_v15 = vsel %vm722_vm7, %v723_v58, %v7073_v17  ;;  %v1020_v41 = vsel %vm937_vm0, %v1019_v29, %v1018_v56  ;;  %v12406_v58 = vld [vmem:[#allocation22_spill] sm:$0xff] }
 0x16e   : > { %v1078_v33 = vsel %vm1072_vm5, %v1075_v62, %v1077_v13  ;;  %vm715_vm10 = vweird.f32 %v7444_v36  ;;  %v721_v4 = vsel %vm719_vm8, %v7071_v49, %v720_v31  ;;  %v1023_v3 = vsel %vm8281_vm2, %v7437_v22, %v1020_v41  ;;  %v12407_v31 = vld [vmem:[#allocation19_spill] sm:$0xff]  ;;  %v12409_v36 = vld [vmem:[#allocation34_spill] sm:$0xff] }
 0x16f   : > { %v6458_v51 = vadd.s32 4294967294, %v795_v27  ;;  %vm1096_vm11 = vc.u32 %v8320_v54, %v8327_v8  ;;  %vm718_vm14 = vcmp.lt.s32.totalorder %v717_v14, 2  ;;  %7074 = vcosq.f32 %v1023_v3 }
 0x170   : > { %v8344_v55 = vand.u32 3, %v1028_v24  ;;  %v1097_v17 = vadd.s32 1, %v8328_v6  ;;  %7076 = vsinq.f32 %v1023_v3  ;;  %v783_v48 = vadd.s32 %v8225_v59, %v8222_v16 }
 0x171   : > { %vm6459_vm13 = vcmp.lt.s32.totalorder %v6458_v51, 0  ;;  %v1094_v49 = vmul.u32 %v1087_v25, %v1078_v33  ;;  %v725_v46 = vsel %vm718_vm14, %v721_v4, %v724_v15  ;;  %v519_v26 = vand.u32 2147483647, %v12405_v63 }
 0x172   : > { %v798_v11 = vsel %vm6459_vm13, 0, %v6458_v51  ;;  %v1098_v28 = vsel %vm1096_vm11, %v1097_v17, %v8328_v6  ;;  %v537_v56 = vshrl.u32 %v12375_v60, %v12406_v58  ;;  %v539_v43 = vshll.u32 %v12375_v60, %v12407_v31 }
 0x173   : > { %v799_v30 = vsub.s32 32, %v798_v11  ;;  %v803_v23 = vsub.s32 4294967266, %v798_v11  ;;  %v1099_v14 = vadd.s32 %v1098_v28, %v1094_v49  ;;  %v800_v20 = vshll.u32 %v8303_v32, %v798_v11  ;;  %v12408_v11 = vld [vmem:[#allocation21_spill] sm:$0xff] }
 0x174   : > { %v540_v16 = vshrl.u32 %v12376_v5, %v12406_v58  ;;  %v542_v59 = vshll.u32 %v12376_v5, %v12407_v31  ;;  %v543_v29 = vshrl.u32 %v12378_v9, %v12406_v58  ;;  %vm1030_vm15 = vcmp.lt.s32.totalorder %v8344_v55, 2 }
 0x175   : > { %v801_v25 = vshrl.u32 %v783_v48, %v799_v30  ;;  %v804_v62 = vadd.s32 127, %v803_v23  ;;  %v1100_v13 = vadd.s32 536870912, %v1099_v14  ;;  %vm1031_vm0 = vcmp.eq.s32.totalorder %v8344_v55, 0 }
 0x176   : > { %v526_v32 = vand.u32 8388607, %v519_v26  ;;  %v536_v24 = vshll.u32 %v12374_v34, %v12407_v31  ;;  %v541_v6 = vor.u32 %v540_v16, %v539_v43  ;;  %vm1027_vm1 = vweird.f32 %v7437_v22 }
 0x177   : > { %v802_v27 = vor.u32 %v801_v25, %v800_v20  ;;  %v805_v15 = vshll.u32 %v804_v62, 23  ;;  %v8369_v41 = vshrl.u32 %v1100_v13, 30  ;;  %v544_v33 = vor.u32 %v543_v29, %v542_v59 }
 0x178   : > { %v726_v4 = vsel %vm715_vm10, nan, %v725_v46  ;;  %vm1034_vm2 = vcmp.eq.s32.totalorder %v8344_v55, 2  ;;  %v813_v3 = vsub.s32 4, %v8285_v19  ;;  %v538_v51 = vor.u32 %v537_v56, %v536_v24  ;;  %v12410_v46 = vld [vmem:[#allocation29_spill] sm:$0xff] }
 0x179   : > { %v806_v17 = vor.u32 4788187, %v805_v15  ;;  %v1102_v48 = vshll.u32 %v8369_v41, 30  ;;  %v535_v49 = vshrl.u32 %v12374_v34, %v12406_v58  ;;  %vm553_vm3 = vcmp.lt.s32.totalorder %v12408_v11, 3  ;;  %v7075_v28 = vpop.eup %7074 }
 0x17a   : > { %v809_v30 = vcvt.s32.f32 %v802_v27  ;;  %v527_v23 = vor.u32 8388608, %v526_v32  ;;  %vm551_vm4 = vcmp.lt.s32.totalorder %v12408_v11, 1  ;;  %v565_v20 = vsel %vm553_vm3, %v12410_v46, %v12409_v36  ;;  %v7077_v31 = vpop.eup %7076 }
 0x17b   : > { %v1035_v56 = vxor.u32 2147483648, %v7075_v28  ;;  %v807_v43 = vand.u32 2147483647, %v806_v17  ;;  %v8384_v16 = vsub.s32 %v1099_v14, %v1102_v48  ;;  %v563_v58 = vsel %vm551_vm4, %v541_v6, %v544_v33  ;;  %v12411_v14 = vld [vmem:[#allocation33_spill] sm:$0xff] }
 0x17c   : > { %v1032_v59 = vxor.u32 2147483648, %v7077_v31  ;;  %vm552_vm5 = vcmp.lt.s32.totalorder %v12408_v11, 2  ;;  %v556_v25 = vsel %vm554_vm9, %v544_v33, 2102212464  ;;  %v559_v62 = vsel %vm551_vm4, %v538_v51, %v541_v6 }
 0x17d   : > { %v1036_v13 = vsel %vm1034_vm2, %v1035_v56, %v7077_v31  ;;  %v810_v29 = vmul.f32 %v809_v30, %v807_v43  ;;  %v1105_v32 = vsub.s32 0, %v8384_v16  ;;  %v561_v24 = vsel %vm553_vm3, %v544_v33, %v12411_v14  ;;  %v12412_v43 = vld [vmem:[#allocation2_spill] sm:$0xff] }
 0x17e   : > { %v1033_v27 = vsel %vm1031_vm0, %v7075_v28, %v1032_v59  ;;  %v555_v15 = vsel %vm551_vm4, %v535_v49, %v538_v51  ;;  %v566_v17 = vsel %vm552_vm5, %v563_v58, %v565_v20  ;;  %v567_v48 = vshll.u32 %v527_v23, 8 }
 0x17f   : > { %v1037_v36 = vsel %vm1030_vm15, %v1033_v27, %v1036_v13  ;;  %v811_v30 = vxor.u32 2147483648, %v810_v29  ;;  %v6469_v46 = vmin.u32 %v1105_v32, %v8384_v16  ;;  %v557_v31 = vsel %vm553_vm3, %v541_v6, %v556_v25 }
 0x180   : > { %v1038_v33 = vsel %vm1027_vm1, nan, %v1037_v36  ;;  %v562_v28 = vsel %vm552_vm5, %v559_v62, %v561_v24  ;;  %v8414_v51 = vmul.u32.u64.low %v567_v48, %v566_v17  ;;  %v8415_v49 = vmul.u32.u64.high %v567_v48, %v566_v17, %v8414_v51  ;;  %v12416_v24 = vld [vmem:[#allocation9_spill] sm:$0xff] }
 0x181   : > { %v1641_v23 = vcvt.s32.f32 %v8242_v10  ;;  %v6772_v20 = vpack.c.bf16 %v1038_v33, %v726_v4  ;;  %vm729_vm9 = vcmp.lt.s32.totalorder %v12392_v50, 0  ;;  %v1107_v55 = vclz %v6469_v46 }
 0x182   : > { %v8421_v56 = vadd.s32 %v7957_v61, %v7967_v39  ;;  %v812_v6 = vsel %vm729_vm9, %v811_v30, %v810_v29  ;;  %v558_v22 = vsel %vm552_vm5, %v555_v15, %v557_v31  ;;  %v831_v58 = vand.u32 2147483647, %v12412_v43 }
 0x183   : > { %v8428_v59 = vmul.f32 %v1641_v23, %v1639_v7  ;;  %6773 = vmatprep.subr.bf16.mxu0 %v6772_v20  ;;  %v6470_v10 = vadd.s32 4294967294, %v1107_v55  ;;  %v8430_v4 = vmul.u32.u64.low %v567_v48, %v562_v28  ;;  %v8431_v25 = vmul.u32.u64.high %v567_v48, %v562_v28, %v8430_v4 }
 0x184   : > { %v1735_v62 = vsub.s32 32, %v8249_v53  ;;  %v1741_v61 = vshll.u32 %v8332_v57, 23  ;;  %vm8438_vm7 = vcmp.le.f32.partialorder %v727_v21, 0.7853982  ;;  %v814_v44 = vsel %vm729_vm9, %v813_v3, %v8285_v19  ;;  %v12415_v57 = vld [vmem:[#allocation13_spill] sm:$0xff] }
 0x185   : > { %v815_v7 = vsel %vm8438_vm7, %v12392_v50, %v812_v6  ;;  %v1095_v11 = vadd.s32 %v8327_v8, %v8320_v54  ;;  %vm6471_vm8 = vcmp.lt.s32.totalorder %v6470_v10, 0  ;;  %v574_v13 = vmul.u32 %v567_v48, %v558_v22 }
 0x186   : > { %v1110_v29 = vsel %vm6471_vm8, 0, %v6470_v10  ;;  %vm576_vm10 = vc.u32 %v8415_v49, %v8430_v4  ;;  %v838_v21 = vand.u32 8388607, %v831_v58  ;;  %v849_v32 = vshrl.u32 %v12375_v60, %v12415_v57 }
 0x187   : > { %v1111_v19 = vsub.s32 32, %v1110_v29  ;;  %v1115_v3 = vsub.s32 4294967266, %v1110_v29  ;;  %v577_v14 = vadd.s32 1, %v8431_v25  ;;  %v848_v27 = vshll.u32 %v12374_v34, %v12416_v24 }
 0x188   : > { %v851_v54 = vshll.u32 %v12375_v60, %v12416_v24  ;;  %v852_v8 = vshrl.u32 %v12376_v5, %v12415_v57  ;;  %v854_v15 = vshll.u32 %v12376_v5, %v12416_v24  ;;  %v855_v17 = vshrl.u32 %v12378_v9, %v12415_v57  ;;  %v12421_v24 = vld [vmem:[#allocation7_spill] sm:$0xff] }
 0x189   : > { %v1112_v48 = vshll.u32 %v8384_v16, %v1110_v29  ;;  %v1113_v36 = vshrl.u32 %v1095_v11, %v1111_v19  ;;  %v1116_v30 = vadd.s32 127, %v1115_v3  ;;  %v578_v46 = vsel %vm576_vm10, %v577_v14, %v8431_v25  ;;  %v12417_v11 = vld [vmem:[#allocation10_spill] sm:$0xff]  ;;  %v12418_v29 = vld [vmem:[#allocation25_spill] sm:$0xff]  ;;  %v12420_v19 = vld [vmem:[#allocation20_spill] sm:$0xff] }
 0x18a   : > { %v579_v31 = vadd.s32 %v578_v46, %v574_v13  ;;  %v850_v33 = vor.u32 %v849_v32, %v848_v27  ;;  %v853_v28 = vor.u32 %v852_v8, %v851_v54  ;;  %v856_v51 = vor.u32 %v855_v17, %v854_v15  ;;  %v12419_v32 = vld [vmem:[#allocation26_spill] sm:$0xff]  ;;  %v12422_v27 = vld [vmem:[#allocation8_spill] sm:$0xff] }
 0x18b   : > { %7078 = vcosq.f32 %v815_v7  ;;  %v1114_v23 = vor.u32 %v1113_v36, %v1112_v48  ;;  %v1117_v20 = vshll.u32 %v1116_v30, 23  ;;  %v839_v55 = vor.u32 8388608, %v838_v21 }
 0x18c   : > { %v816_v6 = vsel %vm8438_vm7, 0, %v814_v44  ;;  %7080 = vsinq.f32 %v815_v7  ;;  %v1125_v22 = vsub.s32 4, %v8369_v41  ;;  %v580_v10 = vadd.s32 536870912, %v579_v31 }
 0x18d   : > { %v1118_v16 = vor.u32 4788187, %v1117_v20  ;;  %vm863_vm11 = vcmp.lt.s32.totalorder %v12417_v11, 1  ;;  %vm864_vm14 = vcmp.lt.s32.totalorder %v12417_v11, 2  ;;  %vm865_vm13 = vcmp.lt.s32.totalorder %v12417_v11, 3  ;;  %v12424_v20 = vld [vmem:[#allocation23_spill] sm:$0xff] }
 0x18e   : > { %v8473_v25 = vshrl.u32 %v580_v10, 30  ;;  %v871_v13 = vsel %vm863_vm11, %v850_v33, %v853_v28  ;;  %v873_v39 = vsel %vm865_vm13, %v856_v51, %v12418_v29  ;;  %v875_v44 = vsel %vm863_vm11, %v853_v28, %v856_v51 }
 0x18f   : > { %v1119_v7 = vand.u32 2147483647, %v1118_v16  ;;  %v1121_v21 = vcvt.s32.f32 %v1114_v23  ;;  %v877_v3 = vsel %vm865_vm13, %v12420_v19, %v12419_v32  ;;  %v879_v14 = vshll.u32 %v839_v55, 8  ;;  %v12423_v23 = vld [vmem:[#allocation17_spill] sm:$0xff] }
 0x190   : > { %vm1249_vm15 = vcmp.lt.s32.totalorder %v12421_v24, 0  ;;  %vm1353_vm0 = vcmp.lt.s32.totalorder %v12422_v27, 0  ;;  %v582_v54 = vshll.u32 %v8473_v25, 30  ;;  %v847_v8 = vshrl.u32 %v12374_v34, %v12415_v57 }
 0x191   : > { %v868_v15 = vsel %vm866_vm6, %v856_v51, 2102212464  ;;  %v878_v17 = vsel %vm864_vm14, %v875_v44, %v877_v3  ;;  %v1122_v48 = vmul.f32 %v1121_v21, %v1119_v7  ;;  %v874_v36 = vsel %vm864_vm14, %v871_v13, %v873_v39 }
 0x192   : > { %v8497_v30 = vmul.u32.u64.low %v879_v14, %v878_v17  ;;  %v8498_v46 = vmul.u32.u64.high %v879_v14, %v878_v17, %v8497_v30  ;;  %vm1457_vm1 = vcmp.lt.s32.totalorder %v12423_v23, 0  ;;  %vm1561_vm2 = vcmp.lt.s32.totalorder %v12424_v20, 0 }
 0x193   : > { %v1736_v57 = vshll.u32 %v8106_v52, %v8249_v53  ;;  %v1737_v55 = vshrl.u32 %v8421_v56, %v1735_v62  ;;  %v1742_v51 = vor.u32 4788187, %v1741_v61  ;;  %v8505_v10 = vsub.s32 %v579_v31, %v582_v54 }
 0x194   : > { %v820_v16 = vadd.s32 3, %v816_v6  ;;  %vm1041_vm6 = vcmp.lt.s32.totalorder %v12396_v38, 0  ;;  %v1123_v29 = vxor.u32 2147483648, %v1122_v48  ;;  %v867_v13 = vsel %vm863_vm11, %v847_v8, %v850_v33 }
 0x195   : > { %v585_v39 = vsub.s32 0, %v8505_v10  ;;  %v869_v44 = vsel %vm865_vm13, %v853_v28, %v868_v15  ;;  %v8513_v7 = vmul.u32.u64.low %v879_v14, %v874_v36  ;;  %v8514_v21 = vmul.u32.u64.high %v879_v14, %v874_v36, %v8513_v7  ;;  %v7079_v52 = vpop.eup %7078 }
 0x196   : > { %v1539_v53 = vxor.u32 2147483648, %v8234_v2  ;;  %vm8520_vm3 = vcmp.le.f32.partialorder %v1039_v42, 0.7853982  ;;  %v1124_v62 = vsel %vm1041_vm6, %v1123_v29, %v1122_v48  ;;  %v1126_v61 = vsel %vm1041_vm6, %v1125_v22, %v8369_v41  ;;  %v7081_v31 = vpop.eup %7080 }
 0x197   : > { %v1643_v33 = vxor.u32 2147483648, %v8428_v59  ;;  %v1738_v28 = vor.u32 %v1737_v55, %v1736_v57  ;;  %v1127_v6 = vsel %vm8520_vm3, %v12396_v38, %v1124_v62  ;;  %v6449_v32 = vmin.u32 %v585_v39, %v8505_v10 }
 0x198   : > { %v1743_v19 = vand.u32 2147483647, %v1742_v51  ;;  %v821_v3 = vand.u32 3, %v820_v16  ;;  %7082 = vcosq.f32 %v1127_v6  ;;  %v870_v42 = vsel %vm864_vm14, %v867_v13, %v869_v44 }
 0x199   : > { %v1128_v54 = vsel %vm8520_vm3, 0, %v1126_v61  ;;  %7084 = vsinq.f32 %v1127_v6  ;;  %v587_v41 = vclz %v6449_v32  ;;  %vm888_vm4 = vc.u32 %v8498_v46, %v8513_v7 }
 0x19a   : > { %v8541_v22 = vsel %vm1249_vm15, %v1331_v1, %v8032_v35  ;;  %v8548_v11 = vsel %vm1353_vm0, %v1435_v18, %v8142_v12  ;;  %v827_v8 = vxor.u32 2147483648, %v7079_v52  ;;  %v889_v15 = vadd.s32 1, %v8514_v21 }
 0x19b   : > { %v1745_v17 = vcvt.s32.f32 %v1738_v28  ;;  %v824_v48 = vxor.u32 2147483648, %v7081_v31  ;;  %v6450_v36 = vadd.s32 4294967294, %v587_v41  ;;  %v886_v30 = vmul.u32 %v879_v14, %v870_v42 }
 0x19c   : > { %v8554_v57 = vsel %vm1457_vm1, %v1539_v53, %v8234_v2  ;;  %v8559_v35 = vsel %vm1561_vm2, %v1643_v33, %v8428_v59  ;;  %v1132_v1 = vadd.s32 3, %v1128_v54  ;;  %v890_v12 = vsel %vm888_vm4, %v889_v15, %v8514_v21 }
 0x19d   : > { %v8562_v18 = vmul.f32 %v1745_v17, %v1743_v19  ;;  %vm826_vm5 = vcmp.eq.s32.totalorder %v821_v3, 2  ;;  %vm6451_vm9 = vcmp.lt.s32.totalorder %v6450_v36, 0  ;;  %v891_v55 = vadd.s32 %v890_v12, %v886_v30  ;;  %v12431_v17 = vld [vmem:[#allocation35_spill] sm:$0xff] }
 0x19e   : > { %vm823_vm7 = vcmp.eq.s32.totalorder %v821_v3, 0  ;;  %v828_v14 = vsel %vm826_vm5, %v827_v8, %v7081_v31  ;;  %v575_v51 = vadd.s32 %v8430_v4, %v8415_v49  ;;  %v590_v2 = vsel %vm6451_vm9, 0, %v6450_v36  ;;  %v12430_v8 = vld [vmem:[#allocation18_spill] sm:$0xff] }
 0x19f   : > { %v825_v16 = vsel %vm823_vm7, %v7079_v52, %v824_v48  ;;  %v591_v29 = vsub.s32 32, %v590_v2  ;;  %v595_v13 = vsub.s32 4294967266, %v590_v2  ;;  %v892_v39 = vadd.s32 536870912, %v891_v55  ;;  %v12429_v52 = vld [vmem:[#allocation31_spill] sm:$0xff] }
 0x1a0   : > { %vm819_vm8 = vweird.f32 %v12392_v50  ;;  %vm822_vm10 = vcmp.lt.s32.totalorder %v821_v3, 2  ;;  %v1133_v59 = vand.u32 3, %v1132_v1  ;;  %v605_v44 = vsub.s32 4, %v8473_v25 }
 0x1a1   : > { %v592_v21 = vshll.u32 %v8505_v10, %v590_v2  ;;  %v593_v53 = vshrl.u32 %v575_v51, %v591_v29  ;;  %v596_v56 = vadd.s32 127, %v595_v13  ;;  %v8569_v62 = vshrl.u32 %v892_v39, 30 }
 0x1a2   : > { %v7083_v61 = vpop.eup %7082  ;;  %v829_v31 = vsel %vm822_vm10, %v825_v16, %v828_v14  ;;  %vm1131_vm11 = vweird.f32 %v12396_v38  ;;  %vm8574_vm14 = vcmp.le.f32.partialorder %v519_v26, 0.7853982  ;;  %vm521_vm13 = vcmp.lt.s32.totalorder %v12405_v63, 0 }
 0x1a3   : > { %v7085_v4 = vpop.eup %7084  ;;  %vm1665_vm6 = vcmp.lt.s32.totalorder %v12429_v52, 0  ;;  %v1139_v10 = vxor.u32 2147483648, %v7083_v61  ;;  %v594_v33 = vor.u32 %v593_v53, %v592_v21  ;;  %v597_v28 = vshll.u32 %v596_v56, 23  ;;  %v12441_v53 = vld [vmem:[#allocation30_spill] sm:$0xff] }
 0x1a4   : > { %v894_v6 = vshll.u32 %v8569_v62, 30  ;;  %vm1134_vm3 = vcmp.lt.s32.totalorder %v1133_v59, 2  ;;  %vm1135_vm4 = vcmp.eq.s32.totalorder %v1133_v59, 0  ;;  %v1136_v32 = vxor.u32 2147483648, %v7085_v4 }
 0x1a5   : > { %vm1138_vm5 = vcmp.eq.s32.totalorder %v1133_v59, 2  ;;  %v598_v3 = vor.u32 4788187, %v597_v28  ;;  %v606_v26 = vsel %vm521_vm13, %v605_v44, %v8473_v25  ;;  %v830_v54 = vsel %vm819_vm8, nan, %v829_v31 }
 0x1a6   : > { %v1140_v19 = vsel %vm1138_vm5, %v1139_v10, %v7085_v4  ;;  %v8584_v42 = vsub.s32 %v891_v55, %v894_v6  ;;  %v1137_v41 = vsel %vm1135_vm4, %v7083_v61, %v1136_v32  ;;  %v1333_v15 = vsub.s32 4, %v12430_v8 }
 0x1a7   : > { %v1645_v48 = vsub.s32 4, %v12431_v17  ;;  %v1141_v36 = vsel %vm1134_vm3, %v1137_v41, %v1140_v19  ;;  %v599_v30 = vand.u32 2147483647, %v598_v3  ;;  %v601_v1 = vcvt.s32.f32 %v594_v33 }
 0x1a8   : > { %v897_v12 = vsub.s32 0, %v8584_v42  ;;  %v1747_v14 = vxor.u32 2147483648, %v8562_v18  ;;  %v1142_v25 = vsel %vm1131_vm11, nan, %v1141_v36  ;;  %v608_v55 = vsel %vm8574_vm14, 0, %v606_v26 }
 0x1a9   : > { %v12432_v50 = vand.u32 2147483647, %v12421_v24  ;;  %v6780_v2 = vpack.c.bf16 %v1142_v25, %v830_v54  ;;  %v602_v16 = vmul.f32 %v601_v1, %v599_v30  ;;  %v1334_v38 = vsel %vm1249_vm15, %v1333_v15, %v12430_v8 }
 0x1aa   : > { %v6461_v29 = vmin.u32 %v897_v12, %v8584_v42  ;;  %v12435_v39 = vand.u32 2147483647, %v12424_v20  ;;  %v12438_v44 = vand.u32 2147483647, %v12422_v27  ;;  %v1437_v56 = vsub.s32 4, %v12441_v53 }
 0x1ab   : > { %vm8598_vm9 = vcmp.le.f32.partialorder %v12432_v50, 0.7853982  ;;  %6781 = vmatprep.subr.bf16.mxu1 %v6780_v2  ;;  %v1646_v31 = vsel %vm1561_vm2, %v1645_v48, %v12431_v17  ;;  %v1748_v10 = vsel %vm1665_vm6, %v1747_v14, %v8562_v18  ;;  %vm833_vm15 = vcmp.lt.s32.totalorder %v12412_v43, 0 }
 0x1ac   : > { %v1335_v13 = vsel %vm8598_vm9, %v12421_v24, %v8541_v22  ;;  %vm8612_vm7 = vcmp.le.f32.partialorder %v12435_v39, 0.7853982  ;;  %vm8618_vm8 = vcmp.le.f32.partialorder %v12438_v44, 0.7853982  ;;  %v603_v22 = vxor.u32 2147483648, %v602_v16  ;;  %6783 = vmatpush3.bf16.msra.mxu1 %v6780_v2 }
 0x1ad   : > { %v899_v61 = vclz %v6461_v29  ;;  %v1439_v4 = vsel %vm8618_vm8, %v12422_v27, %v8548_v11  ;;  %7086 = vcosq.f32 %v1335_v13  ;;  %v1647_v33 = vsel %vm8612_vm7, %v12424_v20, %v8559_v35 }
 0x1ae   : > { %v612_v28 = vadd.s32 3, %v608_v55  ;;  %v1336_v32 = vsel %vm8598_vm9, 0, %v1334_v38  ;;  %7088 = vsinq.f32 %v1335_v13  ;;  %v887_v11 = vadd.s32 %v8513_v7, %v8498_v46 }
 0x1af   : > { %v6462_v6 = vadd.s32 4294967294, %v899_v61  ;;  %v1648_v18 = vsel %vm8612_vm7, 0, %v1646_v31  ;;  %v1438_v19 = vsel %vm1353_vm0, %v1437_v56, %v12441_v53  ;;  %7090 = vcosq.f32 %v1439_v4  ;;  %v12453_v61 = vld [vmem:[#allocation32_spill] sm:$0xff] }
 0x1b0   : > { %v604_v35 = vsel %vm521_vm13, %v603_v22, %v602_v16  ;;  %7092 = vsinq.f32 %v1647_v33  ;;  %v1749_v3 = vsub.s32 4, %v8070_v47  ;;  %v917_v54 = vsub.s32 4, %v8569_v62 }
 0x1b1   : > { %vm6463_vm2 = vcmp.lt.s32.totalorder %v6462_v6, 0  ;;  %v1340_v41 = vadd.s32 3, %v1336_v32  ;;  %7094 = vcosq.f32 %v1647_v33  ;;  %v1652_v8 = vadd.s32 3, %v1648_v18  ;;  %v12454_v18 = vld [vmem:[#allocation15_spill] sm:$0xff] }
 0x1b2   : > { %v902_v26 = vsel %vm6463_vm2, 0, %v6462_v6  ;;  %v1440_v15 = vsel %vm8618_vm8, 0, %v1438_v19  ;;  %v607_v17 = vsel %vm8574_vm14, %v12405_v63, %v604_v35  ;;  %7096 = vsinq.f32 %v1439_v4 }
 0x1b3   : > { %v903_v46 = vsub.s32 32, %v902_v26  ;;  %v907_v7 = vsub.s32 4294967266, %v902_v26  ;;  %v904_v48 = vshll.u32 %v8584_v42, %v902_v26  ;;  %v12442_v36 = vand.u32 2147483647, %v12429_v52 }
 0x1b4   : > { %v1750_v14 = vsel %vm1665_vm6, %v1749_v3, %v8070_v47  ;;  %vm8671_vm10 = vcmp.le.f32.partialorder %v831_v58, 0.7853982  ;;  %v918_v25 = vsel %vm833_vm15, %v917_v54, %v8569_v62  ;;  %v1444_v55 = vadd.s32 3, %v1440_v15 }
 0x1b5   : > { %vm8659_vm0 = vcmp.le.f32.partialorder %v12442_v36, 0.7853982  ;;  %v905_v1 = vshrl.u32 %v887_v11, %v903_v46  ;;  %v908_v12 = vadd.s32 127, %v907_v7  ;;  %v8682_v16 = vand.u32 3, %v612_v28 }
 0x1b6   : > { %v1751_v49 = vsel %vm8659_vm0, %v12429_v52, %v1748_v10  ;;  %v1752_v47 = vsel %vm8659_vm0, 0, %v1750_v14  ;;  %v8684_v58 = vand.u32 3, %v1340_v41  ;;  %v12447_v29 = vand.u32 2147483647, %v12389_v45 }
 0x1b7   : > { %7098 = vcosq.f32 %v1751_v49  ;;  %v906_v50 = vor.u32 %v905_v1, %v904_v48  ;;  %v909_v51 = vshll.u32 %v908_v12, 23  ;;  %v8680_v2 = vpop.eup %7086  ;;  %v920_v39 = vsel %vm8671_vm10, 0, %v918_v25 }
 0x1b8   : > { %7100 = vsinq.f32 %v1751_v49  ;;  %vm8688_vm11 = vcmp.le.f32.partialorder %v12447_v29, 0.7853982  ;;  %v8692_v62 = vpop.eup %7088  ;;  %v8696_v59 = vand.u32 3, %v1652_v8  ;;  %v1756_v53 = vadd.s32 3, %v1752_v47 }
 0x1b9   : > { %7102 = vcosq.f32 %v607_v17  ;;  %v910_v38 = vor.u32 4788187, %v909_v51  ;;  %v1231_v44 = vsel %vm8688_vm11, %v12389_v45, %v8132_v37  ;;  %v7091_v21 = vpop.eup %7090  ;;  %v12450_v56 = vand.u32 2147483647, %v12423_v23 }
 0x1ba   : > { %7104 = vsinq.f32 %v607_v17  ;;  %v1541_v31 = vsub.s32 4, %v12453_v61  ;;  %v8709_v4 = vpop.eup %7092  ;;  %v913_v33 = vcvt.s32.f32 %v906_v50  ;;  %v1445_v28 = vand.u32 3, %v1444_v55 }
 0x1bb   : > { %vm8704_vm14 = vcmp.le.f32.partialorder %v12450_v56, 0.7853982  ;;  %v911_v10 = vand.u32 2147483647, %v910_v38  ;;  %v8715_v6 = vpop.eup %7094  ;;  %v1344_v32 = vxor.u32 2147483648, %v8692_v62  ;;  %v1451_v11 = vxor.u32 2147483648, %v7091_v21 }
 0x1bc   : > { %v1543_v37 = vsel %vm8704_vm14, %v12423_v23, %v8554_v57  ;;  %v1229_v19 = vsub.s32 4, %v12454_v18  ;;  %7106 = vcosq.f32 %v1231_v44  ;;  %v8719_v3 = vadd.s32 3, %v920_v39  ;;  %v7097_v54 = vpop.eup %7096 }
 0x1bd   : > { %v914_v35 = vmul.f32 %v913_v33, %v911_v10  ;;  %v1347_v26 = vxor.u32 2147483648, %v8680_v2  ;;  %vm1443_vm13 = vweird.f32 %v12422_v27  ;;  %7108 = vsinq.f32 %v1231_v44 }
 0x1be   : > { %v1656_v57 = vxor.u32 2147483648, %v8709_v4  ;;  %v1757_v41 = vand.u32 3, %v1756_v53  ;;  %v1542_v46 = vsel %vm1457_vm1, %v1541_v31, %v12453_v61  ;;  %7110 = vcosq.f32 %v1543_v37  ;;  %v8753_v53 = vld [vmem:[%s8740_s18] sm:$0xff] }
 0x1bf   : > { %v915_v7 = vxor.u32 2147483648, %v914_v35  ;;  %vm1343_vm6 = vcmp.eq.s32.totalorder %v8684_v58, 0  ;;  %vm1446_vm3 = vcmp.lt.s32.totalorder %v1445_v28, 2  ;;  %v1448_v8 = vxor.u32 2147483648, %v7097_v54 }
 0x1c0   : > { %vm1450_vm4 = vcmp.eq.s32.totalorder %v1445_v28, 2  ;;  %vm1447_vm5 = vcmp.eq.s32.totalorder %v1445_v28, 0  ;;  %v1230_v48 = vsel %vm1145_vm12, %v1229_v19, %v12454_v18  ;;  %7112 = vsinq.f32 %v1543_v37 }
 0x1c1   : > { %v7099_v15 = vpop.eup %7098  ;;  %v1452_v17 = vsel %vm1450_vm4, %v1451_v11, %v7097_v54  ;;  %vm618_vm9 = vcmp.eq.s32.totalorder %v8682_v16, 2  ;;  %v916_v30 = vsel %vm833_vm15, %v915_v7, %v914_v35  ;;  %v1449_v1 = vsel %vm1447_vm5, %v7091_v21, %v1448_v8  ;;  %v1769_v8 = vld [vmem:[%s8740_s18 + $0x10] sm:$0xff] }
 0x1c2   : > { %v7101_v36 = vpop.eup %7100  ;;  %v1763_v12 = vxor.u32 2147483648, %v7099_v15  ;;  %v1544_v14 = vsel %vm8704_vm14, 0, %v1542_v46  ;;  %vm615_vm12 = vcmp.eq.s32.totalorder %v8682_v16, 0  ;;  %v919_v25 = vsel %vm8671_vm10, %v12412_v43, %v916_v30 }
 0x1c3   : > { %v7103_v49 = vpop.eup %7102  ;;  %vm1759_vm1 = vcmp.eq.s32.totalorder %v1757_v41, 0  ;;  %v1760_v55 = vxor.u32 2147483648, %v7101_v36  ;;  %vm1762_vm7 = vcmp.eq.s32.totalorder %v1757_v41, 2  ;;  %7114 = vcosq.f32 %v919_v25 }
 0x1c4   : > { %v1453_v50 = vsel %vm1446_vm3, %v1449_v1, %v1452_v17  ;;  %v1764_v51 = vsel %vm1762_vm7, %v1763_v12, %v7101_v36  ;;  %v1232_v47 = vsel %vm8688_vm11, 0, %v1230_v48  ;;  %v7105_v29 = vpop.eup %7104  ;;  %7116 = vsinq.f32 %v919_v25 }
 0x1c5   : > { %vm1758_vm8 = vcmp.lt.s32.totalorder %v1757_v41, 2  ;;  %v1761_v38 = vsel %vm1759_vm1, %v7099_v15, %v1760_v55  ;;  %v1548_v39 = vadd.s32 3, %v1544_v14  ;;  %vm614_vm15 = vcmp.lt.s32.totalorder %v8682_v16, 2 }
 0x1c6   : > { %v619_v42 = vxor.u32 2147483648, %v7103_v49  ;;  %v1659_v44 = vxor.u32 2147483648, %v8715_v6  ;;  %vm1755_vm2 = vweird.f32 %v12429_v52  ;;  %v1765_v21 = vsel %vm1758_vm8, %v1761_v38, %v1764_v51  ;;  %v7107_v56 = vpop.eup %7106 }
 0x1c7   : > { %v1454_v13 = vsel %vm1443_vm13, nan, %v1453_v50  ;;  %v1766_v22 = vsel %vm1755_vm2, nan, %v1765_v21  ;;  %v1236_v61 = vadd.s32 3, %v1232_v47  ;;  %v7109_v31 = vpop.eup %7108  ;;  %v616_v10 = vxor.u32 2147483648, %v7105_v29 }
 0x1c8   : > { %vm1346_vm0 = vcmp.eq.s32.totalorder %v8684_v58, 2  ;;  %vm1651_vm10 = vweird.f32 %v12424_v20  ;;  %v6784_v33 = vpack.c.bf16 %v1766_v22, %v1454_v13  ;;  %v12247_v28 = vmov 0.0   ;;  %v7111_v52 = vpop.eup %7110 }
 0x1c9   : > { %1873 = vmatprep.mubr.f32.mxu0 %v12247_v28  ;;  %vm12270_vm11 = vcmask 261120   ;;  %vm611_vm14 = vweird.f32 %v12405_v63  ;;  %vm1342_vm3 = vcmp.lt.s32.totalorder %v8684_v58, 2  ;;  %v1345_v27 = vsel %vm1343_vm6, %v8680_v2, %v1344_v32  ;;  %v1770_v58 = vld [vmem:[%s8740_s18 + $0x18] sm:$0xff] }
 0x1ca   : > { %v1348_v37 = vsel %vm1346_vm0, %v1347_v26, %v8692_v62  ;;  %v1549_v11 = vand.u32 3, %v1548_v39  ;;  %6727 = vmatprep.mubr.msk.f32.mxu1 %vm12270_vm11, %v8753_v53  ;;  %v925_v18 = vand.u32 3, %v8719_v3  ;;  %vm1339_vm13 = vweird.f32 %v12421_v24  ;;  %6785 = vmatprep.subr.bf16.mxu1 %v6784_v33  ;;  %v7113_v19 = vpop.eup %7112  ;;  %v1768_v26 = vld [vmem:[%s8740_s18 + $0x8] sm:$0xff]  ;;  %v8818_v24 = vpop.permute.xlu0 %1778 }
 0x1cb   : > { %vm1655_vm4 = vcmp.eq.s32.totalorder %v8696_v59, 0  ;;  %vm1658_vm5 = vcmp.eq.s32.totalorder %v8696_v59, 2  ;;  %v1555_v32 = vxor.u32 2147483648, %v7111_v52  ;;  %v620_v2 = vsel %vm618_vm9, %v619_v42, %v7105_v29  ;;  %6787 = vmatpush3.bf16.msra.mxu1 %v6784_v33 }
 0x1cc   : > { %vm923_vm6 = vweird.f32 %v12412_v43  ;;  %v1657_v62 = vsel %vm1655_vm4, %v8715_v6, %v1656_v57  ;;  %v1660_v35 = vsel %vm1658_vm5, %v1659_v44, %v8709_v4  ;;  %v1237_v3 = vand.u32 3, %v1236_v61 }
 0x1cd   : > { %v617_v54 = vsel %vm615_vm12, %v7103_v49, %v616_v10  ;;  %v1240_v41 = vxor.u32 2147483648, %v7109_v31  ;;  %v1243_v46 = vxor.u32 2147483648, %v7107_v56  ;;  %v1552_v7 = vxor.u32 2147483648, %v7113_v19  ;;  %v7115_v6 = vpop.eup %7114 }
 0x1ce   : > { %v1349_v15 = vsel %vm1342_vm3, %v1345_v27, %v1348_v37  ;;  %vm1654_vm9 = vcmp.lt.s32.totalorder %v8696_v59, 2  ;;  %vm1551_vm1 = vcmp.eq.s32.totalorder %v1549_v11, 0  ;;  %vm1554_vm7 = vcmp.eq.s32.totalorder %v1549_v11, 2  ;;  %6728 = vmatmul.mubr.msk.f32.vlgmr.msra.gmra.mrb[0].mxu1 %vm12270_vm11, %v1768_v26  ;;  %v7117_v48 = vpop.eup %7116 }
 0x1cf   : > { %vm930_vm8 = vcmp.eq.s32.totalorder %v925_v18, 2  ;;  %v1661_v4 = vsel %vm1654_vm9, %v1657_v62, %v1660_v35  ;;  %v1553_v57 = vsel %vm1551_vm1, %v7111_v52, %v1552_v7  ;;  %v1556_v17 = vsel %vm1554_vm7, %v1555_v32, %v7113_v19  ;;  %6730 = vmatprep.mubr.msk.f32.mxu1 %vm12270_vm11, %v1769_v8 }
 0x1d0   : > { %v621_v36 = vsel %vm614_vm15, %v617_v54, %v620_v2  ;;  %v931_v30 = vxor.u32 2147483648, %v7115_v6  ;;  %vm1239_vm12 = vcmp.eq.s32.totalorder %v1237_v3, 0  ;;  %vm1242_vm2 = vcmp.eq.s32.totalorder %v1237_v3, 2 }
 0x1d1   : > { %v928_v59 = vxor.u32 2147483648, %v7117_v48  ;;  %v1241_v1 = vsel %vm1239_vm12, %v7107_v56, %v1240_v41  ;;  %v1244_v12 = vsel %vm1242_vm2, %v1243_v46, %v7109_v31  ;;  %vm1550_vm0 = vcmp.lt.s32.totalorder %v1549_v11, 2 }
 0x1d2   : > { %vm927_vm3 = vcmp.eq.s32.totalorder %v925_v18, 0  ;;  %v932_v14 = vsel %vm930_vm8, %v931_v30, %v7117_v48  ;;  %v1662_v49 = vsel %vm1651_vm10, nan, %v1661_v4  ;;  %v1557_v25 = vsel %vm1550_vm0, %v1553_v57, %v1556_v17  ;;  %6731 = vmatmul.mubr.msk.f32.gmra.mrb[2].mxu1 %vm12270_vm11, %v1770_v58 }
 0x1d3   : > { %v622_v16 = vsel %vm611_vm14, nan, %v621_v36  ;;  %vm926_vm15 = vcmp.lt.s32.totalorder %v925_v18, 2  ;;  %v929_v55 = vsel %vm927_vm3, %v7115_v6, %v928_v59  ;;  %vm1238_vm4 = vcmp.lt.s32.totalorder %v1237_v3, 2  ;;  %3337 = vmatprep.mubr.f32.mxu1 %v12247_v28 }
 0x1d4   : > { %v933_v50 = vsel %vm926_vm15, %v929_v55, %v932_v14  ;;  %v1350_v51 = vsel %vm1339_vm13, nan, %v1349_v15  ;;  %v1245_v47 = vsel %vm1238_vm4, %v1241_v1, %v1244_v12  ;;  %vm1547_vm5 = vweird.f32 %v12423_v23 }
 0x1d5   : > { %v934_v20 = vsel %vm923_vm6, nan, %v933_v50  ;;  %v6776_v29 = vpack.c.bf16 %v1662_v49, %v1350_v51  ;;  %v1558_v63 = vsel %vm1547_vm5, nan, %v1557_v25  ;;  %vm1235_vm10 = vweird.f32 %v12389_v45  ;;  %v8816_v45 = vpop.permute.xlu1 %1783 }
 0x1d6   : > { %v6774_v38 = vpack.c.bf16 %v934_v20, %v622_v16  ;;  %v1246_v39 = vsel %vm1235_vm10, nan, %v1245_v47 }
 0x1d7   : > { %v6778_v42 = vpack.c.bf16 %v1558_v63, %v1246_v39 }
 0x1d8   : > { %6775 = vmatpush1.bf16.msra.mxu0 %v6774_v38 }
 0x1d9   : > { %6777 = vmatprep.subr.bf16.mxu0 %v6776_v29  ;;  %v8831_v10 = vpop.permute.xlu1 %1793 }
 0x1dc   : > { %6779 = vmatpush1.bf16.msra.mxu0 %v6778_v42 }
 0x1df   : > { %6500 = vmatmul.mubr.msk.f32.vlgmr.msra.gmra.mrb[0].mxu0 %vm12270_vm11, %v8753_v53 }
 0x1e0   : > { %1879 = vmatprep.mubr.f32.mxu0 %v12247_v28 }
 0x1e3   : > { %6501 = vmatmul.mubr.msk.f32.gmra.mrb[2].mxu0 %vm12270_vm11, %v1768_v26 }
 0x1e4   : > { %1885 = vmatprep.mubr.f32.mxu0 %v12247_v28 }
 0x1e7   : > { %6502 = vmatmul.mubr.msk.f32.gmra.mrb[4].mxu0 %vm12270_vm11, %v1769_v8 }
 0x1e8   : > { %1891 = vmatprep.mubr.f32.mxu0 %v12247_v28 }
 0x1eb   : > { %6503 = vmatmul.mubr.msk.f32.gmra.mrb[6].mxu0 %vm12270_vm11, %v1770_v58 }
 0x2a1   : > { %v6729_v43 = vpop.f32.mrb[0].mxu1 }
 0x2a2   : > { %v8821_v23 = vadd.f32 %v6729_v43, %v8816_v45  ;;  %v1964_v44 = vpop.f32.mrb[1].mxu1 }
 0x2a3   : > { %v8824_v21 = vadd.f32 %v1964_v44, %v8818_v24 }
 0x2a4   : > { %12455 = vst [vmem:[#allocation6_spill] sm:$0xff] %v8821_v23  ;;  %v12253_v53 = vand.u32 2147483647, %v8821_v23  ;;  %v2506_v56 = vand.u32 2139095040, %v8821_v23 }
 0x2a5   : > { %v2194_v13 = vand.u32 2139095040, %v8824_v21  ;;  %v6732_v22 = vpop.f32.mrb[2].mxu1  ;;  %v12250_v32 = vand.u32 2147483647, %v8824_v21 }
 0x2a6   : > { %v2507_v61 = vshrl.u32 %v2506_v56, 23  ;;  %v8829_v31 = vpop.f32.mrb[3].mxu1  ;;  %v2510_v27 = vand.u32 8388607, %v12253_v53  ;;  %v8836_v37 = vadd.f32 %v6732_v22, %v8831_v10 }
 0x2a7   : > { %v2195_v33 = vshrl.u32 %v2194_v13, 23  ;;  %v8842_v26 = vand.u32 8388607, %v12250_v32 }
 0x2a8   : > { %v6528_v52 = vadd.s32 4294967169, %v2507_v61  ;;  %v2511_v2 = vor.u32 8388608, %v2510_v27  ;;  %v3130_v62 = vand.u32 2139095040, %v8836_v37 }
 0x2a9   : > { %v6516_v11 = vadd.s32 4294967169, %v2195_v33 }
 0x2aa   : > { %v2513_v18 = vadd.s32 1, %v6528_v52  ;;  %v8844_v46 = vshll.u32 %v2511_v2, 8  ;;  %v3131_v7 = vshrl.u32 %v3130_v62, 23 }
 0x2ab   : > { %v2201_v19 = vadd.s32 1, %v6516_v11 }
 0x2ac   : > { %vm2514_vm14 = vcmp.gt.s32.totalorder %v2513_v18, 0 }
 0x2ad   : > { %v2515_v35 = vsel %vm2514_vm14, %v2513_v18, 0  ;;  %vm2202_vm13 = vcmp.gt.s32.totalorder %v2201_v19, 0 }
 0x2ae   : > { %v2517_v3 = vand.u32 31, %v2515_v35  ;;  %v2516_v54 = vshrl.u32 %v2515_v35, 5  ;;  %v8849_v57 = vsel %vm2202_vm13, %v2201_v19, 0 }
 0x2af   : > { %v8880_v62 = vand.u32 31, %v8849_v57 }
 0x2b0   : > { %v2518_v41 = vsub.s32 32, %v2517_v3  ;;  %v2520_v15 = vshll.u32 %v12374_v34, %v2517_v3  ;;  %v2523_v6 = vshll.u32 %v12375_v60, %v2517_v3  ;;  %v2526_v4 = vshll.u32 %v12376_v5, %v2517_v3 }
 0x2b1   : > { %v2529_v30 = vshll.u32 %v12378_v9, %v2517_v3  ;;  %v2532_v12 = vshll.u32 %v12379_v0, %v2517_v3  ;;  %vm2535_vm6 = vcmp.lt.s32.totalorder %v2516_v54, 1  ;;  %vm2538_vm9 = vcmp.lt.s32.totalorder %v2516_v54, 4 }
 0x2b2   : > { %v1875_v8 = vpop.f32.mrb[0].mxu0  ;;  %v2521_v48 = vshrl.u32 %v12375_v60, %v2518_v41  ;;  %v2524_v36 = vshrl.u32 %v12376_v5, %v2518_v41  ;;  %v2527_v59 = vshrl.u32 %v12378_v9, %v2518_v41  ;;  %v2530_v1 = vshrl.u32 %v12379_v0, %v2518_v41 }
 0x2b3   : > { %v8852_v17 = vadd.f32 %v1875_v8, %v8818_v24  ;;  %v1877_v58 = vpop.f32.mrb[1].mxu0  ;;  %v2533_v14 = vshrl.u32 %v12372_v40, %v2518_v41  ;;  %v2519_v38 = vshrl.u32 %v12374_v34, %v2518_v41  ;;  %vm2537_vm1 = vcmp.lt.s32.totalorder %v2516_v54, 3 }
 0x2b4   : > { %v2522_v16 = vor.u32 %v2521_v48, %v2520_v15  ;;  %v2525_v55 = vor.u32 %v2524_v36, %v2523_v6  ;;  %v2528_v50 = vor.u32 %v2527_v59, %v2526_v4  ;;  %v2531_v51 = vor.u32 %v2530_v1, %v2529_v30 }
 0x2b5   : > { %12456 = vst [vmem:[#allocation11_spill] sm:$0xff] %v8852_v17  ;;  %v12252_v49 = vand.u32 2147483647, %v8852_v17  ;;  %v1986_v25 = vand.u32 2139095040, %v8852_v17  ;;  %v2534_v47 = vor.u32 %v2533_v14, %v2532_v12  ;;  %vm2536_vm7 = vcmp.lt.s32.totalorder %v2516_v54, 2 }
 0x2b6   : > { %v8863_v20 = vpop.f32.mrb[2].mxu0  ;;  %v2540_v39 = vsel %vm2538_vm9, %v2528_v50, 2102212464  ;;  %v2543_v42 = vsel %vm2535_vm6, %v2522_v16, %v2525_v55  ;;  %v2544_v43 = vsel %vm2538_vm9, %v2531_v51, 920167782  ;;  %v2539_v13 = vsel %vm2535_vm6, %v2519_v38, %v2522_v16 }
 0x2b7   : > { %v1987_v29 = vshrl.u32 %v1986_v25, 23  ;;  %v1990_v63 = vand.u32 8388607, %v12252_v49  ;;  %v8869_v44 = vpop.f32.mrb[3].mxu0  ;;  %v2545_v22 = vsel %vm2537_vm1, %v2528_v50, %v2544_v43  ;;  %v2541_v61 = vsel %vm2537_vm1, %v2525_v55, %v2540_v39 }
 0x2b8   : > { %v2546_v33 = vsel %vm2536_vm7, %v2543_v42, %v2545_v22  ;;  %v2547_v52 = vsel %vm2535_vm6, %v2525_v55, %v2528_v50  ;;  %v2548_v27 = vsel %vm2538_vm9, %v2534_v47, 1326507024  ;;  %v8889_v8 = vadd.f32 %v1877_v58, %v8818_v24 }
 0x2b9   : > { %v6508_v56 = vadd.s32 4294967169, %v1987_v29  ;;  %v1991_v18 = vor.u32 8388608, %v1990_v63  ;;  %v2549_v2 = vsel %vm2537_vm1, %v2531_v51, %v2548_v27  ;;  %v2542_v15 = vsel %vm2536_vm7, %v2539_v13, %v2541_v61 }
 0x2ba   : > { %v8876_v11 = vpop.f32.mrb[4].mxu0  ;;  %v2550_v35 = vsel %vm2536_vm7, %v2547_v52, %v2549_v2  ;;  %v8884_v3 = vmul.u32.u64.low %v8844_v46, %v2546_v33  ;;  %v8885_v41 = vmul.u32.u64.high %v8844_v46, %v2546_v33, %v8884_v3  ;;  %v12251_v36 = vand.u32 2147483647, %v8889_v8 }
 0x2bb   : > { %v1993_v19 = vadd.s32 1, %v6508_v56  ;;  %v8893_v6 = vmul.u32.u64.low %v8844_v46, %v2550_v35  ;;  %v8894_v4 = vmul.u32.u64.high %v8844_v46, %v2550_v35, %v8893_v6  ;;  %v2090_v30 = vand.u32 2139095040, %v8889_v8 }
 0x2bc   : > { %v2199_v1 = vor.u32 8388608, %v8842_v26  ;;  %v12249_v12 = vand.u32 2147483647, %v8836_v37  ;;  %v8900_v24 = vshll.u32 %v1991_v18, 8  ;;  %v2558_v54 = vmul.u32 %v8844_v46, %v2542_v15 }
 0x2bd   : > { %vm1994_vm8 = vcmp.gt.s32.totalorder %v1993_v19, 0  ;;  %v6552_v58 = vadd.s32 4294967169, %v3131_v7  ;;  %v2561_v16 = vadd.s32 1, %v8885_v41  ;;  %v2091_v55 = vshrl.u32 %v2090_v30, 23 }
 0x2be   : > { %v1995_v48 = vsel %vm1994_vm8, %v1993_v19, 0  ;;  %v8905_v50 = vsub.s32 32, %v8880_v62  ;;  %v2094_v29 = vand.u32 8388607, %v12251_v36  ;;  %vm2560_vm0 = vc.u32 %v8894_v4, %v8884_v3 }
 0x2bf   : > { %v1997_v59 = vand.u32 31, %v1995_v48  ;;  %v1996_v14 = vshrl.u32 %v1995_v48, 5  ;;  %v2562_v15 = vsel %vm2560_vm0, %v2561_v16, %v8885_v41  ;;  %v6512_v6 = vadd.s32 4294967169, %v2091_v55  ;;  %v8925_v48 = vpop.f32.mrb[5].mxu0 }
 0x2c0   : > { %v2095_v16 = vor.u32 8388608, %v2094_v29  ;;  %v2208_v29 = vshll.u32 %v12374_v34, %v8880_v62 }
 0x2c1   : > { %v1998_v25 = vsub.s32 32, %v1997_v59  ;;  %v2000_v51 = vshll.u32 %v12374_v34, %v1997_v59  ;;  %v2003_v47 = vshll.u32 %v12375_v60, %v1997_v59  ;;  %v2006_v26 = vshll.u32 %v12376_v5, %v1997_v59 }
 0x2c2   : > { %v2009_v38 = vshll.u32 %v12378_v9, %v1997_v59  ;;  %v2012_v42 = vshll.u32 %v12379_v0, %v1997_v59  ;;  %vm2015_vm12 = vcmp.lt.s32.totalorder %v1996_v14, 1  ;;  %vm2018_vm2 = vcmp.lt.s32.totalorder %v1996_v14, 4 }
 0x2c3   : > { %v2001_v63 = vshrl.u32 %v12375_v60, %v1998_v25  ;;  %v2004_v46 = vshrl.u32 %v12376_v5, %v1998_v25  ;;  %v2007_v7 = vshrl.u32 %v12378_v9, %v1998_v25  ;;  %v2010_v39 = vshrl.u32 %v12379_v0, %v1998_v25 }
 0x2c4   : > { %v2013_v43 = vshrl.u32 %v12372_v40, %v1998_v25  ;;  %v1999_v56 = vshrl.u32 %v12374_v34, %v1998_v25  ;;  %vm2017_vm3 = vcmp.lt.s32.totalorder %v1996_v14, 3  ;;  %vm2016_vm15 = vcmp.lt.s32.totalorder %v1996_v14, 2 }
 0x2c5   : > { %v2002_v13 = vor.u32 %v2001_v63, %v2000_v51  ;;  %v2005_v22 = vor.u32 %v2004_v46, %v2003_v47  ;;  %v2008_v61 = vor.u32 %v2007_v7, %v2006_v26  ;;  %v2011_v33 = vor.u32 %v2010_v39, %v2009_v38 }
 0x2c6   : > { %v2014_v52 = vor.u32 %v2013_v43, %v2012_v42  ;;  %v2563_v25 = vadd.s32 %v2562_v15, %v2558_v54  ;;  %v2097_v55 = vadd.s32 1, %v6512_v6  ;;  %v8939_v54 = vand.u32 8388607, %v12249_v12 }
 0x2c7   : > { %v2020_v27 = vsel %vm2018_vm2, %v2008_v61, 2102212464  ;;  %v2023_v18 = vsel %vm2015_vm12, %v2002_v13, %v2005_v22  ;;  %v2027_v19 = vsel %vm2015_vm12, %v2005_v22, %v2008_v61  ;;  %v2024_v2 = vsel %vm2018_vm2, %v2011_v33, 920167782 }
 0x2c8   : > { %v2028_v35 = vsel %vm2018_vm2, %v2014_v52, 1326507024  ;;  %v2025_v30 = vsel %vm2017_vm3, %v2008_v61, %v2024_v2  ;;  %v2019_v51 = vsel %vm2015_vm12, %v1999_v56, %v2002_v13  ;;  %v2021_v47 = vsel %vm2017_vm3, %v2005_v22, %v2020_v27 }
 0x2c9   : > { %v2029_v59 = vsel %vm2017_vm3, %v2011_v33, %v2028_v35  ;;  %v2026_v26 = vsel %vm2016_vm15, %v2023_v18, %v2025_v30  ;;  %v2564_v41 = vadd.s32 536870912, %v2563_v25  ;;  %v2022_v14 = vsel %vm2016_vm15, %v2019_v51, %v2021_v47 }
 0x2ca   : > { %v2030_v63 = vsel %vm2016_vm15, %v2027_v19, %v2029_v59  ;;  %v8933_v38 = vmul.u32.u64.low %v8900_v24, %v2026_v26  ;;  %v8934_v39 = vmul.u32.u64.high %v8900_v24, %v2026_v26, %v8933_v38  ;;  %v8942_v42 = vshrl.u32 %v8849_v57, 5 }
 0x2cb   : > { %v8929_v46 = vmul.u32.u64.low %v8900_v24, %v2030_v63  ;;  %v8930_v7 = vmul.u32.u64.high %v8900_v24, %v2030_v63, %v8929_v46  ;;  %v8944_v43 = vshll.u32 %v2199_v1, 8  ;;  %v8946_v56 = vadd.s32 1, %v6552_v58 }
 0x2cc   : > { %v8948_v13 = vshrl.u32 %v2564_v41, 30  ;;  %vm2098_vm4 = vcmp.gt.s32.totalorder %v2097_v55, 0  ;;  %v8952_v22 = vshrl.u32 %v12374_v34, %v8905_v50  ;;  %v2041_v57 = vadd.s32 1, %v8934_v39 }
 0x2cd   : > { %vm2040_vm5 = vc.u32 %v8930_v7, %v8933_v38  ;;  %v8961_v1 = vadd.s32 %v8884_v3, %v8894_v4  ;;  %v2099_v58 = vsel %vm2098_vm4, %v2097_v55, 0  ;;  %v2038_v61 = vmul.u32 %v8900_v24, %v2022_v14 }
 0x2ce   : > { %12457 = vst [vmem:[#allocation5_spill] sm:$0xff] %v8948_v13  ;;  %v2566_v33 = vshll.u32 %v8948_v13, 30  ;;  %v2101_v52 = vand.u32 31, %v2099_v58  ;;  %v8965_v27 = vshll.u32 %v2095_v16, 8  ;;  %v2042_v18 = vsel %vm2040_vm5, %v2041_v57, %v8934_v39 }
 0x2cf   : > { %v2209_v19 = vshrl.u32 %v12375_v60, %v8905_v50  ;;  %v8972_v2 = vshll.u32 %v12375_v60, %v8880_v62  ;;  %v8976_v3 = vshrl.u32 %v12376_v5, %v8905_v50  ;;  %v2043_v4 = vadd.s32 %v2042_v18, %v2038_v61 }
 0x2d0   : > { %v8978_v24 = vsub.s32 %v2563_v25, %v2566_v33  ;;  %v2102_v35 = vsub.s32 32, %v2101_v52  ;;  %v8982_v15 = vshll.u32 %v12376_v5, %v8880_v62  ;;  %v2100_v6 = vshrl.u32 %v2099_v58, 5 }
 0x2d1   : > { %v2104_v30 = vshll.u32 %v12374_v34, %v2101_v52  ;;  %v2107_v59 = vshll.u32 %v12375_v60, %v2101_v52  ;;  %v2110_v51 = vshll.u32 %v12376_v5, %v2101_v52  ;;  %v2044_v47 = vadd.s32 536870912, %v2043_v4 }
 0x2d2   : > { %v2569_v26 = vsub.s32 0, %v8978_v24  ;;  %v2105_v63 = vshrl.u32 %v12375_v60, %v2102_v35  ;;  %v2113_v25 = vshll.u32 %v12378_v9, %v2101_v52  ;;  %v2108_v46 = vshrl.u32 %v12376_v5, %v2102_v35 }
 0x2d3   : > { %v2111_v39 = vshrl.u32 %v12378_v9, %v2102_v35  ;;  %v2114_v41 = vshrl.u32 %v12379_v0, %v2102_v35  ;;  %v2117_v16 = vshrl.u32 %v12372_v40, %v2102_v35  ;;  %v8994_v55 = vshrl.u32 %v2044_v47, 30 }
 0x2d4   : > { %v6529_v14 = vmin.u32 %v2569_v26, %v8978_v24  ;;  %v2116_v57 = vshll.u32 %v12379_v0, %v2101_v52  ;;  %v2215_v58 = vshrl.u32 %v12378_v9, %v8905_v50  ;;  %v2106_v61 = vor.u32 %v2105_v63, %v2104_v30  ;;  %v9014_v63 = vpop.f32.mrb[6].mxu0 }
 0x2d5   : > { %v2109_v33 = vor.u32 %v2108_v46, %v2107_v59  ;;  %v2112_v18 = vor.u32 %v2111_v39, %v2110_v51  ;;  %v2115_v28 = vor.u32 %v2114_v41, %v2113_v25  ;;  %v2046_v12 = vshll.u32 %v8994_v55, 30 }
 0x2d6   : > { %v2571_v32 = vclz %v6529_v14  ;;  %v9001_v36 = vor.u32 %v2209_v19, %v2208_v29  ;;  %v2217_v47 = vshll.u32 %v12378_v9, %v8880_v62  ;;  %v2103_v49 = vshrl.u32 %v12374_v34, %v2102_v35 }
 0x2d7   : > { %v2118_v26 = vor.u32 %v2117_v16, %v2116_v57  ;;  %vm2119_vm10 = vcmp.lt.s32.totalorder %v2100_v6, 1  ;;  %vm2122_vm14 = vcmp.lt.s32.totalorder %v2100_v6, 4  ;;  %v9006_v52 = vsub.s32 %v2043_v4, %v2046_v12 }
 0x2d8   : > { %v6530_v53 = vadd.s32 4294967294, %v2571_v32  ;;  %vm2121_vm13 = vcmp.lt.s32.totalorder %v2100_v6, 3  ;;  %v2124_v30 = vsel %vm2122_vm14, %v2112_v18, 2102212464  ;;  %v2123_v59 = vsel %vm2119_vm10, %v2103_v49, %v2106_v61 }
 0x2d9   : > { %v2125_v51 = vsel %vm2121_vm13, %v2109_v33, %v2124_v30  ;;  %v2128_v29 = vsel %vm2122_vm14, %v2115_v28, 920167782  ;;  %v2218_v19 = vshrl.u32 %v12379_v0, %v8905_v50  ;;  %v2049_v35 = vsub.s32 0, %v9006_v52 }
 0x2da   : > { %vm6531_vm6 = vcmp.lt.s32.totalorder %v6530_v53, 0  ;;  %vm2120_vm9 = vcmp.lt.s32.totalorder %v2100_v6, 2  ;;  %v2127_v32 = vsel %vm2119_vm10, %v2106_v61, %v2109_v33  ;;  %v2129_v4 = vsel %vm2121_vm13, %v2112_v18, %v2128_v29 }
 0x2db   : > { %v2574_v12 = vsel %vm6531_vm6, 0, %v6530_v53  ;;  %v2131_v49 = vsel %vm2119_vm10, %v2109_v33, %v2112_v18  ;;  %v2132_v25 = vsel %vm2122_vm14, %v2118_v26, 1326507024  ;;  %v6509_v46 = vmin.u32 %v2049_v35, %v9006_v52 }
 0x2dc   : > { %v2575_v39 = vsub.s32 32, %v2574_v12  ;;  %v2579_v41 = vsub.s32 4294967266, %v2574_v12  ;;  %v2126_v16 = vsel %vm2120_vm9, %v2123_v59, %v2125_v51  ;;  %v2576_v14 = vshll.u32 %v8978_v24, %v2574_v12 }
 0x2dd   : > { %v2130_v57 = vsel %vm2120_vm9, %v2127_v32, %v2129_v4  ;;  %v2133_v30 = vsel %vm2121_vm13, %v2115_v28, %v2132_v25  ;;  %v2221_v53 = vshrl.u32 %v12372_v40, %v8905_v50  ;;  %v2051_v61 = vclz %v6509_v46 }
 0x2de   : > { %v2577_v33 = vshrl.u32 %v8961_v1, %v2575_v39  ;;  %v2580_v18 = vadd.s32 127, %v2579_v41  ;;  %v2134_v26 = vsel %vm2120_vm9, %v2131_v49, %v2133_v30  ;;  %v2039_v28 = vadd.s32 %v8933_v38, %v8930_v7 }
 0x2df   : > { %v9031_v29 = vmul.u32.u64.low %v8965_v27, %v2134_v26  ;;  %v9032_v35 = vmul.u32.u64.high %v8965_v27, %v2134_v26, %v9031_v29  ;;  %v9035_v59 = vmul.u32.u64.low %v8965_v27, %v2130_v57  ;;  %v9036_v24 = vmul.u32.u64.high %v8965_v27, %v2130_v57, %v9035_v59 }
 0x2e0   : > { %v6510_v51 = vadd.s32 4294967294, %v2051_v61  ;;  %v2581_v50 = vshll.u32 %v2580_v18, 23  ;;  %v2220_v1 = vshll.u32 %v12379_v0, %v8880_v62  ;;  %v2578_v32 = vor.u32 %v2577_v33, %v2576_v14 }
 0x2e1   : > { %v2213_v6 = vor.u32 %v8976_v3, %v8972_v2  ;;  %v2216_v12 = vor.u32 %v2215_v58, %v8982_v15  ;;  %v2219_v4 = vor.u32 %v2218_v19, %v2217_v47  ;;  %v2142_v25 = vmul.u32 %v8965_v27, %v2126_v16 }
 0x2e2   : > { %vm6511_vm1 = vcmp.lt.s32.totalorder %v6510_v51, 0  ;;  %v2582_v49 = vor.u32 4788187, %v2581_v50  ;;  %v2222_v46 = vor.u32 %v2221_v53, %v2220_v1  ;;  %vm2144_vm7 = vc.u32 %v9032_v35, %v9035_v59 }
 0x2e3   : > { %v2054_v39 = vsel %vm6511_vm1, 0, %v6510_v51  ;;  %v2145_v7 = vadd.s32 1, %v9036_v24  ;;  %vm2223_vm8 = vcmp.lt.s32.totalorder %v8942_v42, 1  ;;  %vm2224_vm12 = vcmp.lt.s32.totalorder %v8942_v42, 2 }
 0x2e4   : > { %v2055_v62 = vsub.s32 32, %v2054_v39  ;;  %v2059_v38 = vsub.s32 4294967266, %v2054_v39  ;;  %vm2226_vm2 = vcmp.lt.s32.totalorder %v8942_v42, 4  ;;  %v2585_v2 = vcvt.s32.f32 %v2578_v32 }
 0x2e5   : > { %v2146_v3 = vsel %vm2144_vm7, %v2145_v7, %v9036_v24  ;;  %vm2225_vm0 = vcmp.lt.s32.totalorder %v8942_v42, 3  ;;  %v2232_v27 = vsel %vm2226_vm2, %v2219_v4, 920167782  ;;  %v2583_v58 = vand.u32 2147483647, %v2582_v49 }
 0x2e6   : > { %v2060_v15 = vadd.s32 127, %v2059_v38  ;;  %v2147_v47 = vadd.s32 %v2146_v3, %v2142_v25  ;;  %v2231_v19 = vsel %vm2223_vm8, %v9001_v36, %v2213_v6  ;;  %v2057_v41 = vshrl.u32 %v2039_v28, %v2055_v62 }
 0x2e7   : > { %v2228_v16 = vsel %vm2226_vm2, %v2216_v12, 2102212464  ;;  %v2233_v14 = vsel %vm2225_vm0, %v2216_v12, %v2232_v27  ;;  %v2236_v57 = vsel %vm2226_vm2, %v2222_v46, 1326507024  ;;  %v2227_v61 = vsel %vm2223_vm8, %v8952_v22, %v9001_v36  ;;  %v9079_v22 = vpop.permute.xlu0 %1788 }
 0x2e8   : > { %v2061_v30 = vshll.u32 %v2060_v15, 23  ;;  %v2148_v53 = vadd.s32 536870912, %v2147_v47  ;;  %v2235_v33 = vsel %vm2223_vm8, %v2213_v6, %v2216_v12  ;;  %v2056_v18 = vshll.u32 %v9006_v52, %v2054_v39  ;;  %v9099_v39 = vpop.f32.mrb[7].mxu0 }
 0x2e9   : > { %v2234_v26 = vsel %vm2224_vm12, %v2231_v19, %v2233_v14  ;;  %v2237_v29 = vsel %vm2225_vm0, %v2219_v4, %v2236_v57  ;;  %v9073_v24 = vadd.f32 %v8863_v20, %v8816_v45  ;;  %v2586_v51 = vmul.f32 %v2585_v2, %v2583_v58 }
 0x2ea   : > { %v2062_v28 = vor.u32 4788187, %v2061_v30  ;;  %v9075_v50 = vshrl.u32 %v2148_v53, 30  ;;  %v2229_v36 = vsel %vm2225_vm0, %v2213_v6, %v2228_v16  ;;  %v2058_v52 = vor.u32 %v2057_v41, %v2056_v18 }
 0x2eb   : > { %12458 = vst [vmem:[#allocation4_spill] sm:$0xff] %v9073_v24  ;;  %v2238_v1 = vsel %vm2224_vm12, %v2235_v33, %v2237_v29  ;;  %v9084_v32 = vmul.u32.u64.low %v8944_v43, %v2234_v26  ;;  %v9085_v12 = vmul.u32.u64.high %v8944_v43, %v2234_v26, %v9084_v32  ;;  %vm2505_vm3 = vcmp.lt.s32.totalorder %v8821_v23, 0 }
 0x2ec   : > { %12459 = vst [vmem:[#allocation16_spill] sm:$0xff] %v9075_v50  ;;  %v2150_v20 = vshll.u32 %v9075_v50, 30  ;;  %v9091_v4 = vadd.f32 %v8829_v31, %v9079_v22  ;;  %v9094_v6 = vmul.u32.u64.low %v8944_v43, %v2238_v1  ;;  %v9095_v49 = vmul.u32.u64.high %v8944_v43, %v2238_v1, %v9094_v6 }
 0x2ed   : > { %v12254_v25 = vand.u32 2147483647, %v9073_v24  ;;  %v3135_v46 = vor.u32 8388608, %v8939_v54  ;;  %v2063_v7 = vand.u32 2147483647, %v2062_v28  ;;  %v2230_v38 = vsel %vm2224_vm12, %v2227_v61, %v2229_v36 }
 0x2ee   : > { %v9101_v62 = vsub.s32 %v2147_v47, %v2150_v20  ;;  %v2298_v2 = vand.u32 2139095040, %v9073_v24  ;;  %v2065_v31 = vcvt.s32.f32 %v2058_v52  ;;  %v2587_v3 = vxor.u32 2147483648, %v2586_v51 }
 0x2ef   : > { %v2249_v27 = vadd.s32 1, %v9085_v12  ;;  %vm3138_vm15 = vcmp.gt.s32.totalorder %v8946_v56, 0  ;;  %v2302_v54 = vand.u32 8388607, %v12254_v25  ;;  %v12460_v19 = vand.u32 2147483647, %v8821_v23 }
 0x2f0   : > { %v2153_v15 = vsub.s32 0, %v9101_v62  ;;  %v2299_v58 = vshrl.u32 %v2298_v2, 23  ;;  %v3139_v47 = vsel %vm3138_vm15, %v8946_v56, 0  ;;  %v12461_v42 = vmov 0 }
 0x2f1   : > { %vm9114_vm4 = vcmp.le.f32.partialorder %v12460_v19, 0.7853982  ;;  %v2246_v41 = vmul.u32 %v8944_v43, %v2230_v38  ;;  %vm2248_vm5 = vc.u32 %v9095_v49, %v9084_v32  ;;  %v2818_v16 = vand.u32 2139095040, %v9091_v4 }
 0x2f2   : > { %v12462_v42 = vsel %vm9114_vm4, 4294967295, %v12461_v42  ;;  %v9121_v14 = vmul.f32 %v2065_v31, %v2063_v7  ;;  %v6513_v57 = vmin.u32 %v2153_v15, %v9101_v62  ;;  %v2250_v30 = vsel %vm2248_vm5, %v2249_v27, %v9085_v12 }
 0x2f3   : > { %12463 = vst [vmem:[#allocation14_spill] sm:$0xff] %v12462_v42  ;;  %v6520_v53 = vadd.s32 4294967169, %v2299_v58  ;;  %v2588_v56 = vsel %vm2505_vm3, %v2587_v3, %v2586_v51  ;;  %v2251_v61 = vadd.s32 %v2250_v30, %v2246_v41  ;;  %v9127_v33 = vand.u32 31, %v3139_v47 }
 0x2f4   : > { %v2155_v43 = vclz %v6513_v57  ;;  %v2303_v26 = vor.u32 8388608, %v2302_v54  ;;  %v9130_v28 = vshll.u32 %v3135_v46, 8  ;;  %v2143_v52 = vadd.s32 %v9035_v59, %v9032_v35 }
 0x2f5   : > { %v2305_v29 = vadd.s32 1, %v6520_v53  ;;  %v2252_v1 = vadd.s32 536870912, %v2251_v61  ;;  %v9135_v12 = vshrl.u32 %v2818_v16, 23  ;;  %v9141_v20 = vsel %vm9114_vm4, %v8821_v23, %v2588_v56 }
 0x2f6   : > { %v6514_v6 = vadd.s32 4294967294, %v2155_v43  ;;  %v9144_v46 = vadd.s32 %v9084_v32, %v9095_v49  ;;  %v9149_v35 = vsub.s32 32, %v9127_v33  ;;  %v9151_v2 = vshll.u32 %v2303_v26, 8 }
 0x2f7   : > { %vm2306_vm10 = vcmp.gt.s32.totalorder %v2305_v29, 0  ;;  %v9146_v7 = vshrl.u32 %v2252_v1, 30  ;;  %v9153_v31 = vshrl.u32 %v3139_v47, 5  ;;  %v3144_v15 = vshll.u32 %v12374_v34, %v9127_v33 }
 0x2f8   : > { %v2307_v38 = vsel %vm2306_vm10, %v2305_v29, 0  ;;  %vm6515_vm14 = vcmp.lt.s32.totalorder %v6514_v6, 0  ;;  %v9160_v32 = vshll.u32 %v12375_v60, %v9127_v33  ;;  %v9164_v19 = vshll.u32 %v12376_v5, %v9127_v33 }
 0x2f9   : > { %v2309_v59 = vand.u32 31, %v2307_v38  ;;  %v2158_v3 = vsel %vm6515_vm14, 0, %v6514_v6  ;;  %v2254_v27 = vshll.u32 %v9146_v7, 30  ;;  %v2308_v47 = vshrl.u32 %v2307_v38, 5 }
 0x2fa   : > { %v2159_v49 = vsub.s32 32, %v2158_v3  ;;  %v2163_v58 = vsub.s32 4294967266, %v2158_v3  ;;  %v3145_v57 = vshrl.u32 %v12375_v60, %v9149_v35  ;;  %v2160_v6 = vshll.u32 %v9101_v62, %v2158_v3 }
 0x2fb   : > { %v2310_v54 = vsub.s32 32, %v2309_v59  ;;  %v9166_v41 = vsub.s32 %v2251_v61, %v2254_v27  ;;  %v2312_v16 = vshll.u32 %v12374_v34, %v2309_v59  ;;  %v2315_v56 = vshll.u32 %v12375_v60, %v2309_v59 }
 0x2fc   : > { %v2164_v30 = vadd.s32 127, %v2163_v58  ;;  %v2318_v43 = vshll.u32 %v12376_v5, %v2309_v59  ;;  %v2161_v26 = vshrl.u32 %v2143_v52, %v2159_v49  ;;  %v2321_v27 = vshll.u32 %v12378_v9, %v2309_v59 }
 0x2fd   : > { %v2313_v53 = vshrl.u32 %v12375_v60, %v2310_v54  ;;  %v2257_v29 = vsub.s32 0, %v9166_v41  ;;  %v2316_v1 = vshrl.u32 %v12376_v5, %v2310_v54  ;;  %v2319_v61 = vshrl.u32 %v12378_v9, %v2310_v54 }
 0x2fe   : > { %v2165_v38 = vshll.u32 %v2164_v30, 23  ;;  %v2322_v58 = vshrl.u32 %v12379_v0, %v2310_v54  ;;  %v2324_v49 = vshll.u32 %v12379_v0, %v2309_v59  ;;  %v2325_v42 = vshrl.u32 %v12372_v40, %v2310_v54 }
 0x2ff   : > { %v6517_v25 = vmin.u32 %v2257_v29, %v9166_v41  ;;  %v2314_v18 = vor.u32 %v2313_v53, %v2312_v16  ;;  %v2317_v36 = vor.u32 %v2316_v1, %v2315_v56  ;;  %v2320_v51 = vor.u32 %v2319_v61, %v2318_v43 }
 0x300   : > { %v2166_v50 = vor.u32 4788187, %v2165_v38  ;;  %v2323_v52 = vor.u32 %v2322_v58, %v2321_v27  ;;  %v2162_v23 = vor.u32 %v2161_v26, %v2160_v6  ;;  %v3148_v62 = vshrl.u32 %v12376_v5, %v9149_v35 }
 0x301   : > { %v2259_v13 = vclz %v6517_v25  ;;  %v3151_v3 = vshrl.u32 %v12378_v9, %v9149_v35  ;;  %v2311_v30 = vshrl.u32 %v12374_v34, %v2310_v54  ;;  %v2326_v29 = vor.u32 %v2325_v42, %v2324_v49 }
 0x302   : > { %vm2327_vm13 = vcmp.lt.s32.totalorder %v2308_v47, 1  ;;  %vm2330_vm6 = vcmp.lt.s32.totalorder %v2308_v47, 4  ;;  %vm2329_vm9 = vcmp.lt.s32.totalorder %v2308_v47, 3  ;;  %v2167_v59 = vand.u32 2147483647, %v2166_v50 }
 0x303   : > { %v6518_v16 = vadd.s32 4294967294, %v2259_v13  ;;  %v2332_v53 = vsel %vm2330_vm6, %v2320_v51, 2102212464  ;;  %v2336_v56 = vsel %vm2330_vm6, %v2323_v52, 920167782  ;;  %v2335_v43 = vsel %vm2327_vm13, %v2314_v18, %v2317_v36 }
 0x304   : > { %v2337_v1 = vsel %vm2329_vm9, %v2320_v51, %v2336_v56  ;;  %v2339_v26 = vsel %vm2327_vm13, %v2317_v36, %v2320_v51  ;;  %v2169_v25 = vcvt.s32.f32 %v2162_v23  ;;  %vm2328_vm7 = vcmp.lt.s32.totalorder %v2308_v47, 2 }
 0x305   : > { %vm6519_vm1 = vcmp.lt.s32.totalorder %v6518_v16, 0  ;;  %v2340_v61 = vsel %vm2330_vm6, %v2326_v29, 1326507024  ;;  %v2331_v38 = vsel %vm2327_vm13, %v2311_v30, %v2314_v18  ;;  %v2333_v27 = vsel %vm2329_vm9, %v2317_v36, %v2332_v53 }
 0x306   : > { %v2262_v6 = vsel %vm6519_vm1, 0, %v6518_v16  ;;  %v2341_v58 = vsel %vm2329_vm9, %v2323_v52, %v2340_v61  ;;  %vm3159_vm8 = vcmp.lt.s32.totalorder %v9153_v31, 1  ;;  %v2338_v13 = vsel %vm2328_vm7, %v2335_v43, %v2337_v1 }
 0x307   : > { %v2263_v42 = vsub.s32 32, %v2262_v6  ;;  %v2267_v54 = vsub.s32 4294967266, %v2262_v6  ;;  %v2342_v49 = vsel %vm2328_vm7, %v2339_v26, %v2341_v58  ;;  %v2170_v50 = vmul.f32 %v2169_v25, %v2167_v59 }
 0x308   : > { %v9192_v56 = vmul.u32.u64.low %v9151_v2, %v2342_v49  ;;  %v9193_v51 = vmul.u32.u64.high %v9151_v2, %v2342_v49, %v9192_v56  ;;  %v3146_v23 = vor.u32 %v3145_v57, %v3144_v15  ;;  %vm1985_vm12 = vcmp.lt.s32.totalorder %v8852_v17, 0 }
 0x309   : > { %v2264_v18 = vshll.u32 %v9166_v41, %v2262_v6  ;;  %v2265_v36 = vshrl.u32 %v9144_v46, %v2263_v42  ;;  %v2268_v52 = vadd.s32 127, %v2267_v54  ;;  %v2334_v30 = vsel %vm2328_vm7, %v2331_v38, %v2333_v27 }
 0x30a   : > { %vm2089_vm2 = vcmp.lt.s32.totalorder %v8889_v8, 0  ;;  %v9201_v29 = vmul.u32.u64.low %v9151_v2, %v2338_v13  ;;  %v9202_v16 = vmul.u32.u64.high %v9151_v2, %v2338_v13, %v9201_v29  ;;  %v3149_v53 = vor.u32 %v3148_v62, %v9160_v32 }
 0x30b   : > { %v3152_v15 = vor.u32 %v3151_v3, %v9164_v19  ;;  %v2266_v57 = vor.u32 %v2265_v36, %v2264_v18  ;;  %v2269_v59 = vshll.u32 %v2268_v52, 23  ;;  %v3153_v41 = vshll.u32 %v12378_v9, %v9127_v33 }
 0x30c   : > { %v3154_v46 = vshrl.u32 %v12379_v0, %v9149_v35  ;;  %v2171_v47 = vxor.u32 2147483648, %v2170_v50  ;;  %v3143_v43 = vshrl.u32 %v12374_v34, %v9149_v35  ;;  %v3156_v1 = vshll.u32 %v12379_v0, %v9127_v33 }
 0x30d   : > { %v3157_v32 = vshrl.u32 %v12372_v40, %v9149_v35  ;;  %v2270_v62 = vor.u32 4788187, %v2269_v59  ;;  %v2350_v19 = vmul.u32 %v9151_v2, %v2334_v30  ;;  %vm2352_vm0 = vc.u32 %v9193_v51, %v9201_v29 }
 0x30e   : > { %v3155_v3 = vor.u32 %v3154_v46, %v3153_v41  ;;  %v12464_v26 = vand.u32 2147483647, %v8852_v17  ;;  %v2273_v61 = vcvt.s32.f32 %v2266_v57  ;;  %v2353_v6 = vadd.s32 1, %v9202_v16 }
 0x30f   : > { %v3158_v33 = vor.u32 %v3157_v32, %v3156_v1  ;;  %vm3162_vm5 = vcmp.lt.s32.totalorder %v9153_v31, 4  ;;  %v2271_v35 = vand.u32 2147483647, %v2270_v62  ;;  %vm3160_vm10 = vcmp.lt.s32.totalorder %v9153_v31, 2 }
 0x310   : > { %vm9222_vm15 = vcmp.le.f32.partialorder %v12464_v26, 0.7853982  ;;  %v3164_v2 = vsel %vm3162_vm5, %v3152_v15, 2102212464  ;;  %v3167_v38 = vsel %vm3159_vm8, %v3146_v23, %v3149_v53  ;;  %v2354_v27 = vsel %vm2352_vm0, %v2353_v6, %v9202_v16 }
 0x311   : > { %vm3161_vm14 = vcmp.lt.s32.totalorder %v9153_v31, 3  ;;  %v3163_v58 = vsel %vm3159_vm8, %v3143_v43, %v3146_v23  ;;  %v3168_v42 = vsel %vm3162_vm5, %v3155_v3, 920167782  ;;  %v2355_v54 = vadd.s32 %v2354_v27, %v2350_v19 }
 0x312   : > { %v3165_v13 = vsel %vm3161_vm14, %v3149_v53, %v3164_v2  ;;  %v3169_v49 = vsel %vm3161_vm14, %v3152_v15, %v3168_v42  ;;  %v3171_v56 = vsel %vm3159_vm8, %v3149_v53, %v3152_v15  ;;  %v12467_v18 = vxor.u32 2147483648, %v9121_v14 }
 0x313   : > { %v3170_v52 = vsel %vm3160_vm10, %v3167_v38, %v3169_v49  ;;  %v3172_v30 = vsel %vm3162_vm5, %v3158_v33, 1326507024  ;;  %v9246_v23 = vadd.f32 %v8869_v44, %v8816_v45  ;;  %v2172_v16 = vsel %vm2089_vm2, %v2171_v47, %v2170_v50 }
 0x314   : > { %v2068_v36 = vsel %vm1985_vm12, %v12467_v18, %v9121_v14  ;;  %v2274_v57 = vmul.f32 %v2273_v61, %v2271_v35  ;;  %v2356_v59 = vadd.s32 536870912, %v2355_v54  ;;  %v3173_v53 = vsel %vm3161_vm14, %v3155_v3, %v3172_v30 }
 0x315   : > { %vm2193_vm13 = vcmp.lt.s32.totalorder %v8824_v21, 0  ;;  %v3166_v15 = vsel %vm3160_vm10, %v3163_v58, %v3165_v13  ;;  %v3174_v14 = vsel %vm3160_vm10, %v3171_v56, %v3173_v53  ;;  %v12262_v50 = vand.u32 2147483647, %v9246_v23 }
 0x316   : > { %v9256_v41 = vmul.u32.u64.low %v9130_v28, %v3170_v52  ;;  %v9257_v46 = vmul.u32.u64.high %v9130_v28, %v3170_v52, %v9256_v41  ;;  %v2357_v45 = vshrl.u32 %v2356_v59, 30  ;;  %v12468_v47 = vsub.s32 4, %v8994_v55 }
 0x317   : > { %v9260_v44 = vmul.u32.u64.low %v9130_v28, %v3174_v14  ;;  %v9261_v43 = vmul.u32.u64.high %v9130_v28, %v3174_v14, %v9260_v44  ;;  %7118 = vcosq.f32 %v9141_v20  ;;  %v12469_v31 = vand.u32 2147483647, %v8889_v8 }
 0x318   : > { %v9269_v1 = vsel %vm1985_vm12, %v12468_v47, %v8994_v55  ;;  %v2402_v62 = vand.u32 2139095040, %v9246_v23  ;;  %v2071_v19 = vsel %vm9222_vm15, %v8852_v17, %v2068_v36  ;;  %7120 = vsinq.f32 %v9141_v20 }
 0x319   : > { %vm9274_vm6 = vcmp.le.f32.partialorder %v12469_v31, 0.7853982  ;;  %v12472_v3 = vand.u32 2147483647, %v8824_v21  ;;  %v2358_v26 = vshll.u32 %v2357_v45, 30  ;;  %v6540_v61 = vadd.s32 4294967169, %v9135_v12 }
 0x31a   : > { %v2175_v6 = vsel %vm9274_vm6, %v8889_v8, %v2172_v16  ;;  %v3182_v33 = vmul.u32 %v9130_v28, %v3166_v15  ;;  %v3185_v35 = vadd.s32 1, %v9257_v46  ;;  %v2403_v2 = vshrl.u32 %v2402_v62, 23 }
 0x31b   : > { %vm9285_vm9 = vcmp.le.f32.partialorder %v12472_v3, 0.7853982  ;;  %v2275_v38 = vxor.u32 2147483648, %v2274_v57  ;;  %v9295_v20 = vsub.s32 %v2355_v54, %v2358_v26  ;;  %vm3184_vm1 = vc.u32 %v9261_v43, %v9256_v41 }
 0x31c   : > { %v2406_v27 = vand.u32 8388607, %v12262_v50  ;;  %7122 = vcosq.f32 %v2071_v19  ;;  %v3186_v12 = vsel %vm3184_vm1, %v3185_v35, %v9257_v46  ;;  %v6524_v58 = vadd.s32 4294967169, %v2403_v2 }
 0x31d   : > { %v12475_v42 = vand.u32 2147483647, %v9091_v4  ;;  %7124 = vsinq.f32 %v2071_v19  ;;  %v2361_v28 = vsub.s32 0, %v9295_v20  ;;  %v3187_v49 = vadd.s32 %v3186_v12, %v3182_v33 }
 0x31e   : > { %v2825_v56 = vadd.s32 1, %v6540_v61  ;;  %7126 = vcosq.f32 %v2175_v6  ;;  %v2381_v18 = vsub.s32 4, %v2357_v45  ;;  %v2409_v36 = vadd.s32 1, %v6524_v58 }
 0x31f   : > { %v2822_v13 = vand.u32 8388607, %v12475_v42  ;;  %v2276_v52 = vsel %vm2193_vm13, %v2275_v38, %v2274_v57  ;;  %v6521_v30 = vmin.u32 %v2361_v28, %v9295_v20  ;;  %v3188_v16 = vadd.s32 536870912, %v3187_v49 }
 0x320   : > { %v2407_v59 = vor.u32 8388608, %v2406_v27  ;;  %7128 = vsinq.f32 %v2175_v6  ;;  %vm2297_vm7 = vcmp.lt.s32.totalorder %v9073_v24, 0  ;;  %vm2410_vm8 = vcmp.gt.s32.totalorder %v2409_v36, 0 }
 0x321   : > { %v2823_v53 = vor.u32 8388608, %v2822_v13  ;;  %v2363_v15 = vclz %v6521_v30  ;;  %v9311_v14 = vshrl.u32 %v3188_v16, 30  ;;  %v2411_v46 = vsel %vm2410_vm8, %v2409_v36, 0  ;;  %v9313_v44 = vpop.eup %7118 }
 0x322   : > { %vm2826_vm12 = vcmp.gt.s32.totalorder %v2825_v56, 0  ;;  %v9318_v57 = vsel %vm9285_vm9, %v8824_v21, %v2276_v52  ;;  %v2351_v47 = vadd.s32 %v9201_v29, %v9193_v51  ;;  %v9324_v31 = vsel %vm2297_vm7, %v2381_v18, %v2357_v45  ;;  %v9326_v19 = vpop.eup %7120 }
 0x323   : > { %v2413_v62 = vand.u32 31, %v2411_v46  ;;  %v6522_v3 = vadd.s32 4294967294, %v2363_v15  ;;  %v9329_v26 = vadd.s32 %v9256_v41, %v9261_v43  ;;  %v3190_v61 = vshll.u32 %v9311_v14, 30 }
 0x324   : > { %v9332_v6 = vshll.u32 %v2407_v59, 8  ;;  %v9334_v33 = vshrl.u32 %v2411_v46, 5  ;;  %v9336_v2 = vsel %vm2826_vm12, %v2825_v56, 0  ;;  %v9338_v51 = vshll.u32 %v2823_v53, 8 }
 0x325   : > { %v2414_v35 = vsub.s32 32, %v2413_v62  ;;  %vm6523_vm0 = vcmp.lt.s32.totalorder %v6522_v3, 0  ;;  %v9340_v29 = vsub.s32 %v3187_v49, %v3190_v61  ;;  %v2416_v45 = vshll.u32 %v12374_v34, %v2413_v62 }
 0x326   : > { %v2419_v38 = vshll.u32 %v12375_v60, %v2413_v62  ;;  %v9344_v41 = vpop.eup %7122  ;;  %v2366_v43 = vsel %vm6523_vm0, 0, %v6522_v3  ;;  %v2422_v58 = vshll.u32 %v12376_v5, %v2413_v62  ;;  %v2425_v49 = vshll.u32 %v12378_v9, %v2413_v62 }
 0x327   : > { %12476 = vst [vmem:[#allocation12_spill] sm:$0xff] %v9344_v41  ;;  %v2417_v27 = vshrl.u32 %v12375_v60, %v2414_v35  ;;  %v2420_v12 = vshrl.u32 %v12376_v5, %v2414_v35  ;;  %v9349_v42 = vpop.eup %7124  ;;  %v2371_v13 = vsub.s32 4294967266, %v2366_v43  ;;  %v3193_v28 = vsub.s32 0, %v9340_v29 }
 0x328   : > { %12477 = vst [vmem:[#allocation28_spill] sm:$0xff] %v9349_v42  ;;  %v2428_v56 = vshll.u32 %v12379_v0, %v2413_v62  ;;  %v9354_v18 = vpop.eup %7126  ;;  %v2367_v36 = vsub.s32 32, %v2366_v43  ;;  %v2423_v30 = vshrl.u32 %v12378_v9, %v2414_v35  ;;  %v2426_v16 = vshrl.u32 %v12379_v0, %v2414_v35 }
 0x329   : > { %v2418_v52 = vor.u32 %v2417_v27, %v2416_v45  ;;  %v2372_v59 = vadd.s32 127, %v2371_v13  ;;  %v6553_v53 = vmin.u32 %v3193_v28, %v9340_v29  ;;  %v2421_v15 = vor.u32 %v2420_v12, %v2419_v38 }
 0x32a   : > { %v2429_v46 = vshrl.u32 %v12372_v40, %v2414_v35  ;;  %v9360_v3 = vpop.eup %7128  ;;  %v2424_v61 = vor.u32 %v2423_v30, %v2422_v58  ;;  %v2427_v50 = vor.u32 %v2426_v16, %v2425_v49  ;;  %v9364_v62 = vadd.f32 %v8876_v11, %v9079_v22 }
 0x32b   : > { %v9368_v45 = vadd.f32 %v8925_v48, %v9079_v22  ;;  %v2373_v27 = vshll.u32 %v2372_v59, 23  ;;  %v3195_v54 = vclz %v6553_v53  ;;  %v2829_v28 = vand.u32 31, %v9336_v2 }
 0x32c   : > { %v2430_v13 = vor.u32 %v2429_v46, %v2428_v56  ;;  %v2369_v38 = vshrl.u32 %v2351_v47, %v2367_v36  ;;  %v2415_v12 = vshrl.u32 %v12374_v34, %v2414_v35  ;;  %vm2431_vm5 = vcmp.lt.s32.totalorder %v9334_v33, 1 }
 0x32d   : > { %vm2432_vm10 = vcmp.lt.s32.totalorder %v9334_v33, 2  ;;  %v6554_v58 = vadd.s32 4294967294, %v3195_v54  ;;  %vm2433_vm14 = vcmp.lt.s32.totalorder %v9334_v33, 3  ;;  %vm2434_vm1 = vcmp.lt.s32.totalorder %v9334_v33, 4 }
 0x32e   : > { %v2439_v11 = vsel %vm2431_vm5, %v2418_v52, %v2421_v15  ;;  %v2368_v48 = vshll.u32 %v9295_v20, %v2366_v43  ;;  %v2436_v22 = vsel %vm2434_vm1, %v2424_v61, 2102212464  ;;  %v2440_v49 = vsel %vm2434_vm1, %v2427_v50, 920167782 }
 0x32f   : > { %v2444_v56 = vsel %vm2434_vm1, %v2430_v13, 1326507024  ;;  %v2374_v47 = vor.u32 4788187, %v2373_v27  ;;  %vm6555_vm8 = vcmp.lt.s32.totalorder %v6554_v58, 0  ;;  %v2441_v35 = vsel %vm2433_vm14, %v2424_v61, %v2440_v49 }
 0x330   : > { %v2443_v54 = vsel %vm2431_vm5, %v2421_v15, %v2424_v61  ;;  %v2370_v36 = vor.u32 %v2369_v38, %v2368_v48  ;;  %v3198_v30 = vsel %vm6555_vm8, 0, %v6554_v58  ;;  %v2442_v16 = vsel %vm2432_vm10, %v2439_v11, %v2441_v35 }
 0x331   : > { %v2445_v59 = vsel %vm2433_vm14, %v2427_v50, %v2444_v56  ;;  %v3199_v20 = vsub.s32 32, %v3198_v30  ;;  %v3203_v43 = vsub.s32 4294967266, %v3198_v30  ;;  %v2435_v53 = vsel %vm2431_vm5, %v2415_v12, %v2418_v52 }
 0x332   : > { %v2437_v46 = vsel %vm2433_vm14, %v2421_v15, %v2436_v22  ;;  %v2446_v27 = vsel %vm2432_vm10, %v2443_v54, %v2445_v59  ;;  %v9394_v61 = vmul.u32.u64.low %v9332_v6, %v2442_v16  ;;  %v9395_v13 = vmul.u32.u64.high %v9332_v6, %v2442_v16, %v9394_v61 }
 0x333   : > { %v2830_v38 = vsub.s32 32, %v2829_v28  ;;  %v2375_v58 = vand.u32 2147483647, %v2374_v47  ;;  %v3200_v50 = vshll.u32 %v9340_v29, %v3198_v30  ;;  %v3201_v11 = vshrl.u32 %v9329_v26, %v3199_v20 }
 0x334   : > { %v3204_v48 = vadd.s32 127, %v3203_v43  ;;  %v2438_v52 = vsel %vm2432_vm10, %v2435_v53, %v2437_v46  ;;  %v9403_v15 = vmul.u32.u64.low %v9332_v6, %v2446_v27  ;;  %v9404_v12 = vmul.u32.u64.high %v9332_v6, %v2446_v27, %v9403_v15 }
 0x335   : > { %v2833_v22 = vshrl.u32 %v12375_v60, %v2830_v38  ;;  %v2377_v49 = vcvt.s32.f32 %v2370_v36  ;;  %v3202_v56 = vor.u32 %v3201_v11, %v3200_v50  ;;  %v2832_v54 = vshll.u32 %v12374_v34, %v2829_v28 }
 0x336   : > { %v3205_v35 = vshll.u32 %v3204_v48, 23  ;;  %v2457_v47 = vadd.s32 1, %v9395_v13  ;;  %v2828_v29 = vshrl.u32 %v9336_v2, 5  ;;  %v2835_v26 = vshll.u32 %v12375_v60, %v2829_v28 }
 0x337   : > { %v2836_v33 = vshrl.u32 %v12376_v5, %v2830_v38  ;;  %v2378_v30 = vmul.f32 %v2377_v49, %v2375_v58  ;;  %v2454_v59 = vmul.u32 %v9332_v6, %v2438_v52  ;;  %v2834_v20 = vor.u32 %v2833_v22, %v2832_v54 }
 0x338   : > { %v3206_v16 = vor.u32 4788187, %v3205_v35  ;;  %v3209_v43 = vcvt.s32.f32 %v3202_v56  ;;  %vm2456_vm12 = vc.u32 %v9404_v12, %v9394_v61  ;;  %v2838_v53 = vshll.u32 %v12376_v5, %v2829_v28 }
 0x339   : > { %v2837_v36 = vor.u32 %v2836_v33, %v2835_v26  ;;  %v2458_v27 = vsel %vm2456_vm12, %v2457_v47, %v9395_v13  ;;  %v2839_v2 = vshrl.u32 %v12378_v9, %v2830_v38  ;;  %v2841_v50 = vshll.u32 %v12378_v9, %v2829_v28 }
 0x33a   : > { %v3207_v46 = vand.u32 2147483647, %v3206_v16  ;;  %v12478_v58 = vand.u32 2147483647, %v9073_v24  ;;  %v2459_v6 = vadd.s32 %v2458_v27, %v2454_v59  ;;  %v2842_v48 = vshrl.u32 %v12379_v0, %v2830_v38 }
 0x33b   : > { %v2844_v52 = vshll.u32 %v12379_v0, %v2829_v28  ;;  %v2845_v15 = vshrl.u32 %v12372_v40, %v2830_v38  ;;  %vm12271_vm5 = vcmp.lt.s32.totalorder %v8836_v37, 0  ;;  %v2840_v22 = vor.u32 %v2839_v2, %v2838_v53 }
 0x33c   : > { %vm9421_vm0 = vcmp.le.f32.partialorder %v12478_v58, 0.7853982  ;;  %v3210_v13 = vmul.f32 %v3209_v43, %v3207_v46  ;;  %vm2847_vm10 = vcmp.lt.s32.totalorder %v2828_v29, 1  ;;  %v2460_v56 = vadd.s32 536870912, %v2459_v6 }
 0x33d   : > { %v2843_v35 = vor.u32 %v2842_v48, %v2841_v50  ;;  %v2846_v54 = vor.u32 %v2845_v15, %v2844_v52  ;;  %vm2850_vm14 = vcmp.lt.s32.totalorder %v2828_v29, 4  ;;  %v2379_v47 = vxor.u32 2147483648, %v2378_v30 }
 0x33e   : > { %v2852_v26 = vsel %vm2850_vm14, %v2840_v22, 2102212464  ;;  %v2855_v33 = vsel %vm2847_vm10, %v2834_v20, %v2837_v36  ;;  %v2859_v16 = vsel %vm2847_vm10, %v2837_v36, %v2840_v22  ;;  %v12481_v28 = vand.u32 2147483647, %v8836_v37 }
 0x33f   : > { %v9438_v43 = vshrl.u32 %v2460_v56, 30  ;;  %vm2849_vm8 = vcmp.lt.s32.totalorder %v2828_v29, 3  ;;  %v2856_v53 = vsel %vm2850_vm14, %v2843_v35, 920167782  ;;  %v2860_v46 = vsel %vm2850_vm14, %v2846_v54, 1326507024 }
 0x340   : > { %vm9434_vm1 = vcmp.le.f32.partialorder %v12481_v28, 0.7853982  ;;  %v2831_v27 = vshrl.u32 %v12374_v34, %v2830_v38  ;;  %vm2848_vm12 = vcmp.lt.s32.totalorder %v2828_v29, 2  ;;  %v2857_v2 = vsel %vm2849_vm8, %v2840_v22, %v2856_v53 }
 0x341   : > { %v2861_v50 = vsel %vm2849_vm8, %v2843_v35, %v2860_v46  ;;  %v3211_v58 = vxor.u32 2147483648, %v3210_v13  ;;  %v2462_v48 = vshll.u32 %v9438_v43, 30  ;;  %v2858_v52 = vsel %vm2848_vm12, %v2855_v33, %v2857_v2 }
 0x342   : > { %v2862_v15 = vsel %vm2848_vm12, %v2859_v16, %v2861_v50  ;;  %v2851_v28 = vsel %vm2847_vm10, %v2831_v27, %v2834_v20  ;;  %v2853_v49 = vsel %vm2849_vm8, %v2837_v36, %v2852_v26  ;;  %v2380_v38 = vsel %vm2297_vm7, %v2379_v47, %v2378_v30 }
 0x343   : > { %v9446_v56 = vmul.u32.u64.low %v9338_v51, %v2862_v15  ;;  %v9447_v17 = vmul.u32.u64.high %v9338_v51, %v2862_v15, %v9446_v56  ;;  %v9451_v54 = vsub.s32 %v2459_v6, %v2462_v48  ;;  %v12484_v33 = vsel %vm9222_vm15, 0, %v9269_v1 }
 0x344   : > { %v9454_v22 = vmul.u32.u64.low %v9338_v51, %v2858_v52  ;;  %v9455_v35 = vmul.u32.u64.high %v9338_v51, %v2858_v52, %v9454_v22  ;;  %v9461_v16 = vadd.s32 3, %v12484_v33  ;;  %7130 = vcosq.f32 %v9318_v57 }
 0x345   : > { %v2384_v20 = vsel %vm9421_vm0, 0, %v9324_v31  ;;  %v2610_v30 = vand.u32 2139095040, %v9364_v62  ;;  %v3212_v36 = vsel %vm12271_vm5, %v3211_v58, %v3210_v13  ;;  %v2465_v6 = vsub.s32 0, %v9451_v54 }
 0x346   : > { %12485 = vst [vmem:[#allocation24_spill] sm:$0xff] %v9461_v16  ;;  %v2854_v25 = vsel %vm2848_vm12, %v2851_v28, %v2853_v49  ;;  %v2714_v1 = vand.u32 2139095040, %v9368_v45  ;;  %v2383_v47 = vsel %vm9421_vm0, %v9073_v24, %v2380_v38  ;;  %vm2872_vm15 = vc.u32 %v9447_v17, %v9454_v22  ;;  %v6556_v49 = vld [vmem:[%s8740_s18 + $0x20] sm:$0xff] }
 0x347   : > { %v2611_v26 = vshrl.u32 %v2610_v30, 23  ;;  %v12486_v31 = vand.u32 2147483647, %v9364_v62  ;;  %7132 = vsinq.f32 %v9318_v57  ;;  %v6525_v13 = vmin.u32 %v2465_v6, %v9451_v54  ;;  %6741 = vmatprep.mubr.msk.f32.mxu0 %vm12270_vm11, %v6556_v49 }
 0x348   : > { %v2873_v46 = vadd.s32 1, %v9455_v35  ;;  %v2715_v29 = vshrl.u32 %v2714_v1, 23  ;;  %v9483_v27 = vadd.s32 3, %v2384_v20  ;;  %v3215_v11 = vsel %vm9434_vm1, %v8836_v37, %v3212_v36 }
 0x349   : > { %v2614_v53 = vand.u32 8388607, %v12486_v31  ;;  %v2870_v2 = vmul.u32 %v9338_v51, %v2854_v25  ;;  %v6532_v50 = vadd.s32 4294967169, %v2611_v26  ;;  %7134 = vcosq.f32 %v2383_v47 }
 0x34a   : > { %12487 = vst [vmem:[#allocation27_spill] sm:$0xff] %v9483_v27  ;;  %v2467_v58 = vclz %v6525_v13  ;;  %v2874_v57 = vsel %vm2872_vm15, %v2873_v46, %v9455_v35  ;;  %v6536_v48 = vadd.s32 4294967169, %v2715_v29  ;;  %7136 = vsinq.f32 %v2383_v47 }
 0x34b   : > { %v2875_v52 = vadd.s32 %v2874_v57, %v2870_v2  ;;  %v2615_v15 = vor.u32 8388608, %v2614_v53  ;;  %v2617_v28 = vadd.s32 1, %v6532_v50  ;;  %7138 = vcosq.f32 %v3215_v11 }
 0x34c   : > { %v2455_v56 = vadd.s32 %v9394_v61, %v9404_v12  ;;  %v6526_v38 = vadd.s32 4294967294, %v2467_v58  ;;  %v2721_v33 = vadd.s32 1, %v6536_v48  ;;  %7140 = vsinq.f32 %v3215_v11 }
 0x34d   : > { %v2876_v51 = vadd.s32 536870912, %v2875_v52  ;;  %vm2618_vm7 = vcmp.gt.s32.totalorder %v2617_v28, 0  ;;  %v12268_v20 = vand.u32 2147483647, %v9368_v45  ;;  %v9495_v30 = vadd.s32 %v9454_v22, %v9447_v17 }
 0x34e   : > { %vm6527_vm0 = vcmp.lt.s32.totalorder %v6526_v38, 0  ;;  %v2619_v35 = vsel %vm2618_vm7, %v2617_v28, 0  ;;  %v9499_v36 = vadd.f32 %v9014_v63, %v8831_v10  ;;  %v9501_v6 = vpop.eup %7130  ;;  %v9505_v1 = vshll.u32 %v2615_v15, 8 }
 0x34f   : > { %v2470_v25 = vsel %vm6527_vm0, 0, %v6526_v38  ;;  %v9503_v61 = vshrl.u32 %v2876_v51, 30  ;;  %v2621_v12 = vand.u32 31, %v2619_v35  ;;  %v9507_v31 = vshrl.u32 %v2619_v35, 5 }
 0x350   : > { %v2471_v47 = vsub.s32 32, %v2470_v25  ;;  %v2475_v26 = vsub.s32 4294967266, %v2470_v25  ;;  %vm2722_vm10 = vcmp.gt.s32.totalorder %v2721_v33, 0  ;;  %v2472_v17 = vshll.u32 %v9451_v54, %v2470_v25 }
 0x351   : > { %v2878_v22 = vshll.u32 %v9503_v61, 30  ;;  %v2622_v53 = vsub.s32 32, %v2621_v12  ;;  %v2624_v63 = vshll.u32 %v12374_v34, %v2621_v12  ;;  %v9512_v13 = vpop.eup %7132  ;;  %v2627_v49 = vshll.u32 %v12375_v60, %v2621_v12 }
 0x352   : > { %v2473_v46 = vshrl.u32 %v2455_v56, %v2471_v47  ;;  %v2476_v29 = vadd.s32 127, %v2475_v26  ;;  %v2630_v11 = vshll.u32 %v12376_v5, %v2621_v12  ;;  %v2633_v54 = vshll.u32 %v12378_v9, %v2621_v12 }
 0x353   : > { %v9516_v2 = vsub.s32 %v2875_v52, %v2878_v22  ;;  %v2625_v50 = vshrl.u32 %v12375_v60, %v2622_v53  ;;  %v2628_v58 = vshrl.u32 %v12376_v5, %v2622_v53  ;;  %v9521_v57 = vpop.eup %7134  ;;  %v2631_v28 = vshrl.u32 %v12378_v9, %v2622_v53 }
 0x354   : > { %12488 = vst [vmem:[#allocation3_spill] sm:$0xff] %v9521_v57  ;;  %v2474_v48 = vor.u32 %v2473_v46, %v2472_v17  ;;  %v2477_v15 = vshll.u32 %v2476_v29, 23  ;;  %v2634_v56 = vshrl.u32 %v12379_v0, %v2622_v53  ;;  %v9525_v38 = vpop.eup %7136  ;;  %v2718_v25 = vand.u32 8388607, %v12268_v20 }
 0x355   : > { %12489 = vst [vmem:[#allocation22_spill] sm:$0xff] %v9525_v38  ;;  %v2881_v51 = vsub.s32 0, %v9516_v2  ;;  %v2626_v52 = vor.u32 %v2625_v50, %v2624_v63  ;;  %v2629_v35 = vor.u32 %v2628_v58, %v2627_v49  ;;  %v9530_v47 = vpop.eup %7138  ;;  %v2632_v26 = vor.u32 %v2631_v28, %v2630_v11 }
 0x356   : > { %12490 = vst [vmem:[#allocation19_spill] sm:$0xff] %v9530_v47  ;;  %v2635_v22 = vor.u32 %v2634_v56, %v2633_v54  ;;  %v2723_v17 = vsel %vm2722_vm10, %v2721_v33, 0  ;;  %v9534_v29 = vpop.eup %7140  ;;  %v2478_v24 = vor.u32 4788187, %v2477_v15  ;;  %v2636_v38 = vshll.u32 %v12379_v0, %v2621_v12 }
 0x357   : > { %12491 = vst [vmem:[#allocation21_spill] sm:$0xff] %v9534_v29  ;;  %v6541_v57 = vmin.u32 %v2881_v51, %v9516_v2  ;;  %v2637_v63 = vshrl.u32 %v12372_v40, %v2622_v53  ;;  %v2481_v49 = vcvt.s32.f32 %v2474_v48  ;;  %v2623_v50 = vshrl.u32 %v12374_v34, %v2622_v53 }
 0x358   : > { %vm2639_vm14 = vcmp.lt.s32.totalorder %v9507_v31, 1  ;;  %vm2642_vm8 = vcmp.lt.s32.totalorder %v9507_v31, 4  ;;  %vm2640_vm12 = vcmp.lt.s32.totalorder %v9507_v31, 2  ;;  %vm2641_vm15 = vcmp.lt.s32.totalorder %v9507_v31, 3 }
 0x359   : > { %v2883_v11 = vclz %v6541_v57  ;;  %v2638_v33 = vor.u32 %v2637_v63, %v2636_v38  ;;  %v2644_v58 = vsel %vm2642_vm8, %v2632_v26, 2102212464  ;;  %v2647_v54 = vsel %vm2639_vm14, %v2626_v52, %v2629_v35 }
 0x35a   : > { %v2648_v15 = vsel %vm2642_vm8, %v2635_v22, 920167782  ;;  %v2651_v28 = vsel %vm2639_vm14, %v2629_v35, %v2632_v26  ;;  %v2479_v12 = vand.u32 2147483647, %v2478_v24  ;;  %v2643_v20 = vsel %vm2639_vm14, %v2623_v50, %v2626_v52 }
 0x35b   : > { %v6542_v56 = vadd.s32 4294967294, %v2883_v11  ;;  %v2649_v51 = vsel %vm2641_vm15, %v2632_v26, %v2648_v15  ;;  %v2652_v48 = vsel %vm2642_vm8, %v2638_v33, 1326507024  ;;  %v2645_v53 = vsel %vm2641_vm15, %v2629_v35, %v2644_v58 }
 0x35c   : > { %v2650_v46 = vsel %vm2640_vm12, %v2647_v54, %v2649_v51  ;;  %v2653_v27 = vsel %vm2641_vm15, %v2635_v22, %v2652_v48  ;;  %v2719_v52 = vor.u32 8388608, %v2718_v25  ;;  %v2482_v35 = vmul.f32 %v2481_v49, %v2479_v12 }
 0x35d   : > { %vm6543_vm7 = vcmp.lt.s32.totalorder %v6542_v56, 0  ;;  %v2654_v57 = vsel %vm2640_vm12, %v2651_v28, %v2653_v27  ;;  %v9549_v38 = vmul.u32.u64.low %v9505_v1, %v2650_v46  ;;  %v9550_v63 = vmul.u32.u64.high %v9505_v1, %v2650_v46, %v9549_v38 }
 0x35e   : > { %v2886_v41 = vsel %vm6543_vm7, 0, %v6542_v56  ;;  %v9554_v24 = vmul.u32.u64.low %v9505_v1, %v2654_v57  ;;  %v9555_v26 = vmul.u32.u64.high %v9505_v1, %v2654_v57, %v9554_v24  ;;  %v2646_v22 = vsel %vm2640_vm12, %v2643_v20, %v2645_v53 }
 0x35f   : > { %v2887_v50 = vsub.s32 32, %v2886_v41  ;;  %v2891_v11 = vsub.s32 4294967266, %v2886_v41  ;;  %vm12280_vm0 = vcmp.lt.s32.totalorder %v9246_v23, 0  ;;  %v2725_v27 = vand.u32 31, %v2723_v17 }
 0x360   : > { %v2922_v33 = vand.u32 2139095040, %v9499_v36  ;;  %v12492_v46 = vand.u32 2147483647, %v9499_v36  ;;  %v9567_v54 = vadd.f32 %v9099_v39, %v8831_v10  ;;  %v2888_v25 = vshll.u32 %v9516_v2, %v2886_v41 }
 0x361   : > { %v2889_v49 = vshrl.u32 %v9495_v30, %v2887_v50  ;;  %v2892_v15 = vadd.s32 127, %v2891_v11  ;;  %v2665_v20 = vadd.s32 1, %v9550_v63  ;;  %v2662_v31 = vmul.u32 %v9505_v1, %v2646_v22 }
 0x362   : > { %v9563_v58 = vand.u32 8388607, %v12492_v46  ;;  %12493 = vst [vmem:[#allocation34_spill] sm:$0xff] %v9567_v54  ;;  %vm2664_vm10 = vc.u32 %v9555_v26, %v9549_v38  ;;  %v2726_v28 = vsub.s32 32, %v2725_v27  ;;  %v9575_v12 = vshll.u32 %v2719_v52, 8 }
 0x363   : > { %v2483_v56 = vxor.u32 2147483648, %v2482_v35  ;;  %v2890_v51 = vor.u32 %v2889_v49, %v2888_v25  ;;  %v2893_v48 = vshll.u32 %v2892_v15, 23  ;;  %v2666_v10 = vsel %vm2664_vm10, %v2665_v20, %v9550_v63 }
 0x364   : > { %v12494_v39 = vand.u32 2147483647, %v9246_v23  ;;  %v2667_v30 = vadd.s32 %v2666_v10, %v2662_v31  ;;  %v2728_v1 = vshll.u32 %v12374_v34, %v2725_v27  ;;  %v2729_v2 = vshrl.u32 %v12375_v60, %v2726_v28 }
 0x365   : > { %v2732_v53 = vshrl.u32 %v12376_v5, %v2726_v28  ;;  %v2894_v57 = vor.u32 4788187, %v2893_v48  ;;  %v2724_v24 = vshrl.u32 %v2723_v17, 5  ;;  %v2731_v52 = vshll.u32 %v12375_v60, %v2725_v27 }
 0x366   : > { %vm9580_vm14 = vcmp.le.f32.partialorder %v12494_v39, 0.7853982  ;;  %v2735_v50 = vshrl.u32 %v12378_v9, %v2726_v28  ;;  %v2897_v63 = vcvt.s32.f32 %v2890_v51  ;;  %v2668_v11 = vadd.s32 536870912, %v2667_v30 }
 0x367   : > { %v2730_v22 = vor.u32 %v2729_v2, %v2728_v1  ;;  %v2734_v46 = vshll.u32 %v12376_v5, %v2725_v27  ;;  %v2895_v25 = vand.u32 2147483647, %v2894_v57  ;;  %v2733_v49 = vor.u32 %v2732_v53, %v2731_v52 }
 0x368   : > { %v2737_v15 = vshll.u32 %v12378_v9, %v2725_v27  ;;  %v2738_v20 = vshrl.u32 %v12379_v0, %v2726_v28  ;;  %vm12278_vm8 = vcmp.lt.s32.totalorder %v9091_v4, 0  ;;  %v2669_v31 = vshrl.u32 %v2668_v11, 30 }
 0x369   : > { %v2736_v48 = vor.u32 %v2735_v50, %v2734_v46  ;;  %v2741_v17 = vshrl.u32 %v12372_v40, %v2726_v28  ;;  %v2923_v10 = vshrl.u32 %v2922_v33, 23  ;;  %v2484_v51 = vsel %vm12280_vm0, %v2483_v56, %v2482_v35 }
 0x36a   : > { %v2898_v39 = vmul.f32 %v2897_v63, %v2895_v25  ;;  %v2739_v1 = vor.u32 %v2738_v20, %v2737_v15  ;;  %v2740_v2 = vshll.u32 %v12379_v0, %v2725_v27  ;;  %v2670_v57 = vshll.u32 %v2669_v31, 30 }
 0x36b   : > { %v2727_v53 = vshrl.u32 %v12374_v34, %v2726_v28  ;;  %vm2743_vm12 = vcmp.lt.s32.totalorder %v2724_v24, 1  ;;  %vm2746_vm15 = vcmp.lt.s32.totalorder %v2724_v24, 4  ;;  %vm2609_vm7 = vcmp.lt.s32.totalorder %v9364_v62, 0 }
 0x36c   : > { %v2742_v52 = vor.u32 %v2741_v17, %v2740_v2  ;;  %vm2745_vm10 = vcmp.lt.s32.totalorder %v2724_v24, 3  ;;  %v2751_v50 = vsel %vm2743_vm12, %v2730_v22, %v2733_v49  ;;  %v2752_v33 = vsel %vm2746_vm15, %v2739_v1, 920167782 }
 0x36d   : > { %v12497_v11 = vand.u32 2147483647, %v9091_v4  ;;  %v9607_v27 = vsub.s32 %v2667_v30, %v2670_v57  ;;  %vm2744_vm5 = vcmp.lt.s32.totalorder %v2724_v24, 2  ;;  %v2748_v28 = vsel %vm2746_vm15, %v2736_v48, 2102212464 }
 0x36e   : > { %v2753_v56 = vsel %vm2745_vm10, %v2736_v48, %v2752_v33  ;;  %v2487_v63 = vsel %vm9580_vm14, %v9246_v23, %v2484_v51  ;;  %v2899_v46 = vxor.u32 2147483648, %v2898_v39  ;;  %v6544_v15 = vadd.s32 4294967169, %v2923_v10 }
 0x36f   : > { %vm9603_vm11 = vcmp.le.f32.partialorder %v12497_v11, 0.7853982  ;;  %v2754_v25 = vsel %vm2744_vm5, %v2751_v50, %v2753_v56  ;;  %v2673_v20 = vsub.s32 0, %v9607_v27  ;;  %v2747_v17 = vsel %vm2743_vm12, %v2727_v53, %v2730_v22 }
 0x370   : > { %v2755_v30 = vsel %vm2743_vm12, %v2733_v49, %v2736_v48  ;;  %v12273_v2 = vand.u32 2147483647, %v9567_v54  ;;  %v2749_v57 = vsel %vm2745_vm10, %v2733_v49, %v2748_v28  ;;  %v2756_v33 = vsel %vm2746_vm15, %v2742_v52, 1326507024 }
 0x371   : > { %v9622_v11 = vmul.u32.u64.low %v9575_v12, %v2754_v25  ;;  %v9623_v42 = vmul.u32.u64.high %v9575_v12, %v2754_v25, %v9622_v11  ;;  %7142 = vcosq.f32 %v2487_v63  ;;  %v6533_v10 = vmin.u32 %v2673_v20, %v9607_v27 }
 0x372   : > { %v2693_v51 = vsub.s32 4, %v2669_v31  ;;  %v2757_v50 = vsel %vm2745_vm10, %v2739_v1, %v2756_v33  ;;  %v2900_v22 = vsel %vm12278_vm8, %v2899_v46, %v2898_v39  ;;  %v2927_v49 = vor.u32 8388608, %v9563_v58 }
 0x373   : > { %v2758_v48 = vsel %vm2744_vm5, %v2755_v30, %v2757_v50  ;;  %v2929_v53 = vadd.s32 1, %v6544_v15  ;;  %v2675_v52 = vclz %v6533_v10  ;;  %v2750_v28 = vsel %vm2744_vm5, %v2747_v17, %v2749_v57 }
 0x374   : > { %v9634_v56 = vmul.u32.u64.low %v9575_v12, %v2758_v48  ;;  %v9635_v25 = vmul.u32.u64.high %v9575_v12, %v2758_v48, %v9634_v56  ;;  %7144 = vsinq.f32 %v2487_v63  ;;  %v2663_v20 = vadd.s32 %v9549_v38, %v9555_v26 }
 0x375   : > { %v2769_v1 = vadd.s32 1, %v9623_v42  ;;  %vm2930_vm12 = vcmp.gt.s32.totalorder %v2929_v53, 0  ;;  %v6534_v39 = vadd.s32 4294967294, %v2675_v52  ;;  %v9642_v46 = vsel %vm2609_vm7, %v2693_v51, %v2669_v31 }
 0x376   : > { %v2931_v58 = vsel %vm2930_vm12, %v2929_v53, 0  ;;  %v3026_v24 = vand.u32 2139095040, %v9567_v54  ;;  %v9648_v15 = vsel %vm9603_vm11, %v9091_v4, %v2900_v22  ;;  %v2766_v63 = vmul.u32 %v9575_v12, %v2750_v28 }
 0x377   : > { %v2933_v17 = vand.u32 31, %v2931_v58  ;;  %v9651_v38 = vshll.u32 %v2927_v49, 8  ;;  %vm6535_vm5 = vcmp.lt.s32.totalorder %v6534_v39, 0  ;;  %vm2768_vm15 = vc.u32 %v9635_v25, %v9622_v11 }
 0x378   : > { %v9657_v26 = vand.u32 8388607, %v12273_v2  ;;  %v2678_v30 = vsel %vm6535_vm5, 0, %v6534_v39  ;;  %v2770_v57 = vsel %vm2768_vm15, %v2769_v1, %v9623_v42  ;;  %v9661_v33 = vshrl.u32 %v2931_v58, 5 }
 0x379   : > { %v2934_v10 = vsub.s32 32, %v2933_v17  ;;  %v2679_v12 = vsub.s32 32, %v2678_v30  ;;  %v2683_v51 = vsub.s32 4294967266, %v2678_v30  ;;  %v2771_v50 = vadd.s32 %v2770_v57, %v2766_v63 }
 0x37a   : > { %v3027_v22 = vshrl.u32 %v3026_v24, 23  ;;  %v2680_v48 = vshll.u32 %v9607_v27, %v2678_v30  ;;  %v2936_v49 = vshll.u32 %v12374_v34, %v2933_v17  ;;  %v2939_v1 = vshll.u32 %v12375_v60, %v2933_v17 }
 0x37b   : > { %v2937_v53 = vshrl.u32 %v12375_v60, %v2934_v10  ;;  %v2940_v52 = vshrl.u32 %v12376_v5, %v2934_v10  ;;  %v9667_v28 = vpop.eup %7142  ;;  %v2681_v56 = vshrl.u32 %v2663_v20, %v2679_v12  ;;  %v2684_v39 = vadd.s32 127, %v2683_v51 }
 0x37c   : > { %v2772_v42 = vadd.s32 536870912, %v2771_v50  ;;  %v2942_v2 = vshll.u32 %v12376_v5, %v2933_v17  ;;  %v2943_v24 = vshrl.u32 %v12378_v9, %v2934_v10  ;;  %v2945_v27 = vshll.u32 %v12378_v9, %v2933_v17 }
 0x37d   : > { %v2938_v58 = vor.u32 %v2937_v53, %v2936_v49  ;;  %v2682_v63 = vor.u32 %v2681_v56, %v2680_v48  ;;  %v2685_v30 = vshll.u32 %v2684_v39, 23  ;;  %v2946_v31 = vshrl.u32 %v12379_v0, %v2934_v10 }
 0x37e   : > { %v9673_v57 = vshrl.u32 %v2772_v42, 30  ;;  %v9676_v54 = vpop.eup %7144  ;;  %v2941_v20 = vor.u32 %v2940_v52, %v2939_v1  ;;  %v2944_v12 = vor.u32 %v2943_v24, %v2942_v2  ;;  %v2948_v51 = vshll.u32 %v12379_v0, %v2933_v17 }
 0x37f   : > { %v2949_v49 = vshrl.u32 %v12372_v40, %v2934_v10  ;;  %v2686_v53 = vor.u32 4788187, %v2685_v30  ;;  %v2935_v29 = vshrl.u32 %v12374_v34, %v2934_v10  ;;  %v2947_v16 = vor.u32 %v2946_v31, %v2945_v27 }
 0x380   : > { %v2774_v47 = vshll.u32 %v9673_v57, 30  ;;  %v2689_v48 = vcvt.s32.f32 %v2682_v63  ;;  %vm2951_vm10 = vcmp.lt.s32.totalorder %v9661_v33, 1  ;;  %vm2954_vm12 = vcmp.lt.s32.totalorder %v9661_v33, 4 }
 0x381   : > { %v2950_v56 = vor.u32 %v2949_v49, %v2948_v51  ;;  %v2687_v39 = vand.u32 2147483647, %v2686_v53  ;;  %vm2952_vm5 = vcmp.lt.s32.totalorder %v9661_v33, 2  ;;  %v2956_v2 = vsel %vm2954_vm12, %v2944_v12, 2102212464 }
 0x382   : > { %v9684_v42 = vsub.s32 %v2771_v50, %v2774_v47  ;;  %v12500_v17 = vand.u32 2147483647, %v9364_v62  ;;  %vm2953_vm8 = vcmp.lt.s32.totalorder %v9661_v33, 3  ;;  %v2955_v31 = vsel %vm2951_vm10, %v2935_v29, %v2938_v58 }
 0x383   : > { %v2959_v10 = vsel %vm2951_vm10, %v2938_v58, %v2941_v20  ;;  %v2960_v1 = vsel %vm2954_vm12, %v2947_v16, 920167782  ;;  %v2690_v47 = vmul.f32 %v2689_v48, %v2687_v39  ;;  %v2963_v27 = vsel %vm2951_vm10, %v2941_v20, %v2944_v12 }
 0x384   : > { %vm9691_vm15 = vcmp.le.f32.partialorder %v12500_v17, 0.7853982  ;;  %v2777_v50 = vsub.s32 0, %v9684_v42  ;;  %v2961_v24 = vsel %vm2953_vm8, %v2944_v12, %v2960_v1  ;;  %v2957_v63 = vsel %vm2953_vm8, %v2941_v20, %v2956_v2 }
 0x385   : > { %v2962_v30 = vsel %vm2952_vm5, %v2959_v10, %v2961_v24  ;;  %v2964_v51 = vsel %vm2954_vm12, %v2950_v56, 1326507024  ;;  %v6548_v49 = vadd.s32 4294967169, %v3027_v22  ;;  %v2691_v53 = vxor.u32 2147483648, %v2690_v47 }
 0x386   : > { %v6537_v29 = vmin.u32 %v2777_v50, %v9684_v42  ;;  %v2965_v58 = vsel %vm2953_vm8, %v2947_v16, %v2964_v51  ;;  %v3031_v17 = vor.u32 8388608, %v9657_v26  ;;  %v2958_v56 = vsel %vm2952_vm5, %v2955_v31, %v2957_v63 }
 0x387   : > { %v2966_v48 = vsel %vm2952_vm5, %v2963_v27, %v2965_v58  ;;  %v9708_v39 = vmul.u32.u64.low %v9651_v38, %v2962_v30  ;;  %v9709_v12 = vmul.u32.u64.high %v9651_v38, %v2962_v30, %v9708_v39  ;;  %v3033_v20 = vadd.s32 1, %v6548_v49 }
 0x388   : > { %v2779_v2 = vclz %v6537_v29  ;;  %v9715_v22 = vmul.u32.u64.low %v9651_v38, %v2966_v48  ;;  %v9716_v10 = vmul.u32.u64.high %v9651_v38, %v2966_v48, %v9715_v22  ;;  %7146 = vcosq.f32 %v9648_v15 }
 0x389   : > { %v2692_v16 = vsel %vm2609_vm7, %v2691_v53, %v2690_v47  ;;  %vm3034_vm8 = vcmp.gt.s32.totalorder %v3033_v20, 0  ;;  %v12503_v26 = vsub.s32 4, %v9146_v7  ;;  %7148 = vsinq.f32 %v9648_v15 }
 0x38a   : > { %v2767_v33 = vadd.s32 %v9622_v11, %v9635_v25  ;;  %v6538_v31 = vadd.s32 4294967294, %v2779_v2  ;;  %v3035_v50 = vsel %vm3034_vm8, %v3033_v20, 0  ;;  %v2974_v24 = vmul.u32 %v9651_v38, %v2958_v56 }
 0x38b   : > { %v2278_v1 = vsel %vm2193_vm13, %v12503_v26, %v9146_v7  ;;  %v2977_v27 = vadd.s32 1, %v9709_v12  ;;  %v3037_v63 = vand.u32 31, %v3035_v50  ;;  %v9731_v47 = vshll.u32 %v3031_v17, 8 }
 0x38c   : > { %v9736_v30 = vsel %vm9691_vm15, %v9364_v62, %v2692_v16  ;;  %vm6539_vm13 = vcmp.lt.s32.totalorder %v6538_v31, 0  ;;  %vm2976_vm7 = vc.u32 %v9716_v10, %v9708_v39  ;;  %v2280_v7 = vsel %vm9285_vm9, 0, %v2278_v1 }
 0x38d   : > { %v2782_v11 = vsel %vm6539_vm13, 0, %v6538_v31  ;;  %v2978_v25 = vsel %vm2976_vm7, %v2977_v27, %v9709_v12  ;;  %v3038_v15 = vsub.s32 32, %v3037_v63  ;;  %v3036_v29 = vshrl.u32 %v3035_v50, 5 }
 0x38e   : > { %v2783_v51 = vsub.s32 32, %v2782_v11  ;;  %v2787_v49 = vsub.s32 4294967266, %v2782_v11  ;;  %v2979_v53 = vadd.s32 %v2978_v25, %v2974_v24  ;;  %v2784_v58 = vshll.u32 %v9684_v42, %v2782_v11 }
 0x38f   : > { %v3040_v17 = vshll.u32 %v12374_v34, %v3037_v63  ;;  %v3041_v48 = vshrl.u32 %v12375_v60, %v3038_v15  ;;  %v2284_v20 = vadd.s32 3, %v2280_v7  ;;  %vm12283_vm9 = vcmp.lt.s32.totalorder %v9499_v36, 0 }
 0x390   : > { %v2785_v2 = vshrl.u32 %v2767_v33, %v2783_v51  ;;  %v2788_v55 = vadd.s32 127, %v2787_v49  ;;  %v2980_v56 = vadd.s32 536870912, %v2979_v53  ;;  %v3044_v12 = vshrl.u32 %v12376_v5, %v3038_v15 }
 0x391   : > { %v3042_v22 = vor.u32 %v3041_v48, %v3040_v17  ;;  %v3043_v16 = vshll.u32 %v12375_v60, %v3037_v63  ;;  %v3046_v26 = vshll.u32 %v12376_v5, %v3037_v63  ;;  %v3047_v1 = vshrl.u32 %v12378_v9, %v3038_v15 }
 0x392   : > { %v2786_v42 = vor.u32 %v2785_v2, %v2784_v58  ;;  %v2789_v31 = vshll.u32 %v2788_v55, 23  ;;  %v2981_v50 = vshrl.u32 %v2980_v56, 30  ;;  %v3050_v24 = vshrl.u32 %v12379_v0, %v3038_v15  ;;  %v9753_v27 = vpop.eup %7146 }
 0x393   : > { %v3048_v33 = vor.u32 %v3047_v1, %v3046_v26  ;;  %v3049_v7 = vshll.u32 %v12378_v9, %v3037_v63  ;;  %v3052_v11 = vshll.u32 %v12379_v0, %v3037_v63  ;;  %v3053_v25 = vshrl.u32 %v12372_v40, %v3038_v15  ;;  %v9758_v51 = vpop.eup %7148 }
 0x394   : > { %v2790_v49 = vor.u32 4788187, %v2789_v31  ;;  %v2982_v17 = vshll.u32 %v2981_v50, 30  ;;  %v3039_v48 = vshrl.u32 %v12374_v34, %v3038_v15  ;;  %v3045_v58 = vor.u32 %v3044_v12, %v3043_v16 }
 0x395   : > { %v12504_v2 = vand.u32 2147483647, %v9499_v36  ;;  %v3005_v56 = vsub.s32 4, %v2981_v50  ;;  %v3051_v26 = vor.u32 %v3050_v24, %v3049_v7  ;;  %v3054_v1 = vor.u32 %v3053_v25, %v3052_v11 }
 0x396   : > { %vm3055_vm12 = vcmp.lt.s32.totalorder %v3036_v29, 1  ;;  %vm12284_vm5 = vcmp.lt.s32.totalorder %v9368_v45, 0  ;;  %v2791_v63 = vand.u32 2147483647, %v2790_v49  ;;  %v2793_v38 = vcvt.s32.f32 %v2786_v42 }
 0x397   : > { %vm9763_vm10 = vcmp.le.f32.partialorder %v12504_v2, 0.7853982  ;;  %v9768_v40 = vsub.s32 %v2979_v53, %v2982_v17  ;;  %vm3058_vm8 = vcmp.lt.s32.totalorder %v3036_v29, 4  ;;  %vm3056_vm13 = vcmp.lt.s32.totalorder %v3036_v29, 2 }
 0x398   : > { %vm3057_vm7 = vcmp.lt.s32.totalorder %v3036_v29, 3  ;;  %v3059_v15 = vsel %vm3055_vm12, %v3039_v48, %v3042_v22  ;;  %v3060_v12 = vsel %vm3058_vm8, %v3048_v33, 2102212464  ;;  %v2794_v16 = vmul.f32 %v2793_v38, %v2791_v63 }
 0x399   : > { %v2985_v31 = vsub.s32 0, %v9768_v40  ;;  %v3061_v2 = vsel %vm3057_vm7, %v3045_v58, %v3060_v12  ;;  %v3063_v24 = vsel %vm3055_vm12, %v3042_v22, %v3045_v58  ;;  %v12507_v7 = vand.u32 2147483647, %v9368_v45 }
 0x39a   : > { %v9781_v53 = vsel %vm12283_vm9, %v3005_v56, %v2981_v50  ;;  %v3064_v42 = vsel %vm3058_vm8, %v3051_v26, 920167782  ;;  %v3067_v25 = vsel %vm3055_vm12, %v3045_v58, %v3048_v33  ;;  %v3068_v49 = vsel %vm3058_vm8, %v3054_v1, 1326507024 }
 0x39b   : > { %vm9775_vm0 = vcmp.le.f32.partialorder %v12507_v7, 0.7853982  ;;  %v6545_v38 = vmin.u32 %v2985_v31, %v9768_v40  ;;  %v3062_v17 = vsel %vm3056_vm13, %v3059_v15, %v3061_v2  ;;  %v3065_v48 = vsel %vm3057_vm7, %v3048_v33, %v3064_v42  ;;  %v12510_v2 = vld [vmem:[#allocation5_spill] sm:$0xff] }
 0x39c   : > { %v3069_v22 = vsel %vm3057_vm7, %v3051_v26, %v3068_v49  ;;  %v2795_v63 = vxor.u32 2147483648, %v2794_v16  ;;  %v3066_v12 = vsel %vm3056_vm13, %v3063_v24, %v3065_v48  ;;  %v2285_v0 = vand.u32 3, %v2284_v20 }
 0x39d   : > { %v3070_v7 = vsel %vm3056_vm13, %v3067_v25, %v3069_v22  ;;  %7150 = vcosq.f32 %v9736_v30  ;;  %v2987_v50 = vclz %v6545_v38  ;;  %v2696_v58 = vsel %vm9691_vm15, 0, %v9642_v46 }
 0x39e   : > { %v9790_v56 = vmul.u32.u64.low %v9731_v47, %v3070_v7  ;;  %v9791_v9 = vmul.u32.u64.high %v9731_v47, %v3070_v7, %v9790_v56  ;;  %7152 = vsinq.f32 %v9736_v30  ;;  %v2975_v29 = vadd.s32 %v9708_v39, %v9716_v10 }
 0x39f   : > { %v9798_v33 = vmul.u32.u64.low %v9731_v47, %v3066_v12  ;;  %v9799_v26 = vmul.u32.u64.high %v9731_v47, %v3066_v12, %v9798_v33  ;;  %v6546_v20 = vadd.s32 4294967294, %v2987_v50  ;;  %v3008_v1 = vsel %vm9763_vm10, 0, %v9781_v53 }
 0x3a0   : > { %v3078_v15 = vmul.u32 %v9731_v47, %v3062_v17  ;;  %vm2283_vm12 = vweird.f32 %v8824_v21  ;;  %v2796_v30 = vsel %vm12284_vm5, %v2795_v63, %v2794_v16  ;;  %vm2287_vm8 = vcmp.eq.s32.totalorder %v2285_v0, 0  ;;  %v12512_v16 = vld [vmem:[#allocation6_spill] sm:$0xff] }
 0x3a1   : > { %v2291_v31 = vxor.u32 2147483648, %v9501_v6  ;;  %v2589_v24 = vsub.s32 4, %v12510_v2  ;;  %vm6547_vm13 = vcmp.lt.s32.totalorder %v6546_v20, 0  ;;  %vm3080_vm7 = vc.u32 %v9791_v9, %v9798_v33 }
 0x3a2   : > { %v12511_v39 = vxor.u32 2147483648, %v9512_v13  ;;  %vm2290_vm9 = vcmp.eq.s32.totalorder %v2285_v0, 2  ;;  %v2990_v47 = vsel %vm6547_vm13, 0, %v6546_v20  ;;  %v3081_v42 = vadd.s32 1, %v9799_v26 }
 0x3a3   : > { %v2292_v25 = vsel %vm2290_vm9, %v2291_v31, %v9512_v13  ;;  %v2590_v49 = vsel %vm2505_vm3, %v2589_v24, %v12510_v2  ;;  %v9826_v38 = vsel %vm9775_vm0, %v9368_v45, %v2796_v30  ;;  %v2991_v17 = vsub.s32 32, %v2990_v47  ;;  %v12514_v2 = vld [vmem:[#allocation16_spill] sm:$0xff] }
 0x3a4   : > { %v2289_v10 = vsel %vm2287_vm8, %v9501_v6, %v12511_v39  ;;  %v2995_v48 = vsub.s32 4294967266, %v2990_v47  ;;  %vm2286_vm5 = vcmp.lt.s32.totalorder %v2285_v0, 2  ;;  %v2992_v6 = vshll.u32 %v9768_v40, %v2990_v47 }
 0x3a5   : > { %v3082_v22 = vsel %vm3080_vm7, %v3081_v42, %v9799_v26  ;;  %v2293_v63 = vsel %vm2286_vm5, %v2289_v10, %v2292_v25  ;;  %v2592_v13 = vsel %vm9114_vm4, 0, %v2590_v49  ;;  %v2993_v7 = vshrl.u32 %v2975_v29, %v2991_v17 }
 0x3a6   : > { %v2996_v50 = vadd.s32 127, %v2995_v48  ;;  %v3083_v56 = vadd.s32 %v3082_v22, %v3078_v15  ;;  %v2596_v20 = vadd.s32 3, %v2592_v13  ;;  %vm2595_vm3 = vweird.f32 %v12512_v16 }
 0x3a7   : > { %v2600_v30 = vxor.u32 2147483648, %v9326_v19  ;;  %v2603_v31 = vxor.u32 2147483648, %v9313_v44  ;;  %v2173_v0 = vsub.s32 4, %v12514_v2  ;;  %v9836_v24 = vpop.eup %7150  ;;  %v2994_v40 = vor.u32 %v2993_v7, %v2992_v6 }
 0x3a8   : > { %v2997_v26 = vshll.u32 %v2996_v50, 23  ;;  %v3084_v39 = vadd.s32 536870912, %v3083_v56  ;;  %v2597_v10 = vand.u32 3, %v2596_v20  ;;  %v9838_v47 = vpop.eup %7152  ;;  %v2294_v29 = vsel %vm2283_vm12, nan, %v2293_v63 }
 0x3a9   : > { %v2174_v15 = vsel %vm2089_vm2, %v2173_v0, %v12514_v2  ;;  %v2184_v42 = vxor.u32 2147483648, %v9360_v3  ;;  %v2485_v25 = vsub.s32 4, %v9438_v43  ;;  %v3001_v17 = vcvt.s32.f32 %v2994_v40 }
 0x3aa   : > { %v2998_v49 = vor.u32 4788187, %v2997_v26  ;;  %v9847_v48 = vshrl.u32 %v3084_v39, 30  ;;  %vm2598_vm4 = vcmp.lt.s32.totalorder %v2597_v10, 2  ;;  %vm2599_vm9 = vcmp.eq.s32.totalorder %v2597_v10, 0 }
 0x3ab   : > { %vm2602_vm5 = vcmp.eq.s32.totalorder %v2597_v10, 2  ;;  %v2176_v6 = vsel %vm9274_vm6, 0, %v2174_v15  ;;  %vm12515_vm12 = vcmp.lt.s32.totalorder %v9246_v23, 0  ;;  %v2601_v12 = vsel %vm2599_vm9, %v9313_v44, %v2600_v30 }
 0x3ac   : > { %v2486_v21 = vsel %vm12515_vm12, %v2485_v25, %v9438_v43  ;;  %v2999_v22 = vand.u32 2147483647, %v2998_v49  ;;  %v3086_v63 = vshll.u32 %v9847_v48, 30  ;;  %v2604_v13 = vsel %vm2602_vm5, %v2603_v31, %v9326_v19 }
 0x3ad   : > { %v2605_v7 = vsel %vm2598_vm4, %v2601_v12, %v2604_v13  ;;  %v2180_v50 = vadd.s32 3, %v2176_v6  ;;  %v2187_v20 = vxor.u32 2147483648, %v9354_v18  ;;  %v2488_v2 = vsel %vm9580_vm14, 0, %v2486_v21 }
 0x3ae   : > { %v3002_v32 = vmul.f32 %v3001_v17, %v2999_v22  ;;  %v9860_v0 = vsub.s32 %v3083_v56, %v3086_v63  ;;  %v2606_v43 = vsel %vm2595_vm3, nan, %v2605_v7  ;;  %v2492_v40 = vadd.s32 3, %v2488_v2 }
 0x3af   : > { %7154 = vcosq.f32 %v9826_v38  ;;  %v6796_v26 = vpack.c.bf16 %v2606_v43, %v2294_v29  ;;  %v2181_v44 = vand.u32 3, %v2180_v50  ;;  %v2901_v19 = vsub.s32 4, %v9503_v61 }
 0x3b0   : > { %v3003_v30 = vxor.u32 2147483648, %v3002_v32  ;;  %v3089_v31 = vsub.s32 0, %v9860_v0  ;;  %v2493_v39 = vand.u32 3, %v2492_v40  ;;  %v2496_v41 = vxor.u32 2147483648, %v9676_v54 }
 0x3b1   : > { %6797 = vmatprep.subr.bf16.mxu0 %v6796_v26  ;;  %vm2183_vm2 = vcmp.eq.s32.totalorder %v2181_v44, 0  ;;  %vm2186_vm6 = vcmp.eq.s32.totalorder %v2181_v44, 2  ;;  %v2499_v56 = vxor.u32 2147483648, %v9667_v28  ;;  %vm12516_vm14 = vcmp.lt.s32.totalorder %v9091_v4, 0 }
 0x3b2   : > { %v2902_v16 = vsel %vm12516_vm14, %v2901_v19, %v9503_v61  ;;  %vm12517_vm8 = vcmp.lt.s32.totalorder %v9499_v36, 0  ;;  %v6549_v29 = vmin.u32 %v3089_v31, %v9860_v0  ;;  %6799 = vmatpush3.bf16.msra.mxu0 %v6796_v26  ;;  %v2185_v15 = vsel %vm2183_vm2, %v9354_v18, %v2184_v42 }
 0x3b3   : > { %v3004_v10 = vsel %vm12517_vm8, %v3003_v30, %v3002_v32  ;;  %v2188_v25 = vsel %vm2186_vm6, %v2187_v20, %v9360_v3  ;;  %7156 = vsinq.f32 %v9826_v38  ;;  %v3079_v49 = vadd.s32 %v9798_v33, %v9791_v9  ;;  %v12519_v32 = vld [vmem:[#allocation24_spill] sm:$0xff] }
 0x3b4   : > { %vm2182_vm13 = vcmp.lt.s32.totalorder %v2181_v44, 2  ;;  %vm2495_vm7 = vcmp.eq.s32.totalorder %v2493_v39, 0  ;;  %v3091_v17 = vclz %v6549_v29  ;;  %vm2179_vm3 = vweird.f32 %v8889_v8  ;;  %v12523_v29 = vld [vmem:[#allocation28_spill] sm:$0xff] }
 0x3b5   : > { %v2189_v61 = vsel %vm2182_vm13, %v2185_v15, %v2188_v25  ;;  %v2497_v6 = vsel %vm2495_vm7, %v9667_v28, %v2496_v41  ;;  %v3007_v21 = vsel %vm9763_vm10, %v9499_v36, %v3004_v10  ;;  %vm2491_vm4 = vweird.f32 %v9246_v23  ;;  %v12520_v41 = vld [vmem:[#allocation21_spill] sm:$0xff]  ;;  %v12522_v10 = vld [vmem:[#allocation34_spill] sm:$0xff]  ;;  %v12524_v15 = vld [vmem:[#allocation12_spill] sm:$0xff] }
 0x3b6   : > { %vm2498_vm9 = vcmp.eq.s32.totalorder %v2493_v39, 2  ;;  %v2904_v18 = vsel %vm9603_vm11, 0, %v2902_v16  ;;  %v6550_v3 = vadd.s32 4294967294, %v3091_v17  ;;  %vm2494_vm5 = vcmp.lt.s32.totalorder %v2493_v39, 2 }
 0x3b7   : > { %v2500_v9 = vsel %vm2498_vm9, %v2499_v56, %v9676_v54  ;;  %v2908_v33 = vadd.s32 3, %v2904_v18  ;;  %v2190_v38 = vsel %vm2179_vm3, nan, %v2189_v61  ;;  %v2912_v42 = vxor.u32 2147483648, %v9758_v51  ;;  %v12521_v56 = vld [vmem:[#allocation19_spill] sm:$0xff] }
 0x3b8   : > { %v2501_v8 = vsel %vm2494_vm5, %v2497_v6, %v2500_v9  ;;  %v3213_v28 = vsub.s32 4, %v9311_v14  ;;  %vm6551_vm12 = vcmp.lt.s32.totalorder %v6550_v3, 0  ;;  %v2915_v23 = vxor.u32 2147483648, %v9753_v27 }
 0x3b9   : > { %v2502_v22 = vsel %vm2491_vm4, nan, %v2501_v8  ;;  %v2909_v63 = vand.u32 3, %v2908_v33  ;;  %v9892_v12 = vpop.eup %7154  ;;  %7158 = vcosq.f32 %v3007_v21  ;;  %v3094_v35 = vsel %vm6551_vm12, 0, %v6550_v3 }
 0x3ba   : > { %v6788_v13 = vpack.c.bf16 %v2502_v22, %v2190_v38  ;;  %vm12518_vm11 = vcmp.lt.s32.totalorder %v8836_v37, 0  ;;  %v3095_v7 = vsub.s32 32, %v3094_v35  ;;  %v3096_v50 = vshll.u32 %v9860_v0, %v3094_v35 }
 0x3bb   : > { %v3214_v54 = vsel %vm12518_vm11, %v3213_v28, %v9311_v14  ;;  %v3099_v20 = vsub.s32 4294967266, %v3094_v35  ;;  %vm2910_vm2 = vcmp.lt.s32.totalorder %v2909_v63, 2  ;;  %vm2911_vm6 = vcmp.eq.s32.totalorder %v2909_v63, 0  ;;  %v12530_v35 = vld [vmem:[#allocation22_spill] sm:$0xff] }
 0x3bc   : > { %6789 = vmatprep.subr.bf16.mxu1 %v6788_v13  ;;  %vm2914_vm14 = vcmp.eq.s32.totalorder %v2909_v63, 2  ;;  %v3216_v2 = vsel %vm9434_vm1, 0, %v3214_v54  ;;  %v2077_v43 = vand.u32 3, %v12519_v32  ;;  %v3097_v40 = vshrl.u32 %v3079_v49, %v3095_v7  ;;  %v12531_v7 = vld [vmem:[#allocation3_spill] sm:$0xff] }
 0x3bd   : > { %v3100_v26 = vadd.s32 127, %v3099_v20  ;;  %v2913_v44 = vsel %vm2911_vm6, %v9753_v27, %v2912_v42  ;;  %v2916_v19 = vsel %vm2914_vm14, %v2915_v23, %v9758_v51  ;;  %v9903_v14 = vpop.eup %7156  ;;  %7160 = vsinq.f32 %v3007_v21  ;;  %v12528_v21 = vld [vmem:[#allocation27_spill] sm:$0xff] }
 0x3be   : > { %vm2907_vm8 = vweird.f32 %v9091_v4  ;;  %v2917_v0 = vsel %vm2910_vm2, %v2913_v44, %v2916_v19  ;;  %v3220_v30 = vadd.s32 3, %v3216_v2  ;;  %v3098_v31 = vor.u32 %v3097_v40, %v3096_v50  ;;  %v12529_v42 = vld [vmem:[#allocation11_spill] sm:$0xff] }
 0x3bf   : > { %v3101_v39 = vshll.u32 %v3100_v26, 23  ;;  %v3224_v59 = vxor.u32 2147483648, %v12520_v41  ;;  %v3227_v16 = vxor.u32 2147483648, %v12521_v56  ;;  %vm3025_vm1 = vcmp.lt.s32.totalorder %v12522_v10, 0 }
 0x3c0   : > { %vm3219_vm13 = vweird.f32 %v8836_v37  ;;  %v3221_v27 = vand.u32 3, %v3220_v30  ;;  %v2080_v51 = vxor.u32 2147483648, %v12523_v29  ;;  %v2083_v25 = vxor.u32 2147483648, %v12524_v15 }
 0x3c1   : > { %v12525_v49 = vand.u32 2147483647, %v12522_v10  ;;  %v3102_v17 = vor.u32 4788187, %v3101_v39  ;;  %v2918_v61 = vsel %vm2907_vm8, nan, %v2917_v0  ;;  %vm2079_vm3 = vcmp.eq.s32.totalorder %v2077_v43, 0 }
 0x3c2   : > { %vm2082_vm4 = vcmp.eq.s32.totalorder %v2077_v43, 2  ;;  %v3105_v6 = vcvt.s32.f32 %v3098_v31  ;;  %vm3223_vm9 = vcmp.eq.s32.totalorder %v3221_v27, 0  ;;  %vm3226_vm5 = vcmp.eq.s32.totalorder %v3221_v27, 2  ;;  %v12533_v0 = vld [vmem:[#allocation4_spill] sm:$0xff]  ;;  %v9941_v31 = vld [vmem:[%s8740_s18 + $0x28] sm:$0xff] }
 0x3c3   : > { %vm9914_vm7 = vcmp.le.f32.partialorder %v12525_v49, 0.7853982  ;;  %v2389_v18 = vand.u32 3, %v12528_v21  ;;  %v3103_v3 = vand.u32 2147483647, %v3102_v17  ;;  %vm3222_vm12 = vcmp.lt.s32.totalorder %v3221_v27, 2  ;;  %v9921_v38 = vpop.eup %7158 }
 0x3c4   : > { %v3225_v9 = vsel %vm3223_vm9, %v12521_v56, %v3224_v59  ;;  %v3228_v33 = vsel %vm3226_vm5, %v3227_v16, %v12520_v41  ;;  %vm2075_vm11 = vweird.f32 %v12529_v42  ;;  %v2081_v28 = vsel %vm2079_vm3, %v12524_v15, %v2080_v51  ;;  %v9951_v56 = vld [vmem:[%s8740_s18 + $0x30] sm:$0xff]  ;;  %v6559_v15 = vld [vmem:[%s8740_s18 + $0x38] sm:$0xff] }
 0x3c5   : > { %v3229_v8 = vsel %vm3222_vm12, %v3225_v9, %v3228_v33  ;;  %v2084_v22 = vsel %vm2082_vm4, %v2083_v25, %v12523_v29  ;;  %v3106_v63 = vmul.f32 %v3105_v6, %v3103_v3  ;;  %vm2078_vm2 = vcmp.lt.s32.totalorder %v2077_v43, 2 }
 0x3c6   : > { %v3230_v23 = vsel %vm3219_vm13, nan, %v3229_v8  ;;  %v2392_v13 = vxor.u32 2147483648, %v12530_v35  ;;  %vm2391_vm6 = vcmp.eq.s32.totalorder %v2389_v18, 0  ;;  %v2395_v50 = vxor.u32 2147483648, %v12531_v7 }
 0x3c7   : > { %v6800_v54 = vpack.c.bf16 %v3230_v23, %v2918_v61  ;;  %v2797_v20 = vsub.s32 4, %v9673_v57  ;;  %v3107_v2 = vxor.u32 2147483648, %v3106_v63  ;;  %v2085_v32 = vsel %vm2078_vm2, %v2081_v28, %v2084_v22  ;;  %v7161_v26 = vpop.eup %7160 }
 0x3c8   : > { %v2393_v40 = vsel %vm2391_vm6, %v12531_v7, %v2392_v13  ;;  %vm2394_vm14 = vcmp.eq.s32.totalorder %v2389_v18, 2  ;;  %vm2390_vm8 = vcmp.lt.s32.totalorder %v2389_v18, 2  ;;  %vm12532_vm13 = vcmp.lt.s32.totalorder %v9368_v45, 0 }
 0x3c9   : > { %6801 = vmatprep.subr.bf16.mxu0 %v6800_v54  ;;  %v2396_v37 = vsel %vm2394_vm14, %v2395_v50, %v12530_v35  ;;  %v2798_v43 = vsel %vm12532_vm13, %v2797_v20, %v9673_v57  ;;  %v3109_v44 = vsub.s32 4, %v9847_v48  ;;  %v3108_v19 = vsel %vm3025_vm1, %v3107_v2, %v3106_v63  ;;  %v7262_v2 = vld [vmem:[%s8740_s18 + $0x20] sm:$0xff] }
 0x3ca   : > { %vm2387_vm3 = vweird.f32 %v12533_v0  ;;  %v2397_v30 = vsel %vm2390_vm8, %v2393_v40, %v2396_v37  ;;  %6803 = vmatpush3.bf16.msra.mxu0 %v6800_v54  ;;  %v2800_v39 = vsel %vm9775_vm0, 0, %v2798_v43  ;;  %v3111_v41 = vsel %vm9914_vm7, %v12522_v10, %v3108_v19 }
 0x3cb   : > { %v2086_v57 = vsel %vm2075_vm11, nan, %v2085_v32  ;;  %v2398_v59 = vsel %vm2387_vm3, nan, %v2397_v30  ;;  %v3110_v16 = vsel %vm3025_vm1, %v3109_v44, %v9847_v48  ;;  %7162 = vcosq.f32 %v3111_v41 }
 0x3cc   : > { %v6790_v27 = vpack.c.bf16 %v2398_v59, %v2086_v57  ;;  %7164 = vsinq.f32 %v3111_v41  ;;  %vm12534_vm0 = vcmask 261120   ;;  %v2804_v11 = vadd.s32 3, %v2800_v39 }
 0x3cd   : > { %6742 = vmatmul.mubr.msk.f32.vlgmr.msra.gmra.mrb[8].mxu0 %vm12534_vm0, %v9941_v31  ;;  %v3112_v29 = vsel %vm9914_vm7, 0, %v3110_v16  ;;  %v2700_v51 = vadd.s32 3, %v2696_v58  ;;  %v3012_v48 = vadd.s32 3, %v3008_v1  ;;  %vm12535_vm1 = vmmov %vm12534_vm0  ;;  %v2808_v4 = vxor.u32 2147483648, %v9903_v14 }
 0x3ce   : > { %6791 = vmatpush1.bf16.msra.mxu1 %v6790_v27  ;;  %6744 = vmatprep.mubr.msk.f32.mxu0 %vm12535_vm1, %v9951_v56  ;;  %v3116_v25 = vadd.s32 3, %v3112_v29  ;;  %v2805_v49 = vand.u32 3, %v2804_v11  ;;  %vm12536_vm4 = vmmov %vm12534_vm0  ;;  %v2811_v52 = vxor.u32 2147483648, %v9892_v12  ;;  %v12537_v17 = vmov 0.0  }
 0x3cf   : > { %v2701_v46 = vand.u32 3, %v2700_v51  ;;  %v3013_v58 = vand.u32 3, %v3012_v48  ;;  %v2704_v55 = vxor.u32 2147483648, %v9838_v47  ;;  %v2707_v53 = vxor.u32 2147483648, %v9836_v24 }
 0x3d0   : > { %v3016_v1 = vxor.u32 2147483648, %v7161_v26  ;;  %v3019_v61 = vxor.u32 2147483648, %v9921_v38  ;;  %v3117_v6 = vand.u32 3, %v3116_v25  ;;  %vm2807_vm7 = vcmp.eq.s32.totalorder %v2805_v49, 0 }
 0x3d1   : > { %6745 = vmatmul.mubr.msk.f32.gmra.mrb[10].mxu0 %vm12536_vm4, %v6559_v15  ;;  %vm3015_vm15 = vcmp.eq.s32.totalorder %v3013_v58, 0  ;;  %vm3018_vm10 = vcmp.eq.s32.totalorder %v3013_v58, 2  ;;  %vm2810_vm9 = vcmp.eq.s32.totalorder %v2805_v49, 2  ;;  %v2809_v9 = vsel %vm2807_vm7, %v9892_v12, %v2808_v4 }
 0x3d2   : > { %4801 = vmatprep.mubr.f32.mxu0 %v12537_v17  ;;  %v3017_v21 = vsel %vm3015_vm15, %v9921_v38, %v3016_v1  ;;  %v3020_v18 = vsel %vm3018_vm10, %v3019_v61, %v7161_v26  ;;  %v2812_v33 = vsel %vm2810_vm9, %v2811_v52, %v9903_v14  ;;  %vm2703_vm5 = vcmp.eq.s32.totalorder %v2701_v46, 0 }
 0x3d3   : > { %vm2706_vm12 = vcmp.eq.s32.totalorder %v2701_v46, 2  ;;  %v2705_v28 = vsel %vm2703_vm5, %v9836_v24, %v2704_v55  ;;  %vm3014_vm11 = vcmp.lt.s32.totalorder %v3013_v58, 2  ;;  %vm2806_vm2 = vcmp.lt.s32.totalorder %v2805_v49, 2 }
 0x3d4   : > { %v2708_v22 = vsel %vm2706_vm12, %v2707_v53, %v9838_v47  ;;  %vm3122_vm6 = vcmp.eq.s32.totalorder %v3117_v6, 2  ;;  %v3021_v23 = vsel %vm3014_vm11, %v3017_v21, %v3020_v18  ;;  %v2813_v38 = vsel %vm2806_vm2, %v2809_v9, %v2812_v33 }
 0x3d5   : > { %v7163_v3 = vpop.eup %7162  ;;  %vm3119_vm14 = vcmp.eq.s32.totalorder %v3117_v6, 0  ;;  %vm2702_vm8 = vcmp.lt.s32.totalorder %v2701_v46, 2  ;;  %vm3118_vm13 = vcmp.lt.s32.totalorder %v3117_v6, 2  ;;  %vm3011_vm3 = vweird.f32 %v9499_v36  ;;  %v9999_v36 = vpop.permute.xlu0 %3243 }
 0x3d6   : > { %v7165_v8 = vpop.eup %7164  ;;  %v3123_v42 = vxor.u32 2147483648, %v7163_v3  ;;  %v2709_v14 = vsel %vm2702_vm8, %v2705_v28, %v2708_v22  ;;  %vm2803_vm0 = vweird.f32 %v9368_v45  ;;  %vm3115_vm1 = vweird.f32 %v12522_v10 }
 0x3d7   : > { %v3120_v63 = vxor.u32 2147483648, %v7165_v8  ;;  %v3022_v47 = vsel %vm3011_vm3, nan, %v3021_v23  ;;  %v2814_v13 = vsel %vm2803_vm0, nan, %v2813_v38  ;;  %vm2699_vm4 = vweird.f32 %v9364_v62  ;;  %v9997_v62 = vpop.permute.xlu1 %3248 }
 0x3d8   : > { %v3124_v35 = vsel %vm3122_vm6, %v3123_v42, %v7165_v8  ;;  %v2710_v50 = vsel %vm2699_vm4, nan, %v2709_v14  ;;  %vm12538_vm15 = vcmask 261120   ;;  %v12543_v22 = vmov 2102212464  }
 0x3d9   : > { %v3121_v12 = vsel %vm3119_vm14, %v7163_v3, %v3120_v63  ;;  %v6794_v20 = vpack.c.bf16 %v3022_v47, %v2710_v50  ;;  %vm12539_vm10 = vmmov %vm12538_vm15  ;;  %v10026_v4 = vpop.permute.xlu0 %3253  ;;  %v12544_v23 = vmov 920167782  }
 0x3da   : > { %v3125_v24 = vsel %vm3118_vm13, %v3121_v12, %v3124_v35  ;;  %vm12540_vm7 = vmmov %vm12539_vm10 }
 0x3db   : > { %v3126_v54 = vsel %vm3115_vm1, nan, %v3125_v24  ;;  %vm12541_vm9 = vmmov %vm12540_vm7  ;;  %v10009_v43 = vpop.permute.xlu1 %3258 }
 0x3dc   : > { %v6792_v7 = vpack.c.bf16 %v3126_v54, %v2814_v13  ;;  %v12545_v13 = vmov 1326507024  }
 0x3de   : > { %6793 = vmatprep.subr.bf16.mxu1 %v6792_v7 }
 0x3df   : > { %6795 = vmatpush1.bf16.msra.mxu1 %v6794_v20 }
 0x3e2   : > { %6564 = vmatmul.mubr.msk.f32.vlgmr.msra.gmra.mrb[4].mxu1 %vm12538_vm15, %v7262_v2 }
 0x3e3   : > { %3343 = vmatprep.mubr.f32.mxu1 %v12537_v17 }
 0x3e6   : > { %6565 = vmatmul.mubr.msk.f32.gmra.mrb[6].mxu1 %vm12539_vm10, %v9941_v31 }
 0x3e7   : > { %3349 = vmatprep.mubr.f32.mxu1 %v12537_v17 }
 0x3ea   : > { %6566 = vmatmul.mubr.msk.f32.gmra.mrb[8].mxu1 %vm12540_vm7, %v9951_v56 }
 0x3eb   : > { %3355 = vmatprep.mubr.f32.mxu1 %v12537_v17 }
 0x3ee   : > { %6567 = vmatmul.mubr.msk.f32.gmra.mrb[10].mxu1 %vm12541_vm9, %v6559_v15 }
 0x4a0   : > { %v6743_v45 = vpop.f32.mrb[8].mxu0 }
 0x4a1   : > { %v10002_v10 = vadd.f32 %v6743_v45, %v9997_v62  ;;  %v3428_v32 = vpop.f32.mrb[9].mxu0 }
 0x4a2   : > { %v10005_v40 = vadd.f32 %v3428_v32, %v9999_v36 }
 0x4a3   : > { %v3967_v26 = vand.u32 2147483647, %v10002_v10  ;;  %v3970_v37 = vand.u32 2139095040, %v10002_v10 }
 0x4a4   : > { %v3655_v44 = vand.u32 2147483647, %v10005_v40  ;;  %v3658_v19 = vand.u32 2139095040, %v10005_v40  ;;  %v6746_v0 = vpop.f32.mrb[10].mxu0 }
 0x4a5   : > { %v3971_v30 = vshrl.u32 %v3970_v37, 23  ;;  %v3974_v31 = vand.u32 8388607, %v3967_v26  ;;  %v10016_v39 = vadd.f32 %v6746_v0, %v10009_v43  ;;  %v3438_v41 = vpop.f32.mrb[11].mxu0 }
 0x4a6   : > { %v3659_v57 = vshrl.u32 %v3658_v19, 23  ;;  %v3662_v59 = vand.u32 8388607, %v3655_v44  ;;  %v10029_v58 = vadd.f32 %v3438_v41, %v10026_v4 }
 0x4a7   : > { %12542 = vst [vmem:[#allocation29_spill] sm:$0xff] %v10016_v39  ;;  %v6592_v56 = vadd.s32 4294967169, %v3971_v30  ;;  %v12288_v16 = vand.u32 2147483647, %v10016_v39  ;;  %v4594_v11 = vand.u32 2139095040, %v10016_v39  ;;  %v3975_v29 = vor.u32 8388608, %v3974_v31 }
 0x4a8   : > { %v6580_v27 = vadd.s32 4294967169, %v3659_v57  ;;  %v3663_v48 = vor.u32 8388608, %v3662_v59 }
 0x4a9   : > { %v3977_v51 = vadd.s32 1, %v6592_v56  ;;  %v4595_v25 = vshrl.u32 %v4594_v11, 23  ;;  %v10024_v49 = vand.u32 8388607, %v12288_v16  ;;  %v10031_v1 = vshll.u32 %v3975_v29, 8 }
 0x4aa   : > { %v3665_v15 = vadd.s32 1, %v6580_v27  ;;  %v10035_v18 = vshll.u32 %v3663_v48, 8 }
 0x4ab   : > { %vm3978_vm5 = vcmp.gt.s32.totalorder %v3977_v51, 0  ;;  %v6616_v46 = vadd.s32 4294967169, %v4595_v25  ;;  %v4599_v3 = vor.u32 8388608, %v10024_v49 }
 0x4ac   : > { %v3979_v52 = vsel %vm3978_vm5, %v3977_v51, 0  ;;  %vm3666_vm12 = vcmp.gt.s32.totalorder %v3665_v15, 0 }
 0x4ad   : > { %v3980_v55 = vshrl.u32 %v3979_v52, 5  ;;  %v3981_v53 = vand.u32 31, %v3979_v52  ;;  %v3667_v61 = vsel %vm3666_vm12, %v3665_v15, 0  ;;  %v10040_v42 = vadd.s32 1, %v6616_v46 }
 0x4ae   : > { %v10033_v6 = vshrl.u32 %v3667_v61, 5  ;;  %v3669_v21 = vand.u32 31, %v3667_v61 }
 0x4af   : > { %v3982_v9 = vsub.s32 32, %v3981_v53  ;;  %v3984_v33 = vshll.u32 %v12374_v34, %v3981_v53  ;;  %v3987_v8 = vshll.u32 %v12375_v60, %v3981_v53  ;;  %v3990_v28 = vshll.u32 %v12376_v5, %v3981_v53 }
 0x4b0   : > { %v3993_v63 = vshll.u32 %v12543_v22, %v3981_v53  ;;  %v3996_v38 = vshll.u32 %v12544_v23, %v3981_v53  ;;  %vm3999_vm11 = vcmp.lt.s32.totalorder %v3980_v55, 1  ;;  %vm4000_vm2 = vcmp.lt.s32.totalorder %v3980_v55, 2 }
 0x4b1   : > { %v3985_v35 = vshrl.u32 %v12375_v60, %v3982_v9  ;;  %v3988_v12 = vshrl.u32 %v12376_v5, %v3982_v9  ;;  %v3991_v14 = vshrl.u32 %v12543_v22, %v3982_v9  ;;  %v3983_v24 = vshrl.u32 %v12374_v34, %v3982_v9 }
 0x4b2   : > { %v3994_v47 = vshrl.u32 %v12544_v23, %v3982_v9  ;;  %v3997_v54 = vshrl.u32 %v12545_v13, %v3982_v9  ;;  %vm4001_vm6 = vcmp.lt.s32.totalorder %v3980_v55, 3  ;;  %v3670_v2 = vsub.s32 32, %v3669_v21 }
 0x4b3   : > { %v3986_v7 = vor.u32 %v3985_v35, %v3984_v33  ;;  %v3989_v50 = vor.u32 %v3988_v12, %v3987_v8  ;;  %v3992_v20 = vor.u32 %v3991_v14, %v3990_v28  ;;  %vm4002_vm14 = vcmp.lt.s32.totalorder %v3980_v55, 4 }
 0x4b4   : > { %v3995_v45 = vor.u32 %v3994_v47, %v3993_v63  ;;  %v3998_v32 = vor.u32 %v3997_v54, %v3996_v38  ;;  %v3672_v37 = vshll.u32 %v12374_v34, %v3669_v21  ;;  %v3675_v56 = vshll.u32 %v12375_v60, %v3669_v21 }
 0x4b5   : > { %v4003_v19 = vsel %vm3999_vm11, %v3983_v24, %v3986_v7  ;;  %v4004_v0 = vsel %vm4002_vm14, %v3992_v20, 2102212464  ;;  %v4007_v30 = vsel %vm3999_vm11, %v3986_v7, %v3989_v50  ;;  %v4011_v31 = vsel %vm3999_vm11, %v3989_v50, %v3992_v20  ;;  %v10057_v27 = vpop.f32.mrb[4].mxu1 }
 0x4b6   : > { %v4005_v41 = vsel %vm4001_vm6, %v3989_v50, %v4004_v0  ;;  %v4008_v57 = vsel %vm4002_vm14, %v3995_v45, 920167782  ;;  %v4012_v59 = vsel %vm4002_vm14, %v3998_v32, 1326507024  ;;  %v3671_v51 = vshrl.u32 %v12374_v34, %v3670_v2  ;;  %v10063_v15 = vpop.f32.mrb[5].mxu1 }
 0x4b7   : > { %v4009_v11 = vsel %vm4001_vm6, %v3992_v20, %v4008_v57  ;;  %v4013_v29 = vsel %vm4001_vm6, %v3995_v45, %v4012_v59  ;;  %v3673_v48 = vshrl.u32 %v12375_v60, %v3670_v2  ;;  %v4006_v25 = vsel %vm4000_vm2, %v4003_v19, %v4005_v41 }
 0x4b8   : > { %v4010_v52 = vsel %vm4000_vm2, %v4007_v30, %v4009_v11  ;;  %v4014_v46 = vsel %vm4000_vm2, %v4011_v31, %v4013_v29  ;;  %v3676_v53 = vshrl.u32 %v12376_v5, %v3670_v2  ;;  %v3678_v38 = vshll.u32 %v12376_v5, %v3669_v21 }
 0x4b9   : > { %v10070_v61 = vmul.u32.u64.low %v10031_v1, %v4014_v46  ;;  %v10071_v9 = vmul.u32.u64.high %v10031_v1, %v4014_v46, %v10070_v61  ;;  %v10074_v33 = vmul.u32.u64.low %v10031_v1, %v4010_v52  ;;  %v10075_v8 = vmul.u32.u64.high %v10031_v1, %v4010_v52, %v10074_v33  ;;  %v10080_v12 = vpop.f32.mrb[6].mxu1 }
 0x4ba   : > { %v3674_v28 = vor.u32 %v3673_v48, %v3672_v37  ;;  %v3677_v63 = vor.u32 %v3676_v53, %v3675_v56  ;;  %v3679_v35 = vshrl.u32 %v12543_v22, %v3670_v2  ;;  %v4022_v55 = vmul.u32 %v10031_v1, %v4006_v25  ;;  %v10086_v54 = vpop.f32.mrb[7].mxu1 }
 0x4bb   : > { %v3681_v14 = vshll.u32 %v12543_v22, %v3669_v21  ;;  %v3682_v24 = vshrl.u32 %v12544_v23, %v3670_v2  ;;  %v3685_v47 = vshrl.u32 %v12545_v13, %v3670_v2  ;;  %v3684_v50 = vshll.u32 %v12544_v23, %v3669_v21 }
 0x4bc   : > { %v3680_v7 = vor.u32 %v3679_v35, %v3678_v38  ;;  %vm3687_vm8 = vcmp.lt.s32.totalorder %v10033_v6, 1  ;;  %vm3688_vm13 = vcmp.lt.s32.totalorder %v10033_v6, 2  ;;  %vm4024_vm3 = vc.u32 %v10071_v9, %v10074_v33 }
 0x4bd   : > { %v4025_v1 = vadd.s32 1, %v10075_v8  ;;  %v3683_v20 = vor.u32 %v3682_v24, %v3681_v14  ;;  %vm3689_vm0 = vcmp.lt.s32.totalorder %v10033_v6, 3  ;;  %v3686_v45 = vor.u32 %v3685_v47, %v3684_v50  ;;  %v10096_v37 = vpop.f32.mrb[8].mxu1 }
 0x4be   : > { %vm3690_vm1 = vcmp.lt.s32.totalorder %v10033_v6, 4  ;;  %v3691_v2 = vsel %vm3687_vm8, %v3671_v51, %v3674_v28  ;;  %v3695_v32 = vsel %vm3687_vm8, %v3674_v28, %v3677_v63  ;;  %v3699_v30 = vsel %vm3687_vm8, %v3677_v63, %v3680_v7  ;;  %v10119_v38 = vpop.f32.mrb[9].mxu1 }
 0x4bf   : > { %v4026_v21 = vsel %vm4024_vm3, %v4025_v1, %v10075_v8  ;;  %v3692_v19 = vsel %vm3690_vm1, %v3680_v7, 2102212464  ;;  %v3696_v0 = vsel %vm3690_vm1, %v3683_v20, 920167782  ;;  %v3700_v59 = vsel %vm3690_vm1, %v3686_v45, 1326507024 }
 0x4c0   : > { %v4027_v31 = vadd.s32 %v4026_v21, %v4022_v55  ;;  %v3693_v41 = vsel %vm3689_vm0, %v3677_v63, %v3692_v19  ;;  %v3697_v57 = vsel %vm3689_vm0, %v3680_v7, %v3696_v0  ;;  %v3701_v11 = vsel %vm3689_vm0, %v3683_v20, %v3700_v59 }
 0x4c1   : > { %v3698_v56 = vsel %vm3688_vm13, %v3695_v32, %v3697_v57  ;;  %vm4602_vm4 = vcmp.gt.s32.totalorder %v10040_v42, 0  ;;  %v4282_v29 = vand.u32 2139095040, %v10029_v58  ;;  %v3702_v48 = vsel %vm3688_vm13, %v3699_v30, %v3701_v11 }
 0x4c2   : > { %v4028_v51 = vadd.s32 536870912, %v4027_v31  ;;  %v10106_v25 = vmul.u32.u64.low %v10035_v18, %v3698_v56  ;;  %v10107_v52 = vmul.u32.u64.high %v10035_v18, %v3698_v56, %v10106_v25  ;;  %v3694_v46 = vsel %vm3688_vm13, %v3691_v2, %v3693_v41 }
 0x4c3   : > { %v10113_v53 = vmul.u32.u64.low %v10035_v18, %v3702_v48  ;;  %v10114_v61 = vmul.u32.u64.high %v10035_v18, %v3702_v48, %v10113_v53  ;;  %v4603_v8 = vsel %vm4602_vm4, %v10040_v42, 0  ;;  %v10123_v35 = vshll.u32 %v4599_v3, 8 }
 0x4c4   : > { %v10117_v28 = vshrl.u32 %v4028_v51, 30  ;;  %v4605_v63 = vand.u32 31, %v4603_v8  ;;  %v12285_v55 = vand.u32 2147483647, %v10029_v58  ;;  %v4283_v14 = vshrl.u32 %v4282_v29, 23 }
 0x4c5   : > { %v3710_v24 = vmul.u32 %v10035_v18, %v3694_v46  ;;  %v3713_v47 = vadd.s32 1, %v10107_v52  ;;  %vm3712_vm15 = vc.u32 %v10114_v61, %v10106_v25  ;;  %v4604_v42 = vshrl.u32 %v4603_v8, 5 }
 0x4c6   : > { %v4030_v6 = vshll.u32 %v10117_v28, 30  ;;  %v4606_v7 = vsub.s32 32, %v4605_v63  ;;  %v4608_v50 = vshll.u32 %v12374_v34, %v4605_v63  ;;  %v4611_v49 = vshll.u32 %v12375_v60, %v4605_v63 }
 0x4c7   : > { %v3714_v1 = vsel %vm3712_vm15, %v3713_v47, %v10107_v52  ;;  %v4614_v45 = vshll.u32 %v12376_v5, %v4605_v63  ;;  %v4617_v21 = vshll.u32 %v12543_v22, %v4605_v63  ;;  %v6604_v48 = vadd.s32 4294967169, %v4283_v14 }
 0x4c8   : > { %v10133_v3 = vsub.s32 %v4027_v31, %v4030_v6  ;;  %v4609_v20 = vshrl.u32 %v12375_v60, %v4606_v7  ;;  %v3715_v18 = vadd.s32 %v3714_v1, %v3710_v24  ;;  %v4612_v2 = vshrl.u32 %v12376_v5, %v4606_v7 }
 0x4c9   : > { %v4615_v32 = vshrl.u32 %v12543_v22, %v4606_v7  ;;  %v4618_v30 = vshrl.u32 %v12544_v23, %v4606_v7  ;;  %v4620_v31 = vshll.u32 %v12544_v23, %v4605_v63  ;;  %v4621_v56 = vshrl.u32 %v12545_v13, %v4606_v7 }
 0x4ca   : > { %v4033_v19 = vsub.s32 0, %v10133_v3  ;;  %v4610_v0 = vor.u32 %v4609_v20, %v4608_v50  ;;  %v3716_v41 = vadd.s32 536870912, %v3715_v18  ;;  %v4613_v57 = vor.u32 %v4612_v2, %v4611_v49 }
 0x4cb   : > { %v4616_v59 = vor.u32 %v4615_v32, %v4614_v45  ;;  %v4607_v29 = vshrl.u32 %v12374_v34, %v4606_v7  ;;  %v4619_v51 = vor.u32 %v4618_v30, %v4617_v21  ;;  %v4622_v46 = vor.u32 %v4621_v56, %v4620_v31 }
 0x4cc   : > { %v6593_v11 = vmin.u32 %v4033_v19, %v10133_v3  ;;  %v10147_v52 = vshrl.u32 %v3716_v41, 30  ;;  %vm4623_vm10 = vcmp.lt.s32.totalorder %v4604_v42, 1  ;;  %vm4626_vm7 = vcmp.lt.s32.totalorder %v4604_v42, 4 }
 0x4cd   : > { %vm4624_vm9 = vcmp.lt.s32.totalorder %v4604_v42, 2  ;;  %v4628_v8 = vsel %vm4626_vm7, %v4616_v59, 2102212464  ;;  %v4631_v63 = vsel %vm4623_vm10, %v4610_v0, %v4613_v57  ;;  %vm4625_vm5 = vcmp.lt.s32.totalorder %v4604_v42, 3 }
 0x4ce   : > { %v4035_v53 = vclz %v6593_v11  ;;  %v3718_v6 = vshll.u32 %v10147_v52, 30  ;;  %v4632_v24 = vsel %vm4626_vm7, %v4619_v51, 920167782  ;;  %v4635_v47 = vsel %vm4623_vm10, %v4613_v57, %v4616_v59 }
 0x4cf   : > { %v4627_v49 = vsel %vm4623_vm10, %v4607_v29, %v4610_v0  ;;  %v4633_v1 = vsel %vm4625_vm5, %v4616_v59, %v4632_v24  ;;  %v4636_v7 = vsel %vm4626_vm7, %v4622_v46, 1326507024  ;;  %v4629_v14 = vsel %vm4625_vm5, %v4613_v57, %v4628_v8 }
 0x4d0   : > { %v6594_v50 = vadd.s32 4294967294, %v4035_v53  ;;  %v10150_v20 = vsub.s32 %v3715_v18, %v3718_v6  ;;  %v4634_v45 = vsel %vm4624_vm9, %v4631_v63, %v4633_v1  ;;  %v4637_v2 = vsel %vm4625_vm5, %v4619_v51, %v4636_v7 }
 0x4d1   : > { %v4638_v32 = vsel %vm4624_vm9, %v4635_v47, %v4637_v2  ;;  %v10155_v21 = vmul.u32.u64.low %v10123_v35, %v4634_v45  ;;  %v10156_v19 = vmul.u32.u64.high %v10123_v35, %v4634_v45, %v10155_v21  ;;  %v4630_v57 = vsel %vm4624_vm9, %v4627_v49, %v4629_v14 }
 0x4d2   : > { %vm6595_vm12 = vcmp.lt.s32.totalorder %v6594_v50, 0  ;;  %v3721_v31 = vsub.s32 0, %v10150_v20  ;;  %v10161_v0 = vmul.u32.u64.low %v10123_v35, %v4638_v32  ;;  %v10162_v41 = vmul.u32.u64.high %v10123_v35, %v4638_v32, %v10161_v0 }
 0x4d3   : > { %v4038_v30 = vsel %vm6595_vm12, 0, %v6594_v50  ;;  %v4289_v59 = vadd.s32 1, %v6604_v48  ;;  %v4286_v29 = vand.u32 8388607, %v12285_v55  ;;  %v4023_v51 = vadd.s32 %v10074_v33, %v10071_v9  ;;  %v10175_v9 = vpop.f32.mrb[10].mxu1 }
 0x4d4   : > { %v4043_v18 = vsub.s32 4294967266, %v4038_v30  ;;  %v4039_v56 = vsub.s32 32, %v4038_v30  ;;  %v6581_v11 = vmin.u32 %v3721_v31, %v10150_v20  ;;  %v4649_v53 = vadd.s32 1, %v10156_v19 }
 0x4d5   : > { %vm4290_vm11 = vcmp.gt.s32.totalorder %v4289_v59, 0  ;;  %v4646_v63 = vmul.u32 %v10123_v35, %v4630_v57  ;;  %vm4648_vm2 = vc.u32 %v10162_v41, %v10155_v21  ;;  %v4287_v1 = vor.u32 8388608, %v4286_v29 }
 0x4d6   : > { %v4044_v46 = vadd.s32 127, %v4043_v18  ;;  %v3723_v8 = vclz %v6581_v11  ;;  %v4291_v42 = vsel %vm4290_vm11, %v4289_v59, 0  ;;  %v4650_v6 = vsel %vm4648_vm2, %v4649_v53, %v10156_v19 }
 0x4d7   : > { %v4041_v24 = vshrl.u32 %v4023_v51, %v4039_v56  ;;  %v4651_v50 = vadd.s32 %v4650_v6, %v4646_v63  ;;  %v4293_v49 = vand.u32 31, %v4291_v42  ;;  %v4040_v33 = vshll.u32 %v10133_v3, %v4038_v30 }
 0x4d8   : > { %v4045_v48 = vshll.u32 %v4044_v46, 23  ;;  %v6582_v47 = vadd.s32 4294967294, %v3723_v8  ;;  %v3711_v45 = vadd.s32 %v10106_v25, %v10114_v61  ;;  %v10182_v32 = vadd.f32 %v10057_v27, %v9999_v36 }
 0x4d9   : > { %v4652_v7 = vadd.s32 536870912, %v4651_v50  ;;  %v4294_v14 = vsub.s32 32, %v4293_v49  ;;  %v4042_v19 = vor.u32 %v4041_v24, %v4040_v33  ;;  %v4292_v18 = vshrl.u32 %v4291_v42, 5 }
 0x4da   : > { %vm6583_vm6 = vcmp.lt.s32.totalorder %v6582_v47, 0  ;;  %v4046_v35 = vor.u32 4788187, %v4045_v48  ;;  %12546 = vst [vmem:[#allocation33_spill] sm:$0xff] %v10182_v32  ;;  %v4296_v57 = vshll.u32 %v12374_v34, %v4293_v49  ;;  %v4299_v30 = vshll.u32 %v12375_v60, %v4293_v49 }
 0x4db   : > { %v3726_v2 = vsel %vm6583_vm6, 0, %v6582_v47  ;;  %v10184_v0 = vshrl.u32 %v4652_v7, 30  ;;  %v4297_v3 = vshrl.u32 %v12375_v60, %v4294_v14  ;;  %v4300_v59 = vshrl.u32 %v12376_v5, %v4294_v14 }
 0x4dc   : > { %v3731_v31 = vsub.s32 4294967266, %v3726_v2  ;;  %v3727_v56 = vsub.s32 32, %v3726_v2  ;;  %v4303_v27 = vshrl.u32 %v12543_v22, %v4294_v14  ;;  %v4047_v11 = vand.u32 2147483647, %v4046_v35 }
 0x4dd   : > { %12547 = vst [vmem:[#allocation2_spill] sm:$0xff] %v10184_v0  ;;  %v4654_v61 = vshll.u32 %v10184_v0, 30  ;;  %v4298_v29 = vor.u32 %v4297_v3, %v4296_v57  ;;  %v4302_v51 = vshll.u32 %v12376_v5, %v4293_v49  ;;  %v10193_v46 = vshll.u32 %v4287_v1, 8 }
 0x4de   : > { %v3732_v25 = vadd.s32 127, %v3731_v31  ;;  %v4301_v63 = vor.u32 %v4300_v59, %v4299_v30  ;;  %v4305_v42 = vshll.u32 %v12543_v22, %v4293_v49  ;;  %v4306_v6 = vshrl.u32 %v12544_v23, %v4294_v14 }
 0x4df   : > { %v10195_v8 = vsub.s32 %v4651_v50, %v4654_v61  ;;  %v4304_v48 = vor.u32 %v4303_v27, %v4302_v51  ;;  %v4308_v24 = vshll.u32 %v12544_v23, %v4293_v49  ;;  %v4309_v47 = vshrl.u32 %v12545_v13, %v4294_v14 }
 0x4e0   : > { %v3733_v53 = vshll.u32 %v3732_v25, 23  ;;  %v4049_v33 = vcvt.s32.f32 %v4042_v19  ;;  %v3729_v7 = vshrl.u32 %v3711_v45, %v3727_v56  ;;  %vm4311_vm14 = vcmp.lt.s32.totalorder %v4292_v18, 1 }
 0x4e1   : > { %v4657_v35 = vsub.s32 0, %v10195_v8  ;;  %v4307_v31 = vor.u32 %v4306_v6, %v4305_v42  ;;  %v4310_v57 = vor.u32 %v4309_v47, %v4308_v24  ;;  %vm4312_vm8 = vcmp.lt.s32.totalorder %v4292_v18, 2 }
 0x4e2   : > { %v3734_v1 = vor.u32 4788187, %v3733_v53  ;;  %v4050_v50 = vmul.f32 %v4049_v33, %v4047_v11  ;;  %v3728_v3 = vshll.u32 %v10150_v20, %v3726_v2  ;;  %vm4314_vm13 = vcmp.lt.s32.totalorder %v4292_v18, 4 }
 0x4e3   : > { %v6617_v30 = vmin.u32 %v4657_v35, %v10195_v8  ;;  %vm4313_vm3 = vcmp.lt.s32.totalorder %v4292_v18, 3  ;;  %v4316_v59 = vsel %vm4314_vm13, %v4304_v48, 2102212464  ;;  %v4319_v49 = vsel %vm4311_vm14, %v4298_v29, %v4301_v63 }
 0x4e4   : > { %v4320_v25 = vsel %vm4314_vm13, %v4307_v31, 920167782  ;;  %v3730_v19 = vor.u32 %v3729_v7, %v3728_v3  ;;  %v4295_v56 = vshrl.u32 %v12374_v34, %v4294_v14  ;;  %v3735_v27 = vand.u32 2147483647, %v3734_v1  ;;  %v10220_v1 = vpop.f32.mrb[11].mxu1 }
 0x4e5   : > { %v4659_v45 = vclz %v6617_v30  ;;  %v4321_v61 = vsel %vm4313_vm3, %v4304_v48, %v4320_v25  ;;  %v4323_v11 = vsel %vm4311_vm14, %v4301_v63, %v4304_v48  ;;  %v4324_v53 = vsel %vm4314_vm13, %v4310_v57, 1326507024 }
 0x4e6   : > { %v4322_v51 = vsel %vm4312_vm8, %v4319_v49, %v4321_v61  ;;  %v4315_v2 = vsel %vm4311_vm14, %v4295_v56, %v4298_v29  ;;  %v4317_v42 = vsel %vm4313_vm3, %v4301_v63, %v4316_v59  ;;  %v4325_v6 = vsel %vm4313_vm3, %v4307_v31, %v4324_v53 }
 0x4e7   : > { %v6618_v20 = vadd.s32 4294967294, %v4659_v45  ;;  %v4326_v24 = vsel %vm4312_vm8, %v4323_v11, %v4325_v6  ;;  %v10211_v47 = vmul.u32.u64.low %v10193_v46, %v4322_v51  ;;  %v10212_v33 = vmul.u32.u64.high %v10193_v46, %v4322_v51, %v10211_v47 }
 0x4e8   : > { %v3450_v14 = vand.u32 2139095040, %v10182_v32  ;;  %v3737_v7 = vcvt.s32.f32 %v3730_v19  ;;  %v10217_v35 = vmul.u32.u64.low %v10193_v46, %v4326_v24  ;;  %v10218_v48 = vmul.u32.u64.high %v10193_v46, %v4326_v24, %v10217_v35 }
 0x4e9   : > { %vm6619_vm0 = vcmp.lt.s32.totalorder %v6618_v20, 0  ;;  %v4318_v63 = vsel %vm4312_vm8, %v4315_v2, %v4317_v42  ;;  %v12287_v30 = vand.u32 2147483647, %v10182_v32  ;;  %v4051_v59 = vxor.u32 2147483648, %v4050_v50 }
 0x4ea   : > { %v4662_v29 = vsel %vm6619_vm0, 0, %v6618_v20  ;;  %v3451_v31 = vshrl.u32 %v3450_v14, 23  ;;  %v3738_v57 = vmul.f32 %v3737_v7, %v3735_v27  ;;  %v4337_v25 = vadd.s32 1, %v10212_v33 }
 0x4eb   : > { %v4667_v3 = vsub.s32 4294967266, %v4662_v29  ;;  %v4663_v49 = vsub.s32 32, %v4662_v29  ;;  %v4334_v56 = vmul.u32 %v10193_v46, %v4318_v63  ;;  %vm4336_vm1 = vc.u32 %v10218_v48, %v10211_v47 }
 0x4ec   : > { %v6572_v19 = vadd.s32 4294967169, %v3451_v31  ;;  %vm3969_vm4 = vcmp.lt.s32.totalorder %v10002_v10, 0  ;;  %v4647_v18 = vadd.s32 %v10155_v21, %v10162_v41  ;;  %v4338_v61 = vsel %vm4336_vm1, %v4337_v25, %v10212_v33 }
 0x4ed   : > { %v4668_v45 = vadd.s32 127, %v4667_v3  ;;  %v3739_v51 = vxor.u32 2147483648, %v3738_v57  ;;  %v4339_v11 = vadd.s32 %v4338_v61, %v4334_v56  ;;  %v3454_v53 = vand.u32 8388607, %v12287_v30 }
 0x4ee   : > { %v3457_v27 = vadd.s32 1, %v6572_v19  ;;  %v10236_v20 = vadd.f32 %v10063_v15, %v9999_v36  ;;  %v4052_v46 = vsel %vm3969_vm4, %v4051_v59, %v4050_v50  ;;  %v4665_v2 = vshrl.u32 %v4647_v18, %v4663_v49 }
 0x4ef   : > { %v4669_v42 = vshll.u32 %v4668_v45, 23  ;;  %vm3657_vm10 = vcmp.lt.s32.totalorder %v10005_v40, 0  ;;  %v4340_v21 = vadd.s32 536870912, %v4339_v11  ;;  %vm10243_vm7 = vcmp.le.f32.partialorder %v3967_v26, 0.7853982 }
 0x4f0   : > { %vm3458_vm15 = vcmp.gt.s32.totalorder %v3457_v27, 0  ;;  %v4664_v24 = vshll.u32 %v10195_v8, %v4662_v29  ;;  %v10250_v15 = vadd.f32 %v10080_v12, %v9997_v62  ;;  %v10255_v50 = vsel %vm10243_vm7, %v10002_v10, %v4052_v46 }
 0x4f1   : > { %v3459_v41 = vsel %vm3458_vm15, %v3457_v27, 0  ;;  %v10259_v33 = vsel %vm3657_vm10, %v3739_v51, %v3738_v57  ;;  %v10261_v26 = vshrl.u32 %v4340_v21, 30  ;;  %v3455_v14 = vor.u32 8388608, %v3454_v53 }
 0x4f2   : > { %v3461_v36 = vand.u32 31, %v3459_v41  ;;  %12550 = vst [vmem:[#allocation13_spill] sm:$0xff] %v10250_v15  ;;  %v4666_v7 = vor.u32 %v4665_v2, %v4664_v24  ;;  %v4670_v35 = vor.u32 4788187, %v4669_v42  ;;  %v3554_v29 = vand.u32 2139095040, %v10236_v20 }
 0x4f3   : > { %12551 = vst [vmem:[#allocation9_spill] sm:$0xff] %v10261_v26  ;;  %v4342_v12 = vshll.u32 %v10261_v26, 30  ;;  %v3460_v63 = vshrl.u32 %v3459_v41, 5  ;;  %v3495_v21 = vshll.u32 %v3455_v14, 8  ;;  %vm10296_vm6 = vcmp.le.f32.partialorder %v3655_v44, 0.7853982 }
 0x4f4   : > { %v3462_v8 = vsub.s32 32, %v3461_v36  ;;  %v3464_v31 = vshll.u32 %v12374_v34, %v3461_v36  ;;  %v3467_v3 = vshll.u32 %v12375_v60, %v3461_v36  ;;  %v3470_v49 = vshll.u32 %v12376_v5, %v3461_v36 }
 0x4f5   : > { %v10271_v19 = vsub.s32 %v4339_v11, %v4342_v12  ;;  %v3473_v45 = vshll.u32 %v12543_v22, %v3461_v36  ;;  %v3476_v53 = vshll.u32 %v12544_v23, %v3461_v36  ;;  %v4673_v46 = vcvt.s32.f32 %v4666_v7 }
 0x4f6   : > { %v3465_v59 = vshrl.u32 %v12375_v60, %v3462_v8  ;;  %v3468_v57 = vshrl.u32 %v12376_v5, %v3462_v8  ;;  %v3471_v25 = vshrl.u32 %v12543_v22, %v3462_v8  ;;  %v3474_v56 = vshrl.u32 %v12544_v23, %v3462_v8 }
 0x4f7   : > { %v3477_v18 = vshrl.u32 %v12545_v13, %v3462_v8  ;;  %v4345_v2 = vsub.s32 0, %v10271_v19  ;;  %v4671_v41 = vand.u32 2147483647, %v4670_v35  ;;  %vm3482_vm9 = vcmp.lt.s32.totalorder %v3460_v63, 4 }
 0x4f8   : > { %v3466_v61 = vor.u32 %v3465_v59, %v3464_v31  ;;  %v3469_v27 = vor.u32 %v3468_v57, %v3467_v3  ;;  %v3472_v51 = vor.u32 %v3471_v25, %v3470_v49  ;;  %v3475_v42 = vor.u32 %v3474_v56, %v3473_v45 }
 0x4f9   : > { %v3478_v24 = vor.u32 %v3477_v18, %v3476_v53  ;;  %v3555_v11 = vshrl.u32 %v3554_v29, 23  ;;  %v6605_v12 = vmin.u32 %v4345_v2, %v10271_v19  ;;  %v3463_v55 = vshrl.u32 %v12374_v34, %v3462_v8 }
 0x4fa   : > { %vm3479_vm5 = vcmp.lt.s32.totalorder %v3460_v63, 1  ;;  %v3484_v31 = vsel %vm3482_vm9, %v3472_v51, 2102212464  ;;  %vm3480_vm12 = vcmp.lt.s32.totalorder %v3460_v63, 2  ;;  %vm3481_vm11 = vcmp.lt.s32.totalorder %v3460_v63, 3 }
 0x4fb   : > { %v3487_v3 = vsel %vm3479_vm5, %v3466_v61, %v3469_v27  ;;  %v3488_v36 = vsel %vm3482_vm9, %v3475_v42, 920167782  ;;  %v4347_v7 = vclz %v6605_v12  ;;  %v3483_v59 = vsel %vm3479_vm5, %v3463_v55, %v3466_v61 }
 0x4fc   : > { %v3489_v57 = vsel %vm3481_vm11, %v3472_v51, %v3488_v36  ;;  %v3491_v14 = vsel %vm3479_vm5, %v3469_v27, %v3472_v51  ;;  %v3485_v35 = vsel %vm3481_vm11, %v3469_v27, %v3484_v31  ;;  %v3492_v29 = vsel %vm3482_vm9, %v3478_v24, 1326507024 }
 0x4fd   : > { %v3490_v49 = vsel %vm3480_vm12, %v3487_v3, %v3489_v57  ;;  %v6576_v25 = vadd.s32 4294967169, %v3555_v11  ;;  %v6606_v45 = vadd.s32 4294967294, %v4347_v7  ;;  %v3493_v8 = vsel %vm3481_vm11, %v3475_v42, %v3492_v29 }
 0x4fe   : > { %v10284_v56 = vmul.u32.u64.low %v3495_v21, %v3490_v49  ;;  %v10285_v18 = vmul.u32.u64.high %v3495_v21, %v3490_v49, %v10284_v56  ;;  %v4674_v53 = vmul.f32 %v4673_v46, %v4671_v41  ;;  %v3494_v2 = vsel %vm3480_vm12, %v3491_v14, %v3493_v8 }
 0x4ff   : > { %v12286_v12 = vand.u32 2147483647, %v10236_v20  ;;  %v3561_v55 = vadd.s32 1, %v6576_v25  ;;  %vm6607_vm2 = vcmp.lt.s32.totalorder %v6606_v45, 0  ;;  %v3486_v61 = vsel %vm3480_vm12, %v3483_v59, %v3485_v35 }
 0x500   : > { %v10291_v27 = vmul.u32.u64.low %v3495_v21, %v3494_v2  ;;  %v10292_v51 = vmul.u32.u64.high %v3495_v21, %v3494_v2, %v10291_v27  ;;  %v4350_v24 = vsel %vm6607_vm2, 0, %v6606_v45  ;;  %7166 = vcosq.f32 %v10255_v50 }
 0x501   : > { %vm3562_vm14 = vcmp.gt.s32.totalorder %v3561_v55, 0  ;;  %v10305_v46 = vsel %vm10296_vm6, %v10005_v40, %v10259_v33  ;;  %v4355_v63 = vsub.s32 4294967266, %v4350_v24  ;;  %v3505_v41 = vadd.s32 1, %v10285_v18 }
 0x502   : > { %v4675_v11 = vxor.u32 2147483648, %v4674_v53  ;;  %v3502_v31 = vmul.u32 %v3495_v21, %v3486_v61  ;;  %v3558_v44 = vand.u32 8388607, %v12286_v12  ;;  %v3563_v3 = vsel %vm3562_vm14, %v3561_v55, 0 }
 0x503   : > { %v4351_v36 = vsub.s32 32, %v4350_v24  ;;  %v4356_v7 = vadd.s32 127, %v4355_v63  ;;  %vm3504_vm8 = vc.u32 %v10292_v51, %v10284_v56  ;;  %v3762_v59 = vand.u32 2139095040, %v10250_v15 }
 0x504   : > { %7168 = vsinq.f32 %v10255_v50  ;;  %v3506_v33 = vsel %vm3504_vm8, %v3505_v41, %v10285_v18  ;;  %v3565_v57 = vand.u32 31, %v3563_v3  ;;  %vm12299_vm13 = vcmp.lt.s32.totalorder %v10016_v39, 0 }
 0x505   : > { %7170 = vcosq.f32 %v10305_v46  ;;  %v4335_v21 = vadd.s32 %v10211_v47, %v10218_v48  ;;  %v3507_v14 = vadd.s32 %v3506_v33, %v3502_v31  ;;  %v10321_v35 = vsel %vm12299_vm13, %v4675_v11, %v4674_v53 }
 0x506   : > { %v3559_v49 = vor.u32 8388608, %v3558_v44  ;;  %v3566_v29 = vsub.s32 32, %v3565_v57  ;;  %v4357_v45 = vshll.u32 %v4356_v7, 23  ;;  %v3763_v18 = vshrl.u32 %v3762_v59, 23 }
 0x507   : > { %v4353_v50 = vshrl.u32 %v4335_v21, %v4351_v36  ;;  %v3508_v8 = vadd.s32 536870912, %v3507_v14  ;;  %v3568_v2 = vshll.u32 %v12374_v34, %v3565_v57  ;;  %v3571_v53 = vshll.u32 %v12375_v60, %v3565_v57 }
 0x508   : > { %v3569_v55 = vshrl.u32 %v12375_v60, %v3566_v29  ;;  %v3572_v61 = vshrl.u32 %v12376_v5, %v3566_v29  ;;  %v3575_v47 = vshrl.u32 %v12543_v22, %v3566_v29  ;;  %v3574_v27 = vshll.u32 %v12376_v5, %v3565_v57 }
 0x509   : > { %v10328_v48 = vshrl.u32 %v3508_v8, 30  ;;  %v3578_v63 = vshrl.u32 %v12544_v23, %v3566_v29  ;;  %v3564_v41 = vshrl.u32 %v3563_v3, 5  ;;  %v3577_v11 = vshll.u32 %v12543_v22, %v3565_v57 }
 0x50a   : > { %v3580_v31 = vshll.u32 %v12544_v23, %v3565_v57  ;;  %v3581_v44 = vshrl.u32 %v12545_v13, %v3566_v29  ;;  %v10336_v36 = vpop.eup %7166  ;;  %v3570_v59 = vor.u32 %v3569_v55, %v3568_v2  ;;  %v3573_v33 = vor.u32 %v3572_v61, %v3571_v53 }
 0x50b   : > { %v3510_v7 = vshll.u32 %v10328_v48, 30  ;;  %v3576_v21 = vor.u32 %v3575_v47, %v3574_v27  ;;  %v4352_v8 = vshll.u32 %v10271_v19, %v4350_v24  ;;  %v4358_v12 = vor.u32 4788187, %v4357_v45 }
 0x50c   : > { %v3579_v30 = vor.u32 %v3578_v63, %v3577_v11  ;;  %v3599_v16 = vshll.u32 %v3559_v49, 8  ;;  %v3582_v3 = vor.u32 %v3581_v44, %v3580_v31  ;;  %v12554_v17 = vand.u32 2147483647, %v10250_v15 }
 0x50d   : > { %v10340_v25 = vsub.s32 %v3507_v14, %v3510_v7  ;;  %v10346_v0 = vadd.f32 %v10086_v54, %v9997_v62  ;;  %v4354_v2 = vor.u32 %v4353_v50, %v4352_v8  ;;  %vm3583_vm3 = vcmp.lt.s32.totalorder %v3564_v41, 1 }
 0x50e   : > { %v3766_v57 = vand.u32 8388607, %v12554_v17  ;;  %v10348_v26 = vpop.eup %7168  ;;  %vm3586_vm0 = vcmp.lt.s32.totalorder %v3564_v41, 4  ;;  %v6584_v55 = vadd.s32 4294967169, %v3763_v18  ;;  %v3567_v14 = vshrl.u32 %v12374_v34, %v3566_v29 }
 0x50f   : > { %v10350_v19 = vpop.eup %7170  ;;  %v3513_v24 = vsub.s32 0, %v10340_v25  ;;  %v3588_v49 = vsel %vm3586_vm0, %v3576_v21, 2102212464  ;;  %v3591_v45 = vsel %vm3583_vm3, %v3570_v59, %v3573_v33  ;;  %v4359_v17 = vand.u32 2147483647, %v4358_v12 }
 0x510   : > { %vm3585_vm1 = vcmp.lt.s32.totalorder %v3564_v41, 3  ;;  %v3592_v61 = vsel %vm3586_vm0, %v3579_v30, 920167782  ;;  %v3595_v62 = vsel %vm3583_vm3, %v3573_v33, %v3576_v21  ;;  %vm3584_vm15 = vcmp.lt.s32.totalorder %v3564_v41, 2 }
 0x511   : > { %v6573_v54 = vmin.u32 %v3513_v24, %v10340_v25  ;;  %v3593_v50 = vsel %vm3585_vm1, %v3576_v21, %v3592_v61  ;;  %v3596_v47 = vsel %vm3586_vm0, %v3582_v3, 1326507024  ;;  %v3587_v18 = vsel %vm3583_vm3, %v3567_v14, %v3570_v59 }
 0x512   : > { %v3589_v53 = vsel %vm3585_vm1, %v3573_v33, %v3588_v49  ;;  %v3594_v27 = vsel %vm3584_vm15, %v3591_v45, %v3593_v50  ;;  %v3597_v63 = vsel %vm3585_vm1, %v3579_v30, %v3596_v47  ;;  %v4361_v44 = vcvt.s32.f32 %v4354_v2 }
 0x513   : > { %v3515_v29 = vclz %v6573_v54  ;;  %v3598_v11 = vsel %vm3584_vm15, %v3595_v62, %v3597_v63  ;;  %v10360_v31 = vmul.u32.u64.low %v3599_v16, %v3594_v27  ;;  %v10361_v12 = vmul.u32.u64.high %v3599_v16, %v3594_v27, %v10360_v31 }
 0x514   : > { %v10364_v7 = vmul.u32.u64.low %v3599_v16, %v3598_v11  ;;  %v10365_v8 = vmul.u32.u64.high %v3599_v16, %v3598_v11, %v10364_v7  ;;  %v3769_v24 = vadd.s32 1, %v6584_v55  ;;  %7172 = vsinq.f32 %v10305_v46 }
 0x515   : > { %v12555_v59 = vand.u32 2147483647, %v10016_v39  ;;  %v12556_v33 = vmov 0  ;;  %v6574_v30 = vadd.s32 4294967294, %v3515_v29  ;;  %v3590_v21 = vsel %vm3584_vm15, %v3587_v18, %v3589_v53 }
 0x516   : > { %v10381_v2 = vmul.f32 %v4361_v44, %v4359_v17  ;;  %v3767_v55 = vor.u32 8388608, %v3766_v57  ;;  %vm3770_vm5 = vcmp.gt.s32.totalorder %v3769_v24, 0  ;;  %v3609_v46 = vadd.s32 1, %v10361_v12 }
 0x517   : > { %vm10370_vm9 = vcmp.le.f32.partialorder %v12555_v59, 0.7853982  ;;  %vm6575_vm12 = vcmp.lt.s32.totalorder %v6574_v30, 0  ;;  %v3771_v14 = vsel %vm3770_vm5, %v3769_v24, 0  ;;  %v3866_v49 = vand.u32 2139095040, %v10346_v0 }
 0x518   : > { %v12557_v33 = vsel %vm10370_vm9, 4294967295, %v12556_v33  ;;  %v10379_v3 = vsel %vm10370_vm9, %v10016_v39, %v10321_v35  ;;  %v3518_v45 = vsel %vm6575_vm12, 0, %v6574_v30  ;;  %v3606_v61 = vmul.u32 %v3599_v16, %v3590_v21 }
 0x519   : > { %12558 = vst [vmem:[#allocation10_spill] sm:$0xff] %v12557_v33  ;;  %vm3608_vm11 = vc.u32 %v10365_v8, %v10360_v31  ;;  %v10387_v41 = vshrl.u32 %v3771_v14, 5  ;;  %v3503_v35 = vadd.s32 %v10284_v56, %v10292_v51  ;;  %v3519_v17 = vsub.s32 32, %v3518_v45 }
 0x51a   : > { %v3523_v62 = vsub.s32 4294967266, %v3518_v45  ;;  %v3610_v57 = vsel %vm3608_vm11, %v3609_v46, %v10361_v12  ;;  %v3533_v54 = vsub.s32 4, %v10328_v48  ;;  %v3773_v47 = vand.u32 31, %v3771_v14 }
 0x51b   : > { %v3611_v50 = vadd.s32 %v3610_v57, %v3606_v61  ;;  %v10393_v18 = vshll.u32 %v3767_v55, 8  ;;  %v4363_v16 = vxor.u32 2147483648, %v10381_v2  ;;  %v3520_v53 = vshll.u32 %v10340_v25, %v3518_v45 }
 0x51c   : > { %v3524_v27 = vadd.s32 127, %v3523_v62  ;;  %v3867_v63 = vshrl.u32 %v3866_v49, 23  ;;  %v3774_v11 = vsub.s32 32, %v3773_v47  ;;  %vm3791_vm2 = vcmp.lt.s32.totalorder %v10387_v41, 1 }
 0x51d   : > { %v3612_v29 = vadd.s32 536870912, %v3611_v50  ;;  %vm3792_vm14 = vcmp.lt.s32.totalorder %v10387_v41, 2  ;;  %v3521_v56 = vshrl.u32 %v3503_v35, %v3519_v17  ;;  %v3776_v51 = vshll.u32 %v12374_v34, %v3773_v47 }
 0x51e   : > { %v3779_v12 = vshll.u32 %v12375_v60, %v3773_v47  ;;  %vm3793_vm8 = vcmp.lt.s32.totalorder %v10387_v41, 3  ;;  %vm3449_vm3 = vcmp.lt.s32.totalorder %v10182_v32, 0  ;;  %v3525_v44 = vshll.u32 %v3524_v27, 23  ;;  %v10407_v59 = vpop.eup %7172 }
 0x51f   : > { %v10403_v7 = vshrl.u32 %v3612_v29, 30  ;;  %v3777_v25 = vshrl.u32 %v12375_v60, %v3774_v11  ;;  %v3780_v24 = vshrl.u32 %v12376_v5, %v3774_v11  ;;  %vm12319_vm0 = vcmp.lt.s32.totalorder %v10029_v58, 0 }
 0x520   : > { %v3782_v30 = vshll.u32 %v12376_v5, %v3773_v47  ;;  %v3783_v21 = vshrl.u32 %v12543_v22, %v3774_v11  ;;  %v3785_v55 = vshll.u32 %v12543_v22, %v3773_v47  ;;  %v3786_v46 = vshrl.u32 %v12544_v23, %v3774_v11 }
 0x521   : > { %12559 = vst [vmem:[#allocation25_spill] sm:$0xff] %v10403_v7  ;;  %v3614_v14 = vshll.u32 %v10403_v7, 30  ;;  %v3778_v49 = vor.u32 %v3777_v25, %v3776_v51  ;;  %v3781_v45 = vor.u32 %v3780_v24, %v3779_v12  ;;  %vm3794_vm1 = vcmp.lt.s32.totalorder %v10387_v41, 4 }
 0x522   : > { %v12560_v61 = vand.u32 2147483647, %v10182_v32  ;;  %v3784_v17 = vor.u32 %v3783_v21, %v3782_v30  ;;  %v3787_v62 = vor.u32 %v3786_v46, %v3785_v55  ;;  %v3788_v57 = vshll.u32 %v12544_v23, %v3773_v47 }
 0x523   : > { %v3789_v27 = vshrl.u32 %v12545_v13, %v3774_v11  ;;  %v12563_v29 = vand.u32 2147483647, %v10029_v58  ;;  %v12564_v7 = vmov 0  ;;  %v3522_v51 = vor.u32 %v3521_v56, %v3520_v53 }
 0x524   : > { %vm10418_vm15 = vcmp.le.f32.partialorder %v12560_v61, 0.7853982  ;;  %v10430_v12 = vsub.s32 %v3611_v50, %v3614_v14  ;;  %v3775_v25 = vshrl.u32 %v12374_v34, %v3774_v11  ;;  %v3799_v24 = vsel %vm3791_vm2, %v3778_v49, %v3781_v45 }
 0x525   : > { %vm10426_vm5 = vcmp.le.f32.partialorder %v12563_v29, 0.7853982  ;;  %v3526_v30 = vor.u32 4788187, %v3525_v44  ;;  %v3790_v21 = vor.u32 %v3789_v27, %v3788_v57  ;;  %v3796_v47 = vsel %vm3794_vm1, %v3784_v17, 2102212464 }
 0x526   : > { %v12565_v7 = vsel %vm10426_vm5, 4294967295, %v12564_v7  ;;  %v3800_v55 = vsel %vm3794_vm1, %v3787_v62, 920167782  ;;  %v3617_v46 = vsub.s32 0, %v10430_v12  ;;  %v3795_v53 = vsel %vm3791_vm2, %v3775_v25, %v3778_v49 }
 0x527   : > { %12566 = vst [vmem:[#allocation26_spill] sm:$0xff] %v12565_v7  ;;  %v3801_v50 = vsel %vm3793_vm8, %v3784_v17, %v3800_v55  ;;  %v3803_v11 = vsel %vm3791_vm2, %v3781_v45, %v3784_v17  ;;  %v3797_v56 = vsel %vm3793_vm8, %v3781_v45, %v3796_v47  ;;  %v3804_v14 = vsel %vm3794_vm1, %v3790_v21, 1326507024 }
 0x528   : > { %v3802_v44 = vsel %vm3792_vm14, %v3799_v24, %v3801_v50  ;;  %v6588_v61 = vadd.s32 4294967169, %v3867_v63  ;;  %v6577_v57 = vmin.u32 %v3617_v46, %v10430_v12  ;;  %v3805_v49 = vsel %vm3793_vm8, %v3787_v62, %v3804_v14 }
 0x529   : > { %v10456_v27 = vmul.u32.u64.low %v10393_v18, %v3802_v44  ;;  %v10457_v29 = vmul.u32.u64.high %v10393_v18, %v3802_v44, %v10456_v27  ;;  %v3527_v17 = vand.u32 2147483647, %v3526_v30  ;;  %v3534_v45 = vsel %vm3449_vm3, %v3533_v54, %v10328_v48 }
 0x52a   : > { %v3806_v25 = vsel %vm3792_vm14, %v3803_v11, %v3805_v49  ;;  %v12296_v63 = vand.u32 2147483647, %v10346_v0  ;;  %v4364_v24 = vsel %vm12319_vm0, %v4363_v16, %v10381_v2  ;;  %v3619_v62 = vclz %v6577_v57 }
 0x52b   : > { %v10470_v21 = vmul.u32.u64.low %v10393_v18, %v3806_v25  ;;  %v10471_v47 = vmul.u32.u64.high %v10393_v18, %v3806_v25, %v10470_v21  ;;  %7174 = vcosq.f32 %v10379_v3  ;;  %v3529_v30 = vcvt.s32.f32 %v3522_v51 }
 0x52c   : > { %v3798_v48 = vsel %vm3792_vm14, %v3795_v53, %v3797_v56  ;;  %v3873_v54 = vadd.s32 1, %v6588_v61  ;;  %7176 = vsinq.f32 %v10379_v3  ;;  %v3536_v55 = vsel %vm10418_vm15, 0, %v3534_v45 }
 0x52d   : > { %v6578_v46 = vadd.s32 4294967294, %v3619_v62  ;;  %v3817_v2 = vadd.s32 1, %v10457_v29  ;;  %v10483_v16 = vsel %vm10426_vm5, %v10029_v58, %v4364_v24  ;;  %v10485_v50 = vmul.f32 %v3529_v30, %v3527_v17 }
 0x52e   : > { %v3870_v41 = vand.u32 8388607, %v12296_v63  ;;  %vm3874_vm12 = vcmp.gt.s32.totalorder %v3873_v54, 0  ;;  %v3814_v3 = vmul.u32 %v10393_v18, %v3798_v48  ;;  %vm3816_vm2 = vc.u32 %v10471_v47, %v10456_v27 }
 0x52f   : > { %vm6579_vm11 = vcmp.lt.s32.totalorder %v6578_v46, 0  ;;  %v3875_v51 = vsel %vm3874_vm12, %v3873_v54, 0  ;;  %v10492_v53 = vadd.s32 3, %v3536_v55  ;;  %v3818_v56 = vsel %vm3816_vm2, %v3817_v2, %v10457_v29 }
 0x530   : > { %v3622_v11 = vsel %vm6579_vm11, 0, %v6578_v46  ;;  %v3877_v44 = vand.u32 31, %v3875_v51  ;;  %7178 = vcosq.f32 %v10483_v16  ;;  %v3819_v61 = vadd.s32 %v3818_v56, %v3814_v3 }
 0x531   : > { %12567 = vst [vmem:[#allocation20_spill] sm:$0xff] %v10492_v53  ;;  %v3627_v14 = vsub.s32 4294967266, %v3622_v11  ;;  %v10498_v57 = vadd.f32 %v10096_v37, %v10026_v4  ;;  %v3607_v18 = vadd.s32 %v10360_v31, %v10365_v8  ;;  %v3623_v49 = vsub.s32 32, %v3622_v11 }
 0x532   : > { %v3878_v17 = vsub.s32 32, %v3877_v44  ;;  %v10504_v45 = vadd.f32 %v10119_v38, %v10026_v4  ;;  %v3820_v24 = vadd.s32 536870912, %v3819_v61  ;;  %v3871_v62 = vor.u32 8388608, %v3870_v41 }
 0x533   : > { %12568 = vst [vmem:[#allocation7_spill] sm:$0xff] %v10498_v57  ;;  %v3628_v25 = vadd.s32 127, %v3627_v14  ;;  %v3880_v21 = vshll.u32 %v12374_v34, %v3877_v44  ;;  %v3883_v37 = vshll.u32 %v12375_v60, %v3877_v44  ;;  %v3624_v55 = vshll.u32 %v10430_v12, %v3622_v11 }
 0x534   : > { %v3881_v30 = vshrl.u32 %v12375_v60, %v3878_v17  ;;  %v3884_v48 = vshrl.u32 %v12376_v5, %v3878_v17  ;;  %v10511_v8 = vshrl.u32 %v3820_v24, 30  ;;  %v3887_v54 = vshrl.u32 %v12543_v22, %v3878_v17 }
 0x535   : > { %v3629_v31 = vshll.u32 %v3628_v25, 23  ;;  %v3890_v4 = vshrl.u32 %v12544_v23, %v3878_v17  ;;  %v10515_v38 = vpop.eup %7174  ;;  %v3625_v46 = vshrl.u32 %v3607_v18, %v3623_v49  ;;  %v3876_v2 = vshrl.u32 %v3875_v51, 5 }
 0x536   : > { %12569 = vst [vmem:[#allocation8_spill] sm:$0xff] %v10515_v38  ;;  %v3889_v41 = vshll.u32 %v12543_v22, %v3877_v44  ;;  %v10519_v3 = vpop.eup %7176  ;;  %v3822_v56 = vshll.u32 %v10511_v8, 30  ;;  %v3882_v14 = vor.u32 %v3881_v30, %v3880_v21  ;;  %v3885_v25 = vor.u32 %v3884_v48, %v3883_v37 }
 0x537   : > { %12570 = vst [vmem:[#allocation17_spill] sm:$0xff] %v10519_v3  ;;  %v3886_v24 = vshll.u32 %v12376_v5, %v3877_v44  ;;  %v3630_v63 = vor.u32 4788187, %v3629_v31  ;;  %v3892_v53 = vshll.u32 %v12544_v23, %v3877_v44  ;;  %v3893_v33 = vshrl.u32 %v12545_v13, %v3878_v17 }
 0x538   : > { %v3891_v29 = vor.u32 %v3890_v4, %v3889_v41  ;;  %v10525_v38 = vsub.s32 %v3819_v61, %v3822_v56  ;;  %v10527_v51 = vshll.u32 %v3871_v62, 8  ;;  %v12300_v11 = vand.u32 2147483647, %v10498_v57 }
 0x539   : > { %v3888_v12 = vor.u32 %v3887_v54, %v3886_v24  ;;  %v3626_v18 = vor.u32 %v3625_v46, %v3624_v55  ;;  %v3879_v49 = vshrl.u32 %v12374_v34, %v3878_v17  ;;  %v3894_v21 = vor.u32 %v3893_v33, %v3892_v53 }
 0x53a   : > { %v4074_v30 = vand.u32 2139095040, %v10498_v57  ;;  %v10532_v37 = vpop.eup %7178  ;;  %vm3761_vm14 = vcmp.lt.s32.totalorder %v10250_v15, 0  ;;  %v3825_v44 = vsub.s32 0, %v10525_v38  ;;  %vm3895_vm8 = vcmp.lt.s32.totalorder %v3876_v2, 1 }
 0x53b   : > { %12571 = vst [vmem:[#allocation23_spill] sm:$0xff] %v10532_v37  ;;  %vm3896_vm1 = vcmp.lt.s32.totalorder %v3876_v2, 2  ;;  %vm3898_vm12 = vcmp.lt.s32.totalorder %v3876_v2, 4  ;;  %v3631_v61 = vand.u32 2147483647, %v3630_v63  ;;  %vm3897_vm11 = vcmp.lt.s32.totalorder %v3876_v2, 3 }
 0x53c   : > { %v3903_v62 = vsel %vm3895_vm8, %v3882_v14, %v3885_v25  ;;  %v3904_v48 = vsel %vm3898_vm12, %v3891_v29, 920167782  ;;  %v6585_v31 = vmin.u32 %v3825_v44, %v10525_v38  ;;  %v3900_v17 = vsel %vm3898_vm12, %v3888_v12, 2102212464 }
 0x53d   : > { %v3905_v33 = vsel %vm3897_vm11, %v3888_v12, %v3904_v48  ;;  %v3907_v53 = vsel %vm3895_vm8, %v3885_v25, %v3888_v12  ;;  %v3633_v54 = vcvt.s32.f32 %v3626_v18  ;;  %v3908_v55 = vsel %vm3898_vm12, %v3894_v21, 1326507024 }
 0x53e   : > { %v3906_v4 = vsel %vm3896_vm1, %v3903_v62, %v3905_v33  ;;  %v4075_v46 = vshrl.u32 %v4074_v30, 23  ;;  %v12572_v41 = vand.u32 2147483647, %v10250_v15  ;;  %v3827_v56 = vclz %v6585_v31 }
 0x53f   : > { %v3845_v24 = vsub.s32 4, %v10511_v8  ;;  %v3899_v44 = vsel %vm3895_vm8, %v3879_v49, %v3882_v14  ;;  %v3909_v48 = vsel %vm3897_vm11, %v3891_v29, %v3908_v55  ;;  %vm12318_vm13 = vcmp.lt.s32.totalorder %v10236_v20, 0 }
 0x540   : > { %vm10543_vm2 = vcmp.le.f32.partialorder %v12572_v41, 0.7853982  ;;  %v3901_v12 = vsel %vm3897_vm11, %v3885_v25, %v3900_v17  ;;  %v3910_v18 = vsel %vm3896_vm1, %v3907_v53, %v3909_v48  ;;  %v3634_v62 = vmul.f32 %v3633_v54, %v3631_v61  ;;  %v6620_v53 = vld [vmem:[%s8740_s18 + $0x40] sm:$0xff] }
 0x541   : > { %v10554_v21 = vmul.u32.u64.low %v10527_v51, %v3906_v4  ;;  %v10555_v30 = vmul.u32.u64.high %v10527_v51, %v3906_v4, %v10554_v21  ;;  %v6586_v31 = vadd.s32 4294967294, %v3827_v56  ;;  %7180 = vsinq.f32 %v10483_v16 }
 0x542   : > { %v10559_v33 = vmul.u32.u64.low %v10527_v51, %v3910_v18  ;;  %v10560_v41 = vmul.u32.u64.high %v10527_v51, %v3910_v18, %v10559_v33  ;;  %v12575_v29 = vxor.u32 2147483648, %v10485_v50  ;;  %v6596_v25 = vadd.s32 4294967169, %v4075_v46 }
 0x543   : > { %v10570_v49 = vadd.f32 %v10175_v9, %v10009_v43  ;;  %v3815_v61 = vadd.s32 %v10456_v27, %v10471_v47  ;;  %vm6587_vm8 = vcmp.lt.s32.totalorder %v6586_v31, 0  ;;  %v3902_v17 = vsel %vm3896_vm1, %v3899_v44, %v3901_v12 }
 0x544   : > { %v3532_v14 = vsel %vm3449_vm3, %v12575_v29, %v10485_v50  ;;  %v4078_v16 = vand.u32 8388607, %v12300_v11  ;;  %v3830_v54 = vsel %vm6587_vm8, 0, %v6586_v31  ;;  %v10581_v50 = vsel %vm3761_vm14, %v3845_v24, %v10511_v8 }
 0x545   : > { %v3921_v4 = vadd.s32 1, %v10555_v30  ;;  %v4081_v9 = vadd.s32 1, %v6596_v25  ;;  %vm12576_vm3 = vcmask 261120   ;;  %v3635_v55 = vxor.u32 2147483648, %v3634_v62 }
 0x546   : > { %6755 = vmatprep.mubr.msk.f32.mxu1 %vm12576_vm3, %v6620_v53  ;;  %v3831_v27 = vsub.s32 32, %v3830_v54  ;;  %v3835_v47 = vsub.s32 4294967266, %v3830_v54  ;;  %v4178_v2 = vand.u32 2139095040, %v10504_v45  ;;  %v10589_v46 = vsel %vm10418_vm15, %v10182_v32, %v3532_v14 }
 0x547   : > { %v3918_v56 = vmul.u32 %v10527_v51, %v3902_v17  ;;  %vm3920_vm1 = vc.u32 %v10560_v41, %v10554_v21  ;;  %vm4082_vm12 = vcmp.gt.s32.totalorder %v4081_v9, 0  ;;  %v3832_v12 = vshll.u32 %v10525_v38, %v3830_v54 }
 0x548   : > { %v3833_v8 = vshrl.u32 %v3815_v61, %v3831_v27  ;;  %v3836_v24 = vadd.s32 127, %v3835_v47  ;;  %v3922_v44 = vsel %vm3920_vm1, %v3921_v4, %v10555_v30  ;;  %v4083_v48 = vsel %vm4082_vm12, %v4081_v9, 0 }
 0x549   : > { %v3923_v35 = vadd.s32 %v3922_v44, %v3918_v56  ;;  %v4085_v31 = vand.u32 31, %v4083_v48  ;;  %v3636_v51 = vsel %vm12318_vm13, %v3635_v55, %v3634_v62  ;;  %v4079_v29 = vor.u32 8388608, %v4078_v16 }
 0x54a   : > { %v3837_v33 = vshll.u32 %v3836_v24, 23  ;;  %v4179_v14 = vshrl.u32 %v4178_v2, 23  ;;  %v3834_v25 = vor.u32 %v3833_v8, %v3832_v12  ;;  %v4084_v17 = vshrl.u32 %v4083_v48, 5 }
 0x54b   : > { %v3924_v61 = vadd.s32 536870912, %v3923_v35  ;;  %v4086_v53 = vsub.s32 32, %v4085_v31  ;;  %v4088_v4 = vshll.u32 %v12374_v34, %v4085_v31  ;;  %v4091_v38 = vshll.u32 %v12375_v60, %v4085_v31  ;;  %v10604_v9 = vpop.eup %7180 }
 0x54c   : > { %v3838_v30 = vor.u32 4788187, %v3837_v33  ;;  %v4094_v54 = vshll.u32 %v12376_v5, %v4085_v31  ;;  %v4097_v55 = vshll.u32 %v12543_v22, %v4085_v31  ;;  %v12578_v47 = vand.u32 2147483647, %v10236_v20 }
 0x54d   : > { %v10606_v27 = vshrl.u32 %v3924_v61, 30  ;;  %v4089_v62 = vshrl.u32 %v12375_v60, %v4086_v53  ;;  %v4092_v16 = vshrl.u32 %v12376_v5, %v4086_v53  ;;  %v4095_v8 = vshrl.u32 %v12543_v22, %v4086_v53 }
 0x54e   : > { %vm10613_vm15 = vcmp.le.f32.partialorder %v12578_v47, 0.7853982  ;;  %v3839_v56 = vand.u32 2147483647, %v3838_v30  ;;  %v4098_v24 = vshrl.u32 %v12544_v23, %v4086_v53  ;;  %v4100_v44 = vshll.u32 %v12544_v23, %v4085_v31 }
 0x54f   : > { %12577 = vst [vmem:[#allocation31_spill] sm:$0xff] %v10606_v27  ;;  %v3926_v48 = vshll.u32 %v10606_v27, 30  ;;  %v4090_v12 = vor.u32 %v4089_v62, %v4088_v4  ;;  %v4093_v33 = vor.u32 %v4092_v16, %v4091_v38  ;;  %v4101_v61 = vshrl.u32 %v12545_v13, %v4086_v53 }
 0x550   : > { %v3841_v11 = vcvt.s32.f32 %v3834_v25  ;;  %v4096_v18 = vor.u32 %v4095_v8, %v4094_v54  ;;  %v4099_v32 = vor.u32 %v4098_v24, %v4097_v55  ;;  %v4119_v47 = vshll.u32 %v4079_v29, 8 }
 0x551   : > { %v10622_v39 = vsub.s32 %v3923_v35, %v3926_v48  ;;  %v4102_v3 = vor.u32 %v4101_v61, %v4100_v44  ;;  %vm4103_vm11 = vcmp.lt.s32.totalorder %v4084_v17, 1  ;;  %v6600_v30 = vadd.s32 4294967169, %v4179_v14 }
 0x552   : > { %v3842_v37 = vmul.f32 %v3841_v11, %v3839_v56  ;;  %v4087_v7 = vshrl.u32 %v12374_v34, %v4086_v53  ;;  %vm4106_vm8 = vcmp.lt.s32.totalorder %v4084_v17, 4  ;;  %v4111_v31 = vsel %vm4103_vm11, %v4090_v12, %v4093_v33 }
 0x553   : > { %v3929_v27 = vsub.s32 0, %v10622_v39  ;;  %vm4105_vm3 = vcmp.lt.s32.totalorder %v4084_v17, 3  ;;  %v4108_v4 = vsel %vm4106_vm8, %v4096_v18, 2102212464  ;;  %v4112_v38 = vsel %vm4106_vm8, %v4099_v32, 920167782 }
 0x554   : > { %vm4104_vm1 = vcmp.lt.s32.totalorder %v4084_v17, 2  ;;  %v4113_v25 = vsel %vm4105_vm3, %v4096_v18, %v4112_v38  ;;  %v4115_v54 = vsel %vm4103_vm11, %v4093_v33, %v4096_v18  ;;  %v4116_v62 = vsel %vm4106_vm8, %v4102_v3, 1326507024 }
 0x555   : > { %v6589_v35 = vmin.u32 %v3929_v27, %v10622_v39  ;;  %v4107_v29 = vsel %vm4103_vm11, %v4087_v7, %v4090_v12  ;;  %v4114_v16 = vsel %vm4104_vm1, %v4111_v31, %v4113_v25  ;;  %v12311_v11 = vand.u32 2147483647, %v10504_v45 }
 0x556   : > { %v4109_v14 = vsel %vm4105_vm3, %v4093_v33, %v4108_v4  ;;  %v4117_v53 = vsel %vm4105_vm3, %v4099_v32, %v4116_v62  ;;  %v10629_v55 = vmul.u32.u64.low %v4119_v47, %v4114_v16  ;;  %v10630_v56 = vmul.u32.u64.high %v4119_v47, %v4114_v16, %v10629_v55 }
 0x557   : > { %v3639_v8 = vsel %vm10613_vm15, %v10236_v20, %v3636_v51  ;;  %v3843_v24 = vxor.u32 2147483648, %v3842_v37  ;;  %v3931_v18 = vclz %v6589_v35  ;;  %v4118_v3 = vsel %vm4104_vm1, %v4115_v54, %v4117_v53 }
 0x558   : > { %7182 = vcosq.f32 %v10589_v46  ;;  %v10638_v7 = vmul.u32.u64.low %v4119_v47, %v4118_v3  ;;  %v10639_v27 = vmul.u32.u64.high %v4119_v47, %v4118_v3, %v10638_v7  ;;  %v4185_v44 = vadd.s32 1, %v6600_v30 }
 0x559   : > { %7184 = vsinq.f32 %v10589_v46  ;;  %v12581_v32 = vsel %vm10543_vm2, 0, %v10581_v50  ;;  %v6590_v12 = vadd.s32 4294967294, %v3931_v18  ;;  %v4110_v51 = vsel %vm4104_vm1, %v4107_v29, %v4109_v14 }
 0x55a   : > { %v10646_v48 = vadd.s32 3, %v12581_v32  ;;  %7186 = vcosq.f32 %v3639_v8  ;;  %v4129_v33 = vadd.s32 1, %v10630_v56  ;;  %v10652_v61 = vand.u32 8388607, %v12311_v11 }
 0x55b   : > { %vm4186_vm12 = vcmp.gt.s32.totalorder %v4185_v44, 0  ;;  %7188 = vsinq.f32 %v3639_v8  ;;  %v3844_v46 = vsel %vm3761_vm14, %v3843_v24, %v3842_v37  ;;  %vm6591_vm11 = vcmp.lt.s32.totalorder %v6590_v12, 0 }
 0x55c   : > { %12582 = vst [vmem:[#allocation18_spill] sm:$0xff] %v10646_v48  ;;  %v4187_v30 = vsel %vm4186_vm12, %v4185_v44, 0  ;;  %v3934_v50 = vsel %vm6591_vm11, 0, %v6590_v12  ;;  %v4126_v31 = vmul.u32 %v4119_v47, %v4110_v51  ;;  %vm4128_vm8 = vc.u32 %v10639_v27, %v10629_v55 }
 0x55d   : > { %v12310_v17 = vand.u32 2147483647, %v10570_v49  ;;  %v3919_v4 = vadd.s32 %v10554_v21, %v10560_v41  ;;  %v3935_v38 = vsub.s32 32, %v3934_v50  ;;  %v3939_v25 = vsub.s32 4294967266, %v3934_v50 }
 0x55e   : > { %v4130_v54 = vsel %vm4128_vm8, %v4129_v33, %v10630_v56  ;;  %v10665_v37 = vsel %vm10543_vm2, %v10250_v15, %v3844_v46  ;;  %v4183_v47 = vor.u32 8388608, %v10652_v61  ;;  %v4189_v35 = vand.u32 31, %v4187_v30 }
 0x55f   : > { %v4131_v62 = vadd.s32 %v4130_v54, %v4126_v31  ;;  %v3936_v29 = vshll.u32 %v10622_v39, %v3934_v50  ;;  %v3937_v16 = vshrl.u32 %v3919_v4, %v3935_v38  ;;  %v3940_v14 = vadd.s32 127, %v3939_v25 }
 0x560   : > { %v4386_v53 = vand.u32 2139095040, %v10570_v49  ;;  %v4188_v41 = vshrl.u32 %v4187_v30, 5  ;;  %v4190_v8 = vsub.s32 32, %v4189_v35  ;;  %v10672_v56 = vand.u32 8388607, %v12310_v17 }
 0x561   : > { %v4132_v21 = vadd.s32 536870912, %v4131_v62  ;;  %v3938_v63 = vor.u32 %v3937_v16, %v3936_v29  ;;  %v3941_v24 = vshll.u32 %v3940_v14, 23  ;;  %v4192_v18 = vshll.u32 %v12374_v34, %v4189_v35 }
 0x562   : > { %v4195_v3 = vshll.u32 %v12375_v60, %v4189_v35  ;;  %v10676_v7 = vpop.eup %7182  ;;  %v4193_v44 = vshrl.u32 %v12375_v60, %v4190_v8  ;;  %v4196_v32 = vshrl.u32 %v12376_v5, %v4190_v8  ;;  %v4198_v12 = vshll.u32 %v12376_v5, %v4189_v35 }
 0x563   : > { %v10678_v39 = vshrl.u32 %v4132_v21, 30  ;;  %v10683_v51 = vpop.eup %7184  ;;  %v3942_v33 = vor.u32 4788187, %v3941_v24  ;;  %v4199_v61 = vshrl.u32 %v12543_v22, %v4190_v8  ;;  %v4201_v46 = vshll.u32 %v12543_v22, %v4189_v35 }
 0x564   : > { %v4202_v30 = vshrl.u32 %v12544_v23, %v4190_v8  ;;  %v10688_v50 = vpop.eup %7186  ;;  %v4194_v4 = vor.u32 %v4193_v44, %v4192_v18  ;;  %v4197_v38 = vor.u32 %v4196_v32, %v4195_v3  ;;  %v4387_v25 = vshrl.u32 %v4386_v53, 23 }
 0x565   : > { %v4134_v31 = vshll.u32 %v10678_v39, 30  ;;  %v10691_v54 = vpop.eup %7188  ;;  %v3943_v29 = vand.u32 2147483647, %v3942_v33  ;;  %v4200_v16 = vor.u32 %v4199_v61, %v4198_v12  ;;  %vm4210_vm14 = vcmp.lt.s32.totalorder %v4188_v41, 4 }
 0x566   : > { %v4203_v14 = vor.u32 %v4202_v30, %v4201_v46  ;;  %v3945_v21 = vcvt.s32.f32 %v3938_v63  ;;  %v4204_v17 = vshll.u32 %v12544_v23, %v4189_v35  ;;  %v4205_v11 = vshrl.u32 %v12545_v13, %v4190_v8 }
 0x567   : > { %v10693_v24 = vsub.s32 %v4131_v62, %v4134_v31  ;;  %v4191_v15 = vshrl.u32 %v12374_v34, %v4190_v8  ;;  %vm4207_vm2 = vcmp.lt.s32.totalorder %v4188_v41, 1  ;;  %vm4208_vm3 = vcmp.lt.s32.totalorder %v4188_v41, 2 }
 0x568   : > { %v4212_v18 = vsel %vm4210_vm14, %v4200_v16, 2102212464  ;;  %vm12313_vm1 = vcmp.lt.s32.totalorder %v10346_v0, 0  ;;  %v3946_v53 = vmul.f32 %v3945_v21, %v3943_v29  ;;  %v4206_v44 = vor.u32 %v4205_v11, %v4204_v17 }
 0x569   : > { %v4137_v3 = vsub.s32 0, %v10693_v24  ;;  %v4215_v32 = vsel %vm4207_vm2, %v4194_v4, %v4197_v38  ;;  %vm4209_vm12 = vcmp.lt.s32.totalorder %v4188_v41, 3  ;;  %v4211_v62 = vsel %vm4207_vm2, %v4191_v15, %v4194_v4 }
 0x56a   : > { %v4216_v63 = vsel %vm4210_vm14, %v4203_v14, 920167782  ;;  %v4219_v35 = vsel %vm4207_vm2, %v4197_v38, %v4200_v16  ;;  %v4213_v33 = vsel %vm4209_vm12, %v4197_v38, %v4212_v18  ;;  %v4220_v61 = vsel %vm4210_vm14, %v4206_v44, 1326507024 }
 0x56b   : > { %v6597_v12 = vmin.u32 %v4137_v3, %v10693_v24  ;;  %v4217_v8 = vsel %vm4209_vm12, %v4200_v16, %v4216_v63  ;;  %v4221_v30 = vsel %vm4209_vm12, %v4203_v14, %v4220_v61  ;;  %v4223_v31 = vshll.u32 %v4183_v47, 8 }
 0x56c   : > { %v4218_v46 = vsel %vm4208_vm3, %v4215_v32, %v4217_v8  ;;  %v6608_v29 = vadd.s32 4294967169, %v4387_v25  ;;  %7190 = vcosq.f32 %v10665_v37  ;;  %v3947_v11 = vxor.u32 2147483648, %v3946_v53 }
 0x56d   : > { %v4139_v17 = vclz %v6597_v12  ;;  %v4222_v15 = vsel %vm4208_vm3, %v4219_v35, %v4221_v30  ;;  %v4214_v4 = vsel %vm4208_vm3, %v4211_v62, %v4213_v33  ;;  %v4391_v47 = vor.u32 8388608, %v10672_v56 }
 0x56e   : > { %v10708_v21 = vmul.u32.u64.low %v4223_v31, %v4222_v15  ;;  %v10709_v48 = vmul.u32.u64.high %v4223_v31, %v4222_v15, %v10708_v21  ;;  %v4393_v38 = vadd.s32 1, %v6608_v29  ;;  %v4127_v25 = vadd.s32 %v10629_v55, %v10639_v27 }
 0x56f   : > { %v6598_v16 = vadd.s32 4294967294, %v4139_v17  ;;  %v10711_v18 = vmul.u32.u64.low %v4223_v31, %v4218_v46  ;;  %v10712_v3 = vmul.u32.u64.high %v4223_v31, %v4218_v46, %v10711_v18  ;;  %v10720_v14 = vadd.f32 %v10220_v1, %v10009_v43 }
 0x570   : > { %vm4394_vm11 = vcmp.gt.s32.totalorder %v4393_v38, 0  ;;  %v4230_v32 = vmul.u32 %v4223_v31, %v4214_v4  ;;  %v10726_v63 = vsel %vm12313_vm1, %v3947_v11, %v3946_v53  ;;  %v10733_v35 = vshll.u32 %v4391_v47, 8 }
 0x571   : > { %vm6599_vm8 = vcmp.lt.s32.totalorder %v6598_v16, 0  ;;  %v4395_v62 = vsel %vm4394_vm11, %v4393_v38, 0  ;;  %vm4232_vm14 = vc.u32 %v10709_v48, %v10711_v18  ;;  %v4233_v1 = vadd.s32 1, %v10712_v3 }
 0x572   : > { %v4142_v56 = vsel %vm6599_vm8, 0, %v6598_v16  ;;  %v10730_v55 = vshrl.u32 %v4395_v62, 5  ;;  %v4397_v33 = vand.u32 31, %v4395_v62  ;;  %v4490_v53 = vand.u32 2139095040, %v10720_v14 }
 0x573   : > { %v4143_v27 = vsub.s32 32, %v4142_v56  ;;  %v4147_v43 = vsub.s32 4294967266, %v4142_v56  ;;  %v4144_v12 = vshll.u32 %v10693_v24, %v4142_v56  ;;  %v4234_v30 = vsel %vm4232_vm14, %v4233_v1, %v10712_v3 }
 0x574   : > { %vm4415_vm2 = vcmp.lt.s32.totalorder %v10730_v55, 1  ;;  %v4235_v31 = vadd.s32 %v4234_v30, %v4230_v32  ;;  %v4398_v29 = vsub.s32 32, %v4397_v33  ;;  %v4400_v11 = vshll.u32 %v12374_v34, %v4397_v33 }
 0x575   : > { %v4145_v61 = vshrl.u32 %v4127_v25, %v4143_v27  ;;  %v4148_v46 = vadd.s32 127, %v4147_v43  ;;  %vm4416_vm3 = vcmp.lt.s32.totalorder %v10730_v55, 2  ;;  %vm4417_vm12 = vcmp.lt.s32.totalorder %v10730_v55, 3 }
 0x576   : > { %v10743_v24 = vpop.eup %7190  ;;  %v4403_v4 = vshll.u32 %v12375_v60, %v4397_v33  ;;  %v4406_v21 = vshll.u32 %v12376_v5, %v4397_v33  ;;  %v12583_v38 = vand.u32 2147483647, %v10346_v0  ;;  %v4236_v3 = vadd.s32 536870912, %v4235_v31 }
 0x577   : > { %v4146_v17 = vor.u32 %v4145_v61, %v4144_v12  ;;  %v4149_v15 = vshll.u32 %v4148_v46, 23  ;;  %v4401_v47 = vshrl.u32 %v12375_v60, %v4398_v29  ;;  %v4404_v25 = vshrl.u32 %v12376_v5, %v4398_v29 }
 0x578   : > { %vm10749_vm11 = vcmp.le.f32.partialorder %v12583_v38, 0.7853982  ;;  %v4409_v32 = vshll.u32 %v12543_v22, %v4397_v33  ;;  %vm4073_vm8 = vcmp.lt.s32.totalorder %v10498_v57, 0  ;;  %v4407_v27 = vshrl.u32 %v12543_v22, %v4398_v29 }
 0x579   : > { %v4150_v62 = vor.u32 4788187, %v4149_v15  ;;  %v4153_v56 = vcvt.s32.f32 %v4146_v17  ;;  %v4410_v43 = vshrl.u32 %v12544_v23, %v4398_v29  ;;  %v10759_v1 = vshrl.u32 %v4236_v3, 30 }
 0x57a   : > { %v4402_v12 = vor.u32 %v4401_v47, %v4400_v11  ;;  %v4405_v61 = vor.u32 %v4404_v25, %v4403_v4  ;;  %v4412_v46 = vshll.u32 %v12544_v23, %v4397_v33  ;;  %v4408_v38 = vor.u32 %v4407_v27, %v4406_v21 }
 0x57b   : > { %v4151_v30 = vand.u32 2147483647, %v4150_v62  ;;  %v4411_v44 = vor.u32 %v4410_v43, %v4409_v32  ;;  %v4413_v8 = vshrl.u32 %v12545_v13, %v4398_v29  ;;  %v12586_v41 = vand.u32 2147483647, %v10498_v57 }
 0x57c   : > { %v4238_v17 = vshll.u32 %v10759_v1, 30  ;;  %v4399_v3 = vshrl.u32 %v12374_v34, %v4398_v29  ;;  %vm4418_vm1 = vcmp.lt.s32.totalorder %v10730_v55, 4  ;;  %v4423_v33 = vsel %vm4415_vm2, %v4402_v12, %v4405_v61 }
 0x57d   : > { %vm10765_vm14 = vcmp.le.f32.partialorder %v12586_v41, 0.7853982  ;;  %v4154_v11 = vmul.f32 %v4153_v56, %v4151_v30  ;;  %v4414_v4 = vor.u32 %v4413_v8, %v4412_v46  ;;  %v4420_v21 = vsel %vm4418_vm1, %v4408_v38, 2102212464 }
 0x57e   : > { %v4424_v47 = vsel %vm4418_vm1, %v4411_v44, 920167782  ;;  %v10774_v25 = vsub.s32 %v4235_v31, %v4238_v17  ;;  %v4419_v41 = vsel %vm4415_vm2, %v4399_v3, %v4402_v12  ;;  %v4427_v29 = vsel %vm4415_vm2, %v4405_v61, %v4408_v38 }
 0x57f   : > { %v4425_v32 = vsel %vm4417_vm12, %v4408_v38, %v4424_v47  ;;  %v4155_v62 = vxor.u32 2147483648, %v4154_v11  ;;  %v4421_v27 = vsel %vm4417_vm12, %v4405_v61, %v4420_v21  ;;  %v4428_v56 = vsel %vm4418_vm1, %v4414_v4, 1326507024 }
 0x580   : > { %v4426_v8 = vsel %vm4416_vm3, %v4423_v33, %v4425_v32  ;;  %v4241_v31 = vsub.s32 0, %v10774_v25  ;;  %v4429_v43 = vsel %vm4417_vm12, %v4411_v44, %v4428_v56  ;;  %v3951_v30 = vsel %vm10749_vm11, %v10346_v0, %v10726_v63 }
 0x581   : > { %v10790_v12 = vmul.u32.u64.low %v10733_v35, %v4426_v8  ;;  %v10791_v46 = vmul.u32.u64.high %v10733_v35, %v4426_v8, %v10790_v12  ;;  %v4430_v61 = vsel %vm4416_vm3, %v4427_v29, %v4429_v43  ;;  %v4491_v38 = vshrl.u32 %v4490_v53, 23 }
 0x582   : > { %v12589_v17 = vsub.s32 4, %v10147_v52  ;;  %v4156_v44 = vsel %vm4073_vm8, %v4155_v62, %v4154_v11  ;;  %v6601_v33 = vmin.u32 %v4241_v31, %v10774_v25  ;;  %7192 = vsinq.f32 %v10665_v37 }
 0x583   : > { %v10808_v4 = vmul.u32.u64.low %v10733_v35, %v4430_v61  ;;  %v10809_v21 = vmul.u32.u64.high %v10733_v35, %v4430_v61, %v10808_v4  ;;  %v4422_v63 = vsel %vm4416_vm3, %v4419_v41, %v4421_v27  ;;  %v6612_v53 = vadd.s32 4294967169, %v4491_v38 }
 0x584   : > { %v3742_v3 = vsel %vm3657_vm10, %v12589_v17, %v10147_v52  ;;  %v12590_v47 = vand.u32 2147483647, %v10720_v14  ;;  %7194 = vcosq.f32 %v3951_v30  ;;  %v4243_v52 = vclz %v6601_v33 }
 0x585   : > { %v4441_v29 = vadd.s32 1, %v10791_v46  ;;  %v3744_v11 = vsel %vm10296_vm6, 0, %v3742_v3  ;;  %7196 = vsinq.f32 %v3951_v30  ;;  %v12591_v62 = vsub.s32 4, %v10678_v39 }
 0x586   : > { %v4494_v32 = vand.u32 8388607, %v12590_v47  ;;  %v4159_v55 = vsel %vm10765_vm14, %v10498_v57, %v4156_v44  ;;  %v4497_v41 = vadd.s32 1, %v6612_v53  ;;  %v4231_v27 = vadd.s32 %v10711_v18, %v10709_v48 }
 0x587   : > { %v10824_v37 = vsel %vm4073_vm8, %v12591_v62, %v10678_v39  ;;  %v6602_v8 = vadd.s32 4294967294, %v4243_v52  ;;  %v4438_v42 = vmul.u32 %v10733_v35, %v4422_v63  ;;  %vm4440_vm10 = vc.u32 %v10809_v21, %v10790_v12 }
 0x588   : > { %v4442_v56 = vsel %vm4440_vm10, %v4441_v29, %v10791_v46  ;;  %v4495_v31 = vor.u32 8388608, %v4494_v32  ;;  %vm4498_vm6 = vcmp.gt.s32.totalorder %v4497_v41, 0  ;;  %v3748_v43 = vadd.s32 3, %v3744_v11 }
 0x589   : > { %7198 = vcosq.f32 %v4159_v55  ;;  %vm6603_vm1 = vcmp.lt.s32.totalorder %v6602_v8, 0  ;;  %v4443_v39 = vadd.s32 %v4442_v56, %v4438_v42  ;;  %v4499_v30 = vsel %vm4498_vm6, %v4497_v41, 0 }
 0x58a   : > { %7200 = vsinq.f32 %v4159_v55  ;;  %v4246_v61 = vsel %vm6603_vm1, 0, %v6602_v8  ;;  %v4501_v38 = vand.u32 31, %v4499_v30  ;;  %v10837_v44 = vadd.s32 %v10790_v12, %v10809_v21 }
 0x58b   : > { %v4247_v48 = vsub.s32 32, %v4246_v61  ;;  %v4251_v18 = vsub.s32 4294967266, %v4246_v61  ;;  %v4444_v3 = vadd.s32 536870912, %v4443_v39  ;;  %v10839_v33 = vshll.u32 %v4495_v31, 8 }
 0x58c   : > { %v4502_v46 = vsub.s32 32, %v4501_v38  ;;  %v10841_v4 = vand.u32 3, %v3748_v43  ;;  %v4248_v63 = vshll.u32 %v10774_v25, %v4246_v61  ;;  %v10846_v52 = vpop.eup %7192  ;;  %v4504_v29 = vshll.u32 %v12374_v34, %v4501_v38 }
 0x58d   : > { %v4249_v53 = vshrl.u32 %v4231_v27, %v4247_v48  ;;  %v4252_v47 = vadd.s32 127, %v4251_v18  ;;  %v10844_v32 = vshrl.u32 %v4444_v3, 30  ;;  %v4510_v27 = vshll.u32 %v12376_v5, %v4501_v38 }
 0x58e   : > { %v4505_v11 = vshrl.u32 %v12375_v60, %v4502_v46  ;;  %v4508_v12 = vshrl.u32 %v12376_v5, %v4502_v46  ;;  %v4511_v21 = vshrl.u32 %v12543_v22, %v4502_v46  ;;  %v10852_v62 = vpop.eup %7194  ;;  %v4500_v42 = vshrl.u32 %v4499_v30, 5 }
 0x58f   : > { %v4250_v55 = vor.u32 %v4249_v53, %v4248_v63  ;;  %v4253_v41 = vshll.u32 %v4252_v47, 23  ;;  %v4446_v25 = vshll.u32 %v10844_v32, 30  ;;  %v10856_v8 = vpop.eup %7196  ;;  %v4507_v56 = vshll.u32 %v12375_v60, %v4501_v38 }
 0x590   : > { %v4513_v31 = vshll.u32 %v12543_v22, %v4501_v38  ;;  %v4514_v43 = vshrl.u32 %v12544_v23, %v4502_v46  ;;  %vm4177_vm2 = vcmp.lt.s32.totalorder %v10504_v45, 0  ;;  %v4506_v18 = vor.u32 %v4505_v11, %v4504_v29 }
 0x591   : > { %v4254_v61 = vor.u32 4788187, %v4253_v41  ;;  %v10862_v48 = vsub.s32 %v4443_v39, %v4446_v25  ;;  %v4512_v3 = vor.u32 %v4511_v21, %v4510_v27  ;;  %v4509_v63 = vor.u32 %v4508_v12, %v4507_v56 }
 0x592   : > { %v4515_v53 = vor.u32 %v4514_v43, %v4513_v31  ;;  %v4516_v47 = vshll.u32 %v12544_v23, %v4501_v38  ;;  %v4517_v35 = vshrl.u32 %v12545_v13, %v4502_v46  ;;  %v4257_v5 = vcvt.s32.f32 %v4250_v55 }
 0x593   : > { %v10866_v30 = vpop.eup %7198  ;;  %v4255_v17 = vand.u32 2147483647, %v4254_v61  ;;  %v4449_v22 = vsub.s32 0, %v10862_v48  ;;  %v4503_v60 = vshrl.u32 %v12374_v34, %v4502_v46  ;;  %vm4519_vm3 = vcmp.lt.s32.totalorder %v4500_v42, 1 }
 0x594   : > { %v10870_v57 = vpop.eup %7200  ;;  %v4518_v39 = vor.u32 %v4517_v35, %v4516_v47  ;;  %vm4520_vm12 = vcmp.lt.s32.totalorder %v4500_v42, 2  ;;  %vm4522_vm8 = vcmp.lt.s32.totalorder %v4500_v42, 4  ;;  %v12592_v29 = vand.u32 2147483647, %v10504_v45 }
 0x595   : > { %v4258_v11 = vmul.f32 %v4257_v5, %v4255_v17  ;;  %v6609_v12 = vmin.u32 %v4449_v22, %v10862_v48  ;;  %vm4521_vm6 = vcmp.lt.s32.totalorder %v4500_v42, 3  ;;  %v4524_v21 = vsel %vm4522_vm8, %v4512_v3, 2102212464 }
 0x596   : > { %vm10874_vm10 = vcmp.le.f32.partialorder %v12592_v29, 0.7853982  ;;  %v4523_v55 = vsel %vm4519_vm3, %v4503_v60, %v4506_v18  ;;  %v4525_v46 = vsel %vm4521_vm6, %v4509_v63, %v4524_v21  ;;  %v4527_v41 = vsel %vm4519_vm3, %v4506_v18, %v4509_v63 }
 0x597   : > { %v4528_v25 = vsel %vm4522_vm8, %v4515_v53, 920167782  ;;  %v4259_v35 = vxor.u32 2147483648, %v4258_v11  ;;  %v4451_v27 = vclz %v6609_v12  ;;  %v4531_v31 = vsel %vm4519_vm3, %v4509_v63, %v4512_v3 }
 0x598   : > { %v4529_v56 = vsel %vm4521_vm6, %v4512_v3, %v4528_v25  ;;  %v4532_v61 = vsel %vm4522_vm8, %v4518_v39, 1326507024  ;;  %vm3750_vm1 = vcmp.lt.s32.totalorder %v10841_v4, 2  ;;  %v4053_v5 = vsub.s32 4, %v10117_v28 }
 0x599   : > { %v4530_v43 = vsel %vm4520_vm12, %v4527_v41, %v4529_v56  ;;  %v6610_v22 = vadd.s32 4294967294, %v4451_v27  ;;  %v4526_v17 = vsel %vm4520_vm12, %v4523_v55, %v4525_v46  ;;  %v4533_v60 = vsel %vm4521_vm6, %v4515_v53, %v4532_v61 }
 0x59a   : > { %vm3747_vm13 = vweird.f32 %v10005_v40  ;;  %vm3751_vm0 = vcmp.eq.s32.totalorder %v10841_v4, 0  ;;  %v4260_v18 = vsel %vm4177_vm2, %v4259_v35, %v4258_v11  ;;  %v4534_v3 = vsel %vm4520_vm12, %v4531_v31, %v4533_v60  ;;  %v12597_v60 = vld [vmem:[#allocation9_spill] sm:$0xff] }
 0x59b   : > { %v10892_v63 = vmul.u32.u64.low %v10839_v33, %v4530_v43  ;;  %v10893_v47 = vmul.u32.u64.high %v10839_v33, %v4530_v43, %v10892_v63  ;;  %vm6611_vm3 = vcmp.lt.s32.totalorder %v6610_v22, 0  ;;  %vm3754_vm8 = vcmp.eq.s32.totalorder %v10841_v4, 2 }
 0x59c   : > { %v10897_v39 = vmul.u32.u64.low %v10839_v33, %v4534_v3  ;;  %v10898_v29 = vmul.u32.u64.high %v10839_v33, %v4534_v3, %v10897_v39  ;;  %v4454_v53 = vsel %vm6611_vm3, 0, %v6610_v22  ;;  %v12595_v12 = vxor.u32 2147483648, %v10407_v59 }
 0x59d   : > { %v12596_v42 = vxor.u32 2147483648, %v10350_v19  ;;  %v4054_v55 = vsel %vm3969_vm4, %v4053_v5, %v10117_v28  ;;  %v4455_v46 = vsub.s32 32, %v4454_v53  ;;  %v4459_v41 = vsub.s32 4294967266, %v4454_v53 }
 0x59e   : > { %v3753_v21 = vsel %vm3751_vm0, %v10350_v19, %v12595_v12  ;;  %v4469_v25 = vsub.s32 4, %v10844_v32  ;;  %v4542_v35 = vmul.u32 %v10839_v33, %v4526_v17  ;;  %v10915_v27 = vsel %vm10874_vm10, %v10504_v45, %v4260_v18 }
 0x59f   : > { %v3756_v11 = vsel %vm3754_vm8, %v12596_v42, %v10407_v59  ;;  %v4456_v56 = vshll.u32 %v10862_v48, %v4454_v53  ;;  %v4545_v19 = vadd.s32 1, %v10893_v47  ;;  %v4056_v59 = vsel %vm10243_vm7, 0, %v4054_v55 }
 0x5a0   : > { %v4457_v28 = vshrl.u32 %v10837_v44, %v4455_v46  ;;  %v4460_v31 = vadd.s32 127, %v4459_v41  ;;  %vm4544_vm4 = vc.u32 %v10898_v29, %v10892_v63  ;;  %v3757_v33 = vsel %vm3750_vm1, %v3753_v21, %v3756_v11  ;;  %v12610_v21 = vld [vmem:[#allocation25_spill] sm:$0xff] }
 0x5a1   : > { %v4546_v43 = vsel %vm4544_vm4, %v4545_v19, %v10893_v47  ;;  %v4060_v61 = vadd.s32 3, %v4056_v59  ;;  %v4064_v5 = vxor.u32 2147483648, %v10348_v26  ;;  %v4067_v48 = vxor.u32 2147483648, %v10336_v36  ;;  %v12603_v59 = vld [vmem:[#allocation23_spill] sm:$0xff] }
 0x5a2   : > { %v4458_v22 = vor.u32 %v4457_v28, %v4456_v56  ;;  %v4461_v17 = vshll.u32 %v4460_v31, 23  ;;  %v4547_v6 = vadd.s32 %v4546_v43, %v4542_v35  ;;  %v4365_v18 = vsub.s32 4, %v12597_v60  ;;  %v12604_v31 = vld [vmem:[#allocation2_spill] sm:$0xff] }
 0x5a3   : > { %vm4385_vm7 = vcmp.lt.s32.totalorder %v10570_v49, 0  ;;  %v3758_v44 = vsel %vm3747_vm13, nan, %v3757_v33  ;;  %vm4059_vm0 = vweird.f32 %v10002_v10  ;;  %v4061_v4 = vand.u32 3, %v4060_v61 }
 0x5a4   : > { %v4376_v3 = vxor.u32 2147483648, %v10604_v9  ;;  %v4462_v47 = vor.u32 4788187, %v4461_v17  ;;  %v4465_v39 = vcvt.s32.f32 %v4458_v22  ;;  %v4548_v53 = vadd.s32 536870912, %v4547_v6  ;;  %v12605_v17 = vld [vmem:[#allocation17_spill] sm:$0xff] }
 0x5a5   : > { %vm12598_vm12 = vcmp.lt.s32.totalorder %v10029_v58, 0  ;;  %vm4062_vm6 = vcmp.lt.s32.totalorder %v4061_v4, 2  ;;  %vm4063_vm1 = vcmp.eq.s32.totalorder %v4061_v4, 0  ;;  %vm4066_vm3 = vcmp.eq.s32.totalorder %v4061_v4, 2 }
 0x5a6   : > { %v4366_v12 = vsel %vm12598_vm12, %v4365_v18, %v12597_v60  ;;  %v12600_v40 = vand.u32 2147483647, %v10570_v49  ;;  %v4463_v55 = vand.u32 2147483647, %v4462_v47  ;;  %v10946_v46 = vshrl.u32 %v4548_v53, 30 }
 0x5a7   : > { %v4368_v42 = vsel %vm10426_vm5, 0, %v4366_v12  ;;  %v4065_v41 = vsel %vm4063_vm1, %v10336_v36, %v4064_v5  ;;  %v4068_v35 = vsel %vm4066_vm3, %v4067_v48, %v10348_v26  ;;  %v4379_v28 = vxor.u32 2147483648, %v12603_v59  ;;  %v12606_v36 = vld [vmem:[#allocation29_spill] sm:$0xff]  ;;  %v12608_v5 = vld [vmem:[#allocation8_spill] sm:$0xff] }
 0x5a8   : > { %vm10942_vm13 = vcmp.le.f32.partialorder %v12600_v40, 0.7853982  ;;  %v4069_v56 = vsel %vm4062_vm6, %v4065_v41, %v4068_v35  ;;  %v4372_v19 = vadd.s32 3, %v4368_v42  ;;  %v4677_v33 = vsub.s32 4, %v12604_v31 }
 0x5a9   : > { %v4466_v43 = vmul.f32 %v4465_v39, %v4463_v55  ;;  %v4550_v61 = vshll.u32 %v10946_v46, 30  ;;  %v4070_v22 = vsel %vm4059_vm0, nan, %v4069_v56  ;;  %v4688_v60 = vxor.u32 2147483648, %v12605_v17 }
 0x5aa   : > { %v6812_v18 = vpack.c.bf16 %v4070_v22, %v3758_v44  ;;  %v4373_v4 = vand.u32 3, %v4372_v19  ;;  %vm12607_vm5 = vcmp.lt.s32.totalorder %v12606_v36, 0  ;;  %v4691_v48 = vxor.u32 2147483648, %v12608_v5 }
 0x5ab   : > { %v4678_v26 = vsel %vm12607_vm5, %v4677_v33, %v12604_v31  ;;  %v4467_v47 = vxor.u32 2147483648, %v4466_v43  ;;  %v10960_v53 = vsub.s32 %v4547_v6, %v4550_v61  ;;  %v3637_v42 = vsub.s32 4, %v12610_v21  ;;  %v12612_v61 = vld [vmem:[#allocation31_spill] sm:$0xff] }
 0x5ac   : > { %v4680_v39 = vsel %vm10370_vm9, 0, %v4678_v26  ;;  %6813 = vmatprep.subr.bf16.mxu1 %v6812_v18  ;;  %vm4374_vm8 = vcmp.lt.s32.totalorder %v4373_v4, 2  ;;  %vm4375_vm4 = vcmp.eq.s32.totalorder %v4373_v4, 0  ;;  %vm4378_vm0 = vcmp.eq.s32.totalorder %v4373_v4, 2 }
 0x5ad   : > { %v4684_v10 = vadd.s32 3, %v4680_v39  ;;  %v4468_v44 = vsel %vm4385_vm7, %v4467_v47, %v4466_v43  ;;  %v4553_v40 = vsub.s32 0, %v10960_v53  ;;  %6815 = vmatpush3.bf16.msra.mxu1 %v6812_v18  ;;  %v4377_v55 = vsel %vm4375_vm4, %v12603_v59, %v4376_v3 }
 0x5ae   : > { %v4380_v6 = vsel %vm4378_vm0, %v4379_v28, %v10604_v9  ;;  %v10975_v41 = vsel %vm4385_vm7, %v4469_v25, %v10844_v32  ;;  %vm12611_vm9 = vcmp.lt.s32.totalorder %v10236_v20, 0  ;;  %7202 = vcosq.f32 %v10915_v27 }
 0x5af   : > { %v4381_v35 = vsel %vm4374_vm8, %v4377_v55, %v4380_v6  ;;  %v4685_v56 = vand.u32 3, %v4684_v10  ;;  %v3638_v19 = vsel %vm12611_vm9, %v3637_v42, %v12610_v21  ;;  %v6613_v31 = vmin.u32 %v4553_v40, %v10960_v53  ;;  %v11004_v21 = vld [vmem:[%s8740_s18 + $0x48] sm:$0xff] }
 0x5b0   : > { %vm4371_vm12 = vweird.f32 %v10029_v58  ;;  %v3640_v9 = vsel %vm10613_vm15, 0, %v3638_v19  ;;  %v4471_v32 = vsel %vm10942_vm13, %v10570_v49, %v4468_v44  ;;  %7204 = vsinq.f32 %v10915_v27 }
 0x5b1   : > { %v4382_v25 = vsel %vm4371_vm12, nan, %v4381_v35  ;;  %vm4687_vm7 = vcmp.eq.s32.totalorder %v4685_v56, 0  ;;  %vm4690_vm6 = vcmp.eq.s32.totalorder %v4685_v56, 2  ;;  %v4555_v3 = vclz %v6613_v31 }
 0x5b2   : > { %vm4686_vm1 = vcmp.lt.s32.totalorder %v4685_v56, 2  ;;  %v4689_v59 = vsel %vm4687_vm7, %v12608_v5, %v4688_v60  ;;  %v4692_v28 = vsel %vm4690_vm6, %v4691_v48, %v12605_v17  ;;  %vm4683_vm3 = vweird.f32 %v12606_v36  ;;  %v12614_v48 = vld [vmem:[#allocation20_spill] sm:$0xff] }
 0x5b3   : > { %v4693_v58 = vsel %vm4686_vm1, %v4689_v59, %v4692_v28  ;;  %v3644_v2 = vadd.s32 3, %v3640_v9  ;;  %7206 = vcosq.f32 %v4471_v32  ;;  %v6614_v33 = vadd.s32 4294967294, %v4555_v3  ;;  %v12618_v3 = vld [vmem:[#allocation18_spill] sm:$0xff] }
 0x5b4   : > { %v4694_v43 = vsel %vm4683_vm3, nan, %v4693_v58  ;;  %v3949_v22 = vsub.s32 4, %v12612_v61  ;;  %v3648_v26 = vxor.u32 2147483648, %v10691_v54  ;;  %v3651_v60 = vxor.u32 2147483648, %v10688_v50 }
 0x5b5   : > { %v6816_v18 = vpack.c.bf16 %v4694_v43, %v4382_v25  ;;  %v3645_v4 = vand.u32 3, %v3644_v2  ;;  %7208 = vsinq.f32 %v4471_v32  ;;  %v4543_v27 = vadd.s32 %v10892_v63, %v10898_v29  ;;  %v11007_v63 = vld [vmem:[%s8740_s18 + $0x50] sm:$0xff]  ;;  %v12617_v32 = vld [vmem:[#allocation33_spill] sm:$0xff] }
 0x5b6   : > { %vm6615_vm15 = vcmp.lt.s32.totalorder %v6614_v33, 0  ;;  %vm12613_vm5 = vcmp.lt.s32.totalorder %v10346_v0, 0  ;;  %vm3643_vm8 = vweird.f32 %v10236_v20  ;;  %v3960_v5 = vxor.u32 2147483648, %v10856_v8 }
 0x5b7   : > { %v3950_v17 = vsel %vm12613_vm5, %v3949_v22, %v12612_v61  ;;  %v4558_v36 = vsel %vm6615_vm15, 0, %v6614_v33  ;;  %6817 = vmatprep.subr.bf16.mxu1 %v6816_v18  ;;  %v3541_v47 = vand.u32 3, %v12614_v48  ;;  %vm3647_vm4 = vcmp.eq.s32.totalorder %v3645_v4, 0 }
 0x5b8   : > { %v4559_v12 = vsub.s32 32, %v4558_v36  ;;  %v4563_v39 = vsub.s32 4294967266, %v4558_v36  ;;  %6819 = vmatpush3.bf16.msra.mxu1 %v6816_v18  ;;  %vm3650_vm0 = vcmp.eq.s32.totalorder %v3645_v4, 2  ;;  %v3649_v29 = vsel %vm3647_vm4, %v10688_v50, %v3648_v26  ;;  %v11015_v40 = vpop.eup %7202 }
 0x5b9   : > { %v3652_v42 = vsel %vm3650_vm0, %v3651_v60, %v10691_v54  ;;  %v3952_v10 = vsel %vm10749_vm11, 0, %v3950_v17  ;;  %vm3955_vm9 = vweird.f32 %v10346_v0  ;;  %v3963_v44 = vxor.u32 2147483648, %v10852_v62 }
 0x5ba   : > { %v4560_v55 = vshll.u32 %v10960_v53, %v4558_v36  ;;  %v4561_v6 = vshrl.u32 %v4543_v27, %v4559_v12  ;;  %v4564_v35 = vadd.s32 127, %v4563_v39  ;;  %v3956_v56 = vadd.s32 3, %v3952_v10  ;;  %v11025_v53 = vld [vmem:[%s8740_s18 + $0x58] sm:$0xff]  ;;  %v11028_v25 = vpop.eup %7204 }
 0x5bb   : > { %vm12615_vm12 = vcmask 261120   ;;  %vm3646_vm7 = vcmp.lt.s32.totalorder %v3645_v4, 2  ;;  %vm3542_vm6 = vcmp.lt.s32.totalorder %v3541_v47, 2  ;;  %v3544_v50 = vxor.u32 2147483648, %v10683_v51  ;;  %v12621_v12 = vld [vmem:[#allocation13_spill] sm:$0xff] }
 0x5bc   : > { %6756 = vmatmul.mubr.msk.f32.vlgmr.msra.gmra.mrb[12].mxu1 %vm12615_vm12, %v11004_v21  ;;  %v3547_v54 = vxor.u32 2147483648, %v10676_v7  ;;  %v4562_v16 = vor.u32 %v4561_v6, %v4560_v55  ;;  %v4565_v19 = vshll.u32 %v4564_v35, 23  ;;  %vm12616_vm11 = vmmov %vm12615_vm12  ;;  %v3653_v31 = vsel %vm3646_vm7, %v3649_v29, %v3652_v42 }
 0x5bd   : > { %6758 = vmatprep.mubr.msk.f32.mxu1 %vm12616_vm11, %v11007_v63  ;;  %v3957_v9 = vand.u32 3, %v3956_v56  ;;  %vm3539_vm1 = vweird.f32 %v12617_v32  ;;  %vm4489_vm3 = vcmp.lt.s32.totalorder %v10720_v14, 0  ;;  %vm3543_vm15 = vcmp.eq.s32.totalorder %v3541_v47, 0  ;;  %v11033_v58 = vpop.eup %7206  ;;  %vm12619_vm12 = vmmov %vm12616_vm11 }
 0x5be   : > { %vm3546_vm5 = vcmp.eq.s32.totalorder %v3541_v47, 2  ;;  %v3853_v59 = vand.u32 3, %v12618_v3  ;;  %v3856_v28 = vxor.u32 2147483648, %v10846_v52  ;;  %v4566_v2 = vor.u32 4788187, %v4565_v19 }
 0x5bf   : > { %vm3959_vm4 = vcmp.eq.s32.totalorder %v3957_v9, 0  ;;  %v3545_v33 = vsel %vm3543_vm15, %v10676_v7, %v3544_v50  ;;  %v3548_v43 = vsel %vm3546_vm5, %v3547_v54, %v10683_v51  ;;  %v4569_v61 = vcvt.s32.f32 %v4562_v16  ;;  %v7209_v4 = vpop.eup %7208 }
 0x5c0   : > { %v3654_v22 = vsel %vm3643_vm8, nan, %v3653_v31  ;;  %v3961_v18 = vsel %vm3959_vm4, %v10852_v62, %v3960_v5  ;;  %vm3962_vm0 = vcmp.eq.s32.totalorder %v3957_v9, 2  ;;  %6759 = vmatmul.mubr.msk.f32.gmra.mrb[14].mxu1 %vm12619_vm12, %v11025_v53  ;;  %v4567_v26 = vand.u32 2147483647, %v4566_v2 }
 0x5c1   : > { %vm3958_vm7 = vcmp.lt.s32.totalorder %v3957_v9, 2  ;;  %v3964_v60 = vsel %vm3962_vm0, %v3963_v44, %v10856_v8  ;;  %vm3855_vm11 = vcmp.eq.s32.totalorder %v3853_v59, 0  ;;  %v12620_v27 = vmov 0.0  }
 0x5c2   : > { %6233 = vmatprep.mubr.f32.mxu1 %v12620_v27  ;;  %v3965_v7 = vsel %vm3958_vm7, %v3961_v18, %v3964_v60  ;;  %v3549_v51 = vsel %vm3542_vm6, %v3545_v33, %v3548_v43  ;;  %v3857_v20 = vsel %vm3855_vm11, %v10743_v24, %v3856_v28  ;;  %v3859_v17 = vxor.u32 2147483648, %v10743_v24 }
 0x5c3   : > { %v4570_v62 = vmul.f32 %v4569_v61, %v4567_v26  ;;  %v3966_v36 = vsel %vm3955_vm9, nan, %v3965_v7  ;;  %vm3858_vm8 = vcmp.eq.s32.totalorder %v3853_v59, 2  ;;  %v4261_v5 = vsub.s32 4, %v10759_v1 }
 0x5c4   : > { %v6804_v48 = vpack.c.bf16 %v3966_v36, %v3654_v22  ;;  %vm3851_vm15 = vweird.f32 %v12621_v12  ;;  %vm3854_vm5 = vcmp.lt.s32.totalorder %v3853_v59, 2  ;;  %v3860_v8 = vsel %vm3858_vm8, %v3859_v17, %v10846_v52  ;;  %v12625_v36 = vld [vmem:[#allocation7_spill] sm:$0xff] }
 0x5c5   : > { %v4571_v39 = vxor.u32 2147483648, %v4570_v62  ;;  %v3861_v47 = vsel %vm3854_vm5, %v3857_v20, %v3860_v8  ;;  %v4262_v29 = vsel %vm4177_vm2, %v4261_v5, %v10759_v1  ;;  %v4573_v24 = vsub.s32 4, %v10946_v46  ;;  %v7263_v8 = vld [vmem:[%s8740_s18 + $0x40] sm:$0xff] }
 0x5c6   : > { %v4472_v0 = vsel %vm10942_vm13, 0, %v10975_v41  ;;  %v12622_v42 = vand.u32 2147483647, %v10720_v14  ;;  %6805 = vmatprep.subr.bf16.mxu0 %v6804_v48  ;;  %v3550_v52 = vsel %vm3539_vm1, nan, %v3549_v51  ;;  %v3862_v44 = vsel %vm3851_vm15, nan, %v3861_v47 }
 0x5c7   : > { %v4572_v1 = vsel %vm4489_vm3, %v4571_v39, %v4570_v62  ;;  %v6806_v55 = vpack.c.bf16 %v3862_v44, %v3550_v52  ;;  %v4264_v6 = vsel %vm10874_vm10, 0, %v4262_v29  ;;  %v4574_v11 = vsel %vm4489_vm3, %v4573_v24, %v10946_v46 }
 0x5c8   : > { %vm11061_vm9 = vcmp.le.f32.partialorder %v12622_v42, 0.7853982  ;;  %v4160_v41 = vsel %vm10765_vm14, 0, %v10824_v37  ;;  %v4476_v56 = vadd.s32 3, %v4472_v0  ;;  %v4268_v50 = vadd.s32 3, %v4264_v6 }
 0x5c9   : > { %v4575_v35 = vsel %vm11061_vm9, %v10720_v14, %v4572_v1  ;;  %6807 = vmatpush1.bf16.msra.mxu0 %v6806_v55  ;;  %v4576_v38 = vsel %vm11061_vm9, 0, %v4574_v11  ;;  %v4164_v54 = vadd.s32 3, %v4160_v41  ;;  %v4272_v46 = vxor.u32 2147483648, %v11028_v25 }
 0x5ca   : > { %7210 = vcosq.f32 %v4575_v35  ;;  %v4580_v16 = vadd.s32 3, %v4576_v38  ;;  %v4269_v19 = vand.u32 3, %v4268_v50  ;;  %v4477_v31 = vand.u32 3, %v4476_v56 }
 0x5cb   : > { %7212 = vsinq.f32 %v4575_v35  ;;  %v4275_v15 = vxor.u32 2147483648, %v11015_v40  ;;  %v4165_v37 = vand.u32 3, %v4164_v54  ;;  %v4480_v9 = vxor.u32 2147483648, %v7209_v4 }
 0x5cc   : > { %v4483_v32 = vxor.u32 2147483648, %v11033_v58  ;;  %v4168_v3 = vxor.u32 2147483648, %v10870_v57  ;;  %v4171_v59 = vxor.u32 2147483648, %v10866_v30  ;;  %v4581_v28 = vand.u32 3, %v4580_v16 }
 0x5cd   : > { %vm4479_vm14 = vcmp.eq.s32.totalorder %v4477_v31, 0  ;;  %vm4482_vm2 = vcmp.eq.s32.totalorder %v4477_v31, 2  ;;  %vm4271_vm10 = vcmp.eq.s32.totalorder %v4269_v19, 0  ;;  %vm4274_vm13 = vcmp.eq.s32.totalorder %v4269_v19, 2 }
 0x5ce   : > { %v4481_v2 = vsel %vm4479_vm14, %v11033_v58, %v4480_v9  ;;  %v4484_v33 = vsel %vm4482_vm2, %v4483_v32, %v7209_v4  ;;  %v4273_v61 = vsel %vm4271_vm10, %v11015_v40, %v4272_v46  ;;  %v4276_v22 = vsel %vm4274_vm13, %v4275_v15, %v11028_v25 }
 0x5cf   : > { %vm4167_vm6 = vcmp.eq.s32.totalorder %v4165_v37, 0  ;;  %vm4170_vm1 = vcmp.eq.s32.totalorder %v4165_v37, 2  ;;  %vm4478_vm3 = vcmp.lt.s32.totalorder %v4477_v31, 2  ;;  %vm4270_vm4 = vcmp.lt.s32.totalorder %v4269_v19, 2 }
 0x5d0   : > { %v4169_v60 = vsel %vm4167_vm6, %v10866_v30, %v4168_v3  ;;  %v4172_v7 = vsel %vm4170_vm1, %v4171_v59, %v10870_v57  ;;  %vm4586_vm0 = vcmp.eq.s32.totalorder %v4581_v28, 2  ;;  %v4485_v20 = vsel %vm4478_vm3, %v4481_v2, %v4484_v33 }
 0x5d1   : > { %v4277_v58 = vsel %vm4270_vm4, %v4273_v61, %v4276_v22  ;;  %vm4583_vm12 = vcmp.eq.s32.totalorder %v4581_v28, 0  ;;  %vm4166_vm7 = vcmp.lt.s32.totalorder %v4165_v37, 2  ;;  %vm4582_vm11 = vcmp.lt.s32.totalorder %v4581_v28, 2 }
 0x5d2   : > { %v4173_v25 = vsel %vm4166_vm7, %v4169_v60, %v4172_v7  ;;  %vm4475_vm8 = vweird.f32 %v10570_v49  ;;  %vm4267_vm15 = vweird.f32 %v10504_v45  ;;  %vm4579_vm5 = vweird.f32 %v10720_v14  ;;  %v11107_v45 = vpop.permute.xlu1 %4712  ;;  %v11109_v14 = vpop.permute.xlu0 %4707 }
 0x5d3   : > { %v4486_v30 = vsel %vm4475_vm8, nan, %v4485_v20  ;;  %v4278_v17 = vsel %vm4267_vm15, nan, %v4277_v58  ;;  %vm4163_vm9 = vweird.f32 %v12625_v36  ;;  %vm12626_vm14 = vcmask 261120  }
 0x5d4   : > { %v7211_v43 = vpop.eup %7210  ;;  %v4174_v48 = vsel %vm4163_vm9, nan, %v4173_v25  ;;  %vm12627_vm2 = vmmov %vm12626_vm14  ;;  %v12632_v22 = vmov 2131351028  }
 0x5d5   : > { %v7213_v18 = vpop.eup %7212  ;;  %v4587_v26 = vxor.u32 2147483648, %v7211_v43  ;;  %v6810_v12 = vpack.c.bf16 %v4486_v30, %v4174_v48  ;;  %vm12628_vm10 = vmmov %vm12627_vm2 }
 0x5d6   : > { %v4584_v51 = vxor.u32 2147483648, %v7213_v18  ;;  %vm12629_vm13 = vmmov %vm12627_vm2  ;;  %v11119_v24 = vpop.permute.xlu1 %4722 }
 0x5d7   : > { %v4588_v4 = vsel %vm4586_vm0, %v4587_v26, %v7213_v18  ;;  %v12633_v26 = vmov 2102212464  }
 0x5d8   : > { %v4585_v40 = vsel %vm4583_vm12, %v7211_v43, %v4584_v51  ;;  %v12631_v43 = vmov 2475754826  }
 0x5d9   : > { %v4589_v57 = vsel %vm4582_vm11, %v4585_v40, %v4588_v4 }
 0x5da   : > { %v4590_v62 = vsel %vm4579_vm5, nan, %v4589_v57 }
 0x5db   : > { %v6808_v5 = vpack.c.bf16 %v4590_v62, %v4278_v17 }
 0x5dd   : > { %6809 = vmatprep.subr.bf16.mxu0 %v6808_v5 }
 0x5de   : > { %6811 = vmatpush1.bf16.msra.mxu0 %v6810_v12 }
 0x5e1   : > { %6628 = vmatmul.mubr.msk.f32.vlgmr.msra.gmra.mrb[12].mxu0 %vm12626_vm14, %v7263_v8 }
 0x5e2   : > { %4807 = vmatprep.mubr.f32.mxu0 %v12620_v27 }
 0x5e5   : > { %6629 = vmatmul.mubr.msk.f32.gmra.mrb[14].mxu0 %vm12627_vm2, %v11004_v21 }
 0x5e6   : > { %4813 = vmatprep.mubr.f32.mxu0 %v12620_v27 }
 0x5e9   : > { %6630 = vmatmul.mubr.msk.f32.gmra.mrb[16].mxu0 %vm12628_vm10, %v11007_v63 }
 0x5ea   : > { %4819 = vmatprep.mubr.f32.mxu0 %v12620_v27 }
 0x5ed   : > { %6631 = vmatmul.mubr.msk.f32.gmra.mrb[18].mxu0 %vm12629_vm13, %v11025_v53 }
 0x68f   : > { %v6757_v49 = vpop.f32.mrb[12].mxu1 }
 0x690   : > { %v11112_v39 = vadd.f32 %v6757_v49, %v11107_v45  ;;  %v4892_v47 = vpop.f32.mrb[13].mxu1 }
 0x691   : > { %v11115_v21 = vadd.f32 %v4892_v47, %v11109_v14 }
 0x692   : > { %v5431_v29 = vand.u32 2147483647, %v11112_v39  ;;  %v5434_v63 = vand.u32 2139095040, %v11112_v39 }
 0x693   : > { %v5119_v53 = vand.u32 2147483647, %v11115_v21  ;;  %v5122_v0 = vand.u32 2139095040, %v11115_v21  ;;  %v6760_v42 = vpop.f32.mrb[14].mxu1 }
 0x694   : > { %v5435_v10 = vshrl.u32 %v5434_v63, 23  ;;  %v11124_v52 = vadd.f32 %v6760_v42, %v11119_v24  ;;  %v11126_v44 = vpop.f32.mrb[15].mxu1  ;;  %v5438_v1 = vand.u32 8388607, %v5431_v29 }
 0x695   : > { %v5123_v55 = vshrl.u32 %v5122_v0, 23  ;;  %v5126_v6 = vand.u32 8388607, %v5119_v53 }
 0x696   : > { %12630 = vst [vmem:[#allocation35_spill] sm:$0xff] %v11124_v52  ;;  %v6656_v11 = vadd.s32 4294967169, %v5435_v10  ;;  %v6058_v35 = vand.u32 2139095040, %v11124_v52  ;;  %v5439_v50 = vor.u32 8388608, %v5438_v1 }
 0x697   : > { %v6644_v41 = vadd.s32 4294967169, %v5123_v55  ;;  %v5127_v38 = vor.u32 8388608, %v5126_v6 }
 0x698   : > { %v5441_v56 = vadd.s32 1, %v6656_v11  ;;  %v6059_v16 = vshrl.u32 %v6058_v35, 23  ;;  %v11133_v9 = vshll.u32 %v5439_v50, 8 }
 0x699   : > { %v5129_v54 = vadd.s32 1, %v6644_v41  ;;  %v11137_v3 = vshll.u32 %v5127_v38, 8 }
 0x69a   : > { %vm5442_vm6 = vcmp.gt.s32.totalorder %v5441_v56, 0  ;;  %v6680_v46 = vadd.s32 4294967169, %v6059_v16 }
 0x69b   : > { %v5443_v19 = vsel %vm5442_vm6, %v5441_v56, 0  ;;  %vm5130_vm1 = vcmp.gt.s32.totalorder %v5129_v54, 0 }
 0x69c   : > { %v5444_v31 = vshrl.u32 %v5443_v19, 5  ;;  %v5445_v15 = vand.u32 31, %v5443_v19  ;;  %v5131_v37 = vsel %vm5130_vm1, %v5129_v54, 0  ;;  %v11140_v33 = vadd.s32 1, %v6680_v46 }
 0x69d   : > { %v11135_v32 = vshrl.u32 %v5131_v37, 5  ;;  %v5133_v2 = vand.u32 31, %v5131_v37 }
 0x69e   : > { %v5446_v59 = vsub.s32 32, %v5445_v15  ;;  %v5448_v28 = vshll.u32 %v12374_v34, %v5445_v15  ;;  %v5451_v61 = vshll.u32 %v12631_v43, %v5445_v15  ;;  %v5454_v18 = vshll.u32 %v12632_v22, %v5445_v15 }
 0x69f   : > { %v5457_v60 = vshll.u32 %v12633_v26, %v5445_v15  ;;  %v5460_v7 = vshll.u32 %v12544_v23, %v5445_v15  ;;  %vm5463_vm3 = vcmp.lt.s32.totalorder %v5444_v31, 1  ;;  %vm5464_vm4 = vcmp.lt.s32.totalorder %v5444_v31, 2 }
 0x6a0   : > { %v5449_v51 = vshrl.u32 %v12631_v43, %v5446_v59  ;;  %v5452_v20 = vshrl.u32 %v12632_v22, %v5446_v59  ;;  %v5455_v58 = vshrl.u32 %v12633_v26, %v5446_v59  ;;  %v5447_v4 = vshrl.u32 %v12374_v34, %v5446_v59 }
 0x6a1   : > { %v5458_v40 = vshrl.u32 %v12544_v23, %v5446_v59  ;;  %v5461_v25 = vshrl.u32 %v12545_v13, %v5446_v59  ;;  %v5134_v62 = vsub.s32 32, %v5133_v2  ;;  %vm5465_vm0 = vcmp.lt.s32.totalorder %v5444_v31, 3 }
 0x6a2   : > { %v5450_v57 = vor.u32 %v5449_v51, %v5448_v28  ;;  %v5453_v30 = vor.u32 %v5452_v20, %v5451_v61  ;;  %v5456_v17 = vor.u32 %v5455_v58, %v5454_v18  ;;  %vm5466_vm12 = vcmp.lt.s32.totalorder %v5444_v31, 4 }
 0x6a3   : > { %v5459_v36 = vor.u32 %v5458_v40, %v5457_v60  ;;  %v5462_v5 = vor.u32 %v5461_v25, %v5460_v7  ;;  %v5136_v42 = vshll.u32 %v12374_v34, %v5133_v2  ;;  %v5137_v55 = vshrl.u32 %v12631_v43, %v5134_v62 }
 0x6a4   : > { %v5467_v48 = vsel %vm5463_vm3, %v5447_v4, %v5450_v57  ;;  %v5468_v12 = vsel %vm5466_vm12, %v5456_v17, 2102212464  ;;  %v5471_v8 = vsel %vm5463_vm3, %v5450_v57, %v5453_v30  ;;  %v5475_v49 = vsel %vm5463_vm3, %v5453_v30, %v5456_v17 }
 0x6a5   : > { %v5469_v47 = vsel %vm5465_vm0, %v5453_v30, %v5468_v12  ;;  %v5472_v63 = vsel %vm5466_vm12, %v5459_v36, 920167782  ;;  %v5476_v0 = vsel %vm5466_vm12, %v5462_v5, 1326507024  ;;  %v5139_v6 = vshll.u32 %v12631_v43, %v5133_v2 }
 0x6a6   : > { %v5473_v10 = vsel %vm5465_vm0, %v5456_v17, %v5472_v63  ;;  %v5477_v1 = vsel %vm5465_vm0, %v5459_v36, %v5476_v0  ;;  %v5470_v11 = vsel %vm5464_vm4, %v5467_v48, %v5469_v47  ;;  %v5140_v56 = vshrl.u32 %v12632_v22, %v5134_v62 }
 0x6a7   : > { %v5474_v41 = vsel %vm5464_vm4, %v5471_v8, %v5473_v10  ;;  %v5478_v35 = vsel %vm5464_vm4, %v5475_v49, %v5477_v1  ;;  %v5138_v19 = vor.u32 %v5137_v55, %v5136_v42  ;;  %v5142_v15 = vshll.u32 %v12632_v22, %v5133_v2 }
 0x6a8   : > { %v11163_v50 = vmul.u32.u64.low %v11133_v9, %v5478_v35  ;;  %v11164_v38 = vmul.u32.u64.high %v11133_v9, %v5478_v35, %v11163_v50  ;;  %v11167_v54 = vmul.u32.u64.low %v11133_v9, %v5474_v41  ;;  %v11168_v16 = vmul.u32.u64.high %v11133_v9, %v5474_v41, %v11167_v54  ;;  %v11209_v41 = vpop.permute.xlu0 %4717 }
 0x6a9   : > { %v5141_v46 = vor.u32 %v5140_v56, %v5139_v6  ;;  %v5143_v37 = vshrl.u32 %v12633_v26, %v5134_v62  ;;  %v5135_v31 = vshrl.u32 %v12374_v34, %v5134_v62  ;;  %v5145_v59 = vshll.u32 %v12633_v26, %v5133_v2 }
 0x6aa   : > { %v5146_v28 = vshrl.u32 %v12544_v23, %v5134_v62  ;;  %v5149_v61 = vshrl.u32 %v12545_v13, %v5134_v62  ;;  %v5486_v18 = vmul.u32 %v11133_v9, %v5470_v11  ;;  %v5148_v7 = vshll.u32 %v12544_v23, %v5133_v2 }
 0x6ab   : > { %v5144_v60 = vor.u32 %v5143_v37, %v5142_v15  ;;  %vm5151_vm7 = vcmp.lt.s32.totalorder %v11135_v32, 1  ;;  %vm5488_vm11 = vc.u32 %v11164_v38, %v11167_v54  ;;  %v5489_v51 = vadd.s32 1, %v11168_v16 }
 0x6ac   : > { %v5147_v20 = vor.u32 %v5146_v28, %v5145_v59  ;;  %vm5152_vm8 = vcmp.lt.s32.totalorder %v11135_v32, 2  ;;  %v5150_v58 = vor.u32 %v5149_v61, %v5148_v7  ;;  %vm5153_vm15 = vcmp.lt.s32.totalorder %v11135_v32, 3 }
 0x6ad   : > { %vm5154_vm5 = vcmp.lt.s32.totalorder %v11135_v32, 4  ;;  %v5159_v4 = vsel %vm5151_vm7, %v5138_v19, %v5141_v46  ;;  %v5490_v9 = vsel %vm5488_vm11, %v5489_v51, %v11168_v16  ;;  %v5163_v25 = vsel %vm5151_vm7, %v5141_v46, %v5144_v60 }
 0x6ae   : > { %v5156_v40 = vsel %vm5154_vm5, %v5144_v60, 2102212464  ;;  %v5160_v2 = vsel %vm5154_vm5, %v5147_v20, 920167782  ;;  %v5491_v57 = vadd.s32 %v5490_v9, %v5486_v18  ;;  %v5155_v30 = vsel %vm5151_vm7, %v5135_v31, %v5138_v19 }
 0x6af   : > { %v5161_v17 = vsel %vm5153_vm15, %v5144_v60, %v5160_v2  ;;  %v5164_v62 = vsel %vm5154_vm5, %v5150_v58, 1326507024  ;;  %v5157_v36 = vsel %vm5153_vm15, %v5141_v46, %v5156_v40  ;;  %vm6066_vm9 = vcmp.gt.s32.totalorder %v11140_v33, 0 }
 0x6b0   : > { %v5162_v5 = vsel %vm5152_vm8, %v5159_v4, %v5161_v17  ;;  %v5165_v48 = vsel %vm5153_vm15, %v5147_v20, %v5164_v62  ;;  %v5492_v12 = vadd.s32 536870912, %v5491_v57  ;;  %v6067_v42 = vsel %vm6066_vm9, %v11140_v33, 0 }
 0x6b1   : > { %v5166_v8 = vsel %vm5152_vm8, %v5163_v25, %v5165_v48  ;;  %v11193_v49 = vmul.u32.u64.low %v11137_v3, %v5162_v5  ;;  %v11194_v47 = vmul.u32.u64.high %v11137_v3, %v5162_v5, %v11193_v49  ;;  %v5158_v1 = vsel %vm5152_vm8, %v5155_v30, %v5157_v36 }
 0x6b2   : > { %v11198_v63 = vmul.u32.u64.low %v11137_v3, %v5166_v8  ;;  %v11199_v0 = vmul.u32.u64.high %v11137_v3, %v5166_v8, %v11198_v63  ;;  %v11202_v10 = vshrl.u32 %v5492_v12, 30  ;;  %v6055_v55 = vand.u32 2147483647, %v11124_v52 }
 0x6b3   : > { %v6069_v6 = vand.u32 31, %v6067_v42  ;;  %v5177_v50 = vadd.s32 1, %v11194_v47  ;;  %v11217_v33 = vadd.f32 %v11126_v44, %v11209_v41  ;;  %v5174_v32 = vmul.u32 %v11137_v3, %v5158_v1 }
 0x6b4   : > { %v11207_v11 = vpop.f32.mrb[12].mxu0  ;;  %v5494_v56 = vshll.u32 %v11202_v10, 30  ;;  %vm5176_vm14 = vc.u32 %v11199_v0, %v11193_v49  ;;  %v6062_v15 = vand.u32 8388607, %v6055_v55  ;;  %v6068_v20 = vshrl.u32 %v6067_v42, 5 }
 0x6b5   : > { %v11211_v35 = vpop.f32.mrb[13].mxu0  ;;  %v6070_v16 = vsub.s32 32, %v6069_v6  ;;  %12634 = vst [vmem:[#allocation30_spill] sm:$0xff] %v11217_v33  ;;  %v5178_v46 = vsel %vm5176_vm14, %v5177_v50, %v11194_v47  ;;  %v6072_v59 = vshll.u32 %v12374_v34, %v6069_v6  ;;  %v6075_v18 = vshll.u32 %v12631_v43, %v6069_v6 }
 0x6b6   : > { %v11222_v19 = vsub.s32 %v5491_v57, %v5494_v56  ;;  %v5179_v31 = vadd.s32 %v5178_v46, %v5174_v32  ;;  %v5746_v7 = vand.u32 2139095040, %v11217_v33  ;;  %v6078_v4 = vshll.u32 %v12632_v22, %v6069_v6 }
 0x6b7   : > { %v6073_v44 = vshrl.u32 %v12631_v43, %v6070_v16  ;;  %v6076_v28 = vshrl.u32 %v12632_v22, %v6070_v16  ;;  %v6079_v60 = vshrl.u32 %v12633_v26, %v6070_v16  ;;  %v6081_v2 = vshll.u32 %v12633_v26, %v6069_v6 }
 0x6b8   : > { %v11227_v37 = vpop.f32.mrb[14].mxu0  ;;  %v5497_v61 = vsub.s32 0, %v11222_v19  ;;  %v5180_v51 = vadd.s32 536870912, %v5179_v31  ;;  %v6082_v25 = vshrl.u32 %v12544_v23, %v6070_v16  ;;  %v6063_v17 = vor.u32 8388608, %v6062_v15 }
 0x6b9   : > { %v11232_v3 = vpop.f32.mrb[15].mxu0  ;;  %v6074_v58 = vor.u32 %v6073_v44, %v6072_v59  ;;  %v6077_v40 = vor.u32 %v6076_v28, %v6075_v18  ;;  %v6080_v62 = vor.u32 %v6079_v60, %v6078_v4  ;;  %v6085_v36 = vshrl.u32 %v12545_v13, %v6070_v16 }
 0x6ba   : > { %v6657_v9 = vmin.u32 %v5497_v61, %v11222_v19  ;;  %v11244_v30 = vshrl.u32 %v5180_v51, 30  ;;  %v6083_v12 = vor.u32 %v6082_v25, %v6081_v2  ;;  %v6084_v8 = vshll.u32 %v12544_v23, %v6069_v6 }
 0x6bb   : > { %v5747_v47 = vshrl.u32 %v5746_v7, 23  ;;  %vm6087_vm2 = vcmp.lt.s32.totalorder %v6068_v20, 1  ;;  %vm6089_vm10 = vcmp.lt.s32.totalorder %v6068_v20, 3  ;;  %vm6090_vm13 = vcmp.lt.s32.totalorder %v6068_v20, 4 }
 0x6bc   : > { %v11242_v57 = vpop.f32.mrb[16].mxu0  ;;  %v5499_v48 = vclz %v6657_v9  ;;  %v5182_v63 = vshll.u32 %v11244_v30, 30  ;;  %v6086_v1 = vor.u32 %v6085_v36, %v6084_v8  ;;  %v6095_v56 = vsel %vm6087_vm2, %v6074_v58, %v6077_v40 }
 0x6bd   : > { %v11247_v5 = vpop.f32.mrb[17].mxu0  ;;  %v6096_v50 = vsel %vm6090_vm13, %v6083_v12, 920167782  ;;  %vm6088_vm6 = vcmp.lt.s32.totalorder %v6068_v20, 2  ;;  %v6092_v46 = vsel %vm6090_vm13, %v6080_v62, 2102212464  ;;  %v6071_v6 = vshrl.u32 %v12374_v34, %v6070_v16 }
 0x6be   : > { %v6658_v42 = vadd.s32 4294967294, %v5499_v48  ;;  %v11253_v32 = vsub.s32 %v5179_v31, %v5182_v63  ;;  %v6097_v15 = vsel %vm6089_vm10, %v6080_v62, %v6096_v50  ;;  %v6103_v44 = vshll.u32 %v6063_v17, 8 }
 0x6bf   : > { %v6098_v59 = vsel %vm6088_vm6, %v6095_v56, %v6097_v15  ;;  %v6099_v18 = vsel %vm6087_vm2, %v6077_v40, %v6080_v62  ;;  %v6668_v60 = vadd.s32 4294967169, %v5747_v47  ;;  %v6091_v31 = vsel %vm6087_vm2, %v6071_v6, %v6074_v58 }
 0x6c0   : > { %vm6659_vm1 = vcmp.lt.s32.totalorder %v6658_v42, 0  ;;  %v5185_v61 = vsub.s32 0, %v11253_v32  ;;  %v6093_v51 = vsel %vm6089_vm10, %v6077_v40, %v6092_v46  ;;  %v6100_v4 = vsel %vm6090_vm13, %v6086_v1, 1326507024 }
 0x6c1   : > { %v5502_v28 = vsel %vm6659_vm1, 0, %v6658_v42  ;;  %v6101_v16 = vsel %vm6089_vm10, %v6083_v12, %v6100_v4  ;;  %v11266_v2 = vmul.u32.u64.low %v6103_v44, %v6098_v59  ;;  %v11267_v25 = vmul.u32.u64.high %v6103_v44, %v6098_v59, %v11266_v2 }
 0x6c2   : > { %v5507_v7 = vsub.s32 4294967266, %v5502_v28  ;;  %v6645_v9 = vmin.u32 %v5185_v61, %v11253_v32  ;;  %v5503_v17 = vsub.s32 32, %v5502_v28  ;;  %v6102_v62 = vsel %vm6088_vm6, %v6099_v18, %v6101_v16 }
 0x6c3   : > { %v12323_v48 = vand.u32 2147483647, %v11217_v33  ;;  %v11272_v58 = vmul.u32.u64.low %v6103_v44, %v6102_v62  ;;  %v11273_v47 = vmul.u32.u64.high %v6103_v44, %v6102_v62, %v11272_v58  ;;  %v5753_v40 = vadd.s32 1, %v6668_v60  ;;  %v11285_v60 = vpop.f32.mrb[18].mxu0 }
 0x6c4   : > { %v5508_v36 = vadd.s32 127, %v5507_v7  ;;  %v5187_v8 = vclz %v6645_v9  ;;  %v5487_v63 = vadd.s32 %v11167_v54, %v11164_v38  ;;  %v6094_v12 = vsel %vm6088_vm6, %v6091_v31, %v6093_v51 }
 0x6c5   : > { %v6113_v1 = vadd.s32 1, %v11267_v25  ;;  %vm5754_vm3 = vcmp.gt.s32.totalorder %v5753_v40, 0  ;;  %v5750_v50 = vand.u32 8388607, %v12323_v48  ;;  %v6110_v6 = vmul.u32 %v6103_v44, %v6094_v12 }
 0x6c6   : > { %v6646_v42 = vadd.s32 4294967294, %v5187_v8  ;;  %v5505_v56 = vshrl.u32 %v5487_v63, %v5503_v17  ;;  %v5755_v46 = vsel %vm5754_vm3, %v5753_v40, 0  ;;  %v5509_v15 = vshll.u32 %v5508_v36, 23 }
 0x6c7   : > { %vm6112_vm0 = vc.u32 %v11273_v47, %v11266_v2  ;;  %v5504_v59 = vshll.u32 %v11222_v19, %v5502_v28  ;;  %v5757_v20 = vand.u32 31, %v5755_v46  ;;  %v5517_v31 = vsub.s32 4, %v11202_v10 }
 0x6c8   : > { %vm6647_vm4 = vcmp.lt.s32.totalorder %v6646_v42, 0  ;;  %v6114_v54 = vsel %vm6112_vm0, %v6113_v1, %v11267_v25  ;;  %vm5433_vm12 = vcmp.lt.s32.totalorder %v11112_v39, 0  ;;  %v5510_v44 = vor.u32 4788187, %v5509_v15 }
 0x6c9   : > { %v5190_v38 = vsel %vm6647_vm4, 0, %v6646_v42  ;;  %v6115_v18 = vadd.s32 %v6114_v54, %v6110_v6  ;;  %v5506_v7 = vor.u32 %v5505_v56, %v5504_v59  ;;  %v5758_v51 = vsub.s32 32, %v5757_v20 }
 0x6ca   : > { %v5195_v61 = vsub.s32 4294967266, %v5190_v38  ;;  %v5175_v9 = vadd.s32 %v11193_v49, %v11199_v0  ;;  %v5751_v28 = vor.u32 8388608, %v5750_v50  ;;  %v11293_v16 = vadd.f32 %v11207_v11, %v11109_v14 }
 0x6cb   : > { %v6116_v4 = vadd.s32 536870912, %v6115_v18  ;;  %v5191_v25 = vsub.s32 32, %v5190_v38  ;;  %v5761_v36 = vshrl.u32 %v12631_v43, %v5758_v51  ;;  %v5764_v62 = vshrl.u32 %v12632_v22, %v5758_v51 }
 0x6cc   : > { %v5196_v19 = vadd.s32 127, %v5195_v61  ;;  %12635 = vst [vmem:[#allocation32_spill] sm:$0xff] %v11293_v16  ;;  %v5513_v8 = vcvt.s32.f32 %v5506_v7  ;;  %v11302_v58 = vsel %vm5433_vm12, %v5517_v31, %v11202_v10  ;;  %v5756_v49 = vshrl.u32 %v5755_v46, 5 }
 0x6cd   : > { %v11295_v17 = vshrl.u32 %v6116_v4, 30  ;;  %v5767_v0 = vshrl.u32 %v12633_v26, %v5758_v51  ;;  %v5511_v40 = vand.u32 2147483647, %v5510_v44  ;;  %v5760_v63 = vshll.u32 %v12374_v34, %v5757_v20 }
 0x6ce   : > { %v5763_v12 = vshll.u32 %v12631_v43, %v5757_v20  ;;  %v5197_v42 = vshll.u32 %v5196_v19, 23  ;;  %v5766_v1 = vshll.u32 %v12632_v22, %v5757_v20  ;;  %v5769_v56 = vshll.u32 %v12633_v26, %v5757_v20 }
 0x6cf   : > { %v6118_v11 = vshll.u32 %v11295_v17, 30  ;;  %v5770_v50 = vshrl.u32 %v12544_v23, %v5758_v51  ;;  %v5193_v15 = vshrl.u32 %v5175_v9, %v5191_v25  ;;  %v5762_v46 = vor.u32 %v5761_v36, %v5760_v63 }
 0x6d0   : > { %v5765_v6 = vor.u32 %v5764_v62, %v5763_v12  ;;  %v5768_v59 = vor.u32 %v5767_v0, %v5766_v1  ;;  %v5772_v61 = vshll.u32 %v12544_v23, %v5757_v20  ;;  %v5773_v7 = vshrl.u32 %v12545_v13, %v5758_v51 }
 0x6d1   : > { %v11311_v10 = vsub.s32 %v6115_v18, %v6118_v11  ;;  %v5771_v54 = vor.u32 %v5770_v50, %v5769_v56  ;;  %vm5121_vm7 = vcmp.lt.s32.totalorder %v11115_v21, 0  ;;  %v5192_v31 = vshll.u32 %v11253_v32, %v5190_v38 }
 0x6d2   : > { %v5205_v44 = vsub.s32 4, %v11244_v30  ;;  %v5791_v19 = vshll.u32 %v5751_v28, 8  ;;  %v5514_v9 = vmul.f32 %v5513_v8, %v5511_v40  ;;  %v5198_v18 = vor.u32 4788187, %v5197_v42 }
 0x6d3   : > { %v6121_v4 = vsub.s32 0, %v11311_v10  ;;  %v5759_v25 = vshrl.u32 %v12374_v34, %v5758_v51  ;;  %v5774_v36 = vor.u32 %v5773_v7, %v5772_v61  ;;  %vm11322_vm11 = vcmp.le.f32.partialorder %v5431_v29, 0.7853982 }
 0x6d4   : > { %v5194_v62 = vor.u32 %v5193_v15, %v5192_v31  ;;  %vm5775_vm8 = vcmp.lt.s32.totalorder %v5756_v49, 1  ;;  %vm5778_vm15 = vcmp.lt.s32.totalorder %v5756_v49, 4  ;;  %vm11329_vm5 = vcmp.le.f32.partialorder %v5119_v53, 0.7853982 }
 0x6d5   : > { %v6681_v0 = vmin.u32 %v6121_v4, %v11311_v10  ;;  %vm5777_vm9 = vcmp.lt.s32.totalorder %v5756_v49, 3  ;;  %v5780_v38 = vsel %vm5778_vm15, %v5768_v59, 2102212464  ;;  %v5783_v51 = vsel %vm5775_vm8, %v5762_v46, %v5765_v6 }
 0x6d6   : > { %v5784_v28 = vsel %vm5778_vm15, %v5771_v54, 920167782  ;;  %vm5776_vm14 = vcmp.lt.s32.totalorder %v5756_v49, 2  ;;  %v5787_v40 = vsel %vm5775_vm8, %v5765_v6, %v5768_v59  ;;  %v5199_v11 = vand.u32 2147483647, %v5198_v18 }
 0x6d7   : > { %v6123_v8 = vclz %v6681_v0  ;;  %v5785_v29 = vsel %vm5777_vm9, %v5768_v59, %v5784_v28  ;;  %v5779_v63 = vsel %vm5775_vm8, %v5759_v25, %v5762_v46  ;;  %v5788_v42 = vsel %vm5778_vm15, %v5774_v36, 1326507024 }
 0x6d8   : > { %v5786_v12 = vsel %vm5776_vm14, %v5783_v51, %v5785_v29  ;;  %v5781_v56 = vsel %vm5777_vm9, %v5765_v6, %v5780_v38  ;;  %v5789_v50 = vsel %vm5777_vm9, %v5771_v54, %v5788_v42  ;;  %v4914_v53 = vand.u32 2139095040, %v11293_v16 }
 0x6d9   : > { %v6682_v1 = vadd.s32 4294967294, %v6123_v8  ;;  %v5201_v15 = vcvt.s32.f32 %v5194_v62  ;;  %v5790_v61 = vsel %vm5776_vm14, %v5787_v40, %v5789_v50  ;;  %v5206_v18 = vsel %vm5121_vm7, %v5205_v44, %v11244_v30 }
 0x6da   : > { %v11336_v7 = vmul.u32.u64.low %v5791_v19, %v5786_v12  ;;  %v11337_v31 = vmul.u32.u64.high %v5791_v19, %v5786_v12, %v11336_v7  ;;  %v11340_v4 = vmul.u32.u64.low %v5791_v19, %v5790_v61  ;;  %v11341_v59 = vmul.u32.u64.high %v5791_v19, %v5790_v61, %v11340_v4 }
 0x6db   : > { %vm6683_vm2 = vcmp.lt.s32.totalorder %v6682_v1, 0  ;;  %v4915_v46 = vshrl.u32 %v4914_v53, 23  ;;  %v5782_v54 = vsel %vm5776_vm14, %v5779_v63, %v5781_v56  ;;  %v12322_v25 = vand.u32 2147483647, %v11293_v16  ;;  %v11361_v63 = vpop.f32.mrb[19].mxu0 }
 0x6dc   : > { %v6126_v6 = vsel %vm6683_vm2, 0, %v6682_v1  ;;  %v5515_v36 = vxor.u32 2147483648, %v5514_v9  ;;  %v5202_v62 = vmul.f32 %v5201_v15, %v5199_v11  ;;  %v5520_v51 = vsel %vm11322_vm11, 0, %v11302_v58 }
 0x6dd   : > { %v6131_v0 = vsub.s32 4294967266, %v6126_v6  ;;  %v6636_v38 = vadd.s32 4294967169, %v4915_v46  ;;  %vm6057_vm10 = vcmp.lt.s32.totalorder %v11124_v52, 0  ;;  %v6127_v28 = vsub.s32 32, %v6126_v6 }
 0x6de   : > { %v5801_v8 = vadd.s32 1, %v11337_v31  ;;  %v5208_v30 = vsel %vm11329_vm5, 0, %v5206_v18  ;;  %v5798_v44 = vmul.u32 %v5791_v19, %v5782_v54  ;;  %vm5800_vm13 = vc.u32 %v11341_v59, %v11336_v7 }
 0x6df   : > { %v6132_v49 = vadd.s32 127, %v6131_v0  ;;  %v6111_v29 = vadd.s32 %v11266_v2, %v11273_v47  ;;  %v6141_v40 = vsub.s32 4, %v11295_v17  ;;  %v4921_v11 = vadd.s32 1, %v6636_v38 }
 0x6e0   : > { %v5802_v58 = vsel %vm5800_vm13, %v5801_v8, %v11337_v31  ;;  %v5516_v12 = vsel %vm5433_vm12, %v5515_v36, %v5514_v9  ;;  %v5203_v42 = vxor.u32 2147483648, %v5202_v62  ;;  %v4918_v19 = vand.u32 8388607, %v12322_v25 }
 0x6e1   : > { %v5803_v1 = vadd.s32 %v5802_v58, %v5798_v44  ;;  %v11367_v56 = vadd.s32 3, %v5520_v51  ;;  %v6129_v50 = vshrl.u32 %v6111_v29, %v6127_v28  ;;  %vm4922_vm6 = vcmp.gt.s32.totalorder %v4921_v11, 0 }
 0x6e2   : > { %v11371_v2 = vadd.f32 %v11211_v35, %v11109_v14  ;;  %v11373_v47 = vadd.s32 3, %v5208_v30  ;;  %v6133_v53 = vshll.u32 %v6132_v49, 23  ;;  %v4923_v61 = vsel %vm4922_vm6, %v4921_v11, 0 }
 0x6e3   : > { %v5804_v15 = vadd.s32 536870912, %v5803_v1  ;;  %v11378_v9 = vsel %vm11322_vm11, %v11112_v39, %v5516_v12  ;;  %v6128_v31 = vshll.u32 %v11311_v10, %v6126_v6  ;;  %v11384_v4 = vsel %vm6057_vm10, %v6141_v40, %v11295_v17 }
 0x6e4   : > { %v4925_v46 = vand.u32 31, %v4923_v61  ;;  %v11388_v14 = vsel %vm5121_vm7, %v5203_v42, %v5202_v62  ;;  %v4919_v18 = vor.u32 8388608, %v4918_v19  ;;  %v11394_v20 = vadd.f32 %v11227_v37, %v11107_v45 }
 0x6e5   : > { %v11390_v35 = vshrl.u32 %v5804_v15, 30  ;;  %v6130_v54 = vor.u32 %v6129_v50, %v6128_v31  ;;  %v12320_v10 = vand.u32 2147483647, %v11371_v2  ;;  %v5018_v6 = vand.u32 2139095040, %v11371_v2 }
 0x6e6   : > { %12640 = vst [vmem:[#allocation15_spill] sm:$0xff] %v11394_v20  ;;  %v4926_v36 = vsub.s32 32, %v4925_v46  ;;  %v6134_v17 = vor.u32 4788187, %v6133_v53  ;;  %v4924_v38 = vshrl.u32 %v4923_v61, 5  ;;  %v4928_v62 = vshll.u32 %v12374_v34, %v4925_v46 }
 0x6e7   : > { %v5806_v0 = vshll.u32 %v11390_v35, 30  ;;  %v4931_v28 = vshll.u32 %v12631_v43, %v4925_v46  ;;  %v4934_v49 = vshll.u32 %v12632_v22, %v4925_v46  ;;  %v4937_v44 = vshll.u32 %v12633_v26, %v4925_v46 }
 0x6e8   : > { %v4929_v51 = vshrl.u32 %v12631_v43, %v4926_v36  ;;  %v4932_v8 = vshrl.u32 %v12632_v22, %v4926_v36  ;;  %v4935_v37 = vshrl.u32 %v12633_v26, %v4926_v36  ;;  %v4938_v29 = vshrl.u32 %v12544_v23, %v4926_v36 }
 0x6e9   : > { %v11404_v30 = vsub.s32 %v5803_v1, %v5806_v0  ;;  %v6137_v40 = vcvt.s32.f32 %v6130_v54  ;;  %v11409_v11 = vshll.u32 %v4919_v18, 8  ;;  %v11413_v12 = vand.u32 8388607, %v12320_v10 }
 0x6ea   : > { %v4930_v58 = vor.u32 %v4929_v51, %v4928_v62  ;;  %v4933_v19 = vor.u32 %v4932_v8, %v4931_v28  ;;  %v4936_v50 = vor.u32 %v4935_v37, %v4934_v49  ;;  %v4939_v1 = vor.u32 %v4938_v29, %v4937_v44 }
 0x6eb   : > { %v5809_v42 = vsub.s32 0, %v11404_v30  ;;  %vm11418_vm1 = vcmp.le.f32.partialorder %v6055_v55, 0.7853982  ;;  %v6135_v15 = vand.u32 2147483647, %v6134_v17  ;;  %v4940_v61 = vshll.u32 %v12544_v23, %v4925_v46 }
 0x6ec   : > { %v4941_v31 = vshrl.u32 %v12545_v13, %v4926_v36  ;;  %v5019_v18 = vshrl.u32 %v5018_v6, 23  ;;  %v4927_v0 = vshrl.u32 %v12374_v34, %v4926_v36  ;;  %vm4943_vm3 = vcmp.lt.s32.totalorder %v4924_v38, 1 }
 0x6ed   : > { %v6669_v54 = vmin.u32 %v5809_v42, %v11404_v30  ;;  %v5226_v62 = vand.u32 2139095040, %v11394_v20  ;;  %vm4944_vm4 = vcmp.lt.s32.totalorder %v4924_v38, 2  ;;  %vm4945_vm0 = vcmp.lt.s32.totalorder %v4924_v38, 3 }
 0x6ee   : > { %v4942_v51 = vor.u32 %v4941_v31, %v4940_v61  ;;  %vm4946_vm12 = vcmp.lt.s32.totalorder %v4924_v38, 4  ;;  %v4951_v8 = vsel %vm4943_vm3, %v4930_v58, %v4933_v19  ;;  %v4947_v37 = vsel %vm4943_vm3, %v4927_v0, %v4930_v58 }
 0x6ef   : > { %v5811_v55 = vclz %v6669_v54  ;;  %v4948_v28 = vsel %vm4946_vm12, %v4936_v50, 2102212464  ;;  %v4952_v17 = vsel %vm4946_vm12, %v4939_v1, 920167782  ;;  %v4955_v49 = vsel %vm4943_vm3, %v4933_v19, %v4936_v50 }
 0x6f0   : > { %v4953_v46 = vsel %vm4945_vm0, %v4936_v50, %v4952_v17  ;;  %v4956_v44 = vsel %vm4946_vm12, %v4942_v51, 1326507024  ;;  %vm5745_vm7 = vcmp.lt.s32.totalorder %v11217_v33, 0  ;;  %v4949_v29 = vsel %vm4945_vm0, %v4933_v19, %v4948_v28 }
 0x6f1   : > { %v6670_v6 = vadd.s32 4294967294, %v5811_v55  ;;  %v4954_v36 = vsel %vm4944_vm4, %v4951_v8, %v4953_v46  ;;  %v4957_v42 = vsel %vm4945_vm0, %v4939_v1, %v4956_v44  ;;  %v6138_v10 = vmul.f32 %v6137_v40, %v6135_v15 }
 0x6f2   : > { %v4958_v61 = vsel %vm4944_vm4, %v4955_v49, %v4957_v42  ;;  %v11431_v31 = vmul.u32.u64.low %v11409_v11, %v4954_v36  ;;  %v11432_v54 = vmul.u32.u64.high %v11409_v11, %v4954_v36, %v11431_v31  ;;  %v6640_v0 = vadd.s32 4294967169, %v5019_v18 }
 0x6f3   : > { %vm6671_vm11 = vcmp.lt.s32.totalorder %v6670_v6, 0  ;;  %v11436_v58 = vmul.u32.u64.low %v11409_v11, %v4958_v61  ;;  %v11437_v50 = vmul.u32.u64.high %v11409_v11, %v4958_v61, %v11436_v58  ;;  %7214 = vcosq.f32 %v11378_v9 }
 0x6f4   : > { %v5814_v19 = vsel %vm6671_vm11, 0, %v6670_v6  ;;  %v4950_v51 = vsel %vm4944_vm4, %v4947_v37, %v4949_v29  ;;  %v5227_v1 = vshrl.u32 %v5226_v62, 23  ;;  %7216 = vsinq.f32 %v11378_v9 }
 0x6f5   : > { %v6144_v40 = vsel %vm11418_vm1, 0, %v11384_v4  ;;  %v5819_v15 = vsub.s32 4294967266, %v5814_v19  ;;  %v5025_v55 = vadd.s32 1, %v6640_v0  ;;  %v11449_v28 = vsel %vm11329_vm5, %v11115_v21, %v11388_v14 }
 0x6f6   : > { %v5829_v18 = vsub.s32 4, %v11390_v35  ;;  %v4969_v38 = vadd.s32 1, %v11432_v54  ;;  %v12321_v62 = vand.u32 2147483647, %v11394_v20  ;;  %v6139_v8 = vxor.u32 2147483648, %v6138_v10 }
 0x6f7   : > { %v4966_v9 = vmul.u32 %v11409_v11, %v4950_v51  ;;  %vm4968_vm8 = vc.u32 %v11437_v50, %v11431_v31  ;;  %v5023_v4 = vor.u32 8388608, %v11413_v12  ;;  %v5815_v17 = vsub.s32 32, %v5814_v19 }
 0x6f8   : > { %v4970_v37 = vsel %vm4968_vm8, %v4969_v38, %v11432_v54  ;;  %vm5026_vm15 = vcmp.gt.s32.totalorder %v5025_v55, 0  ;;  %v6648_v32 = vadd.s32 4294967169, %v5227_v1  ;;  %v11459_v14 = vadd.s32 3, %v6144_v40 }
 0x6f9   : > { %v5820_v46 = vadd.s32 127, %v5819_v15  ;;  %v4971_v49 = vadd.s32 %v4970_v37, %v4966_v9  ;;  %v5027_v44 = vsel %vm5026_vm15, %v5025_v55, 0  ;;  %7218 = vcosq.f32 %v11449_v28 }
 0x6fa   : > { %12643 = vst [vmem:[#allocation5_spill] sm:$0xff] %v11459_v14  ;;  %v5799_v11 = vadd.s32 %v11336_v7, %v11341_v59  ;;  %v11467_v6 = vsel %vm5745_vm7, %v5829_v18, %v11390_v35  ;;  %v5029_v12 = vand.u32 31, %v5027_v44  ;;  %v11471_v29 = vsel %vm6057_vm10, %v6139_v8, %v6138_v10 }
 0x6fb   : > { %v4972_v36 = vadd.s32 536870912, %v4971_v49  ;;  %v11473_v42 = vshll.u32 %v5023_v4, 8  ;;  %v11477_v61 = vand.u32 8388607, %v12321_v62  ;;  %v5816_v54 = vshll.u32 %v11404_v30, %v5814_v19 }
 0x6fc   : > { %v5817_v7 = vshrl.u32 %v5799_v11, %v5815_v17  ;;  %v5030_v59 = vsub.s32 32, %v5029_v12  ;;  %v5233_v58 = vadd.s32 1, %v6648_v32  ;;  %v5821_v0 = vshll.u32 %v5820_v46, 23 }
 0x6fd   : > { %v11480_v35 = vshrl.u32 %v4972_v36, 30  ;;  %v5028_v51 = vshrl.u32 %v5027_v44, 5  ;;  %v5032_v1 = vshll.u32 %v12374_v34, %v5029_v12  ;;  %v11483_v10 = vpop.eup %7214  ;;  %v5035_v15 = vshll.u32 %v12631_v43, %v5029_v12 }
 0x6fe   : > { %v5033_v40 = vshrl.u32 %v12631_v43, %v5030_v59  ;;  %v5036_v55 = vshrl.u32 %v12632_v22, %v5030_v59  ;;  %v5039_v18 = vshrl.u32 %v12633_v26, %v5030_v59  ;;  %v11489_v30 = vpop.eup %7216  ;;  %v5038_v38 = vshll.u32 %v12632_v22, %v5029_v12 }
 0x6ff   : > { %v4974_v19 = vshll.u32 %v11480_v35, 30  ;;  %v5041_v8 = vshll.u32 %v12633_v26, %v5029_v12  ;;  %v5042_v9 = vshrl.u32 %v12544_v23, %v5030_v59  ;;  %v5045_v37 = vshrl.u32 %v12545_v13, %v5030_v59 }
 0x700   : > { %v5034_v4 = vor.u32 %v5033_v40, %v5032_v1  ;;  %v5037_v17 = vor.u32 %v5036_v55, %v5035_v15  ;;  %vm5234_vm5 = vcmp.gt.s32.totalorder %v5233_v58, 0  ;;  %v5040_v46 = vor.u32 %v5039_v18, %v5038_v38 }
 0x701   : > { %v11496_v32 = vsub.s32 %v4971_v49, %v4974_v19  ;;  %v5043_v44 = vor.u32 %v5042_v9, %v5041_v8  ;;  %v5044_v11 = vshll.u32 %v12544_v23, %v5029_v12  ;;  %v5818_v36 = vor.u32 %v5817_v7, %v5816_v54 }
 0x702   : > { %v5822_v62 = vor.u32 4788187, %v5821_v0  ;;  %v5231_v25 = vor.u32 8388608, %v11477_v61  ;;  %v11502_v48 = vadd.f32 %v11232_v3, %v11107_v45  ;;  %vm5047_vm9 = vcmp.lt.s32.totalorder %v5028_v51, 1 }
 0x703   : > { %v4977_v1 = vsub.s32 0, %v11496_v32  ;;  %v5046_v40 = vor.u32 %v5045_v37, %v5044_v11  ;;  %v5235_v15 = vsel %vm5234_vm5, %v5233_v58, 0  ;;  %v11505_v55 = vpop.eup %7218  ;;  %v5031_v49 = vshrl.u32 %v12374_v34, %v5030_v59 }
 0x704   : > { %vm5048_vm14 = vcmp.lt.s32.totalorder %v5028_v51, 2  ;;  %vm5050_vm2 = vcmp.lt.s32.totalorder %v5028_v51, 4  ;;  %v5055_v12 = vsel %vm5047_vm9, %v5034_v4, %v5037_v17  ;;  %vm5049_vm10 = vcmp.lt.s32.totalorder %v5028_v51, 3 }
 0x705   : > { %v6637_v54 = vmin.u32 %v4977_v1, %v11496_v32  ;;  %v5052_v61 = vsel %vm5050_vm2, %v5040_v46, 2102212464  ;;  %v5056_v7 = vsel %vm5050_vm2, %v5043_v44, 920167782  ;;  %v5051_v0 = vsel %vm5047_vm9, %v5031_v49, %v5034_v4 }
 0x706   : > { %v5053_v45 = vsel %vm5049_vm10, %v5037_v17, %v5052_v61  ;;  %v5057_v3 = vsel %vm5049_vm10, %v5040_v46, %v5056_v7  ;;  %v5059_v18 = vsel %vm5047_vm9, %v5037_v17, %v5040_v46  ;;  %v5823_v19 = vand.u32 2147483647, %v5822_v62 }
 0x707   : > { %v4979_v38 = vclz %v6637_v54  ;;  %v5058_v58 = vsel %vm5048_vm14, %v5055_v12, %v5057_v3  ;;  %v5060_v8 = vsel %vm5050_vm2, %v5046_v40, 1326507024  ;;  %v5825_v9 = vcvt.s32.f32 %v5818_v36 }
 0x708   : > { %v5061_v37 = vsel %vm5049_vm10, %v5043_v44, %v5060_v8  ;;  %v11511_v59 = vmul.u32.u64.low %v11473_v42, %v5058_v58  ;;  %v11512_v11 = vmul.u32.u64.high %v11473_v42, %v5058_v58, %v11511_v59  ;;  %v5054_v27 = vsel %vm5048_vm14, %v5051_v0, %v5053_v45 }
 0x709   : > { %v6638_v1 = vadd.s32 4294967294, %v4979_v38  ;;  %v5062_v4 = vsel %vm5048_vm14, %v5059_v18, %v5061_v37  ;;  %v5237_v49 = vand.u32 31, %v5235_v15  ;;  %v4967_v62 = vadd.s32 %v11431_v31, %v11437_v50 }
 0x70a   : > { %v11520_v17 = vmul.u32.u64.low %v11473_v42, %v5062_v4  ;;  %v11521_v46 = vmul.u32.u64.high %v11473_v42, %v5062_v4, %v11520_v17  ;;  %v11523_v36 = vshll.u32 %v5231_v25, 8  ;;  %v11525_v44 = vmul.f32 %v5825_v9, %v5823_v19 }
 0x70b   : > { %vm6639_vm13 = vcmp.lt.s32.totalorder %v6638_v1, 0  ;;  %v5238_v40 = vsub.s32 32, %v5237_v49  ;;  %v5070_v51 = vmul.u32 %v11473_v42, %v5054_v27  ;;  %v5073_v61 = vadd.s32 1, %v11512_v11 }
 0x70c   : > { %v4982_v54 = vsel %vm6639_vm13, 0, %v6638_v1  ;;  %v11530_v7 = vshrl.u32 %v5235_v15, 5  ;;  %v5240_v0 = vshll.u32 %v12374_v34, %v5237_v49  ;;  %v5243_v25 = vshll.u32 %v12631_v43, %v5237_v49 }
 0x70d   : > { %v4983_v31 = vsub.s32 32, %v4982_v54  ;;  %v4987_v50 = vsub.s32 4294967266, %v4982_v54  ;;  %vm5072_vm6 = vc.u32 %v11521_v46, %v11511_v59  ;;  %v5241_v45 = vshrl.u32 %v12631_v43, %v5238_v40 }
 0x70e   : > { %v5244_v3 = vshrl.u32 %v12632_v22, %v5238_v40  ;;  %v5246_v18 = vshll.u32 %v12632_v22, %v5237_v49  ;;  %v5074_v15 = vsel %vm5072_vm6, %v5073_v61, %v11512_v11  ;;  %v5247_v19 = vshrl.u32 %v12633_v26, %v5238_v40 }
 0x70f   : > { %v4985_v27 = vshrl.u32 %v4967_v62, %v4983_v31  ;;  %v4988_v42 = vadd.s32 127, %v4987_v50  ;;  %v4984_v38 = vshll.u32 %v11496_v32, %v4982_v54  ;;  %v5075_v58 = vadd.s32 %v5074_v15, %v5070_v51 }
 0x710   : > { %v5249_v8 = vshll.u32 %v12633_v26, %v5237_v49  ;;  %v5250_v9 = vshrl.u32 %v12544_v23, %v5238_v40  ;;  %vm4913_vm3 = vcmp.lt.s32.totalorder %v11293_v16, 0  ;;  %v5242_v1 = vor.u32 %v5241_v45, %v5240_v0 }
 0x711   : > { %v4989_v37 = vshll.u32 %v4988_v42, 23  ;;  %v5245_v4 = vor.u32 %v5244_v3, %v5243_v25  ;;  %v5248_v17 = vor.u32 %v5247_v19, %v5246_v18  ;;  %v5076_v12 = vadd.s32 536870912, %v5075_v58 }
 0x712   : > { %v5251_v62 = vor.u32 %v5250_v9, %v5249_v8  ;;  %v5252_v31 = vshll.u32 %v12544_v23, %v5237_v49  ;;  %v5253_v11 = vshrl.u32 %v12545_v13, %v5238_v40  ;;  %v12644_v61 = vand.u32 2147483647, %v11217_v33 }
 0x713   : > { %v4986_v54 = vor.u32 %v4985_v27, %v4984_v38  ;;  %v4997_v51 = vsub.s32 4, %v11480_v35  ;;  %v5239_v50 = vshrl.u32 %v12374_v34, %v5238_v40  ;;  %vm5255_vm0 = vcmp.lt.s32.totalorder %v11530_v7, 1 }
 0x714   : > { %vm11549_vm4 = vcmp.le.f32.partialorder %v12644_v61, 0.7853982  ;;  %v12647_v0 = vand.u32 2147483647, %v11293_v16  ;;  %v4990_v49 = vor.u32 4788187, %v4989_v37  ;;  %v5254_v3 = vor.u32 %v5253_v11, %v5252_v31 }
 0x715   : > { %v11562_v45 = vshrl.u32 %v5076_v12, 30  ;;  %vm5258_vm11 = vcmp.lt.s32.totalorder %v11530_v7, 4  ;;  %vm5257_vm8 = vcmp.lt.s32.totalorder %v11530_v7, 3  ;;  %v5263_v27 = vsel %vm5255_vm0, %v5242_v1, %v5245_v4 }
 0x716   : > { %vm11558_vm12 = vcmp.le.f32.partialorder %v12647_v0, 0.7853982  ;;  %v5260_v18 = vsel %vm5258_vm11, %v5248_v17, 2102212464  ;;  %v5264_v42 = vsel %vm5258_vm11, %v5251_v62, 920167782  ;;  %v5267_v19 = vsel %vm5255_vm0, %v5245_v4, %v5248_v17 }
 0x717   : > { %12650 = vst [vmem:[#allocation6_spill] sm:$0xff] %v11562_v45  ;;  %v5078_v40 = vshll.u32 %v11562_v45, 30  ;;  %vm5256_vm15 = vcmp.lt.s32.totalorder %v11530_v7, 2  ;;  %v5265_v15 = vsel %vm5257_vm8, %v5248_v17, %v5264_v42  ;;  %v5259_v38 = vsel %vm5255_vm0, %v5239_v50, %v5242_v1 }
 0x718   : > { %v5261_v8 = vsel %vm5257_vm8, %v5245_v4, %v5260_v18  ;;  %v5266_v12 = vsel %vm5256_vm15, %v5263_v27, %v5265_v15  ;;  %v5268_v9 = vsel %vm5258_vm11, %v5254_v3, 1326507024  ;;  %v5827_v0 = vxor.u32 2147483648, %v11525_v44 }
 0x719   : > { %v11570_v37 = vsub.s32 %v5075_v58, %v5078_v40  ;;  %v5269_v31 = vsel %vm5257_vm8, %v5251_v62, %v5268_v9  ;;  %v11573_v11 = vmul.u32.u64.low %v11523_v36, %v5266_v12  ;;  %v11574_v61 = vmul.u32.u64.high %v11523_v36, %v5266_v12, %v11573_v11 }
 0x71a   : > { %v4991_v45 = vand.u32 2147483647, %v4990_v49  ;;  %v5270_v42 = vsel %vm5256_vm15, %v5267_v19, %v5269_v31  ;;  %v5330_v1 = vand.u32 2139095040, %v11502_v48  ;;  %v4998_v4 = vsel %vm4913_vm3, %v4997_v51, %v11480_v35 }
 0x71b   : > { %v5081_v58 = vsub.s32 0, %v11570_v37  ;;  %v11585_v17 = vmul.u32.u64.low %v11523_v36, %v5270_v42  ;;  %v11586_v62 = vmul.u32.u64.high %v11523_v36, %v5270_v42, %v11585_v17  ;;  %7220 = vsinq.f32 %v11449_v28 }
 0x71c   : > { %v4993_v50 = vcvt.s32.f32 %v4986_v54  ;;  %v5262_v49 = vsel %vm5256_vm15, %v5259_v38, %v5261_v8  ;;  %v5331_v3 = vshrl.u32 %v5330_v1, 23  ;;  %v6143_v18 = vsel %vm11418_vm1, %v11124_v52, %v11471_v29 }
 0x71d   : > { %v5832_v35 = vsel %vm11549_vm4, 0, %v11467_v6  ;;  %v6641_v51 = vmin.u32 %v5081_v58, %v11570_v37  ;;  %v5281_v27 = vadd.s32 1, %v11574_v61  ;;  %v5828_v28 = vsel %vm5745_vm7, %v5827_v0, %v11525_v44 }
 0x71e   : > { %v4994_v7 = vmul.f32 %v4993_v50, %v4991_v45  ;;  %v5000_v54 = vsel %vm11558_vm12, 0, %v4998_v4  ;;  %v6652_v40 = vadd.s32 4294967169, %v5331_v3  ;;  %v5278_v53 = vmul.u32 %v11523_v36, %v5262_v49 }
 0x71f   : > { %v5083_v15 = vclz %v6641_v51  ;;  %vm5280_vm1 = vc.u32 %v11586_v62, %v11573_v11  ;;  %v12651_v6 = vand.u32 2147483647, %v11502_v48  ;;  %v11609_v19 = vadd.s32 3, %v5832_v35 }
 0x720   : > { %v5282_v38 = vsel %vm5280_vm1, %v5281_v27, %v11574_v61  ;;  %v5337_v8 = vadd.s32 1, %v6652_v40  ;;  %v11614_v44 = vadd.f32 %v11242_v57, %v11209_v41  ;;  %7222 = vcosq.f32 %v6143_v18 }
 0x721   : > { %v5334_v29 = vand.u32 8388607, %v12651_v6  ;;  %v5831_v45 = vsel %vm11549_vm4, %v11217_v33, %v5828_v28  ;;  %v6642_v36 = vadd.s32 4294967294, %v5083_v15  ;;  %v5283_v12 = vadd.s32 %v5282_v38, %v5278_v53 }
 0x722   : > { %7224 = vsinq.f32 %v6143_v18  ;;  %v4995_v9 = vxor.u32 2147483648, %v4994_v7  ;;  %v11619_v31 = vadd.s32 3, %v5000_v54  ;;  %vm5338_vm7 = vcmp.gt.s32.totalorder %v5337_v8, 0 }
 0x723   : > { %vm6643_vm5 = vcmp.lt.s32.totalorder %v6642_v36, 0  ;;  %v5284_v0 = vadd.s32 536870912, %v5283_v12  ;;  %v5335_v61 = vor.u32 8388608, %v5334_v29  ;;  %v5339_v42 = vsel %vm5338_vm7, %v5337_v8, 0 }
 0x724   : > { %12652 = vst [vmem:[#allocation14_spill] sm:$0xff] %v11619_v31  ;;  %7226 = vcosq.f32 %v5831_v45  ;;  %v5086_v1 = vsel %vm6643_vm5, 0, %v6642_v36  ;;  %v5341_v57 = vand.u32 31, %v5339_v42  ;;  %v12327_v4 = vand.u32 2147483647, %v11614_v44 }
 0x725   : > { %7228 = vsinq.f32 %v5831_v45  ;;  %v5071_v32 = vadd.s32 %v11511_v59, %v11521_v46  ;;  %v5091_v58 = vsub.s32 4294967266, %v5086_v1  ;;  %v11624_v17 = vshrl.u32 %v5284_v0, 30  ;;  %v11626_v50 = vpop.eup %7220 }
 0x726   : > { %v11630_v49 = vsel %vm4913_vm3, %v4995_v9, %v4994_v7  ;;  %v5087_v3 = vsub.s32 32, %v5086_v1  ;;  %v5342_v18 = vsub.s32 32, %v5341_v57  ;;  %v11634_v35 = vadd.f32 %v11247_v5, %v11209_v41 }
 0x727   : > { %v5092_v51 = vadd.s32 127, %v5091_v58  ;;  %v11637_v27 = vadd.s32 %v11573_v11, %v11586_v62  ;;  %v5286_v59 = vshll.u32 %v11624_v17, 30  ;;  %v11640_v46 = vshll.u32 %v5335_v61, 8 }
 0x728   : > { %v5350_v28 = vshll.u32 %v12632_v22, %v5341_v57  ;;  %v5351_v54 = vshrl.u32 %v12633_v26, %v5342_v18  ;;  %v5538_v7 = vand.u32 2139095040, %v11614_v44  ;;  %v11647_v40 = vand.u32 8388607, %v12327_v4 }
 0x729   : > { %v5093_v41 = vshll.u32 %v5092_v51, 23  ;;  %v11649_v5 = vsub.s32 %v5283_v12, %v5286_v59  ;;  %v5345_v11 = vshrl.u32 %v12631_v43, %v5342_v18  ;;  %v5348_v62 = vshrl.u32 %v12632_v22, %v5342_v18 }
 0x72a   : > { %v5088_v15 = vshll.u32 %v11570_v37, %v5086_v1  ;;  %v5089_v53 = vshrl.u32 %v5071_v32, %v5087_v3  ;;  %v5340_v6 = vshrl.u32 %v5339_v42, 5  ;;  %v5344_v29 = vshll.u32 %v12374_v34, %v5341_v57  ;;  %v11655_v38 = vpop.eup %7222 }
 0x72b   : > { %12653 = vst [vmem:[#allocation16_spill] sm:$0xff] %v11655_v38  ;;  %v5094_v8 = vor.u32 4788187, %v5093_v41  ;;  %v5289_v45 = vsub.s32 0, %v11649_v5  ;;  %v5347_v36 = vshll.u32 %v12631_v43, %v5341_v57  ;;  %v5352_v9 = vor.u32 %v5351_v54, %v5350_v28 }
 0x72c   : > { %v11659_v12 = vpop.eup %7224  ;;  %v5353_v0 = vshll.u32 %v12633_v26, %v5341_v57  ;;  %v5354_v61 = vshrl.u32 %v12544_v23, %v5342_v18  ;;  %v5356_v37 = vshll.u32 %v12544_v23, %v5341_v57  ;;  %v5357_v42 = vshrl.u32 %v12545_v13, %v5342_v18 }
 0x72d   : > { %12654 = vst [vmem:[#allocation24_spill] sm:$0xff] %v11659_v12  ;;  %v6649_v1 = vmin.u32 %v5289_v45, %v11649_v5  ;;  %v5346_v32 = vor.u32 %v5345_v11, %v5344_v29  ;;  %v5349_v58 = vor.u32 %v5348_v62, %v5347_v36  ;;  %v5642_v3 = vand.u32 2139095040, %v11634_v35 }
 0x72e   : > { %v11667_v51 = vpop.eup %7226  ;;  %v5090_v59 = vor.u32 %v5089_v53, %v5088_v15  ;;  %v5355_v28 = vor.u32 %v5354_v61, %v5353_v0  ;;  %v5358_v54 = vor.u32 %v5357_v42, %v5356_v37  ;;  %v5539_v41 = vshrl.u32 %v5538_v7, 23 }
 0x72f   : > { %12655 = vst [vmem:[#allocation21_spill] sm:$0xff] %v11667_v51  ;;  %v11669_v4 = vpop.eup %7228  ;;  %v5095_v31 = vand.u32 2147483647, %v5094_v8  ;;  %v5291_v52 = vclz %v6649_v1  ;;  %v5343_v57 = vshrl.u32 %v12374_v34, %v5342_v18  ;;  %vm5362_vm9 = vcmp.lt.s32.totalorder %v5340_v6, 4 }
 0x730   : > { %vm5225_vm14 = vcmp.lt.s32.totalorder %v11394_v20, 0  ;;  %vm5359_vm2 = vcmp.lt.s32.totalorder %v5340_v6, 1  ;;  %vm5361_vm10 = vcmp.lt.s32.totalorder %v5340_v6, 3  ;;  %v5364_v11 = vsel %vm5362_vm9, %v5352_v9, 2102212464 }
 0x731   : > { %v5368_v62 = vsel %vm5362_vm9, %v5355_v28, 920167782  ;;  %v6650_v29 = vadd.s32 4294967294, %v5291_v52  ;;  %v5367_v45 = vsel %vm5359_vm2, %v5346_v32, %v5349_v58  ;;  %v5371_v15 = vsel %vm5359_vm2, %v5349_v58, %v5352_v9 }
 0x732   : > { %v5369_v36 = vsel %vm5361_vm10, %v5352_v9, %v5368_v62  ;;  %v5097_v53 = vcvt.s32.f32 %v5090_v59  ;;  %vm5360_vm13 = vcmp.lt.s32.totalorder %v5340_v6, 2  ;;  %v5372_v7 = vsel %vm5362_vm9, %v5358_v54, 1326507024 }
 0x733   : > { %v6660_v0 = vadd.s32 4294967169, %v5539_v41  ;;  %vm6651_vm6 = vcmp.lt.s32.totalorder %v6650_v29, 0  ;;  %v5363_v8 = vsel %vm5359_vm2, %v5343_v57, %v5346_v32  ;;  %v5365_v61 = vsel %vm5361_vm10, %v5349_v58, %v5364_v11 }
 0x734   : > { %v5373_v37 = vsel %vm5361_vm10, %v5355_v28, %v5372_v7  ;;  %v5294_v18 = vsel %vm6651_vm6, 0, %v6650_v29  ;;  %v5370_v42 = vsel %vm5360_vm13, %v5367_v45, %v5369_v36  ;;  %v5098_v12 = vmul.f32 %v5097_v53, %v5095_v31 }
 0x735   : > { %v5374_v1 = vsel %vm5360_vm13, %v5371_v15, %v5373_v37  ;;  %v5545_v38 = vadd.s32 1, %v6660_v0  ;;  %v5295_v33 = vsub.s32 32, %v5294_v18  ;;  %v5299_v14 = vsub.s32 4294967266, %v5294_v18 }
 0x736   : > { %v5309_v52 = vsub.s32 4, %v11624_v17  ;;  %v5366_v51 = vsel %vm5360_vm13, %v5363_v8, %v5365_v61  ;;  %v11675_v9 = vmul.u32.u64.low %v11640_v46, %v5374_v1  ;;  %v11676_v59 = vmul.u32.u64.high %v11640_v46, %v5374_v1, %v11675_v9 }
 0x737   : > { %vm5546_vm3 = vcmp.gt.s32.totalorder %v5545_v38, 0  ;;  %v5297_v6 = vshrl.u32 %v11637_v27, %v5295_v33  ;;  %v5300_v32 = vadd.s32 127, %v5299_v14  ;;  %v11688_v31 = vsel %vm11558_vm12, %v11293_v16, %v11630_v49 }
 0x738   : > { %v11680_v58 = vmul.u32.u64.low %v11640_v46, %v5370_v42  ;;  %v11681_v28 = vmul.u32.u64.high %v11640_v46, %v5370_v42, %v11680_v58  ;;  %vm5017_vm4 = vcmp.lt.s32.totalorder %v11371_v2, 0  ;;  %v5543_v54 = vor.u32 8388608, %v11647_v40 }
 0x739   : > { %v5547_v41 = vsel %vm5546_vm3, %v5545_v38, 0  ;;  %v12333_v57 = vand.u32 2147483647, %v11634_v35  ;;  %v5296_v33 = vshll.u32 %v11649_v5, %v5294_v18  ;;  %v5301_v14 = vshll.u32 %v5300_v32, 23 }
 0x73a   : > { %v11697_v27 = vsel %vm5225_vm14, %v5309_v52, %v11624_v17  ;;  %v5549_v11 = vand.u32 31, %v5547_v41  ;;  %v5099_v62 = vxor.u32 2147483648, %v5098_v12  ;;  %v5382_v25 = vmul.u32 %v11640_v46, %v5366_v51 }
 0x73b   : > { %vm5384_vm0 = vc.u32 %v11676_v59, %v11680_v58  ;;  %v5643_v49 = vshrl.u32 %v5642_v3, 23  ;;  %v5298_v40 = vor.u32 %v5297_v6, %v5296_v33  ;;  %v5302_v38 = vor.u32 4788187, %v5301_v14 }
 0x73c   : > { %v5385_v29 = vadd.s32 1, %v11681_v28  ;;  %v5550_v45 = vsub.s32 32, %v5549_v11  ;;  %v5548_v5 = vshrl.u32 %v5547_v41, 5  ;;  %v5552_v36 = vshll.u32 %v12374_v34, %v5549_v11 }
 0x73d   : > { %v5555_v15 = vshll.u32 %v12631_v43, %v5549_v11  ;;  %v5558_v17 = vshll.u32 %v12632_v22, %v5549_v11  ;;  %v5303_v53 = vand.u32 2147483647, %v5302_v38  ;;  %v5561_v51 = vshll.u32 %v12633_v26, %v5549_v11 }
 0x73e   : > { %v5386_v7 = vsel %vm5384_vm0, %v5385_v29, %v11681_v28  ;;  %v5553_v46 = vshrl.u32 %v12631_v43, %v5550_v45  ;;  %v5556_v0 = vshrl.u32 %v12632_v22, %v5550_v45  ;;  %v5559_v8 = vshrl.u32 %v12633_v26, %v5550_v45 }
 0x73f   : > { %v5387_v3 = vadd.s32 %v5386_v7, %v5382_v25  ;;  %v5562_v61 = vshrl.u32 %v12544_v23, %v5550_v45  ;;  %v12656_v37 = vand.u32 2147483647, %v11371_v2  ;;  %v5305_v42 = vcvt.s32.f32 %v5298_v40 }
 0x740   : > { %v5554_v1 = vor.u32 %v5553_v46, %v5552_v36  ;;  %v5564_v52 = vshll.u32 %v12544_v23, %v5549_v11  ;;  %v5565_v9 = vshrl.u32 %v12545_v13, %v5550_v45  ;;  %v5557_v32 = vor.u32 %v5556_v0, %v5555_v15 }
 0x741   : > { %vm11714_vm12 = vcmp.le.f32.partialorder %v12656_v37, 0.7853982  ;;  %v5388_v6 = vadd.s32 536870912, %v5387_v3  ;;  %v5560_v28 = vor.u32 %v5559_v8, %v5558_v17  ;;  %v5563_v41 = vor.u32 %v5562_v61, %v5561_v51 }
 0x742   : > { %v5100_v33 = vsel %vm5017_vm4, %v5099_v62, %v5098_v12  ;;  %v5306_v14 = vmul.f32 %v5305_v42, %v5303_v53  ;;  %v6664_v25 = vadd.s32 4294967169, %v5643_v49  ;;  %v5646_v38 = vand.u32 8388607, %v12333_v57 }
 0x743   : > { %v12659_v29 = vand.u32 2147483647, %v11394_v20  ;;  %v11730_v11 = vshrl.u32 %v5388_v6, 30  ;;  %v5566_v36 = vor.u32 %v5565_v9, %v5564_v52  ;;  %vm5567_vm8 = vcmp.lt.s32.totalorder %v5548_v5, 1 }
 0x744   : > { %vm5570_vm15 = vcmp.lt.s32.totalorder %v5548_v5, 4  ;;  %vm5569_vm1 = vcmp.lt.s32.totalorder %v5548_v5, 3  ;;  %v5575_v12 = vsel %vm5567_vm8, %v5554_v1, %v5557_v32  ;;  %v5551_v17 = vshrl.u32 %v12374_v34, %v5550_v45 }
 0x745   : > { %vm11726_vm11 = vcmp.le.f32.partialorder %v12659_v29, 0.7853982  ;;  %v5572_v15 = vsel %vm5570_vm15, %v5560_v28, 2102212464  ;;  %v5576_v62 = vsel %vm5570_vm15, %v5563_v41, 920167782  ;;  %v5579_v51 = vsel %vm5567_vm8, %v5557_v32, %v5560_v28 }
 0x746   : > { %v5390_v49 = vshll.u32 %v11730_v11, 30  ;;  %vm5568_vm7 = vcmp.lt.s32.totalorder %v5548_v5, 2  ;;  %v5577_v53 = vsel %vm5569_vm1, %v5560_v28, %v5576_v62  ;;  %v5307_v7 = vxor.u32 2147483648, %v5306_v14 }
 0x747   : > { %v5578_v46 = vsel %vm5568_vm7, %v5575_v12, %v5577_v53  ;;  %v5583_v0 = vshll.u32 %v5543_v54, 8  ;;  %v5571_v61 = vsel %vm5567_vm8, %v5551_v17, %v5554_v1  ;;  %v5573_v37 = vsel %vm5569_vm1, %v5557_v32, %v5572_v15 }
 0x748   : > { %v11738_v8 = vsub.s32 %v5387_v3, %v5390_v49  ;;  %v5580_v42 = vsel %vm5570_vm15, %v5566_v36, 1326507024  ;;  %v5649_v45 = vadd.s32 1, %v6664_v25  ;;  %v11750_v29 = vsel %vm11714_vm12, %v11371_v2, %v5100_v33 }
 0x749   : > { %v5581_v52 = vsel %vm5569_vm1, %v5563_v41, %v5580_v42  ;;  %v11743_v9 = vmul.u32.u64.low %v5583_v0, %v5578_v46  ;;  %v11744_v6 = vmul.u32.u64.high %v5583_v0, %v5578_v46, %v11743_v9  ;;  %v5647_v1 = vor.u32 8388608, %v5646_v38 }
 0x74a   : > { %v5393_v54 = vsub.s32 0, %v11738_v8  ;;  %v5582_v3 = vsel %vm5568_vm7, %v5579_v51, %v5581_v52  ;;  %v5308_v32 = vsel %vm5225_vm14, %v5307_v7, %v5306_v14  ;;  %vm5650_vm5 = vcmp.gt.s32.totalorder %v5649_v45, 0 }
 0x74b   : > { %v11756_v28 = vmul.u32.u64.low %v5583_v0, %v5582_v3  ;;  %v11757_v41 = vmul.u32.u64.high %v5583_v0, %v5582_v3, %v11756_v28  ;;  %7230 = vcosq.f32 %v11688_v31  ;;  %v5574_v36 = vsel %vm5568_vm7, %v5571_v61, %v5573_v37 }
 0x74c   : > { %v6653_v25 = vmin.u32 %v5393_v54, %v11738_v8  ;;  %v5651_v33 = vsel %vm5650_vm5, %v5649_v45, 0  ;;  %7232 = vsinq.f32 %v11688_v31  ;;  %v5312_v38 = vsel %vm11726_vm11, 0, %v11697_v27 }
 0x74d   : > { %v5593_v15 = vadd.s32 1, %v11744_v6  ;;  %v5653_v14 = vand.u32 31, %v5651_v33  ;;  %7234 = vcosq.f32 %v11750_v29  ;;  %v11771_v12 = vsel %vm11726_vm11, %v11394_v20, %v5308_v32 }
 0x74e   : > { %v5383_v5 = vadd.s32 %v11680_v58, %v11676_v59  ;;  %v5395_v62 = vclz %v6653_v25  ;;  %v5590_v49 = vmul.u32 %v5583_v0, %v5574_v36  ;;  %vm5592_vm9 = vc.u32 %v11757_v41, %v11743_v9 }
 0x74f   : > { %v5654_v31 = vsub.s32 32, %v5653_v14  ;;  %v11777_v17 = vshll.u32 %v5647_v1, 8  ;;  %v5594_v7 = vsel %vm5592_vm9, %v5593_v15, %v11744_v6  ;;  %v11782_v46 = vadd.f32 %v11285_v60, %v11119_v24 }
 0x750   : > { %v6654_v53 = vadd.s32 4294967294, %v5395_v62  ;;  %v11786_v51 = vadd.f32 %v11361_v63, %v11119_v24  ;;  %v5595_v59 = vadd.s32 %v5594_v7, %v5590_v49  ;;  %v11788_v58 = vshrl.u32 %v5651_v33, 5 }
 0x751   : > { %v5657_v0 = vshrl.u32 %v12631_v43, %v5654_v31  ;;  %v5660_v61 = vshrl.u32 %v12632_v22, %v5654_v31  ;;  %v5656_v37 = vshll.u32 %v12374_v34, %v5653_v14  ;;  %v5659_v42 = vshll.u32 %v12631_v43, %v5653_v14 }
 0x752   : > { %12662 = vst [vmem:[#allocation19_spill] sm:$0xff] %v11786_v51  ;;  %vm6655_vm14 = vcmp.lt.s32.totalorder %v6654_v53, 0  ;;  %v5663_v52 = vshrl.u32 %v12633_v26, %v5654_v31  ;;  %v5596_v6 = vadd.s32 536870912, %v5595_v59  ;;  %v5662_v45 = vshll.u32 %v12632_v22, %v5653_v14 }
 0x753   : > { %v5398_v60 = vsel %vm6655_vm14, 0, %v6654_v53  ;;  %v5666_v24 = vshrl.u32 %v12544_v23, %v5654_v31  ;;  %v5658_v3 = vor.u32 %v5657_v0, %v5656_v37  ;;  %v5665_v1 = vshll.u32 %v12633_v26, %v5653_v14 }
 0x754   : > { %v5399_v63 = vsub.s32 32, %v5398_v60  ;;  %v5403_v54 = vsub.s32 4294967266, %v5398_v60  ;;  %v5400_v32 = vshll.u32 %v11738_v8, %v5398_v60  ;;  %v11799_v28 = vshrl.u32 %v5596_v6, 30 }
 0x755   : > { %v5661_v25 = vor.u32 %v5660_v61, %v5659_v42  ;;  %v5669_v36 = vshrl.u32 %v12545_v13, %v5654_v31  ;;  %v11802_v33 = vpop.eup %7230  ;;  %v5664_v49 = vor.u32 %v5663_v52, %v5662_v45  ;;  %v5668_v53 = vshll.u32 %v12544_v23, %v5653_v14 }
 0x756   : > { %12663 = vst [vmem:[#allocation34_spill] sm:$0xff] %v11799_v28  ;;  %v5401_v15 = vshrl.u32 %v5383_v5, %v5399_v63  ;;  %v5404_v62 = vadd.s32 127, %v5403_v54  ;;  %v11805_v7 = vpop.eup %7232  ;;  %v5598_v0 = vshll.u32 %v11799_v28, 30  ;;  %v5667_v37 = vor.u32 %v5666_v24, %v5665_v1 }
 0x757   : > { %v5850_v8 = vand.u32 2139095040, %v11782_v46  ;;  %v11810_v60 = vpop.eup %7234  ;;  %v5655_v6 = vshrl.u32 %v12374_v34, %v5654_v31  ;;  %v5670_v5 = vor.u32 %v5669_v36, %v5668_v53  ;;  %vm5671_vm2 = vcmp.lt.s32.totalorder %v11788_v58, 1 }
 0x758   : > { %v5402_v61 = vor.u32 %v5401_v15, %v5400_v32  ;;  %v5405_v42 = vshll.u32 %v5404_v62, 23  ;;  %v11813_v63 = vsub.s32 %v5595_v59, %v5598_v0  ;;  %vm5672_vm10 = vcmp.lt.s32.totalorder %v11788_v58, 2 }
 0x759   : > { %vm5674_vm13 = vcmp.lt.s32.totalorder %v11788_v58, 4  ;;  %vm5673_vm6 = vcmp.lt.s32.totalorder %v11788_v58, 3  ;;  %v5679_v45 = vsel %vm5671_vm2, %v5658_v3, %v5661_v25  ;;  %v5675_v1 = vsel %vm5671_vm2, %v5655_v6, %v5658_v3 }
 0x75a   : > { %v5406_v14 = vor.u32 4788187, %v5405_v42  ;;  %v5676_v52 = vsel %vm5674_vm13, %v5664_v49, 2102212464  ;;  %v5409_v24 = vcvt.s32.f32 %v5402_v61  ;;  %v5601_v54 = vsub.s32 0, %v11813_v63 }
 0x75b   : > { %v5680_v32 = vsel %vm5674_vm13, %v5667_v37, 920167782  ;;  %vm5329_vm3 = vcmp.lt.s32.totalorder %v11502_v48, 0  ;;  %v5683_v36 = vsel %vm5671_vm2, %v5661_v25, %v5664_v49  ;;  %v5684_v15 = vsel %vm5674_vm13, %v5670_v5, 1326507024 }
 0x75c   : > { %v5407_v31 = vand.u32 2147483647, %v5406_v14  ;;  %v5681_v59 = vsel %vm5673_vm6, %v5664_v49, %v5680_v32  ;;  %v6661_v62 = vmin.u32 %v5601_v54, %v11813_v63  ;;  %v5677_v53 = vsel %vm5673_vm6, %v5661_v25, %v5676_v52 }
 0x75d   : > { %v5682_v0 = vsel %vm5672_vm10, %v5679_v45, %v5681_v59  ;;  %v5685_v42 = vsel %vm5673_vm6, %v5667_v37, %v5684_v15  ;;  %v12664_v14 = vand.u32 2147483647, %v11502_v48  ;;  %v5851_v37 = vshrl.u32 %v5850_v8, 23 }
 0x75e   : > { %v5410_v57 = vmul.f32 %v5409_v24, %v5407_v31  ;;  %v5686_v61 = vsel %vm5672_vm10, %v5683_v36, %v5685_v42  ;;  %v11827_v3 = vmul.u32.u64.low %v11777_v17, %v5682_v0  ;;  %v11828_v6 = vmul.u32.u64.high %v11777_v17, %v5682_v0, %v11827_v3 }
 0x75f   : > { %vm11832_vm0 = vcmp.le.f32.partialorder %v12664_v14, 0.7853982  ;;  %v5603_v5 = vclz %v6661_v62  ;;  %v11837_v25 = vmul.u32.u64.low %v11777_v17, %v5686_v61  ;;  %v11838_v52 = vmul.u32.u64.high %v11777_v17, %v5686_v61, %v11837_v25 }
 0x760   : > { %7236 = vsinq.f32 %v11750_v29  ;;  %v11845_v45 = vadd.s32 3, %v5312_v38  ;;  %v5678_v24 = vsel %vm5672_vm10, %v5675_v1, %v5677_v53  ;;  %v12667_v54 = vand.u32 2147483647, %v11782_v46 }
 0x761   : > { %7238 = vcosq.f32 %v11771_v12  ;;  %v5411_v31 = vxor.u32 2147483648, %v5410_v57  ;;  %v6662_v59 = vadd.s32 4294967294, %v5603_v5  ;;  %v6672_v36 = vadd.s32 4294967169, %v5851_v37 }
 0x762   : > { %v5854_v32 = vand.u32 8388607, %v12667_v54  ;;  %7240 = vsinq.f32 %v11771_v12  ;;  %v5697_v29 = vadd.s32 1, %v11828_v6  ;;  %v12334_v40 = vand.u32 2147483647, %v11786_v51 }
 0x763   : > { %v5591_v27 = vadd.s32 %v11743_v9, %v11757_v41  ;;  %vm6663_vm11 = vcmp.lt.s32.totalorder %v6662_v59, 0  ;;  %v5694_v38 = vmul.u32 %v11777_v17, %v5678_v24  ;;  %vm5696_vm8 = vc.u32 %v11838_v52, %v11827_v3 }
 0x764   : > { %v12335_v58 = vmov 0.0|0.0   ;;  %v5606_v8 = vsel %vm6663_vm11, 0, %v6662_v59  ;;  %v5698_v1 = vsel %vm5696_vm8, %v5697_v29, %v11828_v6  ;;  %v5855_v15 = vor.u32 8388608, %v5854_v32 }
 0x765   : > { %6828 = vmatprep.subr.bf16.mxu0 %v12335_v58  ;;  %v5857_v12 = vadd.s32 1, %v6672_v36  ;;  %v5412_v62 = vsel %vm5329_vm3, %v5411_v31, %v5410_v57  ;;  %v5607_v53 = vsub.s32 32, %v5606_v8  ;;  %v5611_v0 = vsub.s32 4294967266, %v5606_v8 }
 0x766   : > { %v5954_v9 = vand.u32 2139095040, %v11786_v51  ;;  %v5699_v17 = vadd.s32 %v5698_v1, %v5694_v38  ;;  %v11867_v42 = vand.u32 8388607, %v12334_v40  ;;  %v5608_v61 = vshll.u32 %v11813_v63, %v5606_v8 }
 0x767   : > { %vm5858_vm15 = vcmp.gt.s32.totalorder %v5857_v12, 0  ;;  %v5609_v6 = vshrl.u32 %v5591_v27, %v5607_v53  ;;  %v5612_v14 = vadd.s32 127, %v5611_v0  ;;  %v11873_v57 = vsel %vm11832_vm0, %v11502_v48, %v5412_v62 }
 0x768   : > { %v5859_v5 = vsel %vm5858_vm15, %v5857_v12, 0  ;;  %v5700_v25 = vadd.s32 536870912, %v5699_v17  ;;  %v11875_v24 = vshll.u32 %v5855_v15, 8  ;;  %v11878_v31 = vadd.s32 %v11827_v3, %v11838_v52 }
 0x769   : > { %v5861_v37 = vand.u32 31, %v5859_v5  ;;  %v5610_v54 = vor.u32 %v5609_v6, %v5608_v61  ;;  %v5613_v32 = vshll.u32 %v5612_v14, 23  ;;  %v5955_v59 = vshrl.u32 %v5954_v9, 23 }
 0x76a   : > { %v11880_v36 = vpop.eup %7236  ;;  %vm5537_vm1 = vcmp.lt.s32.totalorder %v11614_v44, 0  ;;  %v11883_v63 = vshrl.u32 %v5700_v25, 30  ;;  %v5860_v29 = vshrl.u32 %v5859_v5, 5  ;;  %v12670_v61 = vand.u32 2147483647, %v11614_v44 }
 0x76b   : > { %v5862_v27 = vsub.s32 32, %v5861_v37  ;;  %v5864_v38 = vshll.u32 %v12374_v34, %v5861_v37  ;;  %v11886_v8 = vpop.eup %7238  ;;  %v5614_v1 = vor.u32 4788187, %v5613_v32  ;;  %v5617_v15 = vcvt.s32.f32 %v5610_v54 }
 0x76c   : > { %12668 = vst [vmem:[#allocation28_spill] sm:$0xff] %v11883_v63  ;;  %12669 = vst [vmem:[#allocation12_spill] sm:$0xff] %v11886_v8  ;;  %v5867_v12 = vshll.u32 %v12631_v43, %v5861_v37  ;;  %v5870_v3 = vshll.u32 %v12632_v22, %v5861_v37  ;;  %v11890_v52 = vpop.eup %7240  ;;  %v5702_v62 = vshll.u32 %v11883_v63, 30  ;;  %v5873_v9 = vshll.u32 %v12633_v26, %v5861_v37 }
 0x76d   : > { %v5865_v53 = vshrl.u32 %v12631_v43, %v5862_v27  ;;  %v5868_v0 = vshrl.u32 %v12632_v22, %v5862_v27  ;;  %vm11898_vm7 = vcmp.le.f32.partialorder %v12670_v61, 0.7853982  ;;  %v5615_v14 = vand.u32 2147483647, %v5614_v1 }
 0x76e   : > { %v5871_v5 = vshrl.u32 %v12633_v26, %v5862_v27  ;;  %v5874_v25 = vshrl.u32 %v12544_v23, %v5862_v27  ;;  %v5876_v54 = vshll.u32 %v12544_v23, %v5861_v37  ;;  %v11905_v32 = vsub.s32 %v5699_v17, %v5702_v62 }
 0x76f   : > { %v5866_v40 = vor.u32 %v5865_v53, %v5864_v38  ;;  %v5869_v41 = vor.u32 %v5868_v0, %v5867_v12  ;;  %v5877_v58 = vshrl.u32 %v12545_v13, %v5862_v27  ;;  %v5618_v51 = vmul.f32 %v5617_v15, %v5615_v14 }
 0x770   : > { %v5872_v28 = vor.u32 %v5871_v5, %v5870_v3  ;;  %v5875_v20 = vor.u32 %v5874_v25, %v5873_v9  ;;  %v6676_v61 = vadd.s32 4294967169, %v5955_v59  ;;  %v5705_v16 = vsub.s32 0, %v11905_v32 }
 0x771   : > { %v5863_v1 = vshrl.u32 %v12374_v34, %v5862_v27  ;;  %v5878_v63 = vor.u32 %v5877_v58, %v5876_v54  ;;  %vm5879_vm5 = vcmp.lt.s32.totalorder %v5860_v29, 1  ;;  %v5619_v8 = vxor.u32 2147483648, %v5618_v51 }
 0x772   : > { %vm5880_vm9 = vcmp.lt.s32.totalorder %v5860_v29, 2  ;;  %vm5882_vm14 = vcmp.lt.s32.totalorder %v5860_v29, 4  ;;  %v5887_v37 = vsel %vm5879_vm5, %v5866_v40, %v5869_v41  ;;  %v6665_v17 = vmin.u32 %v5705_v16, %v11905_v32 }
 0x773   : > { %vm5881_vm2 = vcmp.lt.s32.totalorder %v5860_v29, 3  ;;  %v5884_v38 = vsel %vm5882_vm14, %v5872_v28, 2102212464  ;;  %v5888_v12 = vsel %vm5882_vm14, %v5875_v20, 920167782  ;;  %v5620_v15 = vsel %vm5537_vm1, %v5619_v8, %v5618_v51 }
 0x774   : > { %v5889_v3 = vsel %vm5881_vm2, %v5872_v28, %v5888_v12  ;;  %v5891_v59 = vsel %vm5879_vm5, %v5869_v41, %v5872_v28  ;;  %v5892_v62 = vsel %vm5882_vm14, %v5878_v63, 1326507024  ;;  %v5707_v53 = vclz %v6665_v17 }
 0x775   : > { %v5883_v0 = vsel %vm5879_vm5, %v5863_v1, %v5866_v40  ;;  %v5890_v58 = vsel %vm5880_vm9, %v5887_v37, %v5889_v3  ;;  %v5959_v27 = vor.u32 8388608, %v11867_v42  ;;  %v5885_v9 = vsel %vm5881_vm2, %v5869_v41, %v5884_v38 }
 0x776   : > { %v5893_v14 = vsel %vm5881_vm2, %v5875_v20, %v5892_v62  ;;  %v11916_v5 = vmul.u32.u64.low %v11875_v24, %v5890_v58  ;;  %v11917_v16 = vmul.u32.u64.high %v11875_v24, %v5890_v58, %v11916_v5  ;;  %7242 = vcosq.f32 %v11873_v57 }
 0x777   : > { %v5623_v51 = vsel %vm11898_vm7, %v11614_v44, %v5620_v15  ;;  %v6666_v28 = vadd.s32 4294967294, %v5707_v53  ;;  %v5894_v40 = vsel %vm5880_vm9, %v5891_v59, %v5893_v14  ;;  %v5961_v41 = vadd.s32 1, %v6676_v61 }
 0x778   : > { %v11926_v63 = vmul.u32.u64.low %v11875_v24, %v5894_v40  ;;  %v11927_v8 = vmul.u32.u64.high %v11875_v24, %v5894_v40, %v11926_v63  ;;  %v11930_v20 = vand.u32 3, %v11373_v47  ;;  %7244 = vsinq.f32 %v11873_v57 }
 0x779   : > { %vm6667_vm10 = vcmp.lt.s32.totalorder %v6666_v28, 0  ;;  %v5886_v42 = vsel %vm5880_vm9, %v5883_v0, %v5885_v9  ;;  %v11934_v25 = vshll.u32 %v5959_v27, 8  ;;  %7246 = vcosq.f32 %v5623_v51 }
 0x77a   : > { %v5710_v54 = vsel %vm6667_vm10, 0, %v6666_v28  ;;  %v5905_v1 = vadd.s32 1, %v11917_v16  ;;  %vm5962_vm13 = vcmp.gt.s32.totalorder %v5961_v41, 0  ;;  %7248 = vsinq.f32 %v5623_v51 }
 0x77b   : > { %v5711_v37 = vsub.s32 32, %v5710_v54  ;;  %v5715_v17 = vsub.s32 4294967266, %v5710_v54  ;;  %v5963_v38 = vsel %vm5962_vm13, %v5961_v41, 0  ;;  %v5902_v61 = vmul.u32 %v11875_v24, %v5886_v42 }
 0x77c   : > { %vm5904_vm6 = vc.u32 %v11927_v8, %v11916_v5  ;;  %v5965_v47 = vand.u32 31, %v5963_v38  ;;  %vm5215_vm11 = vcmp.eq.s32.totalorder %v11930_v20, 0  ;;  %v5712_v57 = vshll.u32 %v11905_v32, %v5710_v54 }
 0x77d   : > { %v5713_v29 = vshrl.u32 %v11878_v31, %v5711_v37  ;;  %v5716_v12 = vadd.s32 127, %v5715_v17  ;;  %v5906_v15 = vsel %vm5904_vm6, %v5905_v1, %v11917_v16  ;;  %v11944_v59 = vshrl.u32 %v5963_v38, 5 }
 0x77e   : > { %v5907_v3 = vadd.s32 %v5906_v15, %v5902_v61  ;;  %v5966_v62 = vsub.s32 32, %v5965_v47  ;;  %v5216_v53 = vxor.u32 2147483648, %v11626_v50  ;;  %v5968_v58 = vshll.u32 %v12374_v34, %v5965_v47 }
 0x77f   : > { %v5714_v24 = vor.u32 %v5713_v29, %v5712_v57  ;;  %v5717_v0 = vshll.u32 %v5716_v12, 23  ;;  %v5971_v27 = vshll.u32 %v12631_v43, %v5965_v47  ;;  %v5974_v14 = vshll.u32 %v12632_v22, %v5965_v47 }
 0x780   : > { %v5908_v9 = vadd.s32 536870912, %v5907_v3  ;;  %v5969_v32 = vshrl.u32 %v12631_v43, %v5966_v62  ;;  %v5972_v31 = vshrl.u32 %v12632_v22, %v5966_v62  ;;  %v11952_v16 = vpop.eup %7242  ;;  %vm5641_vm8 = vcmp.lt.s32.totalorder %v11634_v35, 0 }
 0x781   : > { %v5718_v51 = vor.u32 4788187, %v5717_v0  ;;  %v5975_v28 = vshrl.u32 %v12633_v26, %v5966_v62  ;;  %v5977_v40 = vshll.u32 %v12633_v26, %v5965_v47  ;;  %v5978_v63 = vshrl.u32 %v12544_v23, %v5966_v62 }
 0x782   : > { %v5721_v41 = vcvt.s32.f32 %v5714_v24  ;;  %v5909_v42 = vshrl.u32 %v5908_v9, 30  ;;  %v5970_v54 = vor.u32 %v5969_v32, %v5968_v58  ;;  %v5973_v1 = vor.u32 %v5972_v31, %v5971_v27  ;;  %v11958_v43 = vpop.eup %7244 }
 0x783   : > { %v5719_v37 = vand.u32 2147483647, %v5718_v51  ;;  %v5976_v17 = vor.u32 %v5975_v28, %v5974_v14  ;;  %v5980_v22 = vshll.u32 %v12544_v23, %v5965_v47  ;;  %v5981_v38 = vshrl.u32 %v12545_v13, %v5966_v62  ;;  %v11962_v61 = vpop.eup %7246 }
 0x784   : > { %v12673_v57 = vand.u32 2147483647, %v11634_v35  ;;  %vm5849_vm5 = vcmp.lt.s32.totalorder %v11782_v46, 0  ;;  %v5910_v29 = vshll.u32 %v5909_v42, 30  ;;  %v5979_v12 = vor.u32 %v5978_v63, %v5977_v40  ;;  %v11973_v24 = vpop.eup %7248 }
 0x785   : > { %vm5218_vm9 = vcmp.eq.s32.totalorder %v11930_v20, 2  ;;  %v5219_v15 = vxor.u32 2147483648, %v11505_v55  ;;  %v5722_v23 = vmul.f32 %v5721_v41, %v5719_v37  ;;  %v5982_v13 = vor.u32 %v5981_v38, %v5980_v22 }
 0x786   : > { %vm11966_vm15 = vcmp.le.f32.partialorder %v12673_v57, 0.7853982  ;;  %vm5986_vm14 = vcmp.lt.s32.totalorder %v11944_v59, 4  ;;  %vm5214_vm2 = vcmp.lt.s32.totalorder %v11930_v20, 2  ;;  %v5217_v47 = vsel %vm5215_vm11, %v11505_v55, %v5216_v53 }
 0x787   : > { %v11980_v0 = vsub.s32 %v5907_v3, %v5910_v29  ;;  %v5967_v58 = vshrl.u32 %v12374_v34, %v5966_v62  ;;  %vm5983_vm10 = vcmp.lt.s32.totalorder %v11944_v59, 1  ;;  %v5988_v27 = vsel %vm5986_vm14, %v5976_v17, 2102212464 }
 0x788   : > { %vm5211_vm13 = vweird.f32 %v11115_v21  ;;  %v5723_v9 = vxor.u32 2147483648, %v5722_v23  ;;  %v5933_v32 = vsub.s32 4, %v5909_v42  ;;  %vm5985_vm6 = vcmp.lt.s32.totalorder %v11944_v59, 3 }
 0x789   : > { %v5991_v31 = vsel %vm5983_vm10, %v5970_v54, %v5973_v1  ;;  %v5913_v14 = vsub.s32 0, %v11980_v0  ;;  %v5987_v51 = vsel %vm5983_vm10, %v5967_v58, %v5970_v54  ;;  %v5989_v55 = vsel %vm5985_vm6, %v5973_v1, %v5988_v27 }
 0x78a   : > { %v5992_v3 = vsel %vm5986_vm14, %v5979_v12, 920167782  ;;  %vm5984_vm11 = vcmp.lt.s32.totalorder %v11944_v59, 2  ;;  %v5995_v62 = vsel %vm5983_vm10, %v5973_v1, %v5976_v17  ;;  %v5996_v53 = vsel %vm5986_vm14, %v5982_v13, 1326507024 }
 0x78b   : > { %v5993_v34 = vsel %vm5985_vm6, %v5976_v17, %v5992_v3  ;;  %v5724_v28 = vsel %vm5641_vm8, %v5723_v9, %v5722_v23  ;;  %v6673_v40 = vmin.u32 %v5913_v14, %v11980_v0  ;;  %v5997_v41 = vsel %vm5985_vm6, %v5979_v12, %v5996_v53 }
 0x78c   : > { %v5994_v63 = vsel %vm5984_vm11, %v5991_v31, %v5993_v34  ;;  %v5990_v37 = vsel %vm5984_vm11, %v5987_v51, %v5989_v55  ;;  %v5998_v54 = vsel %vm5984_vm11, %v5995_v62, %v5997_v41  ;;  %v5903_v57 = vadd.s32 %v11916_v5, %v11927_v8  ;;  %v12676_v55 = vld [vmem:[#allocation21_spill] sm:$0xff] }
 0x78d   : > { %v11998_v22 = vmul.u32.u64.low %v11934_v25, %v5994_v63  ;;  %v11999_v38 = vmul.u32.u64.high %v11934_v25, %v5994_v63, %v11998_v22  ;;  %v5915_v1 = vclz %v6673_v40  ;;  %v12010_v29 = vsel %vm11966_vm15, %v11634_v35, %v5724_v28 }
 0x78e   : > { %v12004_v59 = vmul.u32.u64.low %v11934_v25, %v5998_v54  ;;  %v12005_v17 = vmul.u32.u64.high %v11934_v25, %v5998_v54, %v12004_v59  ;;  %v12014_v12 = vsel %vm5849_vm5, %v5933_v32, %v5909_v42  ;;  %v5220_v23 = vsel %vm5218_vm9, %v5219_v15, %v11626_v50 }
 0x78f   : > { %v5525_v5 = vand.u32 3, %v11367_v56  ;;  %v6674_v8 = vadd.s32 4294967294, %v5915_v1  ;;  %v6006_v13 = vmul.u32 %v11934_v25, %v5990_v37  ;;  %v5221_v58 = vsel %vm5214_vm2, %v5217_v47, %v5220_v23  ;;  %v12677_v37 = vld [vmem:[#allocation5_spill] sm:$0xff]  ;;  %v12681_v59 = vld [vmem:[#allocation30_spill] sm:$0xff] }
 0x790   : > { %v5528_v27 = vxor.u32 2147483648, %v11489_v30  ;;  %v6009_v9 = vadd.s32 1, %v11999_v38  ;;  %v5222_v42 = vsel %vm5211_vm13, nan, %v5221_v58  ;;  %vm5523_vm14 = vweird.f32 %v11112_v39  ;;  %v12683_v58 = vld [vmem:[#allocation24_spill] sm:$0xff] }
 0x791   : > { %v5531_v32 = vxor.u32 2147483648, %v11483_v10  ;;  %vm6675_vm9 = vcmp.lt.s32.totalorder %v6674_v8, 0  ;;  %vm6008_vm10 = vc.u32 %v12005_v17, %v11998_v22  ;;  %vm5526_vm6 = vcmp.lt.s32.totalorder %v5525_v5, 2 }
 0x792   : > { %vm5527_vm11 = vcmp.eq.s32.totalorder %v5525_v5, 0  ;;  %v5918_v56 = vsel %vm6675_vm9, 0, %v6674_v8  ;;  %v6010_v50 = vsel %vm6008_vm10, %v6009_v9, %v11999_v38  ;;  %vm5530_vm2 = vcmp.eq.s32.totalorder %v5525_v5, 2 }
 0x793   : > { %v5529_v20 = vsel %vm5527_vm11, %v11483_v10, %v5528_v27  ;;  %v5919_v25 = vsub.s32 32, %v5918_v56  ;;  %v5920_v15 = vshll.u32 %v11980_v0, %v5918_v56  ;;  %v5923_v21 = vsub.s32 4294967266, %v5918_v56 }
 0x794   : > { %v6011_v47 = vadd.s32 %v6010_v50, %v6006_v13  ;;  %v5532_v31 = vsel %vm5530_vm2, %v5531_v32, %v11489_v30  ;;  %v5837_v14 = vand.u32 3, %v11609_v19  ;;  %v5840_v51 = vxor.u32 2147483648, %v11669_v4  ;;  %v12684_v32 = vld [vmem:[#allocation16_spill] sm:$0xff] }
 0x795   : > { %v5843_v3 = vxor.u32 2147483648, %v12676_v55  ;;  %v5921_v34 = vshrl.u32 %v5903_v57, %v5919_v25  ;;  %v5924_v62 = vadd.s32 127, %v5923_v21  ;;  %v5533_v28 = vsel %vm5526_vm6, %v5529_v20, %v5532_v31  ;;  %v12685_v20 = vld [vmem:[#allocation6_spill] sm:$0xff]  ;;  %v12687_v31 = vld [vmem:[#allocation35_spill] sm:$0xff] }
 0x796   : > { %v6012_v53 = vadd.s32 536870912, %v6011_v47  ;;  %7250 = vcosq.f32 %v12010_v29  ;;  %v5534_v10 = vsel %vm5523_vm14, nan, %v5533_v28  ;;  %vm5839_vm13 = vcmp.eq.s32.totalorder %v5837_v14, 0 }
 0x797   : > { %vm5842_vm9 = vcmp.eq.s32.totalorder %v5837_v14, 2  ;;  %v5922_v0 = vor.u32 %v5921_v34, %v5920_v15  ;;  %v5925_v30 = vshll.u32 %v5924_v62, 23  ;;  %v6829_v19 = vpack.c.bf16 %v5534_v10, %v5222_v42 }
 0x798   : > { %v12041_v40 = vshrl.u32 %v6012_v53, 30  ;;  %vm5838_vm10 = vcmp.lt.s32.totalorder %v5837_v14, 2  ;;  %v5841_v63 = vsel %vm5839_vm13, %v12676_v55, %v5840_v51  ;;  %v5844_v41 = vsel %vm5842_vm9, %v5843_v3, %v11669_v4 }
 0x799   : > { %v6149_v54 = vand.u32 3, %v12677_v37  ;;  %v12678_v38 = vand.u32 2147483647, %v11782_v46  ;;  %v5926_v39 = vor.u32 4788187, %v5925_v30  ;;  %6830 = vmatpush3.bf16.msra.mxu0 %v6829_v19  ;;  %vm5835_vm14 = vweird.f32 %v12681_v59  ;;  %v12688_v59 = vld [vmem:[#allocation14_spill] sm:$0xff] }
 0x79a   : > { %v6014_v1 = vshll.u32 %v12041_v40, 30  ;;  %v5845_v23 = vsel %vm5838_vm10, %v5841_v63, %v5844_v41  ;;  %v5929_v5 = vcvt.s32.f32 %v5922_v0  ;;  %v12055_v8 = vadd.s32 %v11998_v22, %v12005_v17 }
 0x79b   : > { %vm12048_vm6 = vcmp.le.f32.partialorder %v12678_v38, 0.7853982  ;;  %v12682_v4 = vmov 0.0|0.0   ;;  %v5846_v13 = vsel %vm5835_vm14, nan, %v5845_v23  ;;  %v6152_v27 = vxor.u32 2147483648, %v12683_v58 }
 0x79c   : > { %6831 = vmatprep.subr.bf16.mxu0 %v12682_v4  ;;  %v5927_v9 = vand.u32 2147483647, %v5926_v39  ;;  %v12059_v42 = vsub.s32 %v6011_v47, %v6014_v1  ;;  %vm6151_vm11 = vcmp.eq.s32.totalorder %v6149_v54, 0  ;;  %v6155_v56 = vxor.u32 2147483648, %v12684_v32 }
 0x79d   : > { %v6153_v50 = vsel %vm6151_vm11, %v12684_v32, %v6152_v27  ;;  %vm6154_vm2 = vcmp.eq.s32.totalorder %v6149_v54, 2  ;;  %v5101_v25 = vsub.s32 4, %v12685_v20  ;;  %vm6150_vm13 = vcmp.lt.s32.totalorder %v6149_v54, 2  ;;  %v12092_v54 = vld [vmem:[%s12174_s4] sm:$0xff] }
 0x79e   : > { %v5930_v15 = vmul.f32 %v5929_v5, %v5927_v9  ;;  %v6017_v22 = vsub.s32 0, %v12059_v42  ;;  %v6156_v17 = vsel %vm6154_vm2, %v6155_v56, %v12683_v58  ;;  %vm7298_vm9 = vmmov 0  }
 0x79f   : > { %v12686_v21 = vmov 0.0   ;;  %vm6147_vm10 = vweird.f32 %v12687_v31  ;;  %v6157_v47 = vsel %vm6150_vm13, %v6153_v50, %v6156_v17  ;;  %v5102_v14 = vsel %vm5017_vm4, %v5101_v25, %v12685_v20 }
 0x7a0   : > { %6769 = vmatprep.mubr.msk.f32.mxu0 %vm7298_vm9, %v12686_v21  ;;  %v5413_v51 = vsub.s32 4, %v11730_v11  ;;  %v5931_v55 = vxor.u32 2147483648, %v5930_v15  ;;  %v6677_v3 = vmin.u32 %v6017_v22, %v12059_v42  ;;  %v6158_v34 = vsel %vm6147_vm10, nan, %v6157_v47  ;;  %v12075_v53 = vpop.eup %7250 }
 0x7a1   : > { %v5104_v62 = vsel %vm11714_vm12, 0, %v5102_v14  ;;  %v6832_v28 = vpack.c.bf16 %v6158_v34, %v5846_v13  ;;  %v5112_v0 = vxor.u32 2147483648, %v11880_v36  ;;  %v5115_v41 = vxor.u32 2147483648, %v11810_v60 }
 0x7a2   : > { %v5108_v10 = vadd.s32 3, %v5104_v62  ;;  %v5414_v30 = vsel %vm5329_vm3, %v5413_v51, %v11730_v11  ;;  %v5932_v19 = vsel %vm5849_vm5, %v5931_v55, %v5930_v15  ;;  %v6019_v63 = vclz %v6677_v3  ;;  %v12690_v55 = vld [vmem:[#allocation12_spill] sm:$0xff] }
 0x7a3   : > { %v5416_v18 = vsel %vm11832_vm0, 0, %v5414_v30  ;;  %v5935_v37 = vsel %vm12048_vm6, %v11782_v46, %v5932_v19  ;;  %6833 = vmatpush3.bf16.msra.mxu0 %v6832_v28  ;;  %vm5107_vm4 = vweird.f32 %v11371_v2  ;;  %v5424_v1 = vxor.u32 2147483648, %v11958_v43  ;;  %v12691_v28 = vld [vmem:[#allocation28_spill] sm:$0xff]  ;;  %v12693_v30 = vld [vmem:[#allocation15_spill] sm:$0xff] }
 0x7a4   : > { %v5109_v11 = vand.u32 3, %v5108_v10  ;;  %v5420_v38 = vadd.s32 3, %v5416_v18  ;;  %v6678_v39 = vadd.s32 4294967294, %v6019_v63  ;;  %v5427_v49 = vxor.u32 2147483648, %v11952_v16 }
 0x7a5   : > { %v5005_v23 = vand.u32 3, %v12688_v59  ;;  %7252 = vcosq.f32 %v5935_v37  ;;  %vm12689_vm14 = vcmask 261120   ;;  %vm5419_vm11 = vweird.f32 %v11502_v48  ;;  %v12696_v59 = vld [vmem:[#allocation19_spill] sm:$0xff] }
 0x7a6   : > { %vm5110_vm12 = vcmp.lt.s32.totalorder %v5109_v11, 2  ;;  %vm5111_vm3 = vcmp.eq.s32.totalorder %v5109_v11, 0  ;;  %vm5114_vm0 = vcmp.eq.s32.totalorder %v5109_v11, 2  ;;  %vm6679_vm5 = vcmp.lt.s32.totalorder %v6678_v39, 0  ;;  %6770 = vmatmul.mubr.msk.f32.vlgmr.msra.gmra.mrb[20].mxu0 %vm12689_vm14, %v12092_v54 }
 0x7a7   : > { %v5113_v5 = vsel %vm5111_vm3, %v11810_v60, %v5112_v0  ;;  %v5116_v4 = vsel %vm5114_vm0, %v5115_v41, %v11880_v36  ;;  %v5421_v13 = vand.u32 3, %v5420_v38  ;;  %7254 = vsinq.f32 %v5935_v37  ;;  %v12692_v0 = vld [vmem:[#allocation32_spill] sm:$0xff]  ;;  %v12694_v38 = vld [vmem:[#allocation34_spill] sm:$0xff] }
 0x7a8   : > { %v6022_v58 = vsel %vm6679_vm5, 0, %v6678_v39  ;;  %v5117_v27 = vsel %vm5110_vm12, %v5113_v5, %v5116_v4  ;;  %vm5007_vm2 = vcmp.eq.s32.totalorder %v5005_v23, 0  ;;  %v5008_v50 = vxor.u32 2147483648, %v11805_v7 }
 0x7a9   : > { %v6023_v9 = vsub.s32 32, %v6022_v58  ;;  %v6024_v32 = vshll.u32 %v12059_v42, %v6022_v58  ;;  %v6027_v56 = vsub.s32 4294967266, %v6022_v58  ;;  %vm5422_vm13 = vcmp.lt.s32.totalorder %v5421_v13, 2 }
 0x7aa   : > { %vm5423_vm9 = vcmp.eq.s32.totalorder %v5421_v13, 0  ;;  %vm5426_vm10 = vcmp.eq.s32.totalorder %v5421_v13, 2  ;;  %v5118_v15 = vsel %vm5107_vm4, nan, %v5117_v27  ;;  %v5009_v42 = vsel %vm5007_vm2, %v11802_v33, %v5008_v50 }
 0x7ab   : > { %v6025_v60 = vshrl.u32 %v12055_v8, %v6023_v9  ;;  %v6028_v20 = vadd.s32 127, %v6027_v56  ;;  %v5425_v36 = vsel %vm5423_vm9, %v11952_v16, %v5424_v1  ;;  %v5428_v25 = vsel %vm5426_vm10, %v5427_v49, %v11958_v43 }
 0x7ac   : > { %v5429_v22 = vsel %vm5422_vm13, %v5425_v36, %v5428_v25  ;;  %v5011_v17 = vxor.u32 2147483648, %v11802_v33  ;;  %vm5010_vm12 = vcmp.eq.s32.totalorder %v5005_v23, 2  ;;  %v5317_v16 = vand.u32 3, %v11845_v45 }
 0x7ad   : > { %v6026_v21 = vor.u32 %v6025_v60, %v6024_v32  ;;  %v6029_v31 = vshll.u32 %v6028_v20, 23  ;;  %v5430_v47 = vsel %vm5419_vm11, nan, %v5429_v22  ;;  %v5320_v43 = vxor.u32 2147483648, %v11890_v52 }
 0x7ae   : > { %v6820_v8 = vpack.c.bf16 %v5430_v47, %v5118_v15  ;;  %v5012_v14 = vsel %vm5010_vm12, %v5011_v17, %v11805_v7  ;;  %vm5006_vm4 = vcmp.lt.s32.totalorder %v5005_v23, 2  ;;  %v5323_v3 = vxor.u32 2147483648, %v12690_v55 }
 0x7af   : > { %v6030_v2 = vor.u32 4788187, %v6029_v31  ;;  %v6033_v51 = vcvt.s32.f32 %v6026_v21  ;;  %v7253_v34 = vpop.eup %7252  ;;  %v5013_v33 = vsel %vm5006_vm4, %v5009_v42, %v5012_v14  ;;  %vm5318_vm3 = vcmp.lt.s32.totalorder %v5317_v16, 2 }
 0x7b0   : > { %6821 = vmatprep.subr.bf16.mxu1 %v6820_v8  ;;  %vm5319_vm0 = vcmp.eq.s32.totalorder %v5317_v16, 0  ;;  %vm5322_vm5 = vcmp.eq.s32.totalorder %v5317_v16, 2  ;;  %v5725_v45 = vsub.s32 4, %v12691_v28  ;;  %7256 = vsinq.f32 %v12010_v29 }
 0x7b1   : > { %v6031_v48 = vand.u32 2147483647, %v6030_v2  ;;  %v5321_v62 = vsel %vm5319_vm0, %v12690_v55, %v5320_v43  ;;  %v5324_v7 = vsel %vm5322_vm5, %v5323_v3, %v11890_v52  ;;  %v7255_v10 = vpop.eup %7254  ;;  %vm5003_vm14 = vweird.f32 %v12692_v0 }
 0x7b2   : > { %vm5315_vm11 = vweird.f32 %v12693_v30  ;;  %v5325_v19 = vsel %vm5318_vm3, %v5321_v62, %v5324_v7  ;;  %v5014_v41 = vsel %vm5003_vm14, nan, %v5013_v33  ;;  %v6037_v37 = vsub.s32 4, %v12041_v40 }
 0x7b3   : > { %v6034_v63 = vmul.f32 %v6033_v51, %v6031_v48  ;;  %v5326_v18 = vsel %vm5315_vm11, nan, %v5325_v19  ;;  %v5726_v52 = vsel %vm5641_vm8, %v5725_v45, %v12691_v28  ;;  %v12695_v39 = vsub.s32 4, %v12694_v38 }
 0x7b4   : > { %v6822_v11 = vpack.c.bf16 %v5326_v18, %v5014_v41  ;;  %v5936_v49 = vsel %vm12048_vm6, 0, %v12014_v12  ;;  %vm5953_vm2 = vcmp.lt.s32.totalorder %v12696_v59, 0  ;;  %v12697_v23 = vand.u32 2147483647, %v12696_v59 }
 0x7b5   : > { %v5622_v29 = vsel %vm5537_vm1, %v12695_v39, %v12694_v38  ;;  %v6035_v1 = vxor.u32 2147483648, %v6034_v63  ;;  %v5728_v4 = vsel %vm11966_vm15, 0, %v5726_v52  ;;  %v6038_v13 = vsel %vm5953_vm2, %v6037_v37, %v12041_v40 }
 0x7b6   : > { %6823 = vmatpush1.bf16.msra.mxu1 %v6822_v11  ;;  %vm5952_vm13 = vcmp.le.f32.partialorder %v12697_v23, 0.7853982  ;;  %v5624_v58 = vsel %vm11898_vm7, 0, %v5622_v29  ;;  %v5940_v9 = vadd.s32 3, %v5936_v49  ;;  %v5732_v12 = vadd.s32 3, %v5728_v4 }
 0x7b7   : > { %v6036_v5 = vsel %vm5953_vm2, %v6035_v1, %v6034_v63  ;;  %v6040_v57 = vsel %vm5952_vm13, 0, %v6038_v13  ;;  %v5628_v32 = vadd.s32 3, %v5624_v58  ;;  %v5944_v36 = vxor.u32 2147483648, %v7255_v10 }
 0x7b8   : > { %v6039_v27 = vsel %vm5952_vm13, %v12696_v59, %v6036_v5  ;;  %v6044_v50 = vadd.s32 3, %v6040_v57  ;;  %v5941_v60 = vand.u32 3, %v5940_v9  ;;  %v5733_v20 = vand.u32 3, %v5732_v12 }
 0x7b9   : > { %7258 = vcosq.f32 %v6039_v27  ;;  %v5947_v26 = vxor.u32 2147483648, %v7253_v34  ;;  %v5739_v40 = vxor.u32 2147483648, %v12075_v53  ;;  %v5629_v15 = vand.u32 3, %v5628_v32 }
 0x7ba   : > { %7260 = vsinq.f32 %v6039_v27  ;;  %v7257_v56 = vpop.eup %7256  ;;  %v5632_v6 = vxor.u32 2147483648, %v11973_v24  ;;  %v5635_v22 = vxor.u32 2147483648, %v11962_v61  ;;  %v6045_v42 = vand.u32 3, %v6044_v50 }
 0x7bb   : > { %v5736_v25 = vxor.u32 2147483648, %v7257_v56  ;;  %vm5943_vm1 = vcmp.eq.s32.totalorder %v5941_v60, 0  ;;  %vm5946_vm7 = vcmp.eq.s32.totalorder %v5941_v60, 2  ;;  %vm5735_vm8 = vcmp.eq.s32.totalorder %v5733_v20, 0 }
 0x7bc   : > { %vm5738_vm15 = vcmp.eq.s32.totalorder %v5733_v20, 2  ;;  %v5945_v17 = vsel %vm5943_vm1, %v7253_v34, %v5944_v36  ;;  %v5948_v21 = vsel %vm5946_vm7, %v5947_v26, %v7255_v10  ;;  %vm5631_vm6 = vcmp.eq.s32.totalorder %v5629_v15, 0 }
 0x7bd   : > { %v5737_v47 = vsel %vm5735_vm8, %v12075_v53, %v5736_v25  ;;  %v5740_v8 = vsel %vm5738_vm15, %v5739_v40, %v7257_v56  ;;  %vm5634_vm9 = vcmp.eq.s32.totalorder %v5629_v15, 2  ;;  %v5633_v43 = vsel %vm5631_vm6, %v11962_v61, %v5632_v6 }
 0x7be   : > { %v5636_v2 = vsel %vm5634_vm9, %v5635_v22, %v11973_v24  ;;  %vm5942_vm10 = vcmp.lt.s32.totalorder %v5941_v60, 2  ;;  %vm5734_vm12 = vcmp.lt.s32.totalorder %v5733_v20, 2  ;;  %vm6050_vm4 = vcmp.eq.s32.totalorder %v6045_v42, 2 }
 0x7bf   : > { %v5949_v55 = vsel %vm5942_vm10, %v5945_v17, %v5948_v21  ;;  %v5741_v3 = vsel %vm5734_vm12, %v5737_v47, %v5740_v8  ;;  %vm6047_vm3 = vcmp.eq.s32.totalorder %v6045_v42, 0  ;;  %vm5630_vm0 = vcmp.lt.s32.totalorder %v5629_v15, 2 }
 0x7c0   : > { %vm6046_vm5 = vcmp.lt.s32.totalorder %v6045_v42, 2  ;;  %v5637_v33 = vsel %vm5630_vm0, %v5633_v43, %v5636_v2  ;;  %vm5939_vm14 = vweird.f32 %v11782_v46  ;;  %vm5731_vm11 = vweird.f32 %v11634_v35  ;;  %v6164_v46 = vpop.permute.xlu0 %6163 }
 0x7c1   : > { %vm6043_vm2 = vweird.f32 %v12696_v59  ;;  %v5950_v24 = vsel %vm5939_vm14, nan, %v5949_v55  ;;  %v5742_v48 = vsel %vm5731_vm11, nan, %v5741_v3  ;;  %vm5627_vm13 = vweird.f32 %v11614_v44 }
 0x7c2   : > { %v5638_v28 = vsel %vm5627_vm13, nan, %v5637_v33  ;;  %vm12698_vm1 = vcmask 261120  }
 0x7c3   : > { %v7259_v31 = vpop.eup %7258  ;;  %v6826_v45 = vpack.c.bf16 %v5950_v24, %v5638_v28 }
 0x7c4   : > { %v7261_v14 = vpop.eup %7260  ;;  %v6051_v16 = vxor.u32 2147483648, %v7259_v31 }
 0x7c5   : > { %v6048_v51 = vxor.u32 2147483648, %v7261_v14 }
 0x7c6   : > { %v6052_v34 = vsel %vm6050_vm4, %v6051_v16, %v7261_v14 }
 0x7c7   : > { %v6049_v53 = vsel %vm6047_vm3, %v7259_v31, %v6048_v51 }
 0x7c8   : > { %v6053_v61 = vsel %vm6046_vm5, %v6049_v53, %v6052_v34 }
 0x7c9   : > { %v6054_v62 = vsel %vm6043_vm2, nan, %v6053_v61 }
 0x7ca   : > { %v6824_v7 = vpack.c.bf16 %v6054_v62, %v5742_v48 }
 0x7cc   : > { %6825 = vmatprep.subr.bf16.mxu1 %v6824_v7 }
 0x7cd   : > { %6827 = vmatpush1.bf16.msra.mxu1 %v6826_v45 }
 0x7d0   : > { %6684 = vmatmul.mubr.msk.f32.vlgmr.msra.gmra.mrb[16].mxu1 %vm12698_vm1, %v12092_v54 }
 0x879   : > { %v6306_v35 = vpop.f32.mrb[20].mxu0 }
 0x87a   : > { %v6307_v10 = vadd.f32 %v6306_v35, %v6164_v46  ;;  %v6771_v0 = vpop.f32.mrb[21].mxu0 }
 0x87c   : > { %6312 = vst [vmem:[%s349_s28 + $0x10] sm:$0xff] %v6307_v10 }
 0x8a3   : > { %v6235_v30 = vpop.f32.mrb[16].mxu1 }
 0x8a4   : > { %v6236_v44 = vadd.f32 %v6235_v30, %v6164_v46  ;;  %v6237_v19 = vpop.f32.mrb[17].mxu1 }
 0x8a5   : > { %v6238_v63 = vadd.f32 %v6237_v19, %v6164_v46 }
 0x8a6   : > { %6310 = vst [vmem:[%s349_s28] sm:$0xff] %v6236_v44 }
 0x8a7   : > { %6311 = vst [vmem:[%s349_s28 + $0x8] sm:$0xff] %v6238_v63 }
 0x8a8 PF: > { %s16_s23 = sadd.s32 1, %s7286_s23   ;;  %s12699_s21 = smov %s7282_s22 }
 0x8a9   : > { %p13_p5 = scmp.ge.s32.totalorder %s16_s23, 4   ;;  %s12700_s22 = smov %s12702_s24 }
 0x8ab   :  { %15 = sbr.rel (!%p13_p5) target bundleno = 2 (0x2), region = 88 }

</bundles_post_ra>
